<compile_context>
chip_gen: v6e
topology: v6e:2x2x1
jax: 0.10.0
libtpu: 0.0.40
codegen_flags: <defaults>
</compile_context>

<pallas_src>
import jax
import jax.numpy as jnp
import numpy as np
from jax.experimental import pallas as pl
from jax.experimental.pallas import tpu as pltpu


# ----------------------------------------------------------------------------
# Fused Pallas kernel: one image per grid step; weights resident in VMEM.
# ----------------------------------------------------------------------------
def _fused_disc_kernel(p2_ref, w2_ref, w3_ref, w4_ref, w5_ref, g3_ref, g4_ref,
                       o_ref):
    f32 = jnp.float32
    bf16 = jnp.bfloat16

    def leaky(a):
        return jnp.where(a > 0, a, 0.2 * a)

    # ---- conv2: [256,1024] @ [1024,128] + LeakyReLU(0.2) --------------------
    p2 = p2_ref[0]                                                 # [256,1024] bf16
    h2 = leaky(jnp.dot(p2, w2_ref[...],
                       preferred_element_type=f32)).astype(bf16)   # [256,128]

    # ---- in-VMEM patch gather for conv3 (16x16 -> 8x8, pad folded into G3) --
    pp3 = jnp.dot(g3_ref[...], h2,
                  preferred_element_type=f32).astype(bf16)         # [1024,128]
    # rows are grouped (kh*4+kw, m); 64-row blocks -> 128-lane column blocks
    p3 = jnp.concatenate(
        [pp3[k * 64:(k + 1) * 64, :] for k in range(16)], axis=-1)  # [64,2048]

    # ---- conv3: [64,2048] @ [2048,256] ---------------------------------------
    h3 = leaky(jnp.dot(p3, w3_ref[...],
                       preferred_element_type=f32)).astype(bf16)   # [64,256]

    # ---- in-VMEM patch gather for conv4 (8x8 -> 4x4) -------------------------
    pp4 = jnp.dot(g4_ref[...], h3,
                  preferred_element_type=f32).astype(bf16)         # [256,256]
    p4 = jnp.concatenate(
        [pp4[k * 16:(k + 1) * 16, :] for k in range(16)], axis=-1)  # [16,4096]

    # ---- conv4: [16,4096] @ [4096,512] ---------------------------------------
    h4 = leaky(jnp.dot(p4, w4_ref[...],
                       preferred_element_type=f32))                # [16,512] f32

    # ---- conv5 (Cout=1, full 4x4 window) + sigmoid: VPU/XLU reduction --------
    prod = h4 * w5_ref[...].astype(f32)                            # [16,512]
    s = jnp.sum(prod, axis=0, keepdims=True)                       # [1,512]
    s = jnp.sum(s, axis=1, keepdims=True)                          # [1,1]
    sig = 1.0 / (1.0 + jnp.exp(-s))
    # (8,128)-aligned output tile; wrapper reads element [0,0].
    o_ref[...] = jnp.broadcast_to(sig.reshape(1, 1, 1), (1, 8, 128))


def _fused_tail(p2, w2, w3, w4, w5, g3, g4):
    """p2: [N,256,1024] bf16 layer-2 patches -> [N,8,128] f32 (prob at [:,0,0])."""
    n = p2.shape[0]
    flops = 2 * n * (256 * 1024 * 128      # conv2
                     + 1024 * 256 * 128    # gather for conv3
                     + 64 * 2048 * 256     # conv3
                     + 256 * 64 * 256      # gather for conv4
                     + 16 * 4096 * 512     # conv4
                     + 16 * 512)           # conv5 reduction
    bytes_accessed = 2 * (p2.size + w2.size + w3.size + w4.size + w5.size
                          + g3.size + g4.size) + n * 8 * 128 * 4

    return pl.pallas_call(
        _fused_disc_kernel,
        out_shape=jax.ShapeDtypeStruct((n, 8, 128), jnp.float32),
        grid=(n,),
        in_specs=[
            pl.BlockSpec((1, 256, 1024), lambda i: (i, 0, 0)),   # per-image patches
            pl.BlockSpec((1024, 128), lambda i: (0, 0)),         # w2 (resident)
            pl.BlockSpec((2048, 256), lambda i: (0, 0)),         # w3 (resident)
            pl.BlockSpec((4096, 512), lambda i: (0, 0)),         # w4 (resident)
            pl.BlockSpec((16, 512), lambda i: (0, 0)),           # w5 (resident)
            pl.BlockSpec((1024, 256), lambda i: (0, 0)),         # G3 (resident)
            pl.BlockSpec((256, 64), lambda i: (0, 0)),           # G4 (resident)
        ],
        out_specs=pl.BlockSpec((1, 8, 128), lambda i: (i, 0, 0)),
        compiler_params=pltpu.CompilerParams(
            dimension_semantics=("parallel",),
            vmem_limit_bytes=32 * 1024 * 1024),
        cost_estimate=pl.CostEstimate(
            flops=flops, transcendentals=n, bytes_accessed=bytes_accessed),
    )(p2, w2, w3, w4, w5, g3, g4)


# ----------------------------------------------------------------------------
# XLA glue (fused under the same jit): conv1 + im2col feeding the fused kernel.
# ----------------------------------------------------------------------------
def _im2col_k4_s2_p1(x_nhwc):
    """[N,H,W,C] -> [N, (H//2)*(W//2), 16*C] patches, feature order (kh,kw,c)."""
    nb, h, w, c = x_nhwc.shape
    ho, wo = h // 2, w // 2
    xp = jnp.pad(x_nhwc, ((0, 0), (1, 1), (1, 1), (0, 0)))
    cols = []
    for kh in range(4):
        for kw in range(4):
            cols.append(xp[:, kh:kh + 2 * ho:2, kw:kw + 2 * wo:2, :])
    p = jnp.stack(cols, axis=3)                      # [N, Ho, Wo, 16, C]
    return p.reshape(nb, ho * wo, 16 * c)


def discriminator_forward(x, params):
    """x: [N,1,64,64] f32 NCHW -> [N,1,1,1] f32 sigmoid probabilities."""
    w1, w2, w3, w4, w5, g3, g4 = params
    n = x.shape[0]
    # conv1 (Cin=1, K=16) stays in XLA: ~8 MFLOP, would underfeed the MXU.
    # TODO(synk): could be merged into the fused kernel as a small VPU matmul.
    h1 = jax.lax.conv_general_dilated(
        x, w1, window_strides=(2, 2), padding=((1, 1), (1, 1)),
        dimension_numbers=("NCHW", "OIHW", "NCHW"))            # [N,64,32,32]
    h1 = jnp.where(h1 > 0, h1, 0.2 * h1)
    h1 = jnp.transpose(h1, (0, 2, 3, 1)).astype(jnp.bfloat16)  # NHWC
    p2 = _im2col_k4_s2_p1(h1)                                  # [N,256,1024] bf16
    out = _fused_tail(p2, w2, w3, w4, w5, g3, g4)              # [N,8,128]
    return out[:, 0, 0].reshape(n, 1, 1, 1)


disc_forward = jax.jit(discriminator_forward)


# ----------------------------------------------------------------------------
# Parameter setup (plain JAX / numpy, done once).
# ----------------------------------------------------------------------------
def spectral_normalize(w, n_iter=30, eps=1e-12):
    """PyTorch-style spectral norm: w / sigma_max(w.reshape(Cout, -1)).

    TODO(synk): PyTorch keeps a persistent random `u` and does one power
    iteration per forward; here we use a converged power iteration at init.
    """
    cout = w.shape[0]
    w2 = w.reshape(cout, -1)
    u = jnp.ones((cout,), jnp.float32)
    v = jnp.ones((w2.shape[1],), jnp.float32)
    for _ in range(n_iter):
        v = w2.T @ u
        v = v / (jnp.linalg.norm(v) + eps)
        u = w2 @ v
        u = u / (jnp.linalg.norm(u) + eps)
    sigma = u @ (w2 @ v)
    return w / sigma


def _build_gather(hi, wi, ho, wo):
    """0/1 matrix so (G @ act_flat)[k*ho*wo + m] is the (kh,kw)=k patch row of
    output position m for a 4x4/stride-2/pad-1 conv; pad rows are all-zero."""
    g = np.zeros((16 * ho * wo, hi * wi), np.float32)
    for kh in range(4):
        for kw in range(4):
            k = kh * 4 + kw
            for oh in range(ho):
                for ow in range(wo):
                    sh, sw = 2 * oh + kh - 1, 2 * ow + kw - 1
                    if 0 <= sh < hi and 0 <= sw < wi:
                        g[k * ho * wo + oh * wo + ow, sh * wi + sw] = 1.0
    return jnp.asarray(g, jnp.bfloat16)


def init_params(key):
    shapes = [(64, 1, 4, 4), (128, 64, 4, 4), (256, 128, 4, 4),
              (512, 256, 4, 4), (1, 512, 4, 4)]
    ws = []
    for s in shapes:
        key, sub = jax.random.split(key)
        ws.append(spectral_normalize(
            jax.random.normal(sub, s, jnp.float32) * 0.05))
    w1 = ws[0]                                                   # f32 OIHW

    def conv_to_mat(w):  # (Cout,Cin,4,4) -> [16*Cin, Cout], K order (kh,kw,ci)
        cout = w.shape[0]
        return jnp.transpose(w, (2, 3, 1, 0)).reshape(-1, cout).astype(jnp.bfloat16)

    w2 = conv_to_mat(ws[1])                                      # [1024, 128]
    w3 = conv_to_mat(ws[2])                                      # [2048, 256]
    w4 = conv_to_mat(ws[3])                                      # [4096, 512]
    # conv5: [1,512,4,4] -> [16, 512] matching h4's (kh*4+kw, cin) layout.
    w5 = jnp.transpose(ws[4][0], (1, 2, 0)).reshape(16, 512).astype(jnp.bfloat16)
    g3 = _build_gather(16, 16, 8, 8)                             # [1024, 256]
    g4 = _build_gather(8, 8, 4, 4)                               # [256, 64]
    return (w1, w2, w3, w4, w5, g3, g4)


if __name__ == "__main__":
    key = jax.random.PRNGKey(0)
    k_param, k_input = jax.random.split(key)

    params = init_params(k_param)

    # Input: batch=2, 1 channel, 64x64 -> 32 -> 16 -> 8 -> 4 -> 1x1 output.
    x = jax.random.normal(k_input, (2, 1, 64, 64), jnp.float32)

    out = jax.block_until_ready(disc_forward(x, params))

    assert out.shape == (2, 1, 1, 1), out.shape
    assert bool(jnp.all(jnp.isfinite(out)))
    assert bool(jnp.all((out >= 0.0) & (out <= 1.0)))
    print("KERNEL_OK")
</pallas_src>

<mosaic_0001>
module attributes {stable_mosaic.version = 11 : i64} {
  func.func @_fused_disc_kernel(%arg0: i32, %arg1: memref<1x256x1024xbf16, #tpu.memory_space<vmem>>, %arg2: memref<1024x128xbf16, #tpu.memory_space<vmem>>, %arg3: memref<2048x256xbf16, #tpu.memory_space<vmem>>, %arg4: memref<4096x512xbf16, #tpu.memory_space<vmem>>, %arg5: memref<16x512xbf16, #tpu.memory_space<vmem>>, %arg6: memref<1024x256xbf16, #tpu.memory_space<vmem>>, %arg7: memref<256x64xbf16, #tpu.memory_space<vmem>>, %arg8: memref<1x8x128xf32, #tpu.memory_space<vmem>>) attributes {dimension_semantics = [#tpu.dimension_semantics<parallel>], iteration_bounds = array<i64: 2>, scalar_prefetch = 0 : i64, scratch_operands = 0 : i64, tpu.core_type = #tpu.core_type<tc>, window_params = [{transform_indices = @transform_0, window_bounds = array<i64: 1, 256, 1024>}, {pipeline_mode = #tpu.pipeline_mode<synchronous>, transform_indices = @transform_1, window_bounds = array<i64: 1024, 128>}, {pipeline_mode = #tpu.pipeline_mode<synchronous>, transform_indices = @transform_2, window_bounds = array<i64: 2048, 256>}, {pipeline_mode = #tpu.pipeline_mode<synchronous>, transform_indices = @transform_3, window_bounds = array<i64: 4096, 512>}, {pipeline_mode = #tpu.pipeline_mode<synchronous>, transform_indices = @transform_4, window_bounds = array<i64: 16, 512>}, {pipeline_mode = #tpu.pipeline_mode<synchronous>, transform_indices = @transform_5, window_bounds = array<i64: 1024, 256>}, {pipeline_mode = #tpu.pipeline_mode<synchronous>, transform_indices = @transform_6, window_bounds = array<i64: 256, 64>}, {transform_indices = @transform_7, window_bounds = array<i64: 1, 8, 128>}]} {
    %c0 = arith.constant 0 : index
    %c0_0 = arith.constant 0 : index
    %c0_1 = arith.constant 0 : index
    %0 = vector.load %arg1[%c0, %c0_0, %c0_1] : memref<1x256x1024xbf16, #tpu.memory_space<vmem>>, vector<1x256x1024xbf16>
    %1 = vector.shape_cast %0 : vector<1x256x1024xbf16> to vector<256x1024xbf16>
    %c0_2 = arith.constant 0 : index
    %c0_3 = arith.constant 0 : index
    %2 = vector.load %arg2[%c0_2, %c0_3] : memref<1024x128xbf16, #tpu.memory_space<vmem>>, vector<1024x128xbf16>
    %cst = arith.constant dense<0.000000e+00> : vector<256x128xf32>
    %3 = tpu.matmul %1, %2, %cst {dimension_numbers = #tpu.dot_dimension_numbers<[1], [0], [0], [1], [0, 0, 1, 1], [], []>} : vector<256x1024xbf16>, vector<1024x128xbf16>, vector<256x128xf32> -> vector<256x128xf32>
    %cst_4 = arith.constant 0.000000e+00 : f32
    %4 = vector.broadcast %cst_4 : f32 to vector<256x128xf32>
    %5 = arith.cmpf ogt, %3, %4 : vector<256x128xf32>
    %cst_5 = arith.constant 2.000000e-01 : f32
    %6 = vector.broadcast %cst_5 : f32 to vector<256x128xf32>
    %7 = arith.mulf %6, %3 : vector<256x128xf32>
    %8 = arith.select %5, %3, %7 : vector<256x128xi1>, vector<256x128xf32>
    %9 = arith.truncf %8 : vector<256x128xf32> to vector<256x128xbf16>
    %c0_6 = arith.constant 0 : index
    %c0_7 = arith.constant 0 : index
    %10 = vector.load %arg6[%c0_6, %c0_7] : memref<1024x256xbf16, #tpu.memory_space<vmem>>, vector<1024x256xbf16>
    %cst_8 = arith.constant dense<0.000000e+00> : vector<1024x128xf32>
    %11 = tpu.matmul %10, %9, %cst_8 {dimension_numbers = #tpu.dot_dimension_numbers<[1], [0], [0], [1], [0, 0, 1, 1], [], []>} : vector<1024x256xbf16>, vector<256x128xbf16>, vector<1024x128xf32> -> vector<1024x128xf32>
    %12 = arith.truncf %11 : vector<1024x128xf32> to vector<1024x128xbf16>
    %13 = vector.extract_strided_slice %12 {offsets = [0, 0], sizes = [64, 128], strides = [1, 1]} : vector<1024x128xbf16> to vector<64x128xbf16>
    %14 = vector.extract_strided_slice %12 {offsets = [64, 0], sizes = [64, 128], strides = [1, 1]} : vector<1024x128xbf16> to vector<64x128xbf16>
    %15 = vector.extract_strided_slice %12 {offsets = [128, 0], sizes = [64, 128], strides = [1, 1]} : vector<1024x128xbf16> to vector<64x128xbf16>
    %16 = vector.extract_strided_slice %12 {offsets = [192, 0], sizes = [64, 128], strides = [1, 1]} : vector<1024x128xbf16> to vector<64x128xbf16>
    %17 = vector.extract_strided_slice %12 {offsets = [256, 0], sizes = [64, 128], strides = [1, 1]} : vector<1024x128xbf16> to vector<64x128xbf16>
    %18 = vector.extract_strided_slice %12 {offsets = [320, 0], sizes = [64, 128], strides = [1, 1]} : vector<1024x128xbf16> to vector<64x128xbf16>
    %19 = vector.extract_strided_slice %12 {offsets = [384, 0], sizes = [64, 128], strides = [1, 1]} : vector<1024x128xbf16> to vector<64x128xbf16>
    %20 = vector.extract_strided_slice %12 {offsets = [448, 0], sizes = [64, 128], strides = [1, 1]} : vector<1024x128xbf16> to vector<64x128xbf16>
    %21 = vector.extract_strided_slice %12 {offsets = [512, 0], sizes = [64, 128], strides = [1, 1]} : vector<1024x128xbf16> to vector<64x128xbf16>
    %22 = vector.extract_strided_slice %12 {offsets = [576, 0], sizes = [64, 128], strides = [1, 1]} : vector<1024x128xbf16> to vector<64x128xbf16>
    %23 = vector.extract_strided_slice %12 {offsets = [640, 0], sizes = [64, 128], strides = [1, 1]} : vector<1024x128xbf16> to vector<64x128xbf16>
    %24 = vector.extract_strided_slice %12 {offsets = [704, 0], sizes = [64, 128], strides = [1, 1]} : vector<1024x128xbf16> to vector<64x128xbf16>
    %25 = vector.extract_strided_slice %12 {offsets = [768, 0], sizes = [64, 128], strides = [1, 1]} : vector<1024x128xbf16> to vector<64x128xbf16>
    %26 = vector.extract_strided_slice %12 {offsets = [832, 0], sizes = [64, 128], strides = [1, 1]} : vector<1024x128xbf16> to vector<64x128xbf16>
    %27 = vector.extract_strided_slice %12 {offsets = [896, 0], sizes = [64, 128], strides = [1, 1]} : vector<1024x128xbf16> to vector<64x128xbf16>
    %28 = vector.extract_strided_slice %12 {offsets = [960, 0], sizes = [64, 128], strides = [1, 1]} : vector<1024x128xbf16> to vector<64x128xbf16>
    %29 = tpu.concatenate %13, %14, %15, %16, %17, %18, %19, %20, %21, %22, %23, %24, %25, %26, %27, %28 in 1 : vector<64x128xbf16>, vector<64x128xbf16>, vector<64x128xbf16>, vector<64x128xbf16>, vector<64x128xbf16>, vector<64x128xbf16>, vector<64x128xbf16>, vector<64x128xbf16>, vector<64x128xbf16>, vector<64x128xbf16>, vector<64x128xbf16>, vector<64x128xbf16>, vector<64x128xbf16>, vector<64x128xbf16>, vector<64x128xbf16>, vector<64x128xbf16> -> vector<64x2048xbf16>
    %c0_9 = arith.constant 0 : index
    %c0_10 = arith.constant 0 : index
    %30 = vector.load %arg3[%c0_9, %c0_10] : memref<2048x256xbf16, #tpu.memory_space<vmem>>, vector<2048x256xbf16>
    %cst_11 = arith.constant dense<0.000000e+00> : vector<64x256xf32>
    %31 = tpu.matmul %29, %30, %cst_11 {dimension_numbers = #tpu.dot_dimension_numbers<[1], [0], [0], [1], [0, 0, 1, 1], [], []>} : vector<64x2048xbf16>, vector<2048x256xbf16>, vector<64x256xf32> -> vector<64x256xf32>
    %cst_12 = arith.constant 0.000000e+00 : f32
    %32 = vector.broadcast %cst_12 : f32 to vector<64x256xf32>
    %33 = arith.cmpf ogt, %31, %32 : vector<64x256xf32>
    %cst_13 = arith.constant 2.000000e-01 : f32
    %34 = vector.broadcast %cst_13 : f32 to vector<64x256xf32>
    %35 = arith.mulf %34, %31 : vector<64x256xf32>
    %36 = arith.select %33, %31, %35 : vector<64x256xi1>, vector<64x256xf32>
    %37 = arith.truncf %36 : vector<64x256xf32> to vector<64x256xbf16>
    %c0_14 = arith.constant 0 : index
    %c0_15 = arith.constant 0 : index
    %38 = vector.load %arg7[%c0_14, %c0_15] : memref<256x64xbf16, #tpu.memory_space<vmem>>, vector<256x64xbf16>
    %cst_16 = arith.constant dense<0.000000e+00> : vector<256x256xf32>
    %39 = tpu.matmul %38, %37, %cst_16 {dimension_numbers = #tpu.dot_dimension_numbers<[1], [0], [0], [1], [0, 0, 1, 1], [], []>} : vector<256x64xbf16>, vector<64x256xbf16>, vector<256x256xf32> -> vector<256x256xf32>
    %40 = arith.truncf %39 : vector<256x256xf32> to vector<256x256xbf16>
    %41 = vector.extract_strided_slice %40 {offsets = [0, 0], sizes = [16, 256], strides = [1, 1]} : vector<256x256xbf16> to vector<16x256xbf16>
    %42 = vector.extract_strided_slice %40 {offsets = [16, 0], sizes = [16, 256], strides = [1, 1]} : vector<256x256xbf16> to vector<16x256xbf16>
    %43 = vector.extract_strided_slice %40 {offsets = [32, 0], sizes = [16, 256], strides = [1, 1]} : vector<256x256xbf16> to vector<16x256xbf16>
    %44 = vector.extract_strided_slice %40 {offsets = [48, 0], sizes = [16, 256], strides = [1, 1]} : vector<256x256xbf16> to vector<16x256xbf16>
    %45 = vector.extract_strided_slice %40 {offsets = [64, 0], sizes = [16, 256], strides = [1, 1]} : vector<256x256xbf16> to vector<16x256xbf16>
    %46 = vector.extract_strided_slice %40 {offsets = [80, 0], sizes = [16, 256], strides = [1, 1]} : vector<256x256xbf16> to vector<16x256xbf16>
    %47 = vector.extract_strided_slice %40 {offsets = [96, 0], sizes = [16, 256], strides = [1, 1]} : vector<256x256xbf16> to vector<16x256xbf16>
    %48 = vector.extract_strided_slice %40 {offsets = [112, 0], sizes = [16, 256], strides = [1, 1]} : vector<256x256xbf16> to vector<16x256xbf16>
    %49 = vector.extract_strided_slice %40 {offsets = [128, 0], sizes = [16, 256], strides = [1, 1]} : vector<256x256xbf16> to vector<16x256xbf16>
    %50 = vector.extract_strided_slice %40 {offsets = [144, 0], sizes = [16, 256], strides = [1, 1]} : vector<256x256xbf16> to vector<16x256xbf16>
    %51 = vector.extract_strided_slice %40 {offsets = [160, 0], sizes = [16, 256], strides = [1, 1]} : vector<256x256xbf16> to vector<16x256xbf16>
    %52 = vector.extract_strided_slice %40 {offsets = [176, 0], sizes = [16, 256], strides = [1, 1]} : vector<256x256xbf16> to vector<16x256xbf16>
    %53 = vector.extract_strided_slice %40 {offsets = [192, 0], sizes = [16, 256], strides = [1, 1]} : vector<256x256xbf16> to vector<16x256xbf16>
    %54 = vector.extract_strided_slice %40 {offsets = [208, 0], sizes = [16, 256], strides = [1, 1]} : vector<256x256xbf16> to vector<16x256xbf16>
    %55 = vector.extract_strided_slice %40 {offsets = [224, 0], sizes = [16, 256], strides = [1, 1]} : vector<256x256xbf16> to vector<16x256xbf16>
    %56 = vector.extract_strided_slice %40 {offsets = [240, 0], sizes = [16, 256], strides = [1, 1]} : vector<256x256xbf16> to vector<16x256xbf16>
    %57 = tpu.concatenate %41, %42, %43, %44, %45, %46, %47, %48, %49, %50, %51, %52, %53, %54, %55, %56 in 1 : vector<16x256xbf16>, vector<16x256xbf16>, vector<16x256xbf16>, vector<16x256xbf16>, vector<16x256xbf16>, vector<16x256xbf16>, vector<16x256xbf16>, vector<16x256xbf16>, vector<16x256xbf16>, vector<16x256xbf16>, vector<16x256xbf16>, vector<16x256xbf16>, vector<16x256xbf16>, vector<16x256xbf16>, vector<16x256xbf16>, vector<16x256xbf16> -> vector<16x4096xbf16>
    %c0_17 = arith.constant 0 : index
    %c0_18 = arith.constant 0 : index
    %58 = vector.load %arg4[%c0_17, %c0_18] : memref<4096x512xbf16, #tpu.memory_space<vmem>>, vector<4096x512xbf16>
    %cst_19 = arith.constant dense<0.000000e+00> : vector<16x512xf32>
    %59 = tpu.matmul %57, %58, %cst_19 {dimension_numbers = #tpu.dot_dimension_numbers<[1], [0], [0], [1], [0, 0, 1, 1], [], []>} : vector<16x4096xbf16>, vector<4096x512xbf16>, vector<16x512xf32> -> vector<16x512xf32>
    %cst_20 = arith.constant 0.000000e+00 : f32
    %60 = vector.broadcast %cst_20 : f32 to vector<16x512xf32>
    %61 = arith.cmpf ogt, %59, %60 : vector<16x512xf32>
    %cst_21 = arith.constant 2.000000e-01 : f32
    %62 = vector.broadcast %cst_21 : f32 to vector<16x512xf32>
    %63 = arith.mulf %62, %59 : vector<16x512xf32>
    %64 = arith.select %61, %59, %63 : vector<16x512xi1>, vector<16x512xf32>
    %c0_22 = arith.constant 0 : index
    %c0_23 = arith.constant 0 : index
    %65 = vector.load %arg5[%c0_22, %c0_23] : memref<16x512xbf16, #tpu.memory_space<vmem>>, vector<16x512xbf16>
    %66 = arith.extf %65 : vector<16x512xbf16> to vector<16x512xf32>
    %67 = arith.mulf %64, %66 : vector<16x512xf32>
    %cst_24 = arith.constant dense<0.000000e+00> : vector<512xf32>
    %68 = vector.multi_reduction <add>, %67, %cst_24 [0] : vector<16x512xf32> to vector<512xf32>
    %69 = vector.shape_cast %68 : vector<512xf32> to vector<1x512xf32>
    %cst_25 = arith.constant dense<0.000000e+00> : vector<1xf32>
    %70 = vector.multi_reduction <add>, %69, %cst_25 [1] : vector<1x512xf32> to vector<1xf32>
    %71 = vector.shape_cast %70 : vector<1xf32> to vector<1x1xf32>
    %cst_26 = arith.constant 0.000000e+00 : f32
    %72 = vector.broadcast %cst_26 : f32 to vector<1x1xf32>
    %73 = arith.subf %72, %71 : vector<1x1xf32>
    %74 = math.exp %73 : vector<1x1xf32>
    %cst_27 = arith.constant 1.000000e+00 : f32
    %75 = vector.broadcast %cst_27 : f32 to vector<1x1xf32>
    %76 = arith.addf %75, %74 : vector<1x1xf32>
    %cst_28 = arith.constant 1.000000e+00 : f32
    %77 = vector.broadcast %cst_28 : f32 to vector<1x1xf32>
    %78 = arith.divf %77, %76 : vector<1x1xf32>
    %79 = vector.shape_cast %78 : vector<1x1xf32> to vector<1x1x1xf32>
    %80 = vector.shape_cast %79 : vector<1x1x1xf32> to vector<1x1x1xf32>
    %81 = vector.broadcast %80 : vector<1x1x1xf32> to vector<1x8x128xf32>
    %c0_29 = arith.constant 0 : index
    %c0_30 = arith.constant 0 : index
    %c0_31 = arith.constant 0 : index
    %82 = vector.load %arg8[%c0_29, %c0_30, %c0_31] : memref<1x8x128xf32, #tpu.memory_space<vmem>>, vector<1x8x128xf32>
    tpu.vector_store %arg8[%c0_29, %c0_30, %c0_31], %81 {strides = array<i32>} : memref<1x8x128xf32, #tpu.memory_space<vmem>>, vector<1x8x128xf32>,
    return
  }
  func.func @transform_0(%arg0: i32) -> (i32, i32, i32) {
    %c0_i32 = arith.constant 0 : i32
    %c0_i32_0 = arith.constant 0 : i32
    %c0_i32_1 = arith.constant 0 : i32
    return %arg0, %c0_i32, %c0_i32_0 : i32, i32, i32
  }
  func.func @transform_1(%arg0: i32) -> (i32, i32) {
    %c0_i32 = arith.constant 0 : i32
    %c0_i32_0 = arith.constant 0 : i32
    %c0_i32_1 = arith.constant 0 : i32
    return %c0_i32, %c0_i32_0 : i32, i32
  }
  func.func @transform_2(%arg0: i32) -> (i32, i32) {
    %c0_i32 = arith.constant 0 : i32
    %c0_i32_0 = arith.constant 0 : i32
    %c0_i32_1 = arith.constant 0 : i32
    return %c0_i32, %c0_i32_0 : i32, i32
  }
  func.func @transform_3(%arg0: i32) -> (i32, i32) {
    %c0_i32 = arith.constant 0 : i32
    %c0_i32_0 = arith.constant 0 : i32
    %c0_i32_1 = arith.constant 0 : i32
    return %c0_i32, %c0_i32_0 : i32, i32
  }
  func.func @transform_4(%arg0: i32) -> (i32, i32) {
    %c0_i32 = arith.constant 0 : i32
    %c0_i32_0 = arith.constant 0 : i32
    %c0_i32_1 = arith.constant 0 : i32
    return %c0_i32, %c0_i32_0 : i32, i32
  }
  func.func @transform_5(%arg0: i32) -> (i32, i32) {
    %c0_i32 = arith.constant 0 : i32
    %c0_i32_0 = arith.constant 0 : i32
    %c0_i32_1 = arith.constant 0 : i32
    return %c0_i32, %c0_i32_0 : i32, i32
  }
  func.func @transform_6(%arg0: i32) -> (i32, i32) {
    %c0_i32 = arith.constant 0 : i32
    %c0_i32_0 = arith.constant 0 : i32
    %c0_i32_1 = arith.constant 0 : i32
    return %c0_i32, %c0_i32_0 : i32, i32
  }
  func.func @transform_7(%arg0: i32) -> (i32, i32, i32) {
    %c0_i32 = arith.constant 0 : i32
    %c0_i32_0 = arith.constant 0 : i32
    %c0_i32_1 = arith.constant 0 : i32
    return %arg0, %c0_i32, %c0_i32_0 : i32, i32, i32
  }
}

</mosaic_0001>

<bundles_post_ra>
// kernel: discriminator_forward.1
= control target key start
LH: loop header
LB: loop body
LE: loop exit
PB: predicated region body
PF: predicated region fallthrough
CT: control target
= control target key end

     0   :  { %s18255_s24 = smov 0   ;;  %s23920_s0 = inlined_call_operand.vmem [shape: bf16[2,256,1024], index: 0, kind: input, shape index: {}]   ;;  %s23921_s1 = inlined_call_operand.vmem [shape: bf16[1024,128], index: 1, kind: input, shape index: {}]   ;;  %s23922_s2 = inlined_call_operand.vmem [shape: bf16[2048,256], index: 2, kind: input, shape index: {}]   ;;  %s23923_s3 = inlined_call_operand.vmem [shape: bf16[4096,512], index: 3, kind: input, shape index: {}]   ;;  %s23924_s4 = inlined_call_operand.vmem [shape: bf16[16,512], index: 4, kind: input, shape index: {}]   ;;  %s23925_s5 = inlined_call_operand.vmem [shape: bf16[1024,256], index: 5, kind: input, shape index: {}]   ;;  %s23926_s6 = inlined_call_operand.vmem [shape: bf16[256,64], index: 6, kind: input, shape index: {}]   ;;  %s23927_s7 = inlined_call_operand.vmem [shape: f32[2,8,128], index: 7, kind: output, shape index: {}]  }
   0x1 LB: > { %s13910_s25 = sadd.s32 4294967295, %s18212_s24   ;;  %p13914_p0 = scmp.ge.s32.totalorder %s18212_s24, 1  ;;  %s18212_s24 = sphi %s18255_s24, %s17_s24  }
   0x2   : > { %p237_p1 = scmp.lt.s32.totalorder %s18212_s24, 3 }
   0x4   : > { %p238_p2 = pnand %p13914_p0, %p237_p1 }
   0x6   : > { %241 = sbr.rel (%p238_p2) target bundleno = 3081 (0xc09), region = 48 }
   0xb   : > { %v16010_v0 = vld [vmem:[%s23921_s1 + $0x78] sm:$0xff]   ;;  %v16014_v4 = vld [vmem:[%s23921_s1 + $0x70] sm:$0xff]   ;;  %v16018_v8 = vld [vmem:[%s23921_s1 + $0x68] sm:$0xff]   ;;  %p268_p3 = scmp.lt.s32.totalorder %s13910_s25, 1 }
   0xc   : > { %v16011_v1 = vld [vmem:[%s23921_s1 + $0xf8] sm:$0xff]   ;;  %15553 = vmatprep.subr.bf16.mxu0 %v16010_v0  ;;  %v16015_v5 = vld [vmem:[%s23921_s1 + $0xf0] sm:$0xff]   ;;  %v16019_v9 = vld [vmem:[%s23921_s1 + $0xe8] sm:$0xff]  }
   0xd   : > { %v16012_v2 = vld [vmem:[%s23921_s1 + $0x38] sm:$0xff]   ;;  %15665 = vmatprep.subr.bf16.mxu1 %v16011_v1  ;;  %v16016_v6 = vld [vmem:[%s23921_s1 + $0x30] sm:$0xff]   ;;  %v16020_v10 = vld [vmem:[%s23921_s1 + $0x28] sm:$0xff]   ;;  %s23936_s25 = smov (!%p268_p3, %s13910_s25), 1 }
   0xe   : > { %v16013_v3 = vld [vmem:[%s23921_s1 + $0xb8] sm:$0xff]   ;;  %15554 = vmatpush3.bf16.msra.mxu0 %v16012_v2  ;;  %v16017_v7 = vld [vmem:[%s23921_s1 + $0xb0] sm:$0xff]   ;;  %v16021_v11 = vld [vmem:[%s23921_s1 + $0xa8] sm:$0xff]   ;;  %s15552_s15 = sshll.u32 %s23936_s25, 10 }
   0xf   : > { %15666 = vmatpush3.bf16.msra.mxu1 %v16013_v3  ;;  %15555 = vmatprep.subr.bf16.mxu0 %v16014_v4  ;;  %v16022_v12 = vld [vmem:[%s23921_s1 + $0x60] sm:$0xff]   ;;  %v16026_v16 = vld [vmem:[%s23921_s1 + $0x58] sm:$0xff]   ;;  %v16030_v20 = vld [vmem:[%s23921_s1 + $0x50] sm:$0xff]   ;;  %s18363_s26 = scalar_lea.vmem %s23920_s0, %s15552_s15 }
  0x10   : > { %15667 = vmatprep.subr.bf16.mxu1 %v16015_v5  ;;  %v16023_v13 = vld [vmem:[%s23921_s1 + $0xe0] sm:$0xff]   ;;  %v16027_v17 = vld [vmem:[%s23921_s1 + $0xd8] sm:$0xff]   ;;  %v16031_v21 = vld [vmem:[%s23921_s1 + $0xd0] sm:$0xff]  }
  0x11   : > { %v16024_v14 = vld [vmem:[%s23921_s1 + $0x20] sm:$0xff]   ;;  %v16028_v18 = vld [vmem:[%s23921_s1 + $0x18] sm:$0xff]   ;;  %v16032_v22 = vld [vmem:[%s23921_s1 + $0x10] sm:$0xff]  }
  0x12   : > { %15556 = vmatpush3.bf16.msra.mxu0 %v16016_v6  ;;  %v16025_v15 = vld [vmem:[%s23921_s1 + $0xa0] sm:$0xff]   ;;  %v16029_v19 = vld [vmem:[%s23921_s1 + $0x98] sm:$0xff]   ;;  %v16033_v23 = vld [vmem:[%s23921_s1 + $0x90] sm:$0xff]  }
  0x13   : > { %15668 = vmatpush3.bf16.msra.mxu1 %v16017_v7  ;;  %15557 = vmatprep.subr.bf16.mxu0 %v16018_v8  ;;  %v16034_v24 = vld [vmem:[%s23921_s1 + $0x48] sm:$0xff]   ;;  %v16038_v28 = vld [vmem:[%s23921_s1 + $0x40] sm:$0xff]   ;;  %v16042_v50 = vld [vmem:[%s23921_s1 + $0x178] sm:$0xff]  }
  0x14   : > { %15669 = vmatprep.subr.bf16.mxu1 %v16019_v9  ;;  %v16035_v25 = vld [vmem:[%s23921_s1 + $0xc8] sm:$0xff]   ;;  %v16039_v29 = vld [vmem:[%s23921_s1 + $0xc0] sm:$0xff]   ;;  %v16043_v52 = vld [vmem:[%s23921_s1 + $0x138] sm:$0xff]  }
  0x15   : > { %v16036_v26 = vld [vmem:[%s23921_s1 + $0x8] sm:$0xff]   ;;  %v16040_v30 = vld [vmem:[%s23921_s1] sm:$0xff]   ;;  %v16044_v55 = vld [vmem:[%s23921_s1 + $0x1f8] sm:$0xff]  }
  0x16   : > { %15558 = vmatpush3.bf16.msra.mxu0 %v16020_v10  ;;  %v16037_v27 = vld [vmem:[%s23921_s1 + $0x88] sm:$0xff]   ;;  %v16041_v31 = vld [vmem:[%s23921_s1 + $0x80] sm:$0xff]   ;;  %v16045_v57 = vld [vmem:[%s23921_s1 + $0x1b8] sm:$0xff]  }
  0x17   : > { %15670 = vmatpush3.bf16.msra.mxu1 %v16021_v11  ;;  %15559 = vmatprep.subr.bf16.mxu0 %v16022_v12  ;;  %v278_v32 = vld [vmem:[%s18363_s26] sm:$0xff]  ;;  %v279_v34 = vld [vmem:[%s18363_s26 + $0x8] sm:$0xff]  ;;  %v16046_v62 = vld [vmem:[%s23921_s1 + $0x170] sm:$0xff]  }
  0x18   : > { %15671 = vmatprep.subr.bf16.mxu1 %v16023_v13  ;;  %v282_v33 = vld [vmem:[%s18363_s26 + $0x20] sm:$0xff]  ;;  %v283_v37 = vld [vmem:[%s18363_s26 + $0x28] sm:$0xff]  ;;  %v16047_v63 = vld [vmem:[%s23921_s1 + $0x130] sm:$0xff]  }
  0x19   : > { %v13918_v35 = vcombine.low %v278_v32, %v282_v33  ;;  %v13919_v36 = vcombine.high %v278_v32, %v282_v33  ;;  %v286_v38 = vld [vmem:[%s18363_s26 + $0x40] sm:$0xff]  ;;  %v13920_v40 = vcombine.low %v279_v34, %v283_v37  ;;  %v13921_v41 = vcombine.high %v279_v34, %v283_v37  ;;  %v287_v43 = vld [vmem:[%s18363_s26 + $0x48] sm:$0xff]  ;;  %v16048_v1 = vld [vmem:[%s23921_s1 + $0x1f0] sm:$0xff]  }
  0x1a   : > { %15560 = vmatpush3.bf16.msra.mxu0 %v16024_v14  ;;  %v290_v39 = vld [vmem:[%s18363_s26 + $0x60] sm:$0xff]  ;;  %v291_v44 = vld [vmem:[%s18363_s26 + $0x68] sm:$0xff]  ;;  %v16049_v4 = vld [vmem:[%s23921_s1 + $0x1b0] sm:$0xff]  }
  0x1b   : > { %15672 = vmatpush3.bf16.msra.mxu1 %v16025_v15  ;;  %15561 = vmatprep.subr.bf16.mxu0 %v16026_v16  ;;  %v13927_v42 = vcombine.high %v286_v38, %v290_v39  ;;  %v13929_v45 = vcombine.high %v287_v43, %v291_v44  ;;  %v294_v46 = vld [vmem:[%s18363_s26 + $0x80] sm:$0xff]  ;;  %v295_v48 = vld [vmem:[%s18363_s26 + $0x88] sm:$0xff]  ;;  %v13926_v51 = vcombine.low %v286_v38, %v290_v39  ;;  %v16060_v32 = vld [vmem:[%s23921_s1 + $0x1d8] sm:$0xff]  }
  0x1c   : > { %15673 = vmatprep.subr.bf16.mxu1 %v16027_v17  ;;  %1590 = vmatprep.mubr.bf16.mxu0 %v13919_v36  ;;  %v298_v47 = vld [vmem:[%s18363_s26 + $0xa0] sm:$0xff]  ;;  %v299_v49 = vld [vmem:[%s18363_s26 + $0xa8] sm:$0xff]  ;;  %v13928_v53 = vcombine.low %v287_v43, %v291_v44  ;;  %v16061_v33 = vld [vmem:[%s23921_s1 + $0x198] sm:$0xff]  }
  0x1d   : > { %1751 = vmatprep.mubr.bf16.mxu1 %v13921_v41  ;;  %v13935_v54 = vcombine.high %v294_v46, %v298_v47  ;;  %v13937_v56 = vcombine.high %v295_v48, %v299_v49  ;;  %v302_v58 = vld [vmem:[%s18363_s26 + $0xc0] sm:$0xff]  ;;  %v303_v60 = vld [vmem:[%s18363_s26 + $0xc8] sm:$0xff]  ;;  %v13934_v0 = vcombine.low %v294_v46, %v298_v47  ;;  %v13936_v2 = vcombine.low %v295_v48, %v299_v49  ;;  %v16062_v39 = vld [vmem:[%s23921_s1 + $0x150] sm:$0xff]  }
  0x1e   : > { %15562 = vmatpush3.bf16.msra.mxu0 %v16028_v18  ;;  %v306_v59 = vld [vmem:[%s18363_s26 + $0xe0] sm:$0xff]  ;;  %v307_v61 = vld [vmem:[%s18363_s26 + $0xe8] sm:$0xff]  ;;  %v16064_v44 = vld [vmem:[%s23921_s1 + $0x1d0] sm:$0xff]  }
  0x1f   : > { %15674 = vmatpush3.bf16.msra.mxu1 %v16029_v19  ;;  %15563 = vmatprep.subr.bf16.mxu0 %v16030_v20  ;;  %v13943_v3 = vcombine.high %v302_v58, %v306_v59  ;;  %v13945_v5 = vcombine.high %v303_v60, %v307_v61  ;;  %v310_v6 = vld [vmem:[%s18363_s26 + $0x100] sm:$0xff]  ;;  %v16050_v8 = vld [vmem:[%s23921_s1 + $0x168] sm:$0xff]   ;;  %v13942_v14 = vcombine.low %v302_v58, %v306_v59 }
  0x20   : > { %15675 = vmatprep.subr.bf16.mxu1 %v16031_v21  ;;  %v314_v7 = vld [vmem:[%s18363_s26 + $0x120] sm:$0xff]  ;;  %v311_v9 = vld [vmem:[%s18363_s26 + $0x108] sm:$0xff]  ;;  %v13944_v15 = vcombine.low %v303_v60, %v307_v61 }
  0x21   : > { %v315_v10 = vld [vmem:[%s18363_s26 + $0x128] sm:$0xff]  ;;  %v13951_v16 = vcombine.high %v310_v6, %v314_v7  ;;  %v16054_v18 = vld [vmem:[%s23921_s1 + $0x160] sm:$0xff]  }
  0x22   : > { %15564 = vmatpush3.bf16.msra.mxu0 %v16032_v22  ;;  %v16051_v11 = vld [vmem:[%s23921_s1 + $0x128] sm:$0xff]   ;;  %v13953_v17 = vcombine.high %v311_v9, %v315_v10  ;;  %v318_v19 = vld [vmem:[%s18363_s26 + $0x140] sm:$0xff] }
  0x23   : > { %15676 = vmatpush3.bf16.msra.mxu1 %v16033_v23  ;;  %15565 = vmatprep.subr.bf16.mxu0 %v16034_v24  ;;  %v16052_v12 = vld [vmem:[%s23921_s1 + $0x1e8] sm:$0xff]   ;;  %v16055_v20 = vld [vmem:[%s23921_s1 + $0x120] sm:$0xff]  }
  0x24   : > { %15677 = vmatprep.subr.bf16.mxu1 %v16035_v25  ;;  %v16053_v13 = vld [vmem:[%s23921_s1 + $0x1a8] sm:$0xff]   ;;  %v16056_v21 = vld [vmem:[%s23921_s1 + $0x1e0] sm:$0xff]  }
  0x25   : > { %v322_v22 = vld [vmem:[%s18363_s26 + $0x160] sm:$0xff]  ;;  %v319_v24 = vld [vmem:[%s18363_s26 + $0x148] sm:$0xff] }
  0x26   : > { %15566 = vmatpush3.bf16.msra.mxu0 %v16036_v26  ;;  %v16057_v23 = vld [vmem:[%s23921_s1 + $0x1a0] sm:$0xff]   ;;  %v323_v25 = vld [vmem:[%s18363_s26 + $0x168] sm:$0xff]  ;;  %v13950_v26 = vcombine.low %v310_v6, %v314_v7  ;;  %v13958_v38 = vcombine.low %v318_v19, %v322_v22 }
  0x27   : > { %15678 = vmatpush3.bf16.msra.mxu1 %v16037_v27  ;;  %15567 = vmatprep.subr.bf16.mxu0 %v16038_v28  ;;  %v13952_v27 = vcombine.low %v311_v9, %v315_v10  ;;  %v13959_v28 = vcombine.high %v318_v19, %v322_v22  ;;  %v326_v34 = vld [vmem:[%s18363_s26 + $0x180] sm:$0xff]  ;;  %v327_v36 = vld [vmem:[%s18363_s26 + $0x188] sm:$0xff] }
  0x28   : > { %15679 = vmatprep.subr.bf16.mxu1 %v16039_v29  ;;  %v13961_v29 = vcombine.high %v319_v24, %v323_v25  ;;  %v331_v37 = vld [vmem:[%s18363_s26 + $0x1a8] sm:$0xff]  ;;  %v334_v46 = vld [vmem:[%s18363_s26 + $0x1c0] sm:$0xff] }
  0x29   : > { %v13969_v43 = vcombine.high %v327_v36, %v331_v37  ;;  %v338_v47 = vld [vmem:[%s18363_s26 + $0x1e0] sm:$0xff]  ;;  %v335_v48 = vld [vmem:[%s18363_s26 + $0x1c8] sm:$0xff] }
  0x2a   : > { %15568 = vmatpush3.bf16.msra.mxu0 %v16040_v30  ;;  %v16058_v30 = vld [vmem:[%s23921_s1 + $0x158] sm:$0xff]   ;;  %v339_v49 = vld [vmem:[%s18363_s26 + $0x1e8] sm:$0xff]  ;;  %v16070_v58 = vld [vmem:[%s23921_s1 + $0x140] sm:$0xff]  }
  0x2b   : > { %15680 = vmatpush3.bf16.msra.mxu1 %v16041_v31  ;;  %15777 = vmatprep.subr.bf16.mxu0 %v16042_v50  ;;  %v16059_v31 = vld [vmem:[%s23921_s1 + $0x118] sm:$0xff]   ;;  %v16066_v50 = vld [vmem:[%s23921_s1 + $0x148] sm:$0xff]   ;;  %v16071_v59 = vld [vmem:[%s23921_s1 + $0x1c0] sm:$0xff]  }
  0x2c   : > { %15889 = vmatprep.subr.bf16.mxu1 %v16044_v55  ;;  %v13975_v55 = vcombine.high %v334_v46, %v338_v47  ;;  %v16072_v60 = vld [vmem:[%s23921_s1 + $0x100] sm:$0xff]   ;;  %v355_v9 = vld [vmem:[%s18363_s26 + $0x268] sm:$0xff] }
  0x2d   : > { %1591 = vmatmul.mubr.bf16.vlgmr.msra.gmra.mxu0 %v13918_v35  ;;  %v330_v35 = vld [vmem:[%s18363_s26 + $0x1a0] sm:$0xff] }
  0x2e   : > { %1752 = vmatmul.mubr.bf16.vlgmr.msra.gmra.mxu1 %v13920_v40  ;;  %1598 = vmatprep.mubr.bf16.mxu0 %v13927_v42  ;;  %v13960_v40 = vcombine.low %v319_v24, %v323_v25  ;;  %v13967_v41 = vcombine.high %v326_v34, %v330_v35  ;;  %v16063_v42 = vld [vmem:[%s23921_s1 + $0x110] sm:$0xff]   ;;  %v16073_v61 = vld [vmem:[%s23921_s1 + $0x180] sm:$0xff]   ;;  %v367_v24 = vld [vmem:[%s18363_s26 + $0x2c8] sm:$0xff] }
  0x2f   : > { %1759 = vmatprep.mubr.bf16.mxu1 %v13929_v45  ;;  %15778 = vmatpush3.bf16.msra.mxu0 %v16043_v52  ;;  %v16065_v45 = vld [vmem:[%s23921_s1 + $0x190] sm:$0xff]   ;;  %v13966_v52 = vcombine.low %v326_v34, %v330_v35  ;;  %v350_v6 = vld [vmem:[%s18363_s26 + $0x240] sm:$0xff]  ;;  %v371_v25 = vld [vmem:[%s18363_s26 + $0x2e8] sm:$0xff] }
  0x30   : > { %15890 = vmatpush3.bf16.msra.mxu1 %v16045_v57  ;;  %15779 = vmatprep.subr.bf16.mxu0 %v16046_v62  ;;  %v13977_v57 = vcombine.high %v335_v48, %v339_v49  ;;  %v342_v62 = vld [vmem:[%s18363_s26 + $0x200] sm:$0xff]  ;;  %v14008_v35 = vcombine.low %v367_v24, %v371_v25 }
  0x31   : > { %15891 = vmatprep.subr.bf16.mxu1 %v16048_v1  ;;  %v347_v1 = vld [vmem:[%s18363_s26 + $0x228] sm:$0xff]  ;;  %v354_v7 = vld [vmem:[%s18363_s26 + $0x260] sm:$0xff] }
  0x32   : > { %v366_v22 = vld [vmem:[%s18363_s26 + $0x2c0] sm:$0xff] }
  0x33   : > { %15780 = vmatpush3.bf16.msra.mxu0 %v16047_v63  ;;  %v346_v63 = vld [vmem:[%s18363_s26 + $0x220] sm:$0xff] }
  0x34   : > { %15892 = vmatpush3.bf16.msra.mxu1 %v16049_v4  ;;  %15781 = vmatprep.subr.bf16.mxu0 %v16050_v8  ;;  %v13983_v4 = vcombine.high %v342_v62, %v346_v63  ;;  %v351_v8 = vld [vmem:[%s18363_s26 + $0x248] sm:$0xff]  ;;  %v13982_v10 = vcombine.low %v342_v62, %v346_v63  ;;  %v280_v62 = vld [vmem:[%s18363_s26 + $0x10] sm:$0xff] }
  0x35   : > { %1599 = vmatmul.mubr.bf16.gmra.mxu0 %v13926_v51  ;;  %15893 = vmatprep.subr.bf16.mxu1 %v16052_v12  ;;  %v16067_v51 = vld [vmem:[%s23921_s1 + $0x1c8] sm:$0xff]   ;;  %v13991_v12 = vcombine.high %v350_v6, %v354_v7  ;;  %v13992_v19 = vcombine.low %v351_v8, %v355_v9  ;;  %v284_v63 = vld [vmem:[%s18363_s26 + $0x30] sm:$0xff] }
  0x36   : > { %1760 = vmatmul.mubr.bf16.gmra.mxu1 %v13928_v53  ;;  %1606 = vmatprep.mubr.bf16.mxu0 %v13935_v54  ;;  %v16068_v53 = vld [vmem:[%s23921_s1 + $0x108] sm:$0xff]   ;;  %v13968_v54 = vcombine.low %v327_v36, %v331_v37 }
  0x37   : > { %1767 = vmatprep.mubr.bf16.mxu1 %v13937_v56  ;;  %15782 = vmatpush3.bf16.msra.mxu0 %v16051_v11  ;;  %v16069_v56 = vld [vmem:[%s23921_s1 + $0x188] sm:$0xff]  }
  0x38   : > { %15894 = vmatpush3.bf16.msra.mxu1 %v16053_v13  ;;  %15783 = vmatprep.subr.bf16.mxu0 %v16054_v18  ;;  %v13993_v13 = vcombine.high %v351_v8, %v355_v9  ;;  %v13990_v18 = vcombine.low %v350_v6, %v354_v7  ;;  %v288_v6 = vld [vmem:[%s18363_s26 + $0x50] sm:$0xff]  ;;  %v289_v8 = vld [vmem:[%s18363_s26 + $0x58] sm:$0xff] }
  0x39   : > { %15895 = vmatprep.subr.bf16.mxu1 %v16056_v21  ;;  %v292_v7 = vld [vmem:[%s18363_s26 + $0x70] sm:$0xff]  ;;  %v293_v9 = vld [vmem:[%s18363_s26 + $0x78] sm:$0xff] }
  0x3b   : > { %15784 = vmatpush3.bf16.msra.mxu0 %v16055_v20 }
  0x3c   : > { %15896 = vmatpush3.bf16.msra.mxu1 %v16057_v23  ;;  %15785 = vmatprep.subr.bf16.mxu0 %v16058_v30  ;;  %v370_v23 = vld [vmem:[%s18363_s26 + $0x2e0] sm:$0xff] }
  0x3d   : > { %1607 = vmatmul.mubr.bf16.gmra.mxu0 %v13934_v0  ;;  %15897 = vmatprep.subr.bf16.mxu1 %v16060_v32  ;;  %v343_v0 = vld [vmem:[%s18363_s26 + $0x208] sm:$0xff]  ;;  %v374_v30 = vld [vmem:[%s18363_s26 + $0x300] sm:$0xff]  ;;  %v14006_v34 = vcombine.low %v366_v22, %v370_v23 }
  0x3e   : > { %1768 = vmatmul.mubr.bf16.gmra.mxu1 %v13936_v2  ;;  %1614 = vmatprep.mubr.bf16.mxu0 %v13943_v3  ;;  %v13974_v2 = vcombine.low %v334_v46, %v338_v47  ;;  %v13976_v3 = vcombine.low %v335_v48, %v339_v49  ;;  %v13984_v11 = vcombine.low %v343_v0, %v347_v1  ;;  %v375_v32 = vld [vmem:[%s18363_s26 + $0x308] sm:$0xff]  ;;  %v390_v46 = vld [vmem:[%s18363_s26 + $0x380] sm:$0xff] }
  0x3f   : > { %1775 = vmatprep.mubr.bf16.mxu1 %v13945_v5  ;;  %15786 = vmatpush3.bf16.msra.mxu0 %v16059_v31  ;;  %v13985_v5 = vcombine.high %v343_v0, %v347_v1  ;;  %v378_v31 = vld [vmem:[%s18363_s26 + $0x320] sm:$0xff]  ;;  %v391_v48 = vld [vmem:[%s18363_s26 + $0x388] sm:$0xff]  ;;  %v281_v0 = vld [vmem:[%s18363_s26 + $0x18] sm:$0xff] }
  0x40   : > { %15898 = vmatpush3.bf16.msra.mxu1 %v16061_v33  ;;  %15787 = vmatprep.subr.bf16.mxu0 %v16062_v39  ;;  %v379_v33 = vld [vmem:[%s18363_s26 + $0x328] sm:$0xff]  ;;  %v14015_v36 = vcombine.high %v374_v30, %v378_v31  ;;  %v386_v39 = vld [vmem:[%s18363_s26 + $0x360] sm:$0xff]  ;;  %v285_v1 = vld [vmem:[%s18363_s26 + $0x38] sm:$0xff] }
  0x41   : > { %15899 = vmatprep.subr.bf16.mxu1 %v16064_v44  ;;  %v14017_v37 = vcombine.high %v375_v32, %v379_v33  ;;  %v394_v47 = vld [vmem:[%s18363_s26 + $0x3a0] sm:$0xff]  ;;  %v395_v49 = vld [vmem:[%s18363_s26 + $0x3a8] sm:$0xff] }
  0x43   : > { %15788 = vmatpush3.bf16.msra.mxu0 %v16063_v42  ;;  %v14014_v42 = vcombine.low %v374_v30, %v378_v31  ;;  %v312_v30 = vld [vmem:[%s18363_s26 + $0x110] sm:$0xff] }
  0x44   : > { %15900 = vmatpush3.bf16.msra.mxu1 %v16065_v45  ;;  %15789 = vmatprep.subr.bf16.mxu0 %v16066_v50  ;;  %v316_v31 = vld [vmem:[%s18363_s26 + $0x130] sm:$0xff] }
  0x45   : > { %1615 = vmatmul.mubr.bf16.gmra.mxu0 %v13942_v14  ;;  %15901 = vmatprep.subr.bf16.mxu1 %v16067_v51  ;;  %v358_v14 = vld [vmem:[%s18363_s26 + $0x280] sm:$0xff] }
  0x46   : > { %1776 = vmatmul.mubr.bf16.gmra.mxu1 %v13944_v15  ;;  %1622 = vmatprep.mubr.bf16.mxu0 %v13951_v16  ;;  %v362_v15 = vld [vmem:[%s18363_s26 + $0x2a0] sm:$0xff]  ;;  %v359_v16 = vld [vmem:[%s18363_s26 + $0x288] sm:$0xff] }
  0x47   : > { %1783 = vmatprep.mubr.bf16.mxu1 %v13953_v17  ;;  %15790 = vmatpush3.bf16.msra.mxu0 %v16068_v53  ;;  %v363_v17 = vld [vmem:[%s18363_s26 + $0x2a8] sm:$0xff]  ;;  %v13999_v20 = vcombine.high %v358_v14, %v362_v15  ;;  %v14033_v53 = vcombine.high %v391_v48, %v395_v49 }
  0x48   : > { %15902 = vmatpush3.bf16.msra.mxu1 %v16069_v56  ;;  %15791 = vmatprep.subr.bf16.mxu0 %v16070_v58  ;;  %v14001_v21 = vcombine.high %v359_v16, %v363_v17  ;;  %v399_v56 = vld [vmem:[%s18363_s26 + $0x3c8] sm:$0xff]  ;;  %v14030_v58 = vcombine.low %v390_v46, %v394_v47 }
  0x49   : > { %15903 = vmatprep.subr.bf16.mxu1 %v16071_v59  ;;  %v14032_v59 = vcombine.low %v391_v48, %v395_v49  ;;  %v329_v48 = vld [vmem:[%s18363_s26 + $0x198] sm:$0xff] }
  0x4a   : > { %v333_v49 = vld [vmem:[%s18363_s26 + $0x1b8] sm:$0xff] }
  0x4b   : > { %15792 = vmatpush3.bf16.msra.mxu0 %v16072_v60 }
  0x4c   : > { %15904 = vmatpush3.bf16.msra.mxu1 %v16073_v61 }
  0x4d   : > { %1623 = vmatmul.mubr.bf16.gmra.mxu0 %v13950_v26  ;;  %v13998_v26 = vcombine.low %v358_v14, %v362_v15  ;;  %v296_v14 = vld [vmem:[%s18363_s26 + $0x90] sm:$0xff] }
  0x4e   : > { %1784 = vmatmul.mubr.bf16.gmra.mxu1 %v13952_v27  ;;  %1630 = vmatprep.mubr.bf16.mxu0 %v13959_v28  ;;  %v14000_v27 = vcombine.low %v359_v16, %v363_v17  ;;  %v14007_v28 = vcombine.high %v366_v22, %v370_v23  ;;  %v300_v15 = vld [vmem:[%s18363_s26 + $0xb0] sm:$0xff]  ;;  %v297_v16 = vld [vmem:[%s18363_s26 + $0x98] sm:$0xff] }
  0x4f   : > { %1791 = vmatprep.mubr.bf16.mxu1 %v13961_v29  ;;  %v14009_v29 = vcombine.high %v367_v24, %v371_v25  ;;  %v301_v17 = vld [vmem:[%s18363_s26 + $0xb8] sm:$0xff]  ;;  %v304_v22 = vld [vmem:[%s18363_s26 + $0xd0] sm:$0xff] }
  0x50   : > { %v308_v23 = vld [vmem:[%s18363_s26 + $0xf0] sm:$0xff]  ;;  %v305_v24 = vld [vmem:[%s18363_s26 + $0xd8] sm:$0xff] }
  0x51   : > { %v309_v25 = vld [vmem:[%s18363_s26 + $0xf8] sm:$0xff] }
  0x55   : > { %1631 = vmatmul.mubr.bf16.gmra.mxu0 %v13958_v38  ;;  %v382_v38 = vld [vmem:[%s18363_s26 + $0x340] sm:$0xff] }
  0x56   : > { %1792 = vmatmul.mubr.bf16.gmra.mxu1 %v13960_v40  ;;  %1638 = vmatprep.mubr.bf16.mxu0 %v13967_v41  ;;  %v383_v40 = vld [vmem:[%s18363_s26 + $0x348] sm:$0xff]  ;;  %v14023_v44 = vcombine.high %v382_v38, %v386_v39  ;;  %v14022_v50 = vcombine.low %v382_v38, %v386_v39  ;;  %v320_v38 = vld [vmem:[%s18363_s26 + $0x150] sm:$0xff] }
  0x57   : > { %1799 = vmatprep.mubr.bf16.mxu1 %v13969_v43  ;;  %v387_v41 = vld [vmem:[%s18363_s26 + $0x368] sm:$0xff]  ;;  %v14016_v43 = vcombine.low %v375_v32, %v379_v33  ;;  %v313_v32 = vld [vmem:[%s18363_s26 + $0x118] sm:$0xff]  ;;  %v324_v39 = vld [vmem:[%s18363_s26 + $0x170] sm:$0xff] }
  0x58   : > { %v14025_v45 = vcombine.high %v383_v40, %v387_v41  ;;  %v14024_v51 = vcombine.low %v383_v40, %v387_v41  ;;  %v317_v33 = vld [vmem:[%s18363_s26 + $0x138] sm:$0xff] }
  0x59   : > { %v321_v40 = vld [vmem:[%s18363_s26 + $0x158] sm:$0xff] }
  0x5a   : > { %v325_v41 = vld [vmem:[%s18363_s26 + $0x178] sm:$0xff] }
  0x5d   : > { %1639 = vmatmul.mubr.bf16.gmra.mxu0 %v13966_v52  ;;  %v14031_v52 = vcombine.high %v390_v46, %v394_v47  ;;  %v328_v46 = vld [vmem:[%s18363_s26 + $0x190] sm:$0xff] }
  0x5e   : > { %1800 = vmatmul.mubr.bf16.gmra.mxu1 %v13968_v54  ;;  %1646 = vmatprep.mubr.bf16.mxu0 %v13975_v55  ;;  %v398_v54 = vld [vmem:[%s18363_s26 + $0x3c0] sm:$0xff]  ;;  %v332_v47 = vld [vmem:[%s18363_s26 + $0x1b0] sm:$0xff] }
  0x5f   : > { %1807 = vmatprep.mubr.bf16.mxu1 %v13977_v57  ;;  %v402_v55 = vld [vmem:[%s18363_s26 + $0x3e0] sm:$0xff]  ;;  %v403_v57 = vld [vmem:[%s18363_s26 + $0x3e8] sm:$0xff] }
  0x60   : > { %v14039_v60 = vcombine.high %v398_v54, %v402_v55  ;;  %v14041_v61 = vcombine.high %v399_v56, %v403_v57 }
  0x65   : > { %1647 = vmatmul.mubr.bf16.gmra.mxu0 %v13974_v2  ;;  %v14038_v2 = vcombine.low %v398_v54, %v402_v55  ;;  %v336_v54 = vld [vmem:[%s18363_s26 + $0x1d0] sm:$0xff] }
  0x66   : > { %1808 = vmatmul.mubr.bf16.gmra.mxu1 %v13976_v3  ;;  %1654 = vmatprep.mubr.bf16.mxu0 %v13983_v4  ;;  %v14040_v3 = vcombine.low %v399_v56, %v403_v57  ;;  %v13923_v4 = vcombine.high %v280_v62, %v284_v63  ;;  %v340_v55 = vld [vmem:[%s18363_s26 + $0x1f0] sm:$0xff]  ;;  %v337_v56 = vld [vmem:[%s18363_s26 + $0x1d8] sm:$0xff] }
  0x67   : > { %1815 = vmatprep.mubr.bf16.mxu1 %v13985_v5  ;;  %v13925_v5 = vcombine.high %v281_v0, %v285_v1  ;;  %v341_v57 = vld [vmem:[%s18363_s26 + $0x1f8] sm:$0xff] }
  0x6d   : > { %1655 = vmatmul.mubr.bf16.gmra.mxu0 %v13982_v10  ;;  %v13922_v10 = vcombine.low %v280_v62, %v284_v63  ;;  %v344_v62 = vld [vmem:[%s18363_s26 + $0x210] sm:$0xff] }
  0x6e   : > { %1816 = vmatmul.mubr.bf16.gmra.mxu1 %v13984_v11  ;;  %1662 = vmatprep.mubr.bf16.mxu0 %v13991_v12  ;;  %v13924_v11 = vcombine.low %v281_v0, %v285_v1  ;;  %v13931_v12 = vcombine.high %v288_v6, %v292_v7  ;;  %v348_v63 = vld [vmem:[%s18363_s26 + $0x230] sm:$0xff]  ;;  %v345_v0 = vld [vmem:[%s18363_s26 + $0x218] sm:$0xff] }
  0x6f   : > { %1823 = vmatprep.mubr.bf16.mxu1 %v13993_v13  ;;  %v13933_v13 = vcombine.high %v289_v8, %v293_v9  ;;  %v349_v1 = vld [vmem:[%s18363_s26 + $0x238] sm:$0xff] }
  0x75   : > { %1663 = vmatmul.mubr.bf16.gmra.mxu0 %v13990_v18  ;;  %v13930_v18 = vcombine.low %v288_v6, %v292_v7  ;;  %v352_v6 = vld [vmem:[%s18363_s26 + $0x250] sm:$0xff] }
  0x76   : > { %1824 = vmatmul.mubr.bf16.gmra.mxu1 %v13992_v19  ;;  %1670 = vmatprep.mubr.bf16.mxu0 %v13999_v20  ;;  %v13932_v19 = vcombine.low %v289_v8, %v293_v9  ;;  %v13939_v20 = vcombine.high %v296_v14, %v300_v15  ;;  %v356_v7 = vld [vmem:[%s18363_s26 + $0x270] sm:$0xff]  ;;  %v353_v8 = vld [vmem:[%s18363_s26 + $0x258] sm:$0xff] }
  0x77   : > { %1831 = vmatprep.mubr.bf16.mxu1 %v14001_v21  ;;  %v13941_v21 = vcombine.high %v297_v16, %v301_v17  ;;  %v357_v9 = vld [vmem:[%s18363_s26 + $0x278] sm:$0xff] }
  0x7d   : > { %1671 = vmatmul.mubr.bf16.gmra.mxu0 %v13998_v26  ;;  %v13938_v26 = vcombine.low %v296_v14, %v300_v15  ;;  %v360_v15 = vld [vmem:[%s18363_s26 + $0x290] sm:$0xff] }
  0x7e   : > { %1832 = vmatmul.mubr.bf16.gmra.mxu1 %v14000_v27  ;;  %1678 = vmatprep.mubr.bf16.mxu0 %v14007_v28  ;;  %v13940_v27 = vcombine.low %v297_v16, %v301_v17  ;;  %v13947_v28 = vcombine.high %v304_v22, %v308_v23  ;;  %v364_v16 = vld [vmem:[%s18363_s26 + $0x2b0] sm:$0xff] }
  0x7f   : > { %1839 = vmatprep.mubr.bf16.mxu1 %v14009_v29  ;;  %v13949_v29 = vcombine.high %v305_v24, %v309_v25 }
  0x85   : > { %1679 = vmatmul.mubr.bf16.gmra.mxu0 %v14006_v34  ;;  %v13946_v34 = vcombine.low %v304_v22, %v308_v23 }
  0x86   : > { %1840 = vmatmul.mubr.bf16.gmra.mxu1 %v14008_v35  ;;  %1686 = vmatprep.mubr.bf16.mxu0 %v14015_v36  ;;  %v13948_v35 = vcombine.low %v305_v24, %v309_v25  ;;  %v13955_v36 = vcombine.high %v312_v30, %v316_v31  ;;  %v13994_v25 = vcombine.low %v352_v6, %v356_v7 }
  0x87   : > { %1847 = vmatprep.mubr.bf16.mxu1 %v14017_v37  ;;  %v13957_v37 = vcombine.high %v313_v32, %v317_v33 }
  0x8d   : > { %1687 = vmatmul.mubr.bf16.gmra.mxu0 %v14014_v42  ;;  %v13954_v42 = vcombine.low %v312_v30, %v316_v31 }
  0x8e   : > { %1848 = vmatmul.mubr.bf16.gmra.mxu1 %v14016_v43  ;;  %1694 = vmatprep.mubr.bf16.mxu0 %v14023_v44  ;;  %v13956_v43 = vcombine.low %v313_v32, %v317_v33  ;;  %v13963_v44 = vcombine.high %v320_v38, %v324_v39 }
  0x8f   : > { %1855 = vmatprep.mubr.bf16.mxu1 %v14025_v45  ;;  %v13965_v45 = vcombine.high %v321_v40, %v325_v41 }
  0x95   : > { %1695 = vmatmul.mubr.bf16.gmra.mxu0 %v14022_v50  ;;  %v13962_v50 = vcombine.low %v320_v38, %v324_v39  ;;  %v369_v39 = vld [vmem:[%s18363_s26 + $0x2d8] sm:$0xff] }
  0x96   : > { %1856 = vmatmul.mubr.bf16.gmra.mxu1 %v14024_v51  ;;  %1702 = vmatprep.mubr.bf16.mxu0 %v14031_v52  ;;  %v13964_v51 = vcombine.low %v321_v40, %v325_v41  ;;  %v13971_v52 = vcombine.high %v328_v46, %v332_v47  ;;  %v373_v40 = vld [vmem:[%s18363_s26 + $0x2f8] sm:$0xff] }
  0x97   : > { %1863 = vmatprep.mubr.bf16.mxu1 %v14033_v53  ;;  %v13973_v53 = vcombine.high %v329_v48, %v333_v49 }
  0x9d   : > { %1703 = vmatmul.mubr.bf16.gmra.mxu0 %v14030_v58  ;;  %v13970_v58 = vcombine.low %v328_v46, %v332_v47  ;;  %v14002_v47 = vcombine.low %v360_v15, %v364_v16 }
  0x9e   : > { %1864 = vmatmul.mubr.bf16.gmra.mxu1 %v14032_v59  ;;  %1710 = vmatprep.mubr.bf16.mxu0 %v14039_v60  ;;  %v13972_v59 = vcombine.low %v329_v48, %v333_v49  ;;  %v13979_v60 = vcombine.high %v336_v54, %v340_v55 }
  0x9f   : > { %1871 = vmatprep.mubr.bf16.mxu1 %v14041_v61  ;;  %v13981_v61 = vcombine.high %v337_v56, %v341_v57 }
  0xa5   : > { %1711 = vmatmul.mubr.bf16.gmra.mxu0 %v14038_v2  ;;  %v13978_v2 = vcombine.low %v336_v54, %v340_v55 }
  0xa6   : > { %1872 = vmatmul.mubr.bf16.gmra.mxu1 %v14040_v3  ;;  %1912 = vmatprep.mubr.bf16.mxu0 %v13923_v4  ;;  %v13980_v3 = vcombine.low %v337_v56, %v341_v57  ;;  %v13987_v4 = vcombine.high %v344_v62, %v348_v63 }
  0xa7   : > { %2073 = vmatprep.mubr.bf16.mxu1 %v13925_v5  ;;  %v13989_v5 = vcombine.high %v345_v0, %v349_v1 }
  0xad   : > { %1913 = vmatmul.mubr.bf16.vlgmr.msra.gmra.mxu0 %v13922_v10  ;;  %v13986_v10 = vcombine.low %v344_v62, %v348_v63  ;;  %v381_v62 = vld [vmem:[%s18363_s26 + $0x338] sm:$0xff] }
  0xae   : > { %2074 = vmatmul.mubr.bf16.vlgmr.msra.gmra.mxu1 %v13924_v11  ;;  %1920 = vmatprep.mubr.bf16.mxu0 %v13931_v12  ;;  %v13988_v11 = vcombine.low %v345_v0, %v349_v1  ;;  %v13995_v12 = vcombine.high %v352_v6, %v356_v7  ;;  %v14012_v7 = vcombine.low %v369_v39, %v373_v40 }
  0xaf   : > { %2081 = vmatprep.mubr.bf16.mxu1 %v13933_v13  ;;  %v13997_v13 = vcombine.high %v353_v8, %v357_v9 }
  0xb5   : > { %1921 = vmatmul.mubr.bf16.gmra.mxu0 %v13930_v18  ;;  %v361_v18 = vld [vmem:[%s18363_s26 + $0x298] sm:$0xff] }
  0xb6   : > { %2082 = vmatmul.mubr.bf16.gmra.mxu1 %v13932_v19  ;;  %1928 = vmatprep.mubr.bf16.mxu0 %v13939_v20  ;;  %v365_v19 = vld [vmem:[%s18363_s26 + $0x2b8] sm:$0xff] }
  0xb7   : > { %2089 = vmatprep.mubr.bf16.mxu1 %v13941_v21  ;;  %v14005_v31 = vcombine.high %v361_v18, %v365_v19  ;;  %v14004_v49 = vcombine.low %v361_v18, %v365_v19  ;;  %v385_v19 = vld [vmem:[%s18363_s26 + $0x358] sm:$0xff] }
  0xbd   : > { %1929 = vmatmul.mubr.bf16.gmra.mxu0 %v13938_v26 }
  0xbe   : > { %2090 = vmatmul.mubr.bf16.gmra.mxu1 %v13940_v27  ;;  %1936 = vmatprep.mubr.bf16.mxu0 %v13947_v28  ;;  %v13996_v27 = vcombine.low %v353_v8, %v357_v9  ;;  %v14003_v28 = vcombine.high %v360_v15, %v364_v16  ;;  %v384_v16 = vld [vmem:[%s18363_s26 + $0x350] sm:$0xff] }
  0xbf   : > { %2097 = vmatprep.mubr.bf16.mxu1 %v13949_v29 }
  0xc5   : > { %1937 = vmatmul.mubr.bf16.gmra.mxu0 %v13946_v34 }
  0xc6   : > { %2098 = vmatmul.mubr.bf16.gmra.mxu1 %v13948_v35  ;;  %1944 = vmatprep.mubr.bf16.mxu0 %v13955_v36  ;;  %v368_v36 = vld [vmem:[%s18363_s26 + $0x2d0] sm:$0xff] }
  0xc7   : > { %2105 = vmatprep.mubr.bf16.mxu1 %v13957_v37  ;;  %v372_v37 = vld [vmem:[%s18363_s26 + $0x2f0] sm:$0xff] }
  0xcd   : > { %1945 = vmatmul.mubr.bf16.gmra.mxu0 %v13954_v42 }
  0xce   : > { %2106 = vmatmul.mubr.bf16.gmra.mxu1 %v13956_v43  ;;  %1952 = vmatprep.mubr.bf16.mxu0 %v13963_v44 }
  0xcf   : > { %2113 = vmatprep.mubr.bf16.mxu1 %v13965_v45 }
  0xd5   : > { %1953 = vmatmul.mubr.bf16.gmra.mxu0 %v13962_v50  ;;  %v14011_v50 = vcombine.high %v368_v36, %v372_v37 }
  0xd6   : > { %2114 = vmatmul.mubr.bf16.gmra.mxu1 %v13964_v51  ;;  %1960 = vmatprep.mubr.bf16.mxu0 %v13971_v52 }
  0xd7   : > { %2121 = vmatprep.mubr.bf16.mxu1 %v13973_v53  ;;  %v14013_v53 = vcombine.high %v369_v39, %v373_v40  ;;  %v392_v39 = vld [vmem:[%s18363_s26 + $0x390] sm:$0xff] }
  0xd8   : > { %v396_v40 = vld [vmem:[%s18363_s26 + $0x3b0] sm:$0xff] }
  0xdd   : > { %1961 = vmatmul.mubr.bf16.gmra.mxu0 %v13970_v58  ;;  %v376_v58 = vld [vmem:[%s18363_s26 + $0x310] sm:$0xff] }
  0xde   : > { %2122 = vmatmul.mubr.bf16.gmra.mxu1 %v13972_v59  ;;  %1968 = vmatprep.mubr.bf16.mxu0 %v13979_v60  ;;  %v380_v59 = vld [vmem:[%s18363_s26 + $0x330] sm:$0xff] }
  0xdf   : > { %2129 = vmatprep.mubr.bf16.mxu1 %v13981_v61  ;;  %v377_v61 = vld [vmem:[%s18363_s26 + $0x318] sm:$0xff]  ;;  %v14019_v8 = vcombine.high %v376_v58, %v380_v59 }
  0xe5   : > { %1969 = vmatmul.mubr.bf16.gmra.mxu0 %v13978_v2 }
  0xe6   : > { %2130 = vmatmul.mubr.bf16.gmra.mxu1 %v13980_v3  ;;  %1976 = vmatprep.mubr.bf16.mxu0 %v13987_v4 }
  0xe7   : > { %2137 = vmatprep.mubr.bf16.mxu1 %v13989_v5  ;;  %v14010_v5 = vcombine.low %v368_v36, %v372_v37 }
  0xed   : > { %v15569_v14 = vpop.f32.mrf.mxu0  ;;  %1977 = vmatmul.mubr.bf16.gmra.mxu0 %v13986_v10 }
  0xee   : > { %v15681_v17 = vpop.f32.mrf.mxu1  ;;  %2138 = vmatmul.mubr.bf16.gmra.mxu1 %v13988_v11  ;;  %1984 = vmatprep.mubr.bf16.mxu0 %v13995_v12  ;;  %v14021_v11 = vcombine.high %v377_v61, %v381_v62 }
  0xef   : > { %v15570_v20 = vpop.f32.mrf.mxu0  ;;  %2145 = vmatprep.mubr.bf16.mxu1 %v13997_v13 }
  0xf0   : > { %v15571_v21 = vadd.f32 %v15570_v20, %v15569_v14  ;;  %v15682_v22 = vpop.f32.mrf.mxu1  ;;  %v389_v20 = vld [vmem:[%s18363_s26 + $0x378] sm:$0xff] }
  0xf1   : > { %v15683_v23 = vadd.f32 %v15682_v22, %v15681_v17  ;;  %v15572_v24 = vpop.f32.mrf.mxu0  ;;  %v388_v17 = vld [vmem:[%s18363_s26 + $0x370] sm:$0xff] }
  0xf2   : > { %v15684_v26 = vpop.f32.mrf.mxu1 }
  0xf3   : > { %v18575_v29 = vadd.f32 %v15683_v23, %v15571_v21  ;;  %v15573_v30 = vpop.f32.mrf.mxu0 }
  0xf4   : > { %v15574_v32 = vadd.f32 %v15573_v30, %v15572_v24  ;;  %v15685_v33 = vpop.f32.mrf.mxu1  ;;  %v14020_v30 = vcombine.low %v377_v61, %v381_v62 }
  0xf5   : > { %v15686_v34 = vadd.f32 %v15685_v33, %v15684_v26  ;;  %v15575_v35 = vpop.f32.mrf.mxu0  ;;  %1985 = vmatmul.mubr.bf16.gmra.mxu0 %v13994_v25 }
  0xf6   : > { %v15687_v38 = vpop.f32.mrf.mxu1  ;;  %2146 = vmatmul.mubr.bf16.gmra.mxu1 %v13996_v27  ;;  %1992 = vmatprep.mubr.bf16.mxu0 %v14003_v28  ;;  %v14018_v27 = vcombine.low %v376_v58, %v380_v59 }
  0xf7   : > { %v18581_v41 = vadd.f32 %v15686_v34, %v15574_v32  ;;  %v15576_v42 = vpop.f32.mrf.mxu0  ;;  %2153 = vmatprep.mubr.bf16.mxu1 %v14005_v31  ;;  %v14027_v31 = vcombine.high %v384_v16, %v388_v17  ;;  %v14029_v34 = vcombine.high %v385_v19, %v389_v20 }
  0xf8   : > { %v15577_v43 = vadd.f32 %v15576_v42, %v15575_v35  ;;  %v15688_v44 = vpop.f32.mrf.mxu1 }
  0xf9   : > { %v15689_v45 = vadd.f32 %v15688_v44, %v15687_v38  ;;  %v15578_v46 = vpop.f32.mrf.mxu0  ;;  %v397_v44 = vld [vmem:[%s18363_s26 + $0x3b8] sm:$0xff] }
  0xfa   : > { %v15690_v48 = vpop.f32.mrf.mxu1 }
  0xfb   : > { %v18583_v51 = vadd.f32 %v15689_v45, %v15577_v43  ;;  %v15579_v52 = vpop.f32.mrf.mxu0  ;;  %v393_v43 = vld [vmem:[%s18363_s26 + $0x398] sm:$0xff] }
  0xfc   : > { %v15580_v54 = vadd.f32 %v15579_v52, %v15578_v46  ;;  %v15691_v55 = vpop.f32.mrf.mxu1  ;;  %v14026_v52 = vcombine.low %v384_v16, %v388_v17  ;;  %v14037_v58 = vcombine.high %v393_v43, %v397_v44 }
  0xfd   : > { %v15692_v56 = vadd.f32 %v15691_v55, %v15690_v48  ;;  %v15581_v57 = vpop.f32.mrf.mxu0  ;;  %1993 = vmatmul.mubr.bf16.gmra.mxu0 %v14002_v47  ;;  %v14035_v55 = vcombine.high %v392_v39, %v396_v40 }
  0xfe   : > { %v15693_v60 = vpop.f32.mrf.mxu1  ;;  %2154 = vmatmul.mubr.bf16.gmra.mxu1 %v14004_v49  ;;  %2000 = vmatprep.mubr.bf16.mxu0 %v14011_v50 }
  0xff   : > { %v18589_v63 = vadd.f32 %v15692_v56, %v15580_v54  ;;  %v15582_v0 = vpop.f32.mrf.mxu0  ;;  %2161 = vmatprep.mubr.bf16.mxu1 %v14013_v53  ;;  %v14028_v54 = vcombine.low %v385_v19, %v389_v20 }
 0x100   : > { %v15583_v1 = vadd.f32 %v15582_v0, %v15581_v57  ;;  %v15694_v2 = vpop.f32.mrf.mxu1  ;;  %v400_v0 = vld [vmem:[%s18363_s26 + $0x3d0] sm:$0xff] }
 0x101   : > { %v15695_v3 = vadd.f32 %v15694_v2, %v15693_v60  ;;  %v15584_v4 = vpop.f32.mrf.mxu0 }
 0x102   : > { %v15696_v6 = vpop.f32.mrf.mxu1 }
 0x103   : > { %v18591_v9 = vadd.f32 %v15695_v3, %v15583_v1  ;;  %v15585_v10 = vpop.f32.mrf.mxu0  ;;  %v404_v1 = vld [vmem:[%s18363_s26 + $0x3f0] sm:$0xff]  ;;  %v401_v3 = vld [vmem:[%s18363_s26 + $0x3d8] sm:$0xff] }
 0x104   : > { %v15586_v12 = vadd.f32 %v15585_v10, %v15584_v4  ;;  %v15697_v13 = vpop.f32.mrf.mxu1  ;;  %v405_v4 = vld [vmem:[%s18363_s26 + $0x3f8] sm:$0xff]  ;;  %s13917_s26 = sshll.u32 %s23936_s25, 3 }
 0x105   : > { %v15698_v14 = vadd.f32 %v15697_v13, %v15696_v6  ;;  %v15587_v15 = vpop.f32.mrf.mxu0  ;;  %2001 = vmatmul.mubr.bf16.gmra.mxu0 %v14010_v5  ;;  %s276_s14 = scalar_lea.vmem %s23927_s7, %s13917_s26 }
 0x106   : > { %v15699_v18 = vpop.f32.mrf.mxu1  ;;  %2162 = vmatmul.mubr.bf16.gmra.mxu1 %v14012_v7  ;;  %2008 = vmatprep.mubr.bf16.mxu0 %v14019_v8 }
 0x107   : > { %v18597_v21 = vadd.f32 %v15698_v14, %v15586_v12  ;;  %v15588_v22 = vpop.f32.mrf.mxu0  ;;  %2169 = vmatprep.mubr.bf16.mxu1 %v14021_v11  ;;  %v14034_v12 = vcombine.low %v392_v39, %v396_v40  ;;  %v14036_v14 = vcombine.low %v393_v43, %v397_v44 }
 0x108   : > { %v15589_v23 = vadd.f32 %v15588_v22, %v15587_v15  ;;  %v15700_v24 = vpop.f32.mrf.mxu1  ;;  %v14043_v15 = vcombine.high %v400_v0, %v404_v1 }
 0x109   : > { %v15701_v25 = vadd.f32 %v15700_v24, %v15699_v18  ;;  %v15590_v26 = vpop.f32.mrf.mxu0  ;;  %v14045_v18 = vcombine.high %v401_v3, %v405_v4 }
 0x10a   : > { %v15702_v28 = vpop.f32.mrf.mxu1 }
 0x10b   : > { %v18599_v32 = vadd.f32 %v15701_v25, %v15589_v23  ;;  %v15591_v33 = vpop.f32.mrf.mxu0 }
 0x10c   : > { %v15592_v35 = vadd.f32 %v15591_v33, %v15590_v26  ;;  %v15703_v36 = vpop.f32.mrf.mxu1  ;;  %v14042_v33 = vcombine.low %v400_v0, %v404_v1 }
 0x10d   : > { %v15704_v37 = vadd.f32 %v15703_v36, %v15702_v28  ;;  %v15593_v38 = vpop.f32.mrf.mxu0  ;;  %2009 = vmatmul.mubr.bf16.gmra.mxu0 %v14018_v27 }
 0x10e   : > { %v15705_v42 = vpop.f32.mrf.mxu1  ;;  %2170 = vmatmul.mubr.bf16.gmra.mxu1 %v14020_v30  ;;  %2016 = vmatprep.mubr.bf16.mxu0 %v14027_v31 }
 0x10f   : > { %v18605_v45 = vadd.f32 %v15704_v37, %v15592_v35  ;;  %v15594_v46 = vpop.f32.mrf.mxu0  ;;  %2177 = vmatprep.mubr.bf16.mxu1 %v14029_v34  ;;  %v14044_v35 = vcombine.low %v401_v3, %v405_v4 }
 0x110   : > { %v15595_v47 = vadd.f32 %v15594_v46, %v15593_v38  ;;  %v15706_v48 = vpop.f32.mrf.mxu1 }
 0x111   : > { %v15707_v49 = vadd.f32 %v15706_v48, %v15705_v42  ;;  %v15596_v50 = vpop.f32.mrf.mxu0 }
 0x112   : > { %v15708_v53 = vpop.f32.mrf.mxu1 }
 0x113   : > { %v18607_v56 = vadd.f32 %v15707_v49, %v15595_v47  ;;  %v15597_v57 = vpop.f32.mrf.mxu0 }
 0x114   : > { %v15598_v59 = vadd.f32 %v15597_v57, %v15596_v50  ;;  %v15709_v60 = vpop.f32.mrf.mxu1 }
 0x115   : > { %v15710_v61 = vadd.f32 %v15709_v60, %v15708_v53  ;;  %v15599_v62 = vpop.f32.mrf.mxu0  ;;  %2017 = vmatmul.mubr.bf16.gmra.mxu0 %v14026_v52 }
 0x116   : > { %v15711_v2 = vpop.f32.mrf.mxu1  ;;  %2178 = vmatmul.mubr.bf16.gmra.mxu1 %v14028_v54  ;;  %2024 = vmatprep.mubr.bf16.mxu0 %v14035_v55 }
 0x117   : > { %v18613_v5 = vadd.f32 %v15710_v61, %v15598_v59  ;;  %v15600_v6 = vpop.f32.mrf.mxu0  ;;  %2185 = vmatprep.mubr.bf16.mxu1 %v14037_v58 }
 0x118   : > { %v15601_v7 = vadd.f32 %v15600_v6, %v15599_v62  ;;  %v15712_v8 = vpop.f32.mrf.mxu1 }
 0x119   : > { %v15713_v10 = vadd.f32 %v15712_v8, %v15711_v2  ;;  %v15602_v11 = vpop.f32.mrf.mxu0 }
 0x11a   : > { %v15714_v13 = vpop.f32.mrf.mxu1 }
 0x11b   : > { %v18615_v16 = vadd.f32 %v15713_v10, %v15601_v7  ;;  %v15603_v17 = vpop.f32.mrf.mxu0 }
 0x11c   : > { %v15604_v19 = vadd.f32 %v15603_v17, %v15602_v11  ;;  %v15715_v20 = vpop.f32.mrf.mxu1  ;;  %v23928_v17 = vmov 0  }
 0x11d   : > { %v15716_v22 = vadd.f32 %v15715_v20, %v15714_v13  ;;  %v15605_v23 = vpop.f32.mrf.mxu0  ;;  %2025 = vmatmul.mubr.bf16.gmra.mxu0 %v14034_v12  ;;  %3082 = vmatprep.subr.bf16.mxu0 %v23928_v17 }
 0x11e   : > { %v15717_v24 = vpop.f32.mrf.mxu1  ;;  %2186 = vmatmul.mubr.bf16.gmra.mxu1 %v14036_v14  ;;  %2032 = vmatprep.mubr.bf16.mxu0 %v14043_v15 }
 0x11f   : > { %v18617_v25 = vadd.f32 %v15716_v22, %v15604_v19  ;;  %v15606_v26 = vpop.f32.mrf.mxu0  ;;  %2193 = vmatprep.mubr.bf16.mxu1 %v14045_v18 }
 0x120   : > { %v15607_v27 = vadd.f32 %v15606_v26, %v15605_v23  ;;  %v15718_v28 = vpop.f32.mrf.mxu1 }
 0x121   : > { %v15719_v30 = vadd.f32 %v15718_v28, %v15717_v24  ;;  %v15608_v31 = vpop.f32.mrf.mxu0 }
 0x122   : > { %v15720_v34 = vpop.f32.mrf.mxu1 }
 0x123   : > { %v18619_v36 = vadd.f32 %v15719_v30, %v15607_v27  ;;  %v15609_v37 = vpop.f32.mrf.mxu0 }
 0x124   : > { %v15610_v38 = vadd.f32 %v15609_v37, %v15608_v31  ;;  %v15721_v39 = vpop.f32.mrf.mxu1 }
 0x125   : > { %v15722_v40 = vadd.f32 %v15721_v39, %v15720_v34  ;;  %v15611_v42 = vpop.f32.mrf.mxu0  ;;  %2033 = vmatmul.mubr.bf16.gmra.mxu0 %v14042_v33 }
 0x126   : > { %v15723_v43 = vpop.f32.mrf.mxu1  ;;  %2194 = vmatmul.mubr.bf16.gmra.mxu1 %v14044_v35 }
 0x127   : > { %v18621_v44 = vadd.f32 %v15722_v40, %v15610_v38  ;;  %v15612_v46 = vpop.f32.mrf.mxu0 }
 0x128   : > { %v15613_v47 = vadd.f32 %v15612_v46, %v15611_v42  ;;  %v15724_v48 = vpop.f32.mrf.mxu1 }
 0x129   : > { %v15725_v49 = vadd.f32 %v15724_v48, %v15723_v43  ;;  %v15614_v50 = vpop.f32.mrf.mxu0 }
 0x12a   : > { %v15726_v52 = vpop.f32.mrf.mxu1 }
 0x12b   : > { %v18623_v53 = vadd.f32 %v15725_v49, %v15613_v47  ;;  %v15615_v54 = vpop.f32.mrf.mxu0 }
 0x12c   : > { %v15616_v55 = vadd.f32 %v15615_v54, %v15614_v50  ;;  %v15727_v57 = vpop.f32.mrf.mxu1 }
 0x12d   : > { %v15728_v58 = vadd.f32 %v15727_v57, %v15726_v52  ;;  %v15617_v59 = vpop.f32.mrf.mxu0 }
 0x12e   : > { %v15729_v60 = vpop.f32.mrf.mxu1 }
 0x12f   : > { %v18625_v61 = vadd.f32 %v15728_v58, %v15616_v55  ;;  %v15618_v62 = vpop.f32.mrf.mxu0 }
 0x130   : > { %v15619_v0 = vadd.f32 %v15618_v62, %v15617_v59  ;;  %v15730_v1 = vpop.f32.mrf.mxu1 }
 0x131   : > { %v15731_v2 = vadd.f32 %v15730_v1, %v15729_v60  ;;  %v15620_v3 = vpop.f32.mrf.mxu0 }
 0x132   : > { %v15732_v4 = vpop.f32.mrf.mxu1 }
 0x133   : > { %v18627_v6 = vadd.f32 %v15731_v2, %v15619_v0  ;;  %v15621_v7 = vpop.f32.mrf.mxu0 }
 0x134   : > { %v15622_v8 = vadd.f32 %v15621_v7, %v15620_v3  ;;  %v15733_v10 = vpop.f32.mrf.mxu1 }
 0x135   : > { %v15734_v11 = vadd.f32 %v15733_v10, %v15732_v4  ;;  %v15623_v12 = vpop.f32.mrf.mxu0 }
 0x136   : > { %v15735_v13 = vpop.f32.mrf.mxu1 }
 0x137   : > { %v18629_v14 = vadd.f32 %v15734_v11, %v15622_v8  ;;  %v15624_v15 = vpop.f32.mrf.mxu0 }
 0x138   : > { %v15625_v18 = vadd.f32 %v15624_v15, %v15623_v12  ;;  %v15736_v19 = vpop.f32.mrf.mxu1 }
 0x139   : > { %v15737_v20 = vadd.f32 %v15736_v19, %v15735_v13  ;;  %v15626_v22 = vpop.f32.mrf.mxu0 }
 0x13a   : > { %v15738_v23 = vpop.f32.mrf.mxu1 }
 0x13b   : > { %v18632_v24 = vadd.f32 %v15737_v20, %v15625_v18  ;;  %v15627_v26 = vpop.f32.mrf.mxu0 }
 0x13c   : > { %v15628_v27 = vadd.f32 %v15627_v26, %v15626_v22  ;;  %v15739_v28 = vpop.f32.mrf.mxu1 }
 0x13d   : > { %v15740_v30 = vadd.f32 %v15739_v28, %v15738_v23  ;;  %v15629_v31 = vpop.f32.mrf.mxu0 }
 0x13e   : > { %v15741_v33 = vpop.f32.mrf.mxu1 }
 0x13f   : > { %v18634_v34 = vadd.f32 %v15740_v30, %v15628_v27  ;;  %v15630_v35 = vpop.f32.mrf.mxu0 }
 0x140   : > { %v15631_v37 = vadd.f32 %v15630_v35, %v15629_v31  ;;  %v15742_v38 = vpop.f32.mrf.mxu1 }
 0x141   : > { %v15743_v39 = vadd.f32 %v15742_v38, %v15741_v33  ;;  %v15632_v40 = vpop.f32.mrf.mxu0 }
 0x142   : > { %v15744_v42 = vpop.f32.mrf.mxu1 }
 0x143   : > { %v18636_v43 = vadd.f32 %v15743_v39, %v15631_v37  ;;  %v15633_v46 = vpop.f32.mrf.mxu0 }
 0x144   : > { %v15634_v47 = vadd.f32 %v15633_v46, %v15632_v40  ;;  %v15745_v48 = vpop.f32.mrf.mxu1 }
 0x145   : > { %v15746_v49 = vadd.f32 %v15745_v48, %v15744_v42  ;;  %v15635_v50 = vpop.f32.mrf.mxu0 }
 0x146   : > { %v15747_v52 = vpop.f32.mrf.mxu1 }
 0x147   : > { %v18638_v54 = vadd.f32 %v15746_v49, %v15634_v47  ;;  %v15636_v55 = vpop.f32.mrf.mxu0 }
 0x148   : > { %v15637_v57 = vadd.f32 %v15636_v55, %v15635_v50  ;;  %v15748_v58 = vpop.f32.mrf.mxu1 }
 0x149   : > { %v15749_v59 = vadd.f32 %v15748_v58, %v15747_v52  ;;  %v15638_v60 = vpop.f32.mrf.mxu0 }
 0x14a   : > { %v15750_v62 = vpop.f32.mrf.mxu1 }
 0x14b   : > { %v18640_v0 = vadd.f32 %v15749_v59, %v15637_v57  ;;  %v15639_v1 = vpop.f32.mrf.mxu0 }
 0x14c   : > { %v15640_v2 = vadd.f32 %v15639_v1, %v15638_v60  ;;  %v15751_v3 = vpop.f32.mrf.mxu1 }
 0x14d   : > { %v15752_v4 = vadd.f32 %v15751_v3, %v15750_v62  ;;  %v15641_v7 = vpop.f32.mrf.mxu0 }
 0x14e   : > { %v15753_v8 = vpop.f32.mrf.mxu1 }
 0x14f   : > { %v18642_v10 = vadd.f32 %v15752_v4, %v15640_v2  ;;  %v15642_v11 = vpop.f32.mrf.mxu0 }
 0x150   : > { %v15643_v12 = vadd.f32 %v15642_v11, %v15641_v7  ;;  %v15754_v13 = vpop.f32.mrf.mxu1 }
 0x151   : > { %v15755_v15 = vadd.f32 %v15754_v13, %v15753_v8  ;;  %v15644_v18 = vpop.f32.mrf.mxu0 }
 0x152   : > { %v15756_v19 = vpop.f32.mrf.mxu1 }
 0x153   : > { %v18644_v20 = vadd.f32 %v15755_v15, %v15643_v12  ;;  %v15645_v22 = vpop.f32.mrf.mxu0 }
 0x154   : > { %v15646_v23 = vadd.f32 %v15645_v22, %v15644_v18  ;;  %v15757_v26 = vpop.f32.mrf.mxu1 }
 0x155   : > { %v15758_v27 = vadd.f32 %v15757_v26, %v15756_v19  ;;  %v15647_v28 = vpop.f32.mrf.mxu0 }
 0x156   : > { %v15759_v30 = vpop.f32.mrf.mxu1 }
 0x157   : > { %v18646_v31 = vadd.f32 %v15758_v27, %v15646_v23  ;;  %v15648_v33 = vpop.f32.mrf.mxu0 }
 0x158   : > { %v15649_v35 = vadd.f32 %v15648_v33, %v15647_v28  ;;  %v15760_v37 = vpop.f32.mrf.mxu1 }
 0x159   : > { %v15761_v38 = vadd.f32 %v15760_v37, %v15759_v30  ;;  %v15650_v39 = vpop.f32.mrf.mxu0 }
 0x15a   : > { %v15762_v40 = vpop.f32.mrf.mxu1 }
 0x15b   : > { %v18648_v42 = vadd.f32 %v15761_v38, %v15649_v35  ;;  %v15651_v46 = vpop.f32.mrf.mxu0 }
 0x15c   : > { %v15652_v47 = vadd.f32 %v15651_v46, %v15650_v39  ;;  %v15763_v48 = vpop.f32.mrf.mxu1 }
 0x15d   : > { %v15764_v49 = vadd.f32 %v15763_v48, %v15762_v40  ;;  %v15653_v50 = vpop.f32.mrf.mxu0 }
 0x15e   : > { %v15765_v52 = vpop.f32.mrf.mxu1 }
 0x15f   : > { %v18650_v55 = vadd.f32 %v15764_v49, %v15652_v47  ;;  %v15654_v57 = vpop.f32.mrf.mxu0 }
 0x160   : > { %v15655_v58 = vadd.f32 %v15654_v57, %v15653_v50  ;;  %v15766_v59 = vpop.f32.mrf.mxu1 }
 0x161   : > { %v15767_v60 = vadd.f32 %v15766_v59, %v15765_v52  ;;  %v15656_v62 = vpop.f32.mrf.mxu0 }
 0x162   : > { %v15768_v1 = vpop.f32.mrf.mxu1 }
 0x163   : > { %v18652_v2 = vadd.f32 %v15767_v60, %v15655_v58  ;;  %v15657_v3 = vpop.f32.mrf.mxu0 }
 0x164   : > { %v15658_v4 = vadd.f32 %v15657_v3, %v15656_v62  ;;  %v15769_v7 = vpop.f32.mrf.mxu1 }
 0x165   : > { %v15770_v8 = vadd.f32 %v15769_v7, %v15768_v1  ;;  %v15659_v11 = vpop.f32.mrf.mxu0 }
 0x166   : > { %v15771_v12 = vpop.f32.mrf.mxu1 }
 0x167   : > { %v18654_v13 = vadd.f32 %v15770_v8, %v15658_v4  ;;  %v15660_v15 = vpop.f32.mrf.mxu0 }
 0x168   : > { %v15661_v18 = vadd.f32 %v15660_v15, %v15659_v11  ;;  %v15772_v19 = vpop.f32.mrf.mxu1 }
 0x169   : > { %v15773_v22 = vadd.f32 %v15772_v19, %v15771_v12  ;;  %v15662_v23 = vpop.f32.mrf.mxu0 }
 0x16a   : > { %v15774_v26 = vpop.f32.mrf.mxu1 }
 0x16b   : > { %v18656_v27 = vadd.f32 %v15773_v22, %v15661_v18  ;;  %v15663_v28 = vpop.f32.mrf.mxu0 }
 0x16c   : > { %v15664_v30 = vadd.f32 %v15663_v28, %v15662_v23  ;;  %v15775_v33 = vpop.f32.mrf.mxu1 }
 0x16d   : > { %v15776_v35 = vadd.f32 %v15775_v33, %v15774_v26  ;;  %v15793_v37 = vpop.f32.mrf.mxu0 }
 0x16e   : > { %v15905_v38 = vpop.f32.mrf.mxu1 }
 0x16f   : > { %v18658_v39 = vadd.f32 %v15776_v35, %v15664_v30  ;;  %v15794_v40 = vpop.f32.mrf.mxu0 }
 0x170   : > { %v15795_v46 = vadd.f32 %v15794_v40, %v15793_v37  ;;  %v15906_v47 = vpop.f32.mrf.mxu1 }
 0x171   : > { %v15907_v48 = vadd.f32 %v15906_v47, %v15905_v38  ;;  %v15796_v49 = vpop.f32.mrf.mxu0 }
 0x172   : > { %v1915_v50 = vadd.f32 %v15795_v46, %v18575_v29  ;;  %v15908_v52 = vpop.f32.mrf.mxu1 }
 0x173   : > { %v15797_v57 = vpop.f32.mrf.mxu0 }
 0x174   : > { %v2076_v58 = vadd.f32 %v15907_v48, %v1915_v50  ;;  %v15798_v59 = vadd.f32 %v15797_v57, %v15796_v49  ;;  %v15909_v60 = vpop.f32.mrf.mxu1 }
 0x175   : > { %v15799_v62 = vpop.f32.mrf.mxu0  ;;  %v15910_v3 = vadd.f32 %v15909_v60, %v15908_v52 }
 0x176   : > { %v1918_v1 = vadd.f32 %v15798_v59, %v18581_v41  ;;  %v15911_v4 = vpop.f32.mrf.mxu1  ;;  %v2234_v8 = vmul.f32 0.2, %v2076_v58  ;;  %vm2202_vm0 = vcmp.gt.f32.partialorder %v2076_v58, 0.0 }
 0x177   : > { %v15800_v7 = vpop.f32.mrf.mxu0 }
 0x178   : > { %v2079_v11 = vadd.f32 %v15910_v3, %v1918_v1  ;;  %v15801_v12 = vadd.f32 %v15800_v7, %v15799_v62  ;;  %v15912_v15 = vpop.f32.mrf.mxu1  ;;  %v18663_v28 = vsel %vm2202_vm0, %v2076_v58, %v2234_v8 }
 0x179   : > { %v15913_v18 = vadd.f32 %v15912_v15, %v15911_v4  ;;  %v15802_v19 = vpop.f32.mrf.mxu0 }
 0x17a   : > { %vm2203_vm1 = vcmp.gt.f32.partialorder %v2079_v11, 0.0  ;;  %v2235_v29 = vmul.f32 0.2, %v2079_v11  ;;  %v1923_v22 = vadd.f32 %v15801_v12, %v18583_v51  ;;  %v15914_v23 = vpop.f32.mrf.mxu1 }
 0x17b   : > { %v15803_v26 = vpop.f32.mrf.mxu0 }
 0x17c   : > { %v18665_v30 = vsel %vm2203_vm1, %v2079_v11, %v2235_v29  ;;  %v2084_v41 = vadd.f32 %v15913_v18, %v1923_v22  ;;  %v15804_v33 = vadd.f32 %v15803_v26, %v15802_v19  ;;  %v15915_v35 = vpop.f32.mrf.mxu1 }
 0x17d   : > { %v15805_v37 = vpop.f32.mrf.mxu0  ;;  %v2298_v38 = vpack.c.bf16 %v18665_v30, %v18663_v28  ;;  %v15916_v46 = vadd.f32 %v15915_v35, %v15914_v23 }
 0x17e   : > { %v1926_v40 = vadd.f32 %v15804_v33, %v18589_v63  ;;  %v15917_v47 = vpop.f32.mrf.mxu1  ;;  %v2236_v49 = vmul.f32 0.2, %v2084_v41  ;;  %vm2204_vm2 = vcmp.gt.f32.partialorder %v2084_v41, 0.0 }
 0x17f   : > { %v15806_v48 = vpop.f32.mrf.mxu0 }
 0x180   : > { %v2087_v51 = vadd.f32 %v15916_v46, %v1926_v40  ;;  %v15807_v50 = vadd.f32 %v15806_v48, %v15805_v37  ;;  %v15918_v52 = vpop.f32.mrf.mxu1  ;;  %v18671_v3 = vsel %vm2204_vm2, %v2084_v41, %v2236_v49 }
 0x181   : > { %v15919_v57 = vadd.f32 %v15918_v52, %v15917_v47  ;;  %v15808_v58 = vpop.f32.mrf.mxu0 }
 0x182   : > { %vm2205_vm3 = vcmp.gt.f32.partialorder %v2087_v51, 0.0  ;;  %v2237_v59 = vmul.f32 0.2, %v2087_v51  ;;  %v1931_v60 = vadd.f32 %v15807_v50, %v18591_v9  ;;  %v15920_v62 = vpop.f32.mrf.mxu1 }
 0x183   : > { %v15809_v1 = vpop.f32.mrf.mxu0 }
 0x184   : > { %v18673_v4 = vsel %vm2205_vm3, %v2087_v51, %v2237_v59  ;;  %v2092_v63 = vadd.f32 %v15919_v57, %v1931_v60  ;;  %v15810_v7 = vadd.f32 %v15809_v1, %v15808_v58  ;;  %v15921_v8 = vpop.f32.mrf.mxu1 }
 0x185   : > { %v15811_v11 = vpop.f32.mrf.mxu0  ;;  %v2299_v12 = vpack.c.bf16 %v18673_v4, %v18671_v3  ;;  %v15922_v18 = vadd.f32 %v15921_v8, %v15920_v62 }
 0x186   : > { %v1934_v15 = vadd.f32 %v15810_v7, %v18597_v21  ;;  %v15923_v19 = vpop.f32.mrf.mxu1  ;;  %v2238_v22 = vmul.f32 0.2, %v2092_v63  ;;  %vm2206_vm4 = vcmp.gt.f32.partialorder %v2092_v63, 0.0 }
 0x187   : > { %v15812_v29 = vpop.f32.mrf.mxu0 }
 0x188   : > { %v2095_v9 = vadd.f32 %v15922_v18, %v1934_v15  ;;  %v15813_v23 = vadd.f32 %v15812_v29, %v15811_v11  ;;  %v15924_v26 = vpop.f32.mrf.mxu1  ;;  %v18679_v47 = vsel %vm2206_vm4, %v2092_v63, %v2238_v22 }
 0x189   : > { %v15814_v41 = vpop.f32.mrf.mxu0  ;;  %v15925_v37 = vadd.f32 %v15924_v26, %v15923_v19 }
 0x18a   : > { %vm2207_vm5 = vcmp.gt.f32.partialorder %v2095_v9, 0.0  ;;  %v2239_v33 = vmul.f32 0.2, %v2095_v9  ;;  %v1939_v35 = vadd.f32 %v15813_v23, %v18599_v32  ;;  %v15926_v40 = vpop.f32.mrf.mxu1 }
 0x18b   : > { %v15815_v46 = vpop.f32.mrf.mxu0 }
 0x18c   : > { %v18681_v48 = vsel %vm2207_vm5, %v2095_v9, %v2239_v33  ;;  %v2100_v21 = vadd.f32 %v15925_v37, %v1939_v35  ;;  %v15816_v49 = vadd.f32 %v15815_v46, %v15814_v41  ;;  %v15927_v51 = vpop.f32.mrf.mxu1 }
 0x18d   : > { %v15817_v50 = vpop.f32.mrf.mxu0  ;;  %v2300_v52 = vpack.c.bf16 %v18681_v48, %v18679_v47  ;;  %v15928_v58 = vadd.f32 %v15927_v51, %v15926_v40 }
 0x18e   : > { %v1942_v57 = vadd.f32 %v15816_v49, %v18605_v45  ;;  %v15929_v59 = vpop.f32.mrf.mxu1  ;;  %v2240_v32 = vmul.f32 0.2, %v2100_v21  ;;  %vm2208_vm6 = vcmp.gt.f32.partialorder %v2100_v21, 0.0  ;;  %v16076_v45 = vld [vmem:[%s23925_s5 + $0x4] ss:$8 sps:$4 sm:$0xff]  }
 0x18f   : > { %v15818_v60 = vpop.f32.mrf.mxu0  ;;  %3114 = vmatprep.mubr.bf16.mxu0 %v16076_v45 }
 0x190   : > { %v2103_v62 = vadd.f32 %v15928_v58, %v1942_v57  ;;  %v15819_v1 = vadd.f32 %v15818_v60, %v15817_v50  ;;  %v15930_v7 = vpop.f32.mrf.mxu1  ;;  %v18690_v29 = vsel %vm2208_vm6, %v2100_v21, %v2240_v32 }
 0x191   : > { %v15820_v63 = vpop.f32.mrf.mxu0  ;;  %v15931_v15 = vadd.f32 %v15930_v7, %v15929_v59 }
 0x192   : > { %vm2209_vm7 = vcmp.gt.f32.partialorder %v2103_v62, 0.0  ;;  %v2241_v8 = vmul.f32 0.2, %v2103_v62  ;;  %v1947_v11 = vadd.f32 %v15819_v1, %v18607_v56  ;;  %v15932_v18 = vpop.f32.mrf.mxu1 }
 0x193   : > { %v15821_v19 = vpop.f32.mrf.mxu0 }
 0x194   : > { %v18692_v22 = vsel %vm2209_vm7, %v2103_v62, %v2241_v8  ;;  %v2108_v9 = vadd.f32 %v15931_v15, %v1947_v11  ;;  %v15822_v23 = vadd.f32 %v15821_v19, %v15820_v63  ;;  %v15933_v26 = vpop.f32.mrf.mxu1 }
 0x195   : > { %v15823_v41 = vpop.f32.mrf.mxu0  ;;  %v2301_v33 = vpack.c.bf16 %v18692_v22, %v18690_v29  ;;  %v15934_v35 = vadd.f32 %v15933_v26, %v15932_v18 }
 0x196   : > { %v1950_v56 = vadd.f32 %v15822_v23, %v18613_v5  ;;  %v15935_v37 = vpop.f32.mrf.mxu1  ;;  %v2242_v46 = vmul.f32 0.2, %v2108_v9  ;;  %vm2210_vm8 = vcmp.gt.f32.partialorder %v2108_v9, 0.0 }
 0x197   : > { %v15824_v40 = vpop.f32.mrf.mxu0 }
 0x198   : > { %v2111_v49 = vadd.f32 %v15934_v35, %v1950_v56  ;;  %v15825_v51 = vadd.f32 %v15824_v40, %v15823_v41  ;;  %v15936_v21 = vpop.f32.mrf.mxu1  ;;  %v18698_v62 = vsel %vm2210_vm8, %v2108_v9, %v2242_v46 }
 0x199   : > { %v15826_v50 = vpop.f32.mrf.mxu0  ;;  %v15937_v59 = vadd.f32 %v15936_v21, %v15935_v37 }
 0x19a   : > { %vm2211_vm9 = vcmp.gt.f32.partialorder %v2111_v49, 0.0  ;;  %v2243_v57 = vmul.f32 0.2, %v2111_v49  ;;  %v1955_v58 = vadd.f32 %v15825_v51, %v18615_v16  ;;  %v15938_v60 = vpop.f32.mrf.mxu1 }
 0x19b   : > { %v15827_v32 = vpop.f32.mrf.mxu0 }
 0x19c   : > { %v18700_v1 = vsel %vm2211_vm9, %v2111_v49, %v2243_v57  ;;  %v2116_v5 = vadd.f32 %v15937_v59, %v1955_v58  ;;  %v15828_v7 = vadd.f32 %v15827_v32, %v15826_v50  ;;  %v15939_v63 = vpop.f32.mrf.mxu1 }
 0x19d   : > { %v15829_v8 = vpop.f32.mrf.mxu0  ;;  %v2302_v11 = vpack.c.bf16 %v18700_v1, %v18698_v62  ;;  %v15940_v18 = vadd.f32 %v15939_v63, %v15938_v60 }
 0x19e   : > { %v1958_v15 = vadd.f32 %v15828_v7, %v18617_v25  ;;  %v15941_v19 = vpop.f32.mrf.mxu1  ;;  %v2244_v16 = vmul.f32 0.2, %v2116_v5  ;;  %vm2212_vm10 = vcmp.gt.f32.partialorder %v2116_v5, 0.0 }
 0x19f   : > { %v15830_v45 = vpop.f32.mrf.mxu0 }
 0x1a0   : > { %v2119_v23 = vadd.f32 %v15940_v18, %v1958_v15  ;;  %v15831_v26 = vadd.f32 %v15830_v45, %v15829_v8  ;;  %v15942_v41 = vpop.f32.mrf.mxu1  ;;  %v18706_v49 = vsel %vm2212_vm10, %v2116_v5, %v2244_v16 }
 0x1a1   : > { %v15832_v9 = vpop.f32.mrf.mxu0  ;;  %v15943_v37 = vadd.f32 %v15942_v41, %v15941_v19 }
 0x1a2   : > { %vm2213_vm11 = vcmp.gt.f32.partialorder %v2119_v23, 0.0  ;;  %v2245_v56 = vmul.f32 0.2, %v2119_v23  ;;  %v1963_v35 = vadd.f32 %v15831_v26, %v18619_v36  ;;  %v15944_v40 = vpop.f32.mrf.mxu1 }
 0x1a3   : > { %v15833_v46 = vpop.f32.mrf.mxu0 }
 0x1a4   : > { %v18708_v51 = vsel %vm2213_vm11, %v2119_v23, %v2245_v56  ;;  %v2124_v25 = vadd.f32 %v15943_v37, %v1963_v35  ;;  %v15834_v21 = vadd.f32 %v15833_v46, %v15832_v9  ;;  %v15945_v50 = vpop.f32.mrf.mxu1 }
 0x1a5   : > { %v15835_v57 = vpop.f32.mrf.mxu0  ;;  %v2303_v58 = vpack.c.bf16 %v18708_v51, %v18706_v49  ;;  %v15946_v60 = vadd.f32 %v15945_v50, %v15944_v40 }
 0x1a6   : > { %v1966_v59 = vadd.f32 %v15834_v21, %v18621_v44  ;;  %v15947_v32 = vpop.f32.mrf.mxu1  ;;  %v2246_v36 = vmul.f32 0.2, %v2124_v25  ;;  %vm2214_vm12 = vcmp.gt.f32.partialorder %v2124_v25, 0.0 }
 0x1a7   : > { %v15836_v7 = vpop.f32.mrf.mxu0 }
 0x1a8   : > { %v2127_v63 = vadd.f32 %v15946_v60, %v1966_v59  ;;  %v15837_v8 = vadd.f32 %v15836_v7, %v15835_v57  ;;  %v15948_v15 = vpop.f32.mrf.mxu1  ;;  %v2278_v26 = vsel %vm2214_vm12, %v2124_v25, %v2246_v36 }
 0x1a9   : > { %v15838_v5 = vpop.f32.mrf.mxu0  ;;  %v15949_v45 = vadd.f32 %v15948_v15, %v15947_v32 }
 0x1aa   : > { %vm2215_vm13 = vcmp.gt.f32.partialorder %v2127_v63, 0.0  ;;  %v2247_v18 = vmul.f32 0.2, %v2127_v63  ;;  %v1971_v19 = vadd.f32 %v15837_v8, %v18623_v53  ;;  %v15950_v16 = vpop.f32.mrf.mxu1 }
 0x1ab   : > { %v15839_v23 = vpop.f32.mrf.mxu0 }
 0x1ac   : > { %v2279_v41 = vsel %vm2215_vm13, %v2127_v63, %v2247_v18  ;;  %v2132_v9 = vadd.f32 %v15949_v45, %v1971_v19  ;;  %v15840_v44 = vadd.f32 %v15839_v23, %v15838_v5  ;;  %v15951_v56 = vpop.f32.mrf.mxu1 }
 0x1ad   : > { %v15841_v35 = vpop.f32.mrf.mxu0  ;;  %v2304_v37 = vpack.c.bf16 %v2279_v41, %v2278_v26  ;;  %v15952_v46 = vadd.f32 %v15951_v56, %v15950_v16 }
 0x1ae   : > { %v1974_v40 = vadd.f32 %v15840_v44, %v18625_v61  ;;  %v15953_v21 = vpop.f32.mrf.mxu1  ;;  %v2248_v57 = vmul.f32 0.2, %v2132_v9  ;;  %vm2216_vm14 = vcmp.gt.f32.partialorder %v2132_v9, 0.0 }
 0x1af   : > { %v15842_v50 = vpop.f32.mrf.mxu0 }
 0x1b0   : > { %v2135_v59 = vadd.f32 %v15952_v46, %v1974_v40  ;;  %v15843_v60 = vadd.f32 %v15842_v50, %v15841_v35  ;;  %v15954_v7 = vpop.f32.mrf.mxu1  ;;  %v2280_v15 = vsel %vm2216_vm14, %v2132_v9, %v2248_v57 }
 0x1b1   : > { %v15955_v53 = vadd.f32 %v15954_v7, %v15953_v21  ;;  %v15844_v32 = vpop.f32.mrf.mxu0 }
 0x1b2   : > { %vm2217_vm15 = vcmp.gt.f32.partialorder %v2135_v59, 0.0  ;;  %v2249_v25 = vmul.f32 0.2, %v2135_v59  ;;  %v1979_v36 = vadd.f32 %v15843_v60, %v18627_v6  ;;  %v15956_v63 = vpop.f32.mrf.mxu1 }
 0x1b3   : > { %v15845_v8 = vpop.f32.mrf.mxu0 }
 0x1b4   : > { %v2281_v5 = vsel %vm2217_vm15, %v2135_v59, %v2249_v25  ;;  %v2140_v18 = vadd.f32 %v15955_v53, %v1979_v36  ;;  %v15846_v61 = vadd.f32 %v15845_v8, %v15844_v32  ;;  %v15957_v19 = vpop.f32.mrf.mxu1 }
 0x1b5   : > { %v15847_v45 = vpop.f32.mrf.mxu0  ;;  %v2305_v16 = vpack.c.bf16 %v2281_v5, %v2280_v15  ;;  %v15958_v26 = vadd.f32 %v15957_v19, %v15956_v63 }
 0x1b6   : > { %v1982_v23 = vadd.f32 %v15846_v61, %v18629_v14  ;;  %v15959_v41 = vpop.f32.mrf.mxu1  ;;  %v2250_v56 = vmul.f32 0.2, %v2140_v18  ;;  %vm2218_vm0 = vcmp.gt.f32.partialorder %v2140_v18, 0.0 }
 0x1b7   : > { %v15848_v44 = vpop.f32.mrf.mxu0  ;;  %3083 = vmatpush1.bf16.msra.mxu0 %v2305_v16 }
 0x1b8   : > { %v2143_v35 = vadd.f32 %v15958_v26, %v1982_v23  ;;  %v15849_v40 = vadd.f32 %v15848_v44, %v15847_v45  ;;  %v15960_v46 = vpop.f32.mrf.mxu1  ;;  %3084 = vmatprep.subr.bf16.mxu0 %v23928_v17  ;;  %v18719_v14 = vsel %vm2218_vm0, %v2140_v18, %v2250_v56 }
 0x1b9   : > { %v15961_v6 = vadd.f32 %v15960_v46, %v15959_v41  ;;  %v15850_v9 = vpop.f32.mrf.mxu0 }
 0x1ba   : > { %vm2219_vm1 = vcmp.gt.f32.partialorder %v2143_v35, 0.0  ;;  %v2251_v21 = vmul.f32 0.2, %v2143_v35  ;;  %v1987_v50 = vadd.f32 %v15849_v40, %v18632_v24  ;;  %v15962_v57 = vpop.f32.mrf.mxu1 }
 0x1bb   : > { %v15851_v59 = vpop.f32.mrf.mxu0  ;;  %3085 = vmatpush1.bf16.msra.mxu0 %v2304_v37 }
 0x1bc   : > { %v18721_v60 = vsel %vm2219_vm1, %v2143_v35, %v2251_v21  ;;  %v2148_v7 = vadd.f32 %v15961_v6, %v1987_v50  ;;  %v15852_v53 = vadd.f32 %v15851_v59, %v15850_v9  ;;  %v15963_v32 = vpop.f32.mrf.mxu1  ;;  %3086 = vmatprep.subr.bf16.mxu0 %v23928_v17 }
 0x1bd   : > { %v15853_v25 = vpop.f32.mrf.mxu0  ;;  %v2306_v36 = vpack.c.bf16 %v18721_v60, %v18719_v14  ;;  %v15964_v8 = vadd.f32 %v15963_v32, %v15962_v57  ;;  %v16130_v14 = vld [vmem:[%s23922_s2 + $0x74] ss:$8 sps:$4 sm:$0xff]   ;;  %v16080_v60 = vld [vmem:[%s23925_s5 + $0x20] ss:$8 sps:$4 sm:$0xff]  }
 0x1be   : > { %v1990_v63 = vadd.f32 %v15852_v53, %v18634_v34  ;;  %v15965_v24 = vpop.f32.mrf.mxu1  ;;  %v2252_v37 = vmul.f32 0.2, %v2148_v7  ;;  %vm2220_vm2 = vcmp.gt.f32.partialorder %v2148_v7, 0.0  ;;  %5227 = vmatprep.subr.bf16.mxu1 %v16130_v14  ;;  %v16133_v14 = vld [vmem:[%s23925_s5 + $0x124] ss:$8 sps:$4 sm:$0xff]  }
 0x1bf   : > { %v15854_v15 = vpop.f32.mrf.mxu0  ;;  %3087 = vmatpush1.bf16.msra.mxu0 %v2303_v58 }
 0x1c0   : > { %v2151_v5 = vadd.f32 %v15964_v8, %v1990_v63  ;;  %v15855_v18 = vadd.f32 %v15854_v15, %v15853_v25  ;;  %v15966_v61 = vpop.f32.mrf.mxu1  ;;  %3088 = vmatprep.subr.bf16.mxu0 %v23928_v17  ;;  %v18735_v49 = vsel %vm2220_vm2, %v2148_v7, %v2252_v37 }
 0x1c1   : > { %v15967_v19 = vadd.f32 %v15966_v61, %v15965_v24  ;;  %v15856_v45 = vpop.f32.mrf.mxu0 }
 0x1c2   : > { %vm2221_vm3 = vcmp.gt.f32.partialorder %v2151_v5, 0.0  ;;  %v2253_v16 = vmul.f32 0.2, %v2151_v5  ;;  %v1995_v34 = vadd.f32 %v15855_v18, %v18636_v43  ;;  %v15968_v23 = vpop.f32.mrf.mxu1 }
 0x1c3   : > { %v15857_v26 = vpop.f32.mrf.mxu0  ;;  %3089 = vmatpush1.bf16.msra.mxu0 %v2302_v11 }
 0x1c4   : > { %v18737_v51 = vsel %vm2221_vm3, %v2151_v5, %v2253_v16  ;;  %v2156_v58 = vadd.f32 %v15967_v19, %v1995_v34  ;;  %v15858_v41 = vadd.f32 %v15857_v26, %v15856_v45  ;;  %v15969_v44 = vpop.f32.mrf.mxu1  ;;  %3090 = vmatprep.subr.bf16.mxu0 %v23928_v17 }
 0x1c5   : > { %v15859_v56 = vpop.f32.mrf.mxu0  ;;  %v2307_v35 = vpack.c.bf16 %v18737_v51, %v18735_v49  ;;  %v15970_v40 = vadd.f32 %v15969_v44, %v15968_v23  ;;  %v16077_v49 = vld [vmem:[%s23925_s5 + $0x10] ss:$8 sps:$4 sm:$0xff]   ;;  %v16082_v51 = vld [vmem:[%s23925_s5 + $0x24] ss:$8 sps:$4 sm:$0xff]  }
 0x1c6   : > { %v1998_v43 = vadd.f32 %v15858_v41, %v18638_v54  ;;  %v15971_v46 = vpop.f32.mrf.mxu1  ;;  %v2254_v62 = vmul.f32 0.2, %v2156_v58  ;;  %vm2222_vm4 = vcmp.gt.f32.partialorder %v2156_v58, 0.0 }
 0x1c7   : > { %v15860_v6 = vpop.f32.mrf.mxu0  ;;  %3091 = vmatpush1.bf16.msra.mxu0 %v2301_v33 }
 0x1c8   : > { %v2159_v1 = vadd.f32 %v15970_v40, %v1998_v43  ;;  %v15861_v11 = vadd.f32 %v15860_v6, %v15859_v56  ;;  %v15972_v9 = vpop.f32.mrf.mxu1  ;;  %3092 = vmatprep.subr.bf16.mxu0 %v23928_v17  ;;  %v18751_v29 = vsel %vm2222_vm4, %v2156_v58, %v2254_v62 }
 0x1c9   : > { %v15862_v21 = vpop.f32.mrf.mxu0  ;;  %v15973_v54 = vadd.f32 %v15972_v9, %v15971_v46 }
 0x1ca   : > { %vm2223_vm5 = vcmp.gt.f32.partialorder %v2159_v1, 0.0  ;;  %v2255_v50 = vmul.f32 0.2, %v2159_v1  ;;  %v2003_v57 = vadd.f32 %v15861_v11, %v18640_v0  ;;  %v15974_v59 = vpop.f32.mrf.mxu1 }
 0x1cb   : > { %v15863_v7 = vpop.f32.mrf.mxu0  ;;  %3093 = vmatpush1.bf16.msra.mxu0 %v2300_v52 }
 0x1cc   : > { %v18753_v22 = vsel %vm2223_vm5, %v2159_v1, %v2255_v50  ;;  %v2164_v33 = vadd.f32 %v15973_v54, %v2003_v57  ;;  %v15864_v53 = vadd.f32 %v15863_v7, %v15862_v21  ;;  %v15975_v32 = vpop.f32.mrf.mxu1  ;;  %3094 = vmatprep.subr.bf16.mxu0 %v23928_v17 }
 0x1cd   : > { %v15865_v25 = vpop.f32.mrf.mxu0  ;;  %v2308_v0 = vpack.c.bf16 %v18753_v22, %v18751_v29  ;;  %v15976_v8 = vadd.f32 %v15975_v32, %v15974_v59  ;;  %v16134_v29 = vld [vmem:[%s23922_s2 + $0x60] ss:$8 sps:$4 sm:$0xff]   ;;  %v16136_v22 = vld [vmem:[%s23922_s2 + $0x64] ss:$8 sps:$4 sm:$0xff]  }
 0x1ce   : > { %v2006_v63 = vadd.f32 %v15864_v53, %v18642_v10  ;;  %v15977_v24 = vpop.f32.mrf.mxu1  ;;  %v2256_v47 = vmul.f32 0.2, %v2164_v33  ;;  %vm2224_vm6 = vcmp.gt.f32.partialorder %v2164_v33, 0.0 }
 0x1cf   : > { %v15866_v15 = vpop.f32.mrf.mxu0  ;;  %3095 = vmatpush1.bf16.msra.mxu0 %v2299_v12 }
 0x1d0   : > { %v2167_v48 = vadd.f32 %v15976_v8, %v2006_v63  ;;  %v15867_v52 = vadd.f32 %v15866_v15, %v15865_v25  ;;  %v15978_v37 = vpop.f32.mrf.mxu1  ;;  %3096 = vmatprep.subr.bf16.mxu0 %v23928_v17  ;;  %v18767_v3 = vsel %vm2224_vm6, %v2164_v33, %v2256_v47 }
 0x1d1   : > { %v15868_v5 = vpop.f32.mrf.mxu0  ;;  %v15979_v10 = vadd.f32 %v15978_v37, %v15977_v24 }
 0x1d2   : > { %vm2225_vm7 = vcmp.gt.f32.partialorder %v2167_v48, 0.0  ;;  %v2257_v18 = vmul.f32 0.2, %v2167_v48  ;;  %v2011_v61 = vadd.f32 %v15867_v52, %v18644_v20  ;;  %v15980_v19 = vpop.f32.mrf.mxu1 }
 0x1d3   : > { %v15869_v45 = vpop.f32.mrf.mxu0  ;;  %3097 = vmatpush1.bf16.msra.mxu0 %v2298_v38 }
 0x1d4   : > { %v18769_v4 = vsel %vm2225_vm7, %v2167_v48, %v2257_v18  ;;  %v2172_v12 = vadd.f32 %v15979_v10, %v2011_v61  ;;  %v15870_v16 = vadd.f32 %v15869_v45, %v15868_v5  ;;  %v15981_v34 = vpop.f32.mrf.mxu1  ;;  %3098 = vmatprep.subr.bf16.mxu0 %v23928_v17 }
 0x1d5   : > { %v15871_v23 = vpop.f32.mrf.mxu0  ;;  %v2309_v20 = vpack.c.bf16 %v18769_v4, %v18767_v3  ;;  %v15982_v58 = vadd.f32 %v15981_v34, %v15980_v19  ;;  %v16079_v3 = vld [vmem:[%s23925_s5 + $0x14] ss:$8 sps:$4 sm:$0xff]   ;;  %v16088_v4 = vld [vmem:[%s23925_s5 + $0x44] ss:$8 sps:$4 sm:$0xff]  }
 0x1d6   : > { %v2014_v26 = vadd.f32 %v15870_v16, %v18646_v31  ;;  %v15983_v41 = vpop.f32.mrf.mxu1  ;;  %v2258_v28 = vmul.f32 0.2, %v2172_v12  ;;  %vm2226_vm8 = vcmp.gt.f32.partialorder %v2172_v12, 0.0 }
 0x1d7   : > { %v15872_v44 = vpop.f32.mrf.mxu0 }
 0x1d8   : > { %v2175_v30 = vadd.f32 %v15982_v58, %v2014_v26  ;;  %v15873_v38 = vadd.f32 %v15872_v44, %v15871_v23  ;;  %v15984_v56 = vpop.f32.mrf.mxu1  ;;  %v18776_v11 = vsel %vm2226_vm8, %v2172_v12, %v2258_v28 }
 0x1d9   : > { %v15874_v43 = vpop.f32.mrf.mxu0  ;;  %v15985_v6 = vadd.f32 %v15984_v56, %v15983_v41 }
 0x1da   : > { %vm2227_vm9 = vcmp.gt.f32.partialorder %v2175_v30, 0.0  ;;  %v2259_v40 = vmul.f32 0.2, %v2175_v30  ;;  %v2019_v46 = vadd.f32 %v15873_v38, %v18648_v42  ;;  %v15986_v62 = vpop.f32.mrf.mxu1 }
 0x1db   : > { %v15875_v1 = vpop.f32.mrf.mxu0 }
 0x1dc   : > { %v18778_v9 = vsel %vm2227_vm9, %v2175_v30, %v2259_v40  ;;  %v2180_v31 = vadd.f32 %v15985_v6, %v2019_v46  ;;  %v15876_v21 = vadd.f32 %v15875_v1, %v15874_v43  ;;  %v15987_v50 = vpop.f32.mrf.mxu1 }
 0x1dd   : > { %v15877_v57 = vpop.f32.mrf.mxu0  ;;  %v2310_v54 = vpack.c.bf16 %v18778_v9, %v18776_v11  ;;  %v15988_v7 = vadd.f32 %v15987_v50, %v15986_v62 }
 0x1de   : > { %v2022_v59 = vadd.f32 %v15876_v21, %v18650_v55  ;;  %v15989_v33 = vpop.f32.mrf.mxu1  ;;  %v2260_v42 = vmul.f32 0.2, %v2180_v31  ;;  %vm2228_vm10 = vcmp.gt.f32.partialorder %v2180_v31, 0.0 }
 0x1df   : > { %v15878_v53 = vpop.f32.mrf.mxu0 }
 0x1e0   : > { %v2183_v32 = vadd.f32 %v15988_v7, %v2022_v59  ;;  %v15879_v25 = vadd.f32 %v15878_v53, %v15877_v57  ;;  %v15990_v63 = vpop.f32.mrf.mxu1  ;;  %v2292_v37 = vsel %vm2228_vm10, %v2180_v31, %v2260_v42  ;;  %v16086_v59 = vld [vmem:[%s23925_s5 + $0x40] ss:$8 sps:$4 sm:$0xff]   ;;  %v16091_v7 = vld [vmem:[%s23925_s5 + $0x54] ss:$8 sps:$4 sm:$0xff]   ;;  %v16148_v53 = vld [vmem:[%s23922_s2 + $0x44] ss:$8 sps:$4 sm:$0xff]  }
 0x1e1   : > { %v15880_v8 = vpop.f32.mrf.mxu0  ;;  %v15991_v47 = vadd.f32 %v15990_v63, %v15989_v33  ;;  %v16146_v33 = vld [vmem:[%s23922_s2 + $0x40] ss:$8 sps:$4 sm:$0xff]   ;;  %v16089_v42 = vld [vmem:[%s23925_s5 + $0x50] ss:$8 sps:$4 sm:$0xff]   ;;  %v16154_v63 = vld [vmem:[%s23922_s2 + $0x34] ss:$8 sps:$4 sm:$0xff]  }
 0x1e2   : > { %vm2229_vm11 = vcmp.gt.f32.partialorder %v2183_v32, 0.0  ;;  %v2261_v24 = vmul.f32 0.2, %v2183_v32  ;;  %v2027_v15 = vadd.f32 %v15879_v25, %v18652_v2  ;;  %v15992_v48 = vpop.f32.mrf.mxu1  ;;  %v16152_v25 = vld [vmem:[%s23922_s2 + $0x30] ss:$8 sps:$4 sm:$0xff]  }
 0x1e3   : > { %v15881_v52 = vpop.f32.mrf.mxu0 }
 0x1e4   : > { %v2293_v5 = vsel %vm2229_vm11, %v2183_v32, %v2261_v24  ;;  %v2188_v18 = vadd.f32 %v15991_v47, %v2027_v15  ;;  %v15882_v55 = vadd.f32 %v15881_v52, %v15880_v8  ;;  %v15993_v61 = vpop.f32.mrf.mxu1  ;;  %v16094_v32 = vld [vmem:[%s23925_s5 + $0x64] ss:$8 sps:$4 sm:$0xff]   ;;  %v16092_v8 = vld [vmem:[%s23925_s5 + $0x60] ss:$8 sps:$4 sm:$0xff]   ;;  %v16097_v24 = vld [vmem:[%s23925_s5 + $0x74] ss:$8 sps:$4 sm:$0xff]  }
 0x1e5   : > { %v15883_v10 = vpop.f32.mrf.mxu0  ;;  %v2311_v19 = vpack.c.bf16 %v2293_v5, %v2292_v37  ;;  %v15994_v12 = vadd.f32 %v15993_v61, %v15992_v48  ;;  %v16158_v15 = vld [vmem:[%s23922_s2 + $0x20] ss:$8 sps:$4 sm:$0xff]   ;;  %v16160_v47 = vld [vmem:[%s23922_s2 + $0x24] ss:$8 sps:$4 sm:$0xff]   ;;  %v16095_v48 = vld [vmem:[%s23925_s5 + $0x70] ss:$8 sps:$4 sm:$0xff]  }
 0x1e6   : > { %v2030_v45 = vadd.f32 %v15882_v55, %v18654_v13  ;;  %v15995_v16 = vpop.f32.mrf.mxu1  ;;  %v2262_v23 = vmul.f32 0.2, %v2188_v18  ;;  %vm2230_vm12 = vcmp.gt.f32.partialorder %v2188_v18, 0.0  ;;  %v16100_v52 = vld [vmem:[%s23925_s5 + $0x84] ss:$8 sps:$4 sm:$0xff]  }
 0x1e7   : > { %v15884_v34 = vpop.f32.mrf.mxu0  ;;  %v16164_v37 = vld [vmem:[%s23922_s2 + $0x10] ss:$8 sps:$4 sm:$0xff]   ;;  %v16166_v5 = vld [vmem:[%s23922_s2 + $0x14] ss:$8 sps:$4 sm:$0xff]   ;;  %v16170_v61 = vld [vmem:[%s23922_s2] ss:$8 sps:$4 sm:$0xff]  }
 0x1e8   : > { %v2191_v26 = vadd.f32 %v15994_v12, %v2030_v45  ;;  %v15885_v58 = vadd.f32 %v15884_v34, %v15883_v10  ;;  %v15996_v41 = vpop.f32.mrf.mxu1  ;;  %v2294_v43 = vsel %vm2230_vm12, %v2188_v18, %v2262_v23  ;;  %v16098_v18 = vld [vmem:[%s23925_s5 + $0x80] ss:$8 sps:$4 sm:$0xff]   ;;  %v16103_v55 = vld [vmem:[%s23925_s5 + $0x94] ss:$8 sps:$4 sm:$0xff]   ;;  %v16172_v10 = vld [vmem:[%s23922_s2 + $0x4] ss:$8 sps:$4 sm:$0xff]  }
 0x1e9   : > { %v15886_v2 = vpop.f32.mrf.mxu0  ;;  %v15997_v30 = vadd.f32 %v15996_v41, %v15995_v16  ;;  %v16106_v45 = vld [vmem:[%s23925_s5 + $0xa4] ss:$8 sps:$4 sm:$0xff]   ;;  %v16178_v12 = vld [vmem:[%s23922_s2 + $0xf4] ss:$8 sps:$4 sm:$0xff]   ;;  %v16176_v16 = vld [vmem:[%s23922_s2 + $0xf0] ss:$8 sps:$4 sm:$0xff]  }
 0x1ea   : > { %vm2231_vm13 = vcmp.gt.f32.partialorder %v2191_v26, 0.0  ;;  %v2263_v44 = vmul.f32 0.2, %v2191_v26  ;;  %v2035_v28 = vadd.f32 %v15885_v58, %v18656_v27  ;;  %v15998_v38 = vpop.f32.mrf.mxu1  ;;  %v16104_v34 = vld [vmem:[%s23925_s5 + $0xa0] ss:$8 sps:$4 sm:$0xff]  }
 0x1eb   : > { %v15887_v56 = vpop.f32.mrf.mxu0  ;;  %v16109_v23 = vld [vmem:[%s23925_s5 + $0xb4] ss:$8 sps:$4 sm:$0xff]   ;;  %v16179_v58 = vld [vmem:[%s23922_s2 + $0xe0] ss:$8 sps:$4 sm:$0xff]  }
 0x1ec   : > { %v2295_v40 = vsel %vm2231_vm13, %v2191_v26, %v2263_v44  ;;  %v2196_v46 = vadd.f32 %v15997_v30, %v2035_v28  ;;  %v15888_v13 = vadd.f32 %v15887_v56, %v15886_v2  ;;  %v15999_v6 = vpop.f32.mrf.mxu1  ;;  %v16181_v26 = vld [vmem:[%s23922_s2 + $0xe4] ss:$8 sps:$4 sm:$0xff]   ;;  %v16187_v41 = vld [vmem:[%s23922_s2 + $0xd4] ss:$8 sps:$4 sm:$0xff]   ;;  %v16185_v2 = vld [vmem:[%s23922_s2 + $0xd0] ss:$8 sps:$4 sm:$0xff]  }
 0x1ed   : > { %v2312_v62 = vpack.c.bf16 %v2295_v40, %v2294_v43  ;;  %v16000_v11 = vadd.f32 %v15999_v6, %v15998_v38  ;;  %v16107_v44 = vld [vmem:[%s23925_s5 + $0xb0] ss:$8 sps:$4 sm:$0xff]   ;;  %v16112_v28 = vld [vmem:[%s23925_s5 + $0xc4] ss:$8 sps:$4 sm:$0xff]   ;;  %v16188_v38 = vld [vmem:[%s23922_s2 + $0xc0] ss:$8 sps:$4 sm:$0xff]  }
 0x1ee   : > { %v2038_v1 = vadd.f32 %v15888_v13, %v18658_v39  ;;  %v2264_v9 = vmul.f32 0.2, %v2196_v46  ;;  %vm2232_vm14 = vcmp.gt.f32.partialorder %v2196_v46, 0.0  ;;  %v16074_v39 = vld [vmem:[%s23925_s5] ss:$8 sps:$4 sm:$0xff]  }
 0x1ef   : > { %v16190_v30 = vld [vmem:[%s23922_s2 + $0xc4] ss:$8 sps:$4 sm:$0xff]   ;;  %v16196_v56 = vld [vmem:[%s23922_s2 + $0xb4] ss:$8 sps:$4 sm:$0xff]   ;;  %v16194_v43 = vld [vmem:[%s23922_s2 + $0xb0] ss:$8 sps:$4 sm:$0xff]  }
 0x1f0   : > { %v2199_v31 = vadd.f32 %v16000_v11, %v2038_v1  ;;  %v2296_v50 = vsel %vm2232_vm14, %v2196_v46, %v2264_v9  ;;  %v16110_v40 = vld [vmem:[%s23925_s5 + $0xc0] ss:$8 sps:$4 sm:$0xff]   ;;  %v16199_v46 = vld [vmem:[%s23922_s2 + $0xa4] ss:$8 sps:$4 sm:$0xff]   ;;  %v16115_v6 = vld [vmem:[%s23925_s5 + $0xd4] ss:$8 sps:$4 sm:$0xff]  }
 0x1f1   : > { %v16197_v13 = vld [vmem:[%s23922_s2 + $0xa0] ss:$8 sps:$4 sm:$0xff]   ;;  %v16203_v1 = vld [vmem:[%s23922_s2 + $0x90] ss:$8 sps:$4 sm:$0xff]   ;;  %v16208_v11 = vld [vmem:[%s23922_s2 + $0x84] ss:$8 sps:$4 sm:$0xff]  }
 0x1f2   : > { %vm2233_vm15 = vcmp.gt.f32.partialorder %v2199_v31, 0.0  ;;  %v2265_v21 = vmul.f32 0.2, %v2199_v31  ;;  %v16113_v9 = vld [vmem:[%s23925_s5 + $0xd0] ss:$8 sps:$4 sm:$0xff]  }
 0x1f4   : > { %v2297_v57 = vsel %vm2233_vm15, %v2199_v31, %v2265_v21  ;;  %v16206_v31 = vld [vmem:[%s23922_s2 + $0x80] ss:$8 sps:$4 sm:$0xff]   ;;  %v16118_v21 = vld [vmem:[%s23925_s5 + $0xe4] ss:$8 sps:$4 sm:$0xff]  }
 0x1f5   : > { %v2313_v27 = vpack.c.bf16 %v2297_v57, %v2296_v50  ;;  %v16214_v50 = vld [vmem:[%s23922_s2 + $0x174] ss:$8 sps:$4 sm:$0xff]   ;;  %v16116_v57 = vld [vmem:[%s23925_s5 + $0xe0] ss:$8 sps:$4 sm:$0xff]  }
 0x1f7   : > { %3099 = vmatpush2.bf16.msra.mxu0 %v2313_v27  ;;  %v16121_v27 = vld [vmem:[%s23925_s5 + $0xf4] ss:$8 sps:$4 sm:$0xff]  }
 0x1f8   : > { %3100 = vmatprep.subr.bf16.mxu0 %v23928_v17 }
 0x1fb   : > { %3101 = vmatpush2.bf16.msra.mxu0 %v2312_v62  ;;  %v16205_v62 = vld [vmem:[%s23922_s2 + $0x94] ss:$8 sps:$4 sm:$0xff]  }
 0x1fc   : > { %3102 = vmatprep.subr.bf16.mxu0 %v23928_v17 }
 0x1ff   : > { %3103 = vmatpush2.bf16.msra.mxu0 %v2311_v19  ;;  %v16101_v19 = vld [vmem:[%s23925_s5 + $0x90] ss:$8 sps:$4 sm:$0xff]  }
 0x200   : > { %3104 = vmatprep.subr.bf16.mxu0 %v23928_v17 }
 0x203   : > { %3105 = vmatpush2.bf16.msra.mxu0 %v2310_v54  ;;  %v16142_v54 = vld [vmem:[%s23922_s2 + $0x54] ss:$8 sps:$4 sm:$0xff]  }
 0x204   : > { %3106 = vmatprep.subr.bf16.mxu0 %v23928_v17 }
 0x207   : > { %3107 = vmatpush2.bf16.msra.mxu0 %v2309_v20  ;;  %v16140_v20 = vld [vmem:[%s23922_s2 + $0x50] ss:$8 sps:$4 sm:$0xff]  }
 0x208   : > { %3108 = vmatprep.subr.bf16.mxu0 %v23928_v17 }
 0x20b   : > { %3109 = vmatpush2.bf16.msra.mxu0 %v2308_v0  ;;  %v16083_v0 = vld [vmem:[%s23925_s5 + $0x30] ss:$8 sps:$4 sm:$0xff]  }
 0x20c   : > { %3110 = vmatprep.subr.bf16.mxu0 %v23928_v17 }
 0x20f   : > { %3111 = vmatpush2.bf16.msra.mxu0 %v2307_v35  ;;  %v16128_v35 = vld [vmem:[%s23922_s2 + $0x70] ss:$8 sps:$4 sm:$0xff]  }
 0x210   : > { %3112 = vmatprep.subr.bf16.mxu0 %v23928_v17  ;;  %5228 = vmatpush1.bf16.msra.mxu1 %v16128_v35  ;;  %v16125_v35 = vld [vmem:[%s23925_s5 + $0x110] ss:$8 sps:$4 sm:$0xff]  }
 0x211   : > { %5229 = vmatprep.subr.bf16.mxu1 %v16136_v22  ;;  %v16145_v22 = vld [vmem:[%s23925_s5 + $0x144] ss:$8 sps:$4 sm:$0xff]  }
 0x213   : > { %3113 = vmatpush2.bf16.msra.mxu0 %v2306_v36  ;;  %v16085_v36 = vld [vmem:[%s23925_s5 + $0x34] ss:$8 sps:$4 sm:$0xff]  }
 0x214   : > { %5230 = vmatpush1.bf16.msra.mxu1 %v16134_v29  ;;  %v16137_v29 = vld [vmem:[%s23925_s5 + $0x130] ss:$8 sps:$4 sm:$0xff]  }
 0x215   : > { %5231 = vmatprep.subr.bf16.mxu1 %v16142_v54  ;;  %v16157_v54 = vld [vmem:[%s23925_s5 + $0x164] ss:$8 sps:$4 sm:$0xff]  }
 0x216   : > { %3115 = vmatmul.mubr.bf16.vlgmr.msra.gmra.mxu0 %v16074_v39  ;;  %v16119_v39 = vld [vmem:[%s23925_s5 + $0xf0] ss:$8 sps:$4 sm:$0xff]  }
 0x217   : > { %3122 = vmatprep.mubr.bf16.mxu0 %v16079_v3  ;;  %v16124_v3 = vld [vmem:[%s23925_s5 + $0x104] ss:$8 sps:$4 sm:$0xff]  }
 0x218   : > { %5232 = vmatpush1.bf16.msra.mxu1 %v16140_v20  ;;  %v16149_v20 = vld [vmem:[%s23925_s5 + $0x150] ss:$8 sps:$4 sm:$0xff]  }
 0x219   : > { %5233 = vmatprep.subr.bf16.mxu1 %v16148_v53  ;;  %v16169_v53 = vld [vmem:[%s23925_s5 + $0x184] ss:$8 sps:$4 sm:$0xff]  }
 0x21c   : > { %5234 = vmatpush1.bf16.msra.mxu1 %v16146_v33  ;;  %v16161_v33 = vld [vmem:[%s23925_s5 + $0x170] ss:$8 sps:$4 sm:$0xff]  }
 0x21d   : > { %5235 = vmatprep.subr.bf16.mxu1 %v16154_v63 }
 0x21e   : > { %3123 = vmatmul.mubr.bf16.gmra.mxu0 %v16077_v49  ;;  %v16122_v49 = vld [vmem:[%s23925_s5 + $0x100] ss:$8 sps:$4 sm:$0xff]  }
 0x21f   : > { %3130 = vmatprep.mubr.bf16.mxu0 %v16082_v51  ;;  %v16127_v51 = vld [vmem:[%s23925_s5 + $0x114] ss:$8 sps:$4 sm:$0xff]  }
 0x220   : > { %5236 = vmatpush1.bf16.msra.mxu1 %v16152_v25 }
 0x221   : > { %5237 = vmatprep.subr.bf16.mxu1 %v16160_v47 }
 0x224   : > { %5238 = vmatpush1.bf16.msra.mxu1 %v16158_v15  ;;  %v16184_v15 = vld [vmem:[%s23925_s5 + $0x1a4] ss:$8 sps:$4 sm:$0xff]  }
 0x225   : > { %5239 = vmatprep.subr.bf16.mxu1 %v16166_v5  ;;  %v16182_v5 = vld [vmem:[%s23925_s5 + $0x1a0] ss:$8 sps:$4 sm:$0xff]  }
 0x226   : > { %3131 = vmatmul.mubr.bf16.gmra.mxu0 %v16080_v60  ;;  %v16131_v60 = vld [vmem:[%s23925_s5 + $0x120] ss:$8 sps:$4 sm:$0xff]  }
 0x227   : > { %3138 = vmatprep.mubr.bf16.mxu0 %v16085_v36  ;;  %v16139_v36 = vld [vmem:[%s23925_s5 + $0x134] ss:$8 sps:$4 sm:$0xff]  }
 0x228   : > { %5240 = vmatpush1.bf16.msra.mxu1 %v16164_v37 }
 0x229   : > { %5241 = vmatprep.subr.bf16.mxu1 %v16172_v10 }
 0x22c   : > { %5242 = vmatpush1.bf16.msra.mxu1 %v16170_v61 }
 0x22d   : > { %5243 = vmatprep.subr.bf16.mxu1 %v16178_v12  ;;  %v16202_v12 = vld [vmem:[%s23925_s5 + $0x1c4] ss:$8 sps:$4 sm:$0xff]  }
 0x22e   : > { %3139 = vmatmul.mubr.bf16.gmra.mxu0 %v16083_v0  ;;  %v16143_v0 = vld [vmem:[%s23925_s5 + $0x140] ss:$8 sps:$4 sm:$0xff]  }
 0x22f   : > { %3146 = vmatprep.mubr.bf16.mxu0 %v16088_v4  ;;  %v16151_v4 = vld [vmem:[%s23925_s5 + $0x154] ss:$8 sps:$4 sm:$0xff]  }
 0x230   : > { %5244 = vmatpush2.bf16.msra.mxu1 %v16176_v16 }
 0x231   : > { %5245 = vmatprep.subr.bf16.mxu1 %v16181_v26 }
 0x234   : > { %5246 = vmatpush2.bf16.msra.mxu1 %v16179_v58  ;;  %v16200_v58 = vld [vmem:[%s23925_s5 + $0x1c0] ss:$8 sps:$4 sm:$0xff]  }
 0x235   : > { %5247 = vmatprep.subr.bf16.mxu1 %v16187_v41  ;;  %v16211_v41 = vld [vmem:[%s23925_s5 + $0x1d4] ss:$8 sps:$4 sm:$0xff]  }
 0x236   : > { %3147 = vmatmul.mubr.bf16.gmra.mxu0 %v16086_v59  ;;  %v16155_v59 = vld [vmem:[%s23925_s5 + $0x160] ss:$8 sps:$4 sm:$0xff]  }
 0x237   : > { %3154 = vmatprep.mubr.bf16.mxu0 %v16091_v7  ;;  %v16163_v7 = vld [vmem:[%s23925_s5 + $0x174] ss:$8 sps:$4 sm:$0xff]  }
 0x238   : > { %5248 = vmatpush2.bf16.msra.mxu1 %v16185_v2 }
 0x239   : > { %5249 = vmatprep.subr.bf16.mxu1 %v16190_v30 }
 0x23c   : > { %5250 = vmatpush2.bf16.msra.mxu1 %v16188_v38  ;;  %v16209_v38 = vld [vmem:[%s23925_s5 + $0x1d0] ss:$8 sps:$4 sm:$0xff]  }
 0x23d   : > { %5251 = vmatprep.subr.bf16.mxu1 %v16196_v56 }
 0x23e   : > { %3155 = vmatmul.mubr.bf16.gmra.mxu0 %v16089_v42  ;;  %v16167_v42 = vld [vmem:[%s23925_s5 + $0x180] ss:$8 sps:$4 sm:$0xff]  }
 0x23f   : > { %3162 = vmatprep.mubr.bf16.mxu0 %v16094_v32  ;;  %v16175_v32 = vld [vmem:[%s23925_s5 + $0x194] ss:$8 sps:$4 sm:$0xff]  }
 0x240   : > { %5252 = vmatpush2.bf16.msra.mxu1 %v16194_v43  ;;  %v16212_v43 = vld [vmem:[%s23922_s2 + $0x170] ss:$8 sps:$4 sm:$0xff]  }
 0x241   : > { %5253 = vmatprep.subr.bf16.mxu1 %v16199_v46 }
 0x244   : > { %5254 = vmatpush2.bf16.msra.mxu1 %v16197_v13 }
 0x245   : > { %5255 = vmatprep.subr.bf16.mxu1 %v16205_v62 }
 0x246   : > { %3163 = vmatmul.mubr.bf16.gmra.mxu0 %v16092_v8 }
 0x247   : > { %3170 = vmatprep.mubr.bf16.mxu0 %v16097_v24  ;;  %v16173_v24 = vld [vmem:[%s23925_s5 + $0x190] ss:$8 sps:$4 sm:$0xff]  }
 0x248   : > { %5256 = vmatpush2.bf16.msra.mxu1 %v16203_v1  ;;  %v16215_v1 = vld [vmem:[%s23922_s2 + $0x160] ss:$8 sps:$4 sm:$0xff]  }
 0x249   : > { %5257 = vmatprep.subr.bf16.mxu1 %v16208_v11 }
 0x24c   : > { %5258 = vmatpush2.bf16.msra.mxu1 %v16206_v31 }
 0x24d   : > { %5300 = vmatprep.subr.bf16.mxu1 %v16214_v50 }
 0x24e   : > { %3171 = vmatmul.mubr.bf16.gmra.mxu0 %v16095_v48 }
 0x24f   : > { %3178 = vmatprep.mubr.bf16.mxu0 %v16100_v52 }
 0x256   : > { %3179 = vmatmul.mubr.bf16.gmra.mxu0 %v16098_v18  ;;  %v16193_v18 = vld [vmem:[%s23925_s5 + $0x1b4] ss:$8 sps:$4 sm:$0xff]  }
 0x257   : > { %3186 = vmatprep.mubr.bf16.mxu0 %v16103_v55 }
 0x25e   : > { %3187 = vmatmul.mubr.bf16.gmra.mxu0 %v16101_v19 }
 0x25f   : > { %3194 = vmatprep.mubr.bf16.mxu0 %v16106_v45  ;;  %v16191_v45 = vld [vmem:[%s23925_s5 + $0x1b0] ss:$8 sps:$4 sm:$0xff]  }
 0x266   : > { %3195 = vmatmul.mubr.bf16.gmra.mxu0 %v16104_v34 }
 0x267   : > { %3202 = vmatprep.mubr.bf16.mxu0 %v16109_v23 }
 0x26e   : > { %3203 = vmatmul.mubr.bf16.gmra.mxu0 %v16107_v44 }
 0x26f   : > { %3210 = vmatprep.mubr.bf16.mxu0 %v16112_v28 }
 0x276   : > { %3211 = vmatmul.mubr.bf16.gmra.mxu0 %v16110_v40  ;;  %v16220_v40 = vld [vmem:[%s23925_s5 + $0x1e4] ss:$8 sps:$4 sm:$0xff]  }
 0x277   : > { %3218 = vmatprep.mubr.bf16.mxu0 %v16115_v6  ;;  %v16217_v6 = vld [vmem:[%s23922_s2 + $0x164] ss:$8 sps:$4 sm:$0xff]  }
 0x27e   : > { %3219 = vmatmul.mubr.bf16.gmra.mxu0 %v16113_v9  ;;  %v16223_v9 = vld [vmem:[%s23922_s2 + $0x154] ss:$8 sps:$4 sm:$0xff]  }
 0x27f   : > { %3226 = vmatprep.mubr.bf16.mxu0 %v16118_v21  ;;  %v16218_v21 = vld [vmem:[%s23925_s5 + $0x1e0] ss:$8 sps:$4 sm:$0xff]  }
 0x286   : > { %3227 = vmatmul.mubr.bf16.gmra.mxu0 %v16116_v57  ;;  %v16221_v57 = vld [vmem:[%s23922_s2 + $0x150] ss:$8 sps:$4 sm:$0xff]  }
 0x287   : > { %3234 = vmatprep.mubr.bf16.mxu0 %v16121_v27  ;;  %v16229_v27 = vld [vmem:[%s23925_s5 + $0x1f4] ss:$8 sps:$4 sm:$0xff]  }
 0x28e   : > { %3235 = vmatmul.mubr.bf16.gmra.mxu0 %v16119_v39 }
 0x28f   : > { %3242 = vmatprep.mubr.bf16.mxu0 %v16124_v3 }
 0x296   : > { %3243 = vmatmul.mubr.bf16.gmra.mxu0 %v16122_v49  ;;  %v16226_v49 = vld [vmem:[%s23922_s2 + $0x144] ss:$8 sps:$4 sm:$0xff]  }
 0x297   : > { %3250 = vmatprep.mubr.bf16.mxu0 %v16127_v51 }
 0x29e   : > { %3251 = vmatmul.mubr.bf16.gmra.mxu0 %v16125_v35  ;;  %v16224_v35 = vld [vmem:[%s23922_s2 + $0x140] ss:$8 sps:$4 sm:$0xff]  }
 0x29f   : > { %3258 = vmatprep.mubr.bf16.mxu0 %v16133_v14 }
 0x2a6   : > { %3259 = vmatmul.mubr.bf16.gmra.mxu0 %v16131_v60  ;;  %v16232_v60 = vld [vmem:[%s23922_s2 + $0x134] ss:$8 sps:$4 sm:$0xff]  }
 0x2a7   : > { %3266 = vmatprep.mubr.bf16.mxu0 %v16139_v36 }
 0x2ae   : > { %3267 = vmatmul.mubr.bf16.gmra.mxu0 %v16137_v29  ;;  %v16227_v29 = vld [vmem:[%s23925_s5 + $0x1f0] ss:$8 sps:$4 sm:$0xff]  }
 0x2af   : > { %3274 = vmatprep.mubr.bf16.mxu0 %v16145_v22 }
 0x2b6   : > { %3275 = vmatmul.mubr.bf16.gmra.mxu0 %v16143_v0  ;;  %v16230_v0 = vld [vmem:[%s23922_s2 + $0x130] ss:$8 sps:$4 sm:$0xff]  }
 0x2b7   : > { %3282 = vmatprep.mubr.bf16.mxu0 %v16151_v4  ;;  %v16238_v4 = vld [vmem:[%s23925_s5 + $0x204] ss:$8 sps:$4 sm:$0xff]  }
 0x2be   : > { %3283 = vmatmul.mubr.bf16.gmra.mxu0 %v16149_v20 }
 0x2bf   : > { %3290 = vmatprep.mubr.bf16.mxu0 %v16157_v54 }
 0x2c6   : > { %3291 = vmatmul.mubr.bf16.gmra.mxu0 %v16155_v59  ;;  %v16235_v59 = vld [vmem:[%s23922_s2 + $0x124] ss:$8 sps:$4 sm:$0xff]  }
 0x2c7   : > { %3298 = vmatprep.mubr.bf16.mxu0 %v16163_v7 }
 0x2ce   : > { %3299 = vmatmul.mubr.bf16.gmra.mxu0 %v16161_v33  ;;  %v16233_v33 = vld [vmem:[%s23922_s2 + $0x120] ss:$8 sps:$4 sm:$0xff]  }
 0x2cf   : > { %3306 = vmatprep.mubr.bf16.mxu0 %v16169_v53 }
 0x2d6   : > { %v3116_v25 = vpop.f32.mrf.mxu0  ;;  %3307 = vmatmul.mubr.bf16.gmra.mxu0 %v16167_v42  ;;  %v16241_v42 = vld [vmem:[%s23922_s2 + $0x114] ss:$8 sps:$4 sm:$0xff]  }
 0x2d7   : > { %3314 = vmatprep.mubr.bf16.mxu0 %v16175_v32 }
 0x2d8   : > { %v3118_v63 = vpop.f32.mrf.mxu0 }
 0x2da   : > { %v3119_v8 = vpop.f32.mrf.mxu0 }
 0x2db   : > { %v3627_v46 = vpack.c.bf16 %v3119_v8, %v3116_v25  ;;  %v16236_v25 = vld [vmem:[%s23925_s5 + $0x200] ss:$8 sps:$4 sm:$0xff]   ;;  %v16239_v8 = vld [vmem:[%s23922_s2 + $0x110] ss:$8 sps:$4 sm:$0xff]  }
 0x2dc   : > { %v3121_v47 = vpop.f32.mrf.mxu0 }
 0x2de   : > { %v3124_v48 = vpop.f32.mrf.mxu0  ;;  %3315 = vmatmul.mubr.bf16.gmra.mxu0 %v16173_v24  ;;  %v16247_v24 = vld [vmem:[%s23925_s5 + $0x214] ss:$8 sps:$4 sm:$0xff]  }
 0x2df   : > { %3322 = vmatprep.mubr.bf16.mxu0 %v16184_v15 }
 0x2e0   : > { %v3126_v52 = vpop.f32.mrf.mxu0 }
 0x2e2   : > { %v3127_v37 = vpop.f32.mrf.mxu0 }
 0x2e3   : > { %v3628_v39 = vpack.c.bf16 %v3127_v37, %v3124_v48  ;;  %v16244_v48 = vld [vmem:[%s23922_s2 + $0x104] ss:$8 sps:$4 sm:$0xff]   ;;  %v16242_v37 = vld [vmem:[%s23922_s2 + $0x100] ss:$8 sps:$4 sm:$0xff]  }
 0x2e4   : > { %v3129_v55 = vpop.f32.mrf.mxu0 }
 0x2e6   : > { %v19067_v61 = vpop.f32.mrf.mxu0  ;;  %3323 = vmatmul.mubr.bf16.gmra.mxu0 %v16182_v5 }
 0x2e7   : > { %3330 = vmatprep.mubr.bf16.mxu0 %v16193_v18  ;;  %v16250_v18 = vld [vmem:[%s23922_s2 + $0x1f4] ss:$8 sps:$4 sm:$0xff]  }
 0x2e8   : > { %v3134_v10 = vpop.f32.mrf.mxu0 }
 0x2e9   : > { %v16248_v10 = vld [vmem:[%s23922_s2 + $0x1f0] ss:$8 sps:$4 sm:$0xff]  }
 0x2ea   : > { %v19069_v19 = vpop.f32.mrf.mxu0 }
 0x2eb   : > { %v3629_v20 = vpack.c.bf16 %v19069_v19, %v19067_v61  ;;  %v16245_v61 = vld [vmem:[%s23925_s5 + $0x210] ss:$8 sps:$4 sm:$0xff]   ;;  %v16256_v19 = vld [vmem:[%s23925_s5 + $0x224] ss:$8 sps:$4 sm:$0xff]  }
 0x2ec   : > { %v3137_v16 = vpop.f32.mrf.mxu0 }
 0x2ee   : > { %v19077_v34 = vpop.f32.mrf.mxu0  ;;  %3331 = vmatmul.mubr.bf16.gmra.mxu0 %v16191_v45 }
 0x2ef   : > { %3338 = vmatprep.mubr.bf16.mxu0 %v16202_v12  ;;  %v16253_v12 = vld [vmem:[%s23922_s2 + $0x1e4] ss:$8 sps:$4 sm:$0xff]  }
 0x2f0   : > { %v3142_v23 = vpop.f32.mrf.mxu0 }
 0x2f2   : > { %v19079_v26 = vpop.f32.mrf.mxu0 }
 0x2f3   : > { %v3630_v15 = vpack.c.bf16 %v19079_v26, %v19077_v34  ;;  %v16251_v34 = vld [vmem:[%s23922_s2 + $0x1e0] ss:$8 sps:$4 sm:$0xff]   ;;  %v16259_v26 = vld [vmem:[%s23922_s2 + $0x1d4] ss:$8 sps:$4 sm:$0xff]  }
 0x2f4   : > { %v3145_v2 = vpop.f32.mrf.mxu0 }
 0x2f5   : > { %v16257_v2 = vld [vmem:[%s23922_s2 + $0x1d0] ss:$8 sps:$4 sm:$0xff]  }
 0x2f6   : > { %v3148_v44 = vpop.f32.mrf.mxu0  ;;  %3339 = vmatmul.mubr.bf16.gmra.mxu0 %v16200_v58 }
 0x2f7   : > { %3346 = vmatprep.mubr.bf16.mxu0 %v16211_v41  ;;  %v16254_v41 = vld [vmem:[%s23925_s5 + $0x220] ss:$8 sps:$4 sm:$0xff]  }
 0x2f8   : > { %v3150_v28 = vpop.f32.mrf.mxu0 }
 0x2fa   : > { %v3151_v30 = vpop.f32.mrf.mxu0 }
 0x2fb   : > { %v3631_v56 = vpack.c.bf16 %v3151_v30, %v3148_v44  ;;  %v16265_v44 = vld [vmem:[%s23925_s5 + $0x234] ss:$8 sps:$4 sm:$0xff]   ;;  %v16262_v30 = vld [vmem:[%s23922_s2 + $0x1c4] ss:$8 sps:$4 sm:$0xff]  }
 0x2fc   : > { %v3153_v13 = vpop.f32.mrf.mxu0 }
 0x2fd   : > { %5259 = vmatprep.mubr.bf16.mxu1 %v3631_v56  ;;  %v16260_v56 = vld [vmem:[%s23922_s2 + $0x1c0] ss:$8 sps:$4 sm:$0xff]   ;;  %v16263_v13 = vld [vmem:[%s23925_s5 + $0x230] ss:$8 sps:$4 sm:$0xff]  }
 0x2fe   : > { %v3156_v62 = vpop.f32.mrf.mxu0  ;;  %3347 = vmatmul.mubr.bf16.gmra.mxu0 %v16209_v38  ;;  %5260 = vmatmul.mubr.bf16.vlgmr.msra.gmra.mxu1 %v3627_v46 }
 0x2ff   : > { %5301 = vmatpush1.bf16.msra.mxu1 %v16212_v43  ;;  %3354 = vmatprep.mubr.bf16.mxu0 %v16220_v40  ;;  %v16268_v40 = vld [vmem:[%s23922_s2 + $0x1b4] ss:$8 sps:$4 sm:$0xff]  }
 0x300   : > { %v3158_v11 = vpop.f32.mrf.mxu0  ;;  %5302 = vmatprep.subr.bf16.mxu1 %v16217_v6  ;;  %v16266_v6 = vld [vmem:[%s23922_s2 + $0x1b0] ss:$8 sps:$4 sm:$0xff]  }
 0x301   : > { %v16271_v11 = vld [vmem:[%s23922_s2 + $0x1a4] ss:$8 sps:$4 sm:$0xff]  }
 0x302   : > { %v3159_v31 = vpop.f32.mrf.mxu0 }
 0x303   : > { %v3632_v50 = vpack.c.bf16 %v3159_v31, %v3156_v62  ;;  %5303 = vmatpush1.bf16.msra.mxu1 %v16215_v1  ;;  %v16274_v62 = vld [vmem:[%s23925_s5 + $0x244] ss:$8 sps:$4 sm:$0xff]   ;;  %v16269_v31 = vld [vmem:[%s23922_s2 + $0x1a0] ss:$8 sps:$4 sm:$0xff]  }
 0x304   : > { %v3161_v3 = vpop.f32.mrf.mxu0  ;;  %5304 = vmatprep.subr.bf16.mxu1 %v16223_v9 }
 0x305   : > { %5269 = vmatprep.mubr.bf16.mxu1 %v3632_v50  ;;  %v16277_v50 = vld [vmem:[%s23922_s2 + $0x194] ss:$8 sps:$4 sm:$0xff]  }
 0x306   : > { %v3164_v51 = vpop.f32.mrf.mxu0  ;;  %3355 = vmatmul.mubr.bf16.gmra.mxu0 %v16218_v21  ;;  %5270 = vmatmul.mubr.bf16.gmra.mxu1 %v3628_v39  ;;  %v16275_v39 = vld [vmem:[%s23922_s2 + $0x190] ss:$8 sps:$4 sm:$0xff]   ;;  %v16283_v3 = vld [vmem:[%s23925_s5 + $0x254] ss:$8 sps:$4 sm:$0xff]  }
 0x307   : > { %5305 = vmatpush1.bf16.msra.mxu1 %v16221_v57  ;;  %3362 = vmatprep.mubr.bf16.mxu0 %v16229_v27  ;;  %v16272_v27 = vld [vmem:[%s23925_s5 + $0x240] ss:$8 sps:$4 sm:$0xff]  }
 0x308   : > { %v3166_v14 = vpop.f32.mrf.mxu0  ;;  %5306 = vmatprep.subr.bf16.mxu1 %v16226_v49 }
 0x309   : > { %v16278_v14 = vld [vmem:[%s23922_s2 + $0x180] ss:$8 sps:$4 sm:$0xff]  }
 0x30a   : > { %v3167_v36 = vpop.f32.mrf.mxu0 }
 0x30b   : > { %v3633_v22 = vpack.c.bf16 %v3167_v36, %v3164_v51  ;;  %5307 = vmatpush1.bf16.msra.mxu1 %v16224_v35  ;;  %v16280_v51 = vld [vmem:[%s23922_s2 + $0x184] ss:$8 sps:$4 sm:$0xff]   ;;  %v16286_v36 = vld [vmem:[%s23922_s2 + $0x274] ss:$8 sps:$4 sm:$0xff]  }
 0x30c   : > { %v3169_v54 = vpop.f32.mrf.mxu0  ;;  %5308 = vmatprep.subr.bf16.mxu1 %v16232_v60 }
 0x30d   : > { %5279 = vmatprep.mubr.bf16.mxu1 %v3633_v22  ;;  %v16281_v22 = vld [vmem:[%s23925_s5 + $0x250] ss:$8 sps:$4 sm:$0xff]  }
 0x30e   : > { %v3172_v7 = vpop.f32.mrf.mxu0  ;;  %3363 = vmatmul.mubr.bf16.gmra.mxu0 %v16227_v29  ;;  %5280 = vmatmul.mubr.bf16.gmra.mxu1 %v3629_v20  ;;  %v16292_v20 = vld [vmem:[%s23925_s5 + $0x264] ss:$8 sps:$4 sm:$0xff]  }
 0x30f   : > { %5309 = vmatpush1.bf16.msra.mxu1 %v16230_v0  ;;  %3370 = vmatprep.mubr.bf16.mxu0 %v16238_v4  ;;  %v16284_v4 = vld [vmem:[%s23922_s2 + $0x270] ss:$8 sps:$4 sm:$0xff]  }
 0x310   : > { %v3174_v53 = vpop.f32.mrf.mxu0  ;;  %5310 = vmatprep.subr.bf16.mxu1 %v16235_v59 }
 0x311   : > { %v16287_v53 = vld [vmem:[%s23922_s2 + $0x260] ss:$8 sps:$4 sm:$0xff]  }
 0x312   : > { %v3175_v32 = vpop.f32.mrf.mxu0 }
 0x313   : > { %v3634_v63 = vpack.c.bf16 %v3175_v32, %v3172_v7  ;;  %5311 = vmatpush1.bf16.msra.mxu1 %v16233_v33  ;;  %v16289_v7 = vld [vmem:[%s23922_s2 + $0x264] ss:$8 sps:$4 sm:$0xff]   ;;  %v16295_v32 = vld [vmem:[%s23922_s2 + $0x254] ss:$8 sps:$4 sm:$0xff]  }
 0x314   : > { %v3177_v47 = vpop.f32.mrf.mxu0  ;;  %5312 = vmatprep.subr.bf16.mxu1 %v16241_v42 }
 0x315   : > { %5289 = vmatprep.mubr.bf16.mxu1 %v3634_v63  ;;  %v16290_v63 = vld [vmem:[%s23925_s5 + $0x260] ss:$8 sps:$4 sm:$0xff]  }
 0x316   : > { %v19157_v52 = vpop.f32.mrf.mxu0  ;;  %3371 = vmatmul.mubr.bf16.gmra.mxu0 %v16236_v25  ;;  %5290 = vmatmul.mubr.bf16.gmra.mxu1 %v3630_v15  ;;  %v16301_v15 = vld [vmem:[%s23925_s5 + $0x274] ss:$8 sps:$4 sm:$0xff]  }
 0x317   : > { %5313 = vmatpush1.bf16.msra.mxu1 %v16239_v8  ;;  %3378 = vmatprep.mubr.bf16.mxu0 %v16247_v24  ;;  %v16293_v24 = vld [vmem:[%s23922_s2 + $0x250] ss:$8 sps:$4 sm:$0xff]  }
 0x318   : > { %v3182_v5 = vpop.f32.mrf.mxu0  ;;  %5314 = vmatprep.subr.bf16.mxu1 %v16244_v48 }
 0x319   : > { %v16296_v5 = vld [vmem:[%s23922_s2 + $0x240] ss:$8 sps:$4 sm:$0xff]  }
 0x31a   : > { %v19165_v55 = vpop.f32.mrf.mxu0 }
 0x31b   : > { %5315 = vmatpush1.bf16.msra.mxu1 %v16242_v37  ;;  %v3635_v54 = vpack.c.bf16 %v19165_v55, %v19157_v52  ;;  %v16298_v52 = vld [vmem:[%s23922_s2 + $0x244] ss:$8 sps:$4 sm:$0xff]   ;;  %v16304_v55 = vld [vmem:[%s23922_s2 + $0x234] ss:$8 sps:$4 sm:$0xff]  }
 0x31c   : > { %v3185_v45 = vpop.f32.mrf.mxu0  ;;  %5316 = vmatprep.subr.bf16.mxu1 %v16250_v18 }
 0x31d   : > { %v16302_v45 = vld [vmem:[%s23922_s2 + $0x230] ss:$8 sps:$4 sm:$0xff]  }
 0x31e   : > { %v19179_v16 = vpop.f32.mrf.mxu0  ;;  %3379 = vmatmul.mubr.bf16.gmra.mxu0 %v16245_v61 }
 0x31f   : > { %5317 = vmatpush2.bf16.msra.mxu1 %v16248_v10  ;;  %3386 = vmatprep.mubr.bf16.mxu0 %v16256_v19  ;;  %v16299_v10 = vld [vmem:[%s23925_s5 + $0x270] ss:$8 sps:$4 sm:$0xff]  }
 0x320   : > { %v3190_v23 = vpop.f32.mrf.mxu0  ;;  %5318 = vmatprep.subr.bf16.mxu1 %v16253_v12  ;;  %v16310_v12 = vld [vmem:[%s23925_s5 + $0x284] ss:$8 sps:$4 sm:$0xff]  }
 0x321   : > { %v16307_v23 = vld [vmem:[%s23922_s2 + $0x224] ss:$8 sps:$4 sm:$0xff]  }
 0x322   : > { %v19187_v58 = vpop.f32.mrf.mxu0 }
 0x323   : > { %5319 = vmatpush2.bf16.msra.mxu1 %v16251_v34  ;;  %v3636_v47 = vpack.c.bf16 %v19187_v58, %v19179_v16  ;;  %v16305_v58 = vld [vmem:[%s23922_s2 + $0x220] ss:$8 sps:$4 sm:$0xff]  }
 0x324   : > { %v3193_v28 = vpop.f32.mrf.mxu0  ;;  %5320 = vmatprep.subr.bf16.mxu1 %v16259_v26 }
 0x325   : > { %v16308_v28 = vld [vmem:[%s23925_s5 + $0x280] ss:$8 sps:$4 sm:$0xff]  }
 0x326   : > { %v19201_v38 = vpop.f32.mrf.mxu0  ;;  %3387 = vmatmul.mubr.bf16.gmra.mxu0 %v16254_v41 }
 0x327   : > { %5321 = vmatpush2.bf16.msra.mxu1 %v16257_v2  ;;  %3394 = vmatprep.mubr.bf16.mxu0 %v16265_v44  ;;  %v16313_v2 = vld [vmem:[%s23922_s2 + $0x214] ss:$8 sps:$4 sm:$0xff]  }
 0x328   : > { %v3198_v43 = vpop.f32.mrf.mxu0  ;;  %5322 = vmatprep.subr.bf16.mxu1 %v16262_v30 }
 0x32a   : > { %v19209_v46 = vpop.f32.mrf.mxu0 }
 0x32b   : > { %5323 = vmatpush2.bf16.msra.mxu1 %v16260_v56  ;;  %v3637_v16 = vpack.c.bf16 %v19209_v46, %v19201_v38  ;;  %v16311_v38 = vld [vmem:[%s23922_s2 + $0x210] ss:$8 sps:$4 sm:$0xff]   ;;  %v16319_v56 = vld [vmem:[%s23925_s5 + $0x294] ss:$8 sps:$4 sm:$0xff]   ;;  %v16316_v46 = vld [vmem:[%s23922_s2 + $0x204] ss:$8 sps:$4 sm:$0xff]  }
 0x32c   : > { %v3201_v1 = vpop.f32.mrf.mxu0  ;;  %5324 = vmatprep.subr.bf16.mxu1 %v16268_v40 }
 0x32d   : > { %v16322_v1 = vld [vmem:[%s23922_s2 + $0x2f4] ss:$8 sps:$4 sm:$0xff]  }
 0x32e   : > { %v19223_v9 = vpop.f32.mrf.mxu0  ;;  %3395 = vmatmul.mubr.bf16.gmra.mxu0 %v16263_v13 }
 0x32f   : > { %5325 = vmatpush2.bf16.msra.mxu1 %v16266_v6  ;;  %3402 = vmatprep.mubr.bf16.mxu0 %v16274_v62  ;;  %v16314_v6 = vld [vmem:[%s23922_s2 + $0x200] ss:$8 sps:$4 sm:$0xff]  }
 0x330   : > { %v3206_v21 = vpop.f32.mrf.mxu0  ;;  %5326 = vmatprep.subr.bf16.mxu1 %v16271_v11 }
 0x331   : > { %v16328_v21 = vld [vmem:[%s23925_s5 + $0x2a4] ss:$8 sps:$4 sm:$0xff]  }
 0x332   : > { %v19231_v57 = vpop.f32.mrf.mxu0 }
 0x333   : > { %5327 = vmatpush2.bf16.msra.mxu1 %v16269_v31  ;;  %v3638_v43 = vpack.c.bf16 %v19231_v57, %v19223_v9  ;;  %v16317_v9 = vld [vmem:[%s23925_s5 + $0x290] ss:$8 sps:$4 sm:$0xff]   ;;  %v16325_v57 = vld [vmem:[%s23922_s2 + $0x2e4] ss:$8 sps:$4 sm:$0xff]  }
 0x334   : > { %v3209_v49 = vpop.f32.mrf.mxu0  ;;  %5328 = vmatprep.subr.bf16.mxu1 %v16277_v50  ;;  %v16320_v31 = vld [vmem:[%s23922_s2 + $0x2f0] ss:$8 sps:$4 sm:$0xff]  }
 0x335   : > { %v16331_v49 = vld [vmem:[%s23922_s2 + $0x2d4] ss:$8 sps:$4 sm:$0xff]  }
 0x336   : > { %v3212_v35 = vpop.f32.mrf.mxu0  ;;  %3403 = vmatmul.mubr.bf16.gmra.mxu0 %v16272_v27 }
 0x337   : > { %5329 = vmatpush2.bf16.msra.mxu1 %v16275_v39  ;;  %3410 = vmatprep.mubr.bf16.mxu0 %v16283_v3  ;;  %v16323_v39 = vld [vmem:[%s23922_s2 + $0x2e0] ss:$8 sps:$4 sm:$0xff]  }
 0x338   : > { %v3214_v60 = vpop.f32.mrf.mxu0  ;;  %5330 = vmatprep.subr.bf16.mxu1 %v16280_v51 }
 0x339   : > { %v16337_v60 = vld [vmem:[%s23925_s5 + $0x2b4] ss:$8 sps:$4 sm:$0xff]  }
 0x33a   : > { %v3215_v29 = vpop.f32.mrf.mxu0 }
 0x33b   : > { %v3639_v0 = vpack.c.bf16 %v3215_v29, %v3212_v35  ;;  %5331 = vmatpush2.bf16.msra.mxu1 %v16278_v14  ;;  %v16326_v35 = vld [vmem:[%s23925_s5 + $0x2a0] ss:$8 sps:$4 sm:$0xff]   ;;  %v16329_v14 = vld [vmem:[%s23922_s2 + $0x2d0] ss:$8 sps:$4 sm:$0xff]   ;;  %v16334_v29 = vld [vmem:[%s23922_s2 + $0x2c4] ss:$8 sps:$4 sm:$0xff]  }
 0x33c   : > { %v3217_v59 = vpop.f32.mrf.mxu0  ;;  %5373 = vmatprep.subr.bf16.mxu1 %v16286_v36 }
 0x33d   : > { %5332 = vmatprep.mubr.bf16.mxu1 %v3639_v0  ;;  %v16332_v0 = vld [vmem:[%s23922_s2 + $0x2c0] ss:$8 sps:$4 sm:$0xff]   ;;  %v16335_v59 = vld [vmem:[%s23925_s5 + $0x2b0] ss:$8 sps:$4 sm:$0xff]  }
 0x33e   : > { %v3220_v33 = vpop.f32.mrf.mxu0  ;;  %3411 = vmatmul.mubr.bf16.gmra.mxu0 %v16281_v22  ;;  %5333 = vmatmul.mubr.bf16.vlgmr.msra.gmra.mxu1 %v3635_v54 }
 0x33f   : > { %5374 = vmatpush1.bf16.msra.mxu1 %v16284_v4  ;;  %3418 = vmatprep.mubr.bf16.mxu0 %v16292_v20  ;;  %v16340_v20 = vld [vmem:[%s23922_s2 + $0x2b4] ss:$8 sps:$4 sm:$0xff]  }
 0x340   : > { %v3222_v42 = vpop.f32.mrf.mxu0  ;;  %5375 = vmatprep.subr.bf16.mxu1 %v16289_v7  ;;  %v16338_v7 = vld [vmem:[%s23922_s2 + $0x2b0] ss:$8 sps:$4 sm:$0xff]  }
 0x341   : > { %v16343_v42 = vld [vmem:[%s23922_s2 + $0x2a4] ss:$8 sps:$4 sm:$0xff]  }
 0x342   : > { %v3223_v25 = vpop.f32.mrf.mxu0 }
 0x343   : > { %v3640_v8 = vpack.c.bf16 %v3223_v25, %v3220_v33  ;;  %5376 = vmatpush1.bf16.msra.mxu1 %v16287_v53  ;;  %v16346_v33 = vld [vmem:[%s23925_s5 + $0x2c4] ss:$8 sps:$4 sm:$0xff]   ;;  %v16341_v25 = vld [vmem:[%s23922_s2 + $0x2a0] ss:$8 sps:$4 sm:$0xff]  }
 0x344   : > { %v3225_v48 = vpop.f32.mrf.mxu0  ;;  %5377 = vmatprep.subr.bf16.mxu1 %v16295_v32 }
 0x345   : > { %5342 = vmatprep.mubr.bf16.mxu1 %v3640_v8  ;;  %v16349_v8 = vld [vmem:[%s23922_s2 + $0x294] ss:$8 sps:$4 sm:$0xff]  }
 0x346   : > { %v3228_v37 = vpop.f32.mrf.mxu0  ;;  %3419 = vmatmul.mubr.bf16.gmra.mxu0 %v16290_v63  ;;  %5343 = vmatmul.mubr.bf16.gmra.mxu1 %v3636_v47  ;;  %v16347_v47 = vld [vmem:[%s23922_s2 + $0x290] ss:$8 sps:$4 sm:$0xff]   ;;  %v16355_v48 = vld [vmem:[%s23925_s5 + $0x2d4] ss:$8 sps:$4 sm:$0xff]  }
 0x347   : > { %5378 = vmatpush1.bf16.msra.mxu1 %v16293_v24  ;;  %3426 = vmatprep.mubr.bf16.mxu0 %v16301_v15  ;;  %v16344_v15 = vld [vmem:[%s23925_s5 + $0x2c0] ss:$8 sps:$4 sm:$0xff]  }
 0x348   : > { %v3230_v18 = vpop.f32.mrf.mxu0  ;;  %5379 = vmatprep.subr.bf16.mxu1 %v16298_v52 }
 0x349   : > { %v16350_v18 = vld [vmem:[%s23922_s2 + $0x280] ss:$8 sps:$4 sm:$0xff]  }
 0x34a   : > { %v3231_v61 = vpop.f32.mrf.mxu0 }
 0x34b   : > { %v3641_v19 = vpack.c.bf16 %v3231_v61, %v3228_v37  ;;  %5380 = vmatpush1.bf16.msra.mxu1 %v16296_v5  ;;  %v16352_v37 = vld [vmem:[%s23922_s2 + $0x284] ss:$8 sps:$4 sm:$0xff]   ;;  %v16358_v61 = vld [vmem:[%s23922_s2 + $0x374] ss:$8 sps:$4 sm:$0xff]  }
 0x34c   : > { %v3233_v34 = vpop.f32.mrf.mxu0  ;;  %5381 = vmatprep.subr.bf16.mxu1 %v16304_v55 }
 0x34d   : > { %5352 = vmatprep.mubr.bf16.mxu1 %v3641_v19  ;;  %v16353_v19 = vld [vmem:[%s23925_s5 + $0x2d0] ss:$8 sps:$4 sm:$0xff]  }
 0x34e   : > { %v3236_v26 = vpop.f32.mrf.mxu0  ;;  %3427 = vmatmul.mubr.bf16.gmra.mxu0 %v16299_v10  ;;  %5353 = vmatmul.mubr.bf16.gmra.mxu1 %v3637_v16  ;;  %v16364_v16 = vld [vmem:[%s23925_s5 + $0x2e4] ss:$8 sps:$4 sm:$0xff]  }
 0x34f   : > { %5382 = vmatpush1.bf16.msra.mxu1 %v16302_v45  ;;  %3434 = vmatprep.mubr.bf16.mxu0 %v16310_v12  ;;  %v16356_v12 = vld [vmem:[%s23922_s2 + $0x370] ss:$8 sps:$4 sm:$0xff]  }
 0x350   : > { %v3238_v41 = vpop.f32.mrf.mxu0  ;;  %5383 = vmatprep.subr.bf16.mxu1 %v16307_v23 }
 0x351   : > { %v16359_v41 = vld [vmem:[%s23922_s2 + $0x360] ss:$8 sps:$4 sm:$0xff]  }
 0x352   : > { %v3239_v44 = vpop.f32.mrf.mxu0 }
 0x353   : > { %v3642_v30 = vpack.c.bf16 %v3239_v44, %v3236_v26  ;;  %5384 = vmatpush1.bf16.msra.mxu1 %v16305_v58  ;;  %v16361_v26 = vld [vmem:[%s23922_s2 + $0x364] ss:$8 sps:$4 sm:$0xff]   ;;  %v16367_v44 = vld [vmem:[%s23922_s2 + $0x354] ss:$8 sps:$4 sm:$0xff]  }
 0x354   : > { %v3241_v40 = vpop.f32.mrf.mxu0  ;;  %5385 = vmatprep.subr.bf16.mxu1 %v16313_v2 }
 0x355   : > { %5362 = vmatprep.mubr.bf16.mxu1 %v3642_v30  ;;  %v16362_v30 = vld [vmem:[%s23925_s5 + $0x2e0] ss:$8 sps:$4 sm:$0xff]  }
 0x356   : > { %v19325_v13 = vpop.f32.mrf.mxu0  ;;  %3435 = vmatmul.mubr.bf16.gmra.mxu0 %v16308_v28  ;;  %5363 = vmatmul.mubr.bf16.gmra.mxu1 %v3638_v43  ;;  %v16373_v43 = vld [vmem:[%s23925_s5 + $0x2f4] ss:$8 sps:$4 sm:$0xff]  }
 0x357   : > { %5386 = vmatpush1.bf16.msra.mxu1 %v16311_v38  ;;  %3442 = vmatprep.mubr.bf16.mxu0 %v16319_v56  ;;  %v16365_v56 = vld [vmem:[%s23922_s2 + $0x350] ss:$8 sps:$4 sm:$0xff]  }
 0x358   : > { %v3246_v62 = vpop.f32.mrf.mxu0  ;;  %5387 = vmatprep.subr.bf16.mxu1 %v16316_v46 }
 0x359   : > { %v16368_v62 = vld [vmem:[%s23922_s2 + $0x340] ss:$8 sps:$4 sm:$0xff]  }
 0x35a   : > { %v19333_v11 = vpop.f32.mrf.mxu0 }
 0x35b   : > { %5388 = vmatpush1.bf16.msra.mxu1 %v16314_v6  ;;  %v3643_v34 = vpack.c.bf16 %v19333_v11, %v19325_v13  ;;  %v16370_v13 = vld [vmem:[%s23922_s2 + $0x344] ss:$8 sps:$4 sm:$0xff]   ;;  %v16376_v11 = vld [vmem:[%s23922_s2 + $0x334] ss:$8 sps:$4 sm:$0xff]  }
 0x35c   : > { %v3249_v50 = vpop.f32.mrf.mxu0  ;;  %5389 = vmatprep.subr.bf16.mxu1 %v16322_v1 }
 0x35d   : > { %v16374_v50 = vld [vmem:[%s23922_s2 + $0x330] ss:$8 sps:$4 sm:$0xff]  }
 0x35e   : > { %v19347_v27 = vpop.f32.mrf.mxu0  ;;  %3443 = vmatmul.mubr.bf16.gmra.mxu0 %v16317_v9 }
 0x35f   : > { %5390 = vmatpush2.bf16.msra.mxu1 %v16320_v31  ;;  %3450 = vmatprep.mubr.bf16.mxu0 %v16328_v21  ;;  %v16371_v31 = vld [vmem:[%s23925_s5 + $0x2f0] ss:$8 sps:$4 sm:$0xff]  }
 0x360   : > { %v3254_v3 = vpop.f32.mrf.mxu0  ;;  %5391 = vmatprep.subr.bf16.mxu1 %v16325_v57  ;;  %v16382_v57 = vld [vmem:[%s23925_s5 + $0x304] ss:$8 sps:$4 sm:$0xff]  }
 0x361   : > { %v16379_v3 = vld [vmem:[%s23922_s2 + $0x324] ss:$8 sps:$4 sm:$0xff]  }
 0x362   : > { %v19355_v51 = vpop.f32.mrf.mxu0 }
 0x363   : > { %5392 = vmatpush2.bf16.msra.mxu1 %v16323_v39  ;;  %v3644_v40 = vpack.c.bf16 %v19355_v51, %v19347_v27  ;;  %v16377_v51 = vld [vmem:[%s23922_s2 + $0x320] ss:$8 sps:$4 sm:$0xff]  }
 0x364   : > { %v3257_v36 = vpop.f32.mrf.mxu0  ;;  %5393 = vmatprep.subr.bf16.mxu1 %v16331_v49 }
 0x365   : > { %v16380_v36 = vld [vmem:[%s23925_s5 + $0x300] ss:$8 sps:$4 sm:$0xff]  }
 0x366   : > { %v19369_v22 = vpop.f32.mrf.mxu0  ;;  %3451 = vmatmul.mubr.bf16.gmra.mxu0 %v16326_v35 }
 0x367   : > { %5394 = vmatpush2.bf16.msra.mxu1 %v16329_v14  ;;  %3458 = vmatprep.mubr.bf16.mxu0 %v16337_v60  ;;  %v16385_v14 = vld [vmem:[%s23922_s2 + $0x314] ss:$8 sps:$4 sm:$0xff]  }
 0x368   : > { %v3262_v4 = vpop.f32.mrf.mxu0  ;;  %5395 = vmatprep.subr.bf16.mxu1 %v16334_v29 }
 0x36a   : > { %v19377_v54 = vpop.f32.mrf.mxu0 }
 0x36b   : > { %5396 = vmatpush2.bf16.msra.mxu1 %v16332_v0  ;;  %v3645_v27 = vpack.c.bf16 %v19377_v54, %v19369_v22  ;;  %v16383_v22 = vld [vmem:[%s23922_s2 + $0x310] ss:$8 sps:$4 sm:$0xff]   ;;  %v16391_v0 = vld [vmem:[%s23925_s5 + $0x314] ss:$8 sps:$4 sm:$0xff]   ;;  %v16388_v54 = vld [vmem:[%s23922_s2 + $0x304] ss:$8 sps:$4 sm:$0xff]  }
 0x36c   : > { %v3265_v53 = vpop.f32.mrf.mxu0  ;;  %5397 = vmatprep.subr.bf16.mxu1 %v16340_v20 }
 0x36d   : > { %v16394_v53 = vld [vmem:[%s23922_s2 + $0x3f4] ss:$8 sps:$4 sm:$0xff]  }
 0x36e   : > { %v19391_v32 = vpop.f32.mrf.mxu0  ;;  %3459 = vmatmul.mubr.bf16.gmra.mxu0 %v16335_v59 }
 0x36f   : > { %5398 = vmatpush2.bf16.msra.mxu1 %v16338_v7  ;;  %3466 = vmatprep.mubr.bf16.mxu0 %v16346_v33  ;;  %v16386_v7 = vld [vmem:[%s23922_s2 + $0x300] ss:$8 sps:$4 sm:$0xff]  }
 0x370   : > { %v3270_v63 = vpop.f32.mrf.mxu0  ;;  %5399 = vmatprep.subr.bf16.mxu1 %v16343_v42 }
 0x371   : > { %v16400_v63 = vld [vmem:[%s23925_s5 + $0x324] ss:$8 sps:$4 sm:$0xff]  }
 0x372   : > { %v19399_v24 = vpop.f32.mrf.mxu0 }
 0x373   : > { %5400 = vmatpush2.bf16.msra.mxu1 %v16341_v25  ;;  %v3646_v4 = vpack.c.bf16 %v19399_v24, %v19391_v32  ;;  %v16389_v32 = vld [vmem:[%s23925_s5 + $0x310] ss:$8 sps:$4 sm:$0xff]   ;;  %v16397_v24 = vld [vmem:[%s23922_s2 + $0x3e4] ss:$8 sps:$4 sm:$0xff]  }
 0x374   : > { %v3273_v52 = vpop.f32.mrf.mxu0  ;;  %5401 = vmatprep.subr.bf16.mxu1 %v16349_v8  ;;  %v16392_v25 = vld [vmem:[%s23922_s2 + $0x3f0] ss:$8 sps:$4 sm:$0xff]  }
 0x375   : > { %v16403_v52 = vld [vmem:[%s23922_s2 + $0x3d4] ss:$8 sps:$4 sm:$0xff]  }
 0x376   : > { %v3276_v5 = vpop.f32.mrf.mxu0  ;;  %3467 = vmatmul.mubr.bf16.gmra.mxu0 %v16344_v15 }
 0x377   : > { %5402 = vmatpush2.bf16.msra.mxu1 %v16347_v47  ;;  %3474 = vmatprep.mubr.bf16.mxu0 %v16355_v48  ;;  %v16395_v47 = vld [vmem:[%s23922_s2 + $0x3e0] ss:$8 sps:$4 sm:$0xff]  }
 0x378   : > { %v3278_v55 = vpop.f32.mrf.mxu0  ;;  %5403 = vmatprep.subr.bf16.mxu1 %v16352_v37 }
 0x379   : > { %v16409_v55 = vld [vmem:[%s23925_s5 + $0x334] ss:$8 sps:$4 sm:$0xff]  }
 0x37a   : > { %v3279_v10 = vpop.f32.mrf.mxu0 }
 0x37b   : > { %v3647_v45 = vpack.c.bf16 %v3279_v10, %v3276_v5  ;;  %5404 = vmatpush2.bf16.msra.mxu1 %v16350_v18  ;;  %v16398_v5 = vld [vmem:[%s23925_s5 + $0x320] ss:$8 sps:$4 sm:$0xff]   ;;  %v16401_v18 = vld [vmem:[%s23922_s2 + $0x3d0] ss:$8 sps:$4 sm:$0xff]   ;;  %v16406_v10 = vld [vmem:[%s23922_s2 + $0x3c4] ss:$8 sps:$4 sm:$0xff]  }
 0x37c   : > { %v3281_v23 = vpop.f32.mrf.mxu0  ;;  %5446 = vmatprep.subr.bf16.mxu1 %v16358_v61 }
 0x37d   : > { %5405 = vmatprep.mubr.bf16.mxu1 %v3647_v45  ;;  %v16404_v45 = vld [vmem:[%s23922_s2 + $0x3c0] ss:$8 sps:$4 sm:$0xff]   ;;  %v16407_v23 = vld [vmem:[%s23925_s5 + $0x330] ss:$8 sps:$4 sm:$0xff]  }
 0x37e   : > { %v3284_v58 = vpop.f32.mrf.mxu0  ;;  %3475 = vmatmul.mubr.bf16.gmra.mxu0 %v16353_v19  ;;  %5406 = vmatmul.mubr.bf16.vlgmr.msra.gmra.mxu1 %v3643_v34 }
 0x37f   : > { %5447 = vmatpush1.bf16.msra.mxu1 %v16356_v12  ;;  %3482 = vmatprep.mubr.bf16.mxu0 %v16364_v16  ;;  %v16412_v16 = vld [vmem:[%s23922_s2 + $0x3b4] ss:$8 sps:$4 sm:$0xff]  }
 0x380   : > { %v3286_v2 = vpop.f32.mrf.mxu0  ;;  %5448 = vmatprep.subr.bf16.mxu1 %v16361_v26  ;;  %v16410_v26 = vld [vmem:[%s23922_s2 + $0x3b0] ss:$8 sps:$4 sm:$0xff]  }
 0x381   : > { %v16415_v2 = vld [vmem:[%s23922_s2 + $0x3a4] ss:$8 sps:$4 sm:$0xff]  }
 0x382   : > { %v3287_v28 = vpop.f32.mrf.mxu0 }
 0x383   : > { %v3648_v38 = vpack.c.bf16 %v3287_v28, %v3284_v58  ;;  %5449 = vmatpush1.bf16.msra.mxu1 %v16359_v41  ;;  %v16418_v58 = vld [vmem:[%s23925_s5 + $0x344] ss:$8 sps:$4 sm:$0xff]   ;;  %v16413_v28 = vld [vmem:[%s23922_s2 + $0x3a0] ss:$8 sps:$4 sm:$0xff]  }
 0x384   : > { %v3289_v46 = vpop.f32.mrf.mxu0  ;;  %5450 = vmatprep.subr.bf16.mxu1 %v16367_v44 }
 0x385   : > { %5415 = vmatprep.mubr.bf16.mxu1 %v3648_v38  ;;  %v16421_v38 = vld [vmem:[%s23922_s2 + $0x394] ss:$8 sps:$4 sm:$0xff]  }
 0x386   : > { %v3292_v6 = vpop.f32.mrf.mxu0  ;;  %3483 = vmatmul.mubr.bf16.gmra.mxu0 %v16362_v30  ;;  %5416 = vmatmul.mubr.bf16.gmra.mxu1 %v3644_v40  ;;  %v16419_v40 = vld [vmem:[%s23922_s2 + $0x390] ss:$8 sps:$4 sm:$0xff]   ;;  %v16427_v46 = vld [vmem:[%s23925_s5 + $0x354] ss:$8 sps:$4 sm:$0xff]  }
 0x387   : > { %5451 = vmatpush1.bf16.msra.mxu1 %v16365_v56  ;;  %3490 = vmatprep.mubr.bf16.mxu0 %v16373_v43  ;;  %v16416_v43 = vld [vmem:[%s23925_s5 + $0x340] ss:$8 sps:$4 sm:$0xff]  }
 0x388   : > { %v3294_v1 = vpop.f32.mrf.mxu0  ;;  %5452 = vmatprep.subr.bf16.mxu1 %v16370_v13 }
 0x389   : > { %v16422_v1 = vld [vmem:[%s23922_s2 + $0x380] ss:$8 sps:$4 sm:$0xff]  }
 0x38a   : > { %v3295_v9 = vpop.f32.mrf.mxu0 }
 0x38b   : > { %v3649_v21 = vpack.c.bf16 %v3295_v9, %v3292_v6  ;;  %5453 = vmatpush1.bf16.msra.mxu1 %v16368_v62  ;;  %v16424_v6 = vld [vmem:[%s23922_s2 + $0x384] ss:$8 sps:$4 sm:$0xff]   ;;  %v16430_v9 = vld [vmem:[%s23922_s2 + $0x474] ss:$8 sps:$4 sm:$0xff]  }
 0x38c   : > { %v3297_v39 = vpop.f32.mrf.mxu0  ;;  %5454 = vmatprep.subr.bf16.mxu1 %v16376_v11 }
 0x38d   : > { %5425 = vmatprep.mubr.bf16.mxu1 %v3649_v21  ;;  %v16425_v21 = vld [vmem:[%s23925_s5 + $0x350] ss:$8 sps:$4 sm:$0xff]  }
 0x38e   : > { %v3300_v49 = vpop.f32.mrf.mxu0  ;;  %3491 = vmatmul.mubr.bf16.gmra.mxu0 %v16371_v31  ;;  %5426 = vmatmul.mubr.bf16.gmra.mxu1 %v3645_v27  ;;  %v16436_v27 = vld [vmem:[%s23925_s5 + $0x364] ss:$8 sps:$4 sm:$0xff]  }
 0x38f   : > { %5455 = vmatpush1.bf16.msra.mxu1 %v16374_v50  ;;  %3498 = vmatprep.mubr.bf16.mxu0 %v16382_v57  ;;  %v16428_v57 = vld [vmem:[%s23922_s2 + $0x470] ss:$8 sps:$4 sm:$0xff]  }
 0x390   : > { %v3302_v35 = vpop.f32.mrf.mxu0  ;;  %5456 = vmatprep.subr.bf16.mxu1 %v16379_v3 }
 0x391   : > { %v16431_v35 = vld [vmem:[%s23922_s2 + $0x460] ss:$8 sps:$4 sm:$0xff]  }
 0x392   : > { %v3303_v60 = vpop.f32.mrf.mxu0 }
 0x393   : > { %v3650_v29 = vpack.c.bf16 %v3303_v60, %v3300_v49  ;;  %5457 = vmatpush1.bf16.msra.mxu1 %v16377_v51  ;;  %v16433_v49 = vld [vmem:[%s23922_s2 + $0x464] ss:$8 sps:$4 sm:$0xff]  }
 0x394   : > { %v3305_v20 = vpop.f32.mrf.mxu0  ;;  %5458 = vmatprep.subr.bf16.mxu1 %v16385_v14 }
 0x395   : > { %5435 = vmatprep.mubr.bf16.mxu1 %v3650_v29  ;;  %v16445_v20 = vld [vmem:[%s23925_s5 + $0x374] ss:$8 sps:$4 sm:$0xff]  }
 0x396   : > { %v19493_v59 = vpop.f32.mrf.mxu0  ;;  %3499 = vmatmul.mubr.bf16.gmra.mxu0 %v16380_v36  ;;  %5436 = vmatmul.mubr.bf16.gmra.mxu1 %v3646_v4  ;;  %v16439_v36 = vld [vmem:[%s23922_s2 + $0x454] ss:$8 sps:$4 sm:$0xff]   ;;  %v16437_v4 = vld [vmem:[%s23922_s2 + $0x450] ss:$8 sps:$4 sm:$0xff]  }
 0x397   : > { %5459 = vmatpush1.bf16.msra.mxu1 %v16383_v22  ;;  %3506 = vmatprep.mubr.bf16.mxu0 %v16391_v0  ;;  %v16434_v22 = vld [vmem:[%s23925_s5 + $0x360] ss:$8 sps:$4 sm:$0xff]  }
 0x398   : > { %v3310_v33 = vpop.f32.mrf.mxu0  ;;  %5460 = vmatprep.subr.bf16.mxu1 %v16388_v54 }
 0x399   : > { %v16442_v33 = vld [vmem:[%s23922_s2 + $0x444] ss:$8 sps:$4 sm:$0xff]  }
 0x39a   : > { %v19501_v42 = vpop.f32.mrf.mxu0 }
 0x39b   : > { %5461 = vmatpush1.bf16.msra.mxu1 %v16386_v7  ;;  %v3651_v39 = vpack.c.bf16 %v19501_v42, %v19493_v59  ;;  %v16440_v42 = vld [vmem:[%s23922_s2 + $0x440] ss:$8 sps:$4 sm:$0xff]  }
 0x39c   : > { %v3313_v8 = vpop.f32.mrf.mxu0  ;;  %5462 = vmatprep.subr.bf16.mxu1 %v16394_v53 }
 0x39e   : > { %v19515_v15 = vpop.f32.mrf.mxu0  ;;  %3507 = vmatmul.mubr.bf16.gmra.mxu0 %v16389_v32 }
 0x39f   : > { %5463 = vmatpush2.bf16.msra.mxu1 %v16392_v25  ;;  %3514 = vmatprep.mubr.bf16.mxu0 %v16400_v63  ;;  %v16448_v63 = vld [vmem:[%s23922_s2 + $0x434] ss:$8 sps:$4 sm:$0xff]  }
 0x3a0   : > { %v3318_v48 = vpop.f32.mrf.mxu0  ;;  %5464 = vmatprep.subr.bf16.mxu1 %v16397_v24  ;;  %v16443_v24 = vld [vmem:[%s23925_s5 + $0x370] ss:$8 sps:$4 sm:$0xff]  }
 0x3a1   : > { %v16454_v48 = vld [vmem:[%s23925_s5 + $0x384] ss:$8 sps:$4 sm:$0xff]  }
 0x3a2   : > { %v19523_v37 = vpop.f32.mrf.mxu0 }
 0x3a3   : > { %5465 = vmatpush2.bf16.msra.mxu1 %v16395_v47  ;;  %v3652_v54 = vpack.c.bf16 %v19523_v37, %v19515_v15  ;;  %v16446_v47 = vld [vmem:[%s23922_s2 + $0x430] ss:$8 sps:$4 sm:$0xff]  }
 0x3a4   : > { %v3321_v61 = vpop.f32.mrf.mxu0  ;;  %5466 = vmatprep.subr.bf16.mxu1 %v16403_v52 }
 0x3a5   : > { %v16449_v61 = vld [vmem:[%s23922_s2 + $0x420] ss:$8 sps:$4 sm:$0xff]  }
 0x3a6   : > { %v19537_v19 = vpop.f32.mrf.mxu0  ;;  %3515 = vmatmul.mubr.bf16.gmra.mxu0 %v16398_v5 }
 0x3a7   : > { %5467 = vmatpush2.bf16.msra.mxu1 %v16401_v18  ;;  %3522 = vmatprep.mubr.bf16.mxu0 %v16409_v55  ;;  %v16451_v18 = vld [vmem:[%s23922_s2 + $0x424] ss:$8 sps:$4 sm:$0xff]  }
 0x3a8   : > { %v3326_v12 = vpop.f32.mrf.mxu0  ;;  %5468 = vmatprep.subr.bf16.mxu1 %v16406_v10 }
 0x3aa   : > { %v19545_v34 = vpop.f32.mrf.mxu0 }
 0x3ab   : > { %5469 = vmatpush2.bf16.msra.mxu1 %v16404_v45  ;;  %v3653_v52 = vpack.c.bf16 %v19545_v34, %v19537_v19  ;;  %v16457_v45 = vld [vmem:[%s23922_s2 + $0x414] ss:$8 sps:$4 sm:$0xff]  }
 0x3ac   : > { %v3329_v41 = vpop.f32.mrf.mxu0  ;;  %5470 = vmatprep.subr.bf16.mxu1 %v16412_v16  ;;  %v16452_v16 = vld [vmem:[%s23925_s5 + $0x380] ss:$8 sps:$4 sm:$0xff]  }
 0x3ae   : > { %v19559_v44 = vpop.f32.mrf.mxu0  ;;  %3523 = vmatmul.mubr.bf16.gmra.mxu0 %v16407_v23  ;;  %v16455_v23 = vld [vmem:[%s23922_s2 + $0x410] ss:$8 sps:$4 sm:$0xff]  }
 0x3af   : > { %5471 = vmatpush2.bf16.msra.mxu1 %v16410_v26  ;;  %3530 = vmatprep.mubr.bf16.mxu0 %v16418_v58  ;;  %v16463_v26 = vld [vmem:[%s23925_s5 + $0x394] ss:$8 sps:$4 sm:$0xff]  }
 0x3b0   : > { %v3334_v30 = vpop.f32.mrf.mxu0  ;;  %5472 = vmatprep.subr.bf16.mxu1 %v16415_v2 }
 0x3b2   : > { %v19567_v56 = vpop.f32.mrf.mxu0 }
 0x3b3   : > { %5473 = vmatpush2.bf16.msra.mxu1 %v16413_v28  ;;  %v3654_v58 = vpack.c.bf16 %v19567_v56, %v19559_v44  ;;  %v16460_v28 = vld [vmem:[%s23922_s2 + $0x404] ss:$8 sps:$4 sm:$0xff]  }
 0x3b4   : > { %v3337_v13 = vpop.f32.mrf.mxu0  ;;  %5474 = vmatprep.subr.bf16.mxu1 %v16421_v38  ;;  %v16458_v38 = vld [vmem:[%s23922_s2 + $0x400] ss:$8 sps:$4 sm:$0xff]  }
 0x3b5   : > { %v16464_v13 = vld [vmem:[%s23922_s2 + $0x4f0] ss:$8 sps:$4 sm:$0xff]  }
 0x3b6   : > { %v3340_v62 = vpop.f32.mrf.mxu0  ;;  %3531 = vmatmul.mubr.bf16.gmra.mxu0 %v16416_v43  ;;  %v16466_v43 = vld [vmem:[%s23922_s2 + $0x4f4] ss:$8 sps:$4 sm:$0xff]  }
 0x3b7   : > { %5475 = vmatpush2.bf16.msra.mxu1 %v16419_v40  ;;  %3538 = vmatprep.mubr.bf16.mxu0 %v16427_v46  ;;  %v16461_v46 = vld [vmem:[%s23925_s5 + $0x390] ss:$8 sps:$4 sm:$0xff]  }
 0x3b8   : > { %v3342_v11 = vpop.f32.mrf.mxu0  ;;  %5476 = vmatprep.subr.bf16.mxu1 %v16424_v6  ;;  %v16472_v6 = vld [vmem:[%s23925_s5 + $0x3a4] ss:$8 sps:$4 sm:$0xff]  }
 0x3b9   : > { %v16469_v11 = vld [vmem:[%s23922_s2 + $0x4e4] ss:$8 sps:$4 sm:$0xff]  }
 0x3ba   : > { %v3343_v31 = vpop.f32.mrf.mxu0 }
 0x3bb   : > { %v3655_v50 = vpack.c.bf16 %v3343_v31, %v3340_v62  ;;  %5477 = vmatpush2.bf16.msra.mxu1 %v16422_v1  ;;  %v16467_v31 = vld [vmem:[%s23922_s2 + $0x4e0] ss:$8 sps:$4 sm:$0xff]  }
 0x3bc   : > { %v3345_v3 = vpop.f32.mrf.mxu0  ;;  %5519 = vmatprep.subr.bf16.mxu1 %v16430_v9 }
 0x3bd   : > { %5478 = vmatprep.mubr.bf16.mxu1 %v3655_v50  ;;  %v16473_v3 = vld [vmem:[%s23922_s2 + $0x4d0] ss:$8 sps:$4 sm:$0xff]  }
 0x3be   : > { %v3348_v51 = vpop.f32.mrf.mxu0  ;;  %3539 = vmatmul.mubr.bf16.gmra.mxu0 %v16425_v21  ;;  %5479 = vmatmul.mubr.bf16.vlgmr.msra.gmra.mxu1 %v3651_v39  ;;  %v19604_v14 = vpop.f32.mrf.mxu1  ;;  %v16470_v39 = vld [vmem:[%s23925_s5 + $0x3a0] ss:$8 sps:$4 sm:$0xff]  }
 0x3bf   : > { %5520 = vmatpush1.bf16.msra.mxu1 %v16428_v57  ;;  %3546 = vmatprep.mubr.bf16.mxu0 %v16436_v27  ;;  %v16475_v57 = vld [vmem:[%s23922_s2 + $0x4d4] ss:$8 sps:$4 sm:$0xff]  }
 0x3c0   : > { %v3350_v60 = vpop.f32.mrf.mxu0  ;;  %5521 = vmatprep.subr.bf16.mxu1 %v16433_v49  ;;  %v19620_v59 = vpop.f32.mrf.mxu1  ;;  %v16481_v49 = vld [vmem:[%s23925_s5 + $0x3b4] ss:$8 sps:$4 sm:$0xff]  }
 0x3c1   : > { %v16478_v60 = vld [vmem:[%s23922_s2 + $0x4c4] ss:$8 sps:$4 sm:$0xff]  }
 0x3c2   : > { %v3351_v29 = vpop.f32.mrf.mxu0  ;;  %v19628_v32 = vpop.f32.mrf.mxu1 }
 0x3c3   : > { %v3656_v0 = vpack.c.bf16 %v3351_v29, %v3348_v51  ;;  %5522 = vmatpush1.bf16.msra.mxu1 %v16431_v35  ;;  %v16476_v29 = vld [vmem:[%s23922_s2 + $0x4c0] ss:$8 sps:$4 sm:$0xff]  }
 0x3c4   : > { %v3353_v7 = vpop.f32.mrf.mxu0  ;;  %5523 = vmatprep.subr.bf16.mxu1 %v16439_v36  ;;  %v19644_v37 = vpop.f32.mrf.mxu1 }
 0x3c5   : > { %5488 = vmatprep.mubr.bf16.mxu1 %v3656_v0  ;;  %v16482_v7 = vld [vmem:[%s23922_s2 + $0x4b0] ss:$8 sps:$4 sm:$0xff]  }
 0x3c6   : > { %v3356_v53 = vpop.f32.mrf.mxu0  ;;  %3547 = vmatmul.mubr.bf16.gmra.mxu0 %v16434_v22  ;;  %5489 = vmatmul.mubr.bf16.gmra.mxu1 %v3652_v54  ;;  %v19652_v10 = vpop.f32.mrf.mxu1  ;;  %v16479_v54 = vld [vmem:[%s23925_s5 + $0x3b0] ss:$8 sps:$4 sm:$0xff]  }
 0x3c7   : > { %5524 = vmatpush1.bf16.msra.mxu1 %v16437_v4  ;;  %3554 = vmatprep.mubr.bf16.mxu0 %v16445_v20  ;;  %v16484_v4 = vld [vmem:[%s23922_s2 + $0x4b4] ss:$8 sps:$4 sm:$0xff]  }
 0x3c8   : > { %v3358_v25 = vpop.f32.mrf.mxu0  ;;  %5525 = vmatprep.subr.bf16.mxu1 %v16442_v33  ;;  %v19668_v41 = vpop.f32.mrf.mxu1  ;;  %v16490_v33 = vld [vmem:[%s23925_s5 + $0x3c4] ss:$8 sps:$4 sm:$0xff]  }
 0x3c9   : > { %v16487_v25 = vld [vmem:[%s23922_s2 + $0x4a4] ss:$8 sps:$4 sm:$0xff]  }
 0x3ca   : > { %v3359_v8 = vpop.f32.mrf.mxu0  ;;  %v19678_v44 = vpop.f32.mrf.mxu1 }
 0x3cb   : > { %v3657_v15 = vpack.c.bf16 %v3359_v8, %v3356_v53  ;;  %5526 = vmatpush1.bf16.msra.mxu1 %v16440_v42  ;;  %v16485_v8 = vld [vmem:[%s23922_s2 + $0x4a0] ss:$8 sps:$4 sm:$0xff]  }
 0x3cc   : > { %v3361_v5 = vpop.f32.mrf.mxu0  ;;  %5527 = vmatprep.subr.bf16.mxu1 %v16448_v63  ;;  %v19694_v62 = vpop.f32.mrf.mxu1 }
 0x3cd   : > { %5498 = vmatprep.mubr.bf16.mxu1 %v3657_v15  ;;  %v16491_v5 = vld [vmem:[%s23922_s2 + $0x490] ss:$8 sps:$4 sm:$0xff]  }
 0x3ce   : > { %v3364_v55 = vpop.f32.mrf.mxu0  ;;  %3555 = vmatmul.mubr.bf16.gmra.mxu0 %v16443_v24  ;;  %5499 = vmatmul.mubr.bf16.gmra.mxu1 %v3653_v52  ;;  %v19704_v21 = vpop.f32.mrf.mxu1  ;;  %v16488_v52 = vld [vmem:[%s23925_s5 + $0x3c0] ss:$8 sps:$4 sm:$0xff]  }
 0x3cf   : > { %5528 = vmatpush1.bf16.msra.mxu1 %v16446_v47  ;;  %3562 = vmatprep.mubr.bf16.mxu0 %v16454_v48  ;;  %v16493_v47 = vld [vmem:[%s23922_s2 + $0x494] ss:$8 sps:$4 sm:$0xff]  }
 0x3d0   : > { %v3366_v19 = vpop.f32.mrf.mxu0  ;;  %5529 = vmatprep.subr.bf16.mxu1 %v16451_v18  ;;  %v19720_v51 = vpop.f32.mrf.mxu1  ;;  %v16499_v18 = vld [vmem:[%s23925_s5 + $0x3d4] ss:$8 sps:$4 sm:$0xff]  }
 0x3d1   : > { %v16496_v19 = vld [vmem:[%s23922_s2 + $0x484] ss:$8 sps:$4 sm:$0xff]  }
 0x3d2   : > { %v3367_v12 = vpop.f32.mrf.mxu0  ;;  %v19730_v22 = vpop.f32.mrf.mxu1 }
 0x3d3   : > { %v3658_v34 = vpack.c.bf16 %v3367_v12, %v3364_v55  ;;  %5530 = vmatpush1.bf16.msra.mxu1 %v16449_v61  ;;  %v16494_v12 = vld [vmem:[%s23922_s2 + $0x480] ss:$8 sps:$4 sm:$0xff]  }
 0x3d4   : > { %v3369_v2 = vpop.f32.mrf.mxu0  ;;  %5531 = vmatprep.subr.bf16.mxu1 %v16457_v45  ;;  %v19746_v53 = vpop.f32.mrf.mxu1 }
 0x3d5   : > { %5508 = vmatprep.mubr.bf16.mxu1 %v3658_v34 }
 0x3d6   : > { %v19673_v30 = vpop.f32.mrf.mxu0  ;;  %3563 = vmatmul.mubr.bf16.gmra.mxu0 %v16452_v16  ;;  %5509 = vmatmul.mubr.bf16.gmra.mxu1 %v3654_v58  ;;  %v19756_v24 = vpop.f32.mrf.mxu1  ;;  %v16497_v58 = vld [vmem:[%s23925_s5 + $0x3d0] ss:$8 sps:$4 sm:$0xff]  }
 0x3d7   : > { %5532 = vmatpush1.bf16.msra.mxu1 %v16455_v23  ;;  %3570 = vmatprep.mubr.bf16.mxu0 %v16463_v26  ;;  %v16502_v23 = vld [vmem:[%s23922_s2 + $0x574] ss:$8 sps:$4 sm:$0xff]  }
 0x3d8   : > { %v3374_v56 = vpop.f32.mrf.mxu0  ;;  %5533 = vmatprep.subr.bf16.mxu1 %v16460_v28  ;;  %v19772_v55 = vpop.f32.mrf.mxu1  ;;  %v16500_v28 = vld [vmem:[%s23922_s2 + $0x570] ss:$8 sps:$4 sm:$0xff]  }
 0x3da   : > { %v19683_v40 = vpop.f32.mrf.mxu0  ;;  %v19780_v16 = vpop.f32.mrf.mxu1 }
 0x3db   : > { %5534 = vmatpush1.bf16.msra.mxu1 %v16458_v38  ;;  %v16508_v38 = vld [vmem:[%s23925_s5 + $0x3e4] ss:$8 sps:$4 sm:$0xff]   ;;  %v3659_v56 = vpack.c.bf16 %v19683_v40, %v19673_v30  ;;  %v16503_v30 = vld [vmem:[%s23922_s2 + $0x560] ss:$8 sps:$4 sm:$0xff]  }
 0x3dc   : > { %v3377_v1 = vpop.f32.mrf.mxu0  ;;  %5535 = vmatprep.subr.bf16.mxu1 %v16466_v43  ;;  %v19796_v43 = vpop.f32.mrf.mxu1 }
 0x3de   : > { %v19699_v9 = vpop.f32.mrf.mxu0  ;;  %3571 = vmatmul.mubr.bf16.gmra.mxu0 %v16461_v46 }
 0x3df   : > { %5536 = vmatpush2.bf16.msra.mxu1 %v16464_v13  ;;  %3578 = vmatprep.mubr.bf16.mxu0 %v16472_v6  ;;  %v16505_v13 = vld [vmem:[%s23922_s2 + $0x564] ss:$8 sps:$4 sm:$0xff]  }
 0x3e0   : > { %v3382_v50 = vpop.f32.mrf.mxu0  ;;  %5537 = vmatprep.subr.bf16.mxu1 %v16469_v11 }
 0x3e1   : > { %v16511_v50 = vld [vmem:[%s23922_s2 + $0x554] ss:$8 sps:$4 sm:$0xff]  }
 0x3e2   : > { %v19709_v27 = vpop.f32.mrf.mxu0 }
 0x3e3   : > { %5538 = vmatpush2.bf16.msra.mxu1 %v16467_v31 }
 0x3e4   : > { %v3385_v35 = vpop.f32.mrf.mxu0  ;;  %5539 = vmatprep.subr.bf16.mxu1 %v16475_v57 }
 0x3e6   : > { %v19725_v36 = vpop.f32.mrf.mxu0  ;;  %3579 = vmatmul.mubr.bf16.gmra.mxu0 %v16470_v39 }
 0x3e7   : > { %5540 = vmatpush2.bf16.msra.mxu1 %v16473_v3  ;;  %3586 = vmatprep.mubr.bf16.mxu0 %v16481_v49 }
 0x3e8   : > { %v3390_v0 = vpop.f32.mrf.mxu0  ;;  %5541 = vmatprep.subr.bf16.mxu1 %v16478_v60  ;;  %v16509_v60 = vld [vmem:[%s23922_s2 + $0x550] ss:$8 sps:$4 sm:$0xff]  }
 0x3ea   : > { %v19735_v20 = vpop.f32.mrf.mxu0 }
 0x3eb   : > { %5542 = vmatpush2.bf16.msra.mxu1 %v16476_v29  ;;  %v3660_v29 = vpack.c.bf16 %v19709_v27, %v19699_v9  ;;  %v16512_v9 = vld [vmem:[%s23922_s2 + $0x540] ss:$8 sps:$4 sm:$0xff]  }
 0x3ec   : > { %v3393_v42 = vpop.f32.mrf.mxu0  ;;  %5543 = vmatprep.subr.bf16.mxu1 %v16484_v4 }
 0x3ee   : > { %v19751_v63 = vpop.f32.mrf.mxu0  ;;  %3587 = vmatmul.mubr.bf16.gmra.mxu0 %v16479_v54 }
 0x3ef   : > { %5544 = vmatpush2.bf16.msra.mxu1 %v16482_v7  ;;  %3594 = vmatprep.mubr.bf16.mxu0 %v16490_v33 }
 0x3f0   : > { %v3398_v15 = vpop.f32.mrf.mxu0  ;;  %5545 = vmatprep.subr.bf16.mxu1 %v16487_v25  ;;  %v16520_v25 = vld [vmem:[%s23922_s2 + $0x534] ss:$8 sps:$4 sm:$0xff]  }
 0x3f2   : > { %v19761_v48 = vpop.f32.mrf.mxu0 }
 0x3f3   : > { %5546 = vmatpush2.bf16.msra.mxu1 %v16485_v8 }
 0x3f4   : > { %v3401_v61 = vpop.f32.mrf.mxu0  ;;  %5547 = vmatprep.subr.bf16.mxu1 %v16493_v47 }
 0x3f5   : > { %v3661_v61 = vpack.c.bf16 %v19735_v20, %v19725_v36  ;;  %v16521_v36 = vld [vmem:[%s23922_s2 + $0x520] ss:$8 sps:$4 sm:$0xff]  }
 0x3f6   : > { %v3404_v45 = vpop.f32.mrf.mxu0  ;;  %3595 = vmatmul.mubr.bf16.gmra.mxu0 %v16488_v52 }
 0x3f7   : > { %5548 = vmatpush2.bf16.msra.mxu1 %v16491_v5  ;;  %3602 = vmatprep.mubr.bf16.mxu0 %v16499_v18  ;;  %v16518_v18 = vld [vmem:[%s23922_s2 + $0x530] ss:$8 sps:$4 sm:$0xff]  }
 0x3f8   : > { %v3406_v34 = vpop.f32.mrf.mxu0  ;;  %5549 = vmatprep.subr.bf16.mxu1 %v16496_v19 }
 0x3fa   : > { %v3407_v26 = vpop.f32.mrf.mxu0 }
 0x3fb   : > { %v3663_v2 = vpack.c.bf16 %v3407_v26, %v3404_v45  ;;  %5550 = vmatpush2.bf16.msra.mxu1 %v16494_v12  ;;  %v16523_v45 = vld [vmem:[%s23922_s2 + $0x524] ss:$8 sps:$4 sm:$0xff]   ;;  %v16526_v26 = vld [vmem:[%s23922_s2 + $0x514] ss:$8 sps:$4 sm:$0xff]  }
 0x3fc   : > { %v3409_v46 = vpop.f32.mrf.mxu0  ;;  %5592 = vmatprep.subr.bf16.mxu1 %v16502_v23 }
 0x3fd   : > { %5551 = vmatprep.mubr.bf16.mxu1 %v3663_v2  ;;  %v3662_v46 = vpack.c.bf16 %v19761_v48, %v19751_v63  ;;  %v16527_v63 = vld [vmem:[%s23922_s2 + $0x500] ss:$8 sps:$4 sm:$0xff]  }
 0x3fe   : > { %v3412_v6 = vpop.f32.mrf.mxu0  ;;  %3603 = vmatmul.mubr.bf16.gmra.mxu0 %v16497_v58  ;;  %v5334_v1 = vpop.f32.mrf.mxu1  ;;  %5552 = vmatmul.mubr.bf16.vlgmr.msra.gmra.mxu1 %v3659_v56  ;;  %v16524_v56 = vld [vmem:[%s23922_s2 + $0x510] ss:$8 sps:$4 sm:$0xff]  }
 0x3ff   : > { %v19802_v11 = vadd.f32 %v5334_v1, %v19604_v14  ;;  %5593 = vmatpush1.bf16.msra.mxu1 %v16500_v28  ;;  %3610 = vmatprep.mubr.bf16.mxu0 %v16508_v38  ;;  %v16506_v14 = vld [vmem:[%s23925_s5 + $0x3e0] ss:$8 sps:$4 sm:$0xff]  }
 0x400   : > { %v3414_v40 = vpop.f32.mrf.mxu0  ;;  %v5336_v31 = vpop.f32.mrf.mxu1  ;;  %5594 = vmatprep.subr.bf16.mxu1 %v16505_v13 }
 0x401   : > { %v19811_v57 = vadd.f32 %v5336_v31, %v19620_v59  ;;  %v16517_v59 = vld [vmem:[%s23925_s5 + $0x3f4] ss:$8 sps:$4 sm:$0xff]  }
 0x402   : > { %v3415_v39 = vpop.f32.mrf.mxu0  ;;  %v5338_v3 = vpop.f32.mrf.mxu1  ;;  %v16532_v31 = vld [vmem:[%s23922_s2 + $0x5f4] ss:$8 sps:$4 sm:$0xff]  }
 0x403   : > { %v3664_v49 = vpack.c.bf16 %v3415_v39, %v3412_v6  ;;  %v19817_v35 = vadd.f32 %v5338_v3, %v19628_v32  ;;  %5595 = vmatpush1.bf16.msra.mxu1 %v16503_v30  ;;  %v16514_v32 = vld [vmem:[%s23922_s2 + $0x544] ss:$8 sps:$4 sm:$0xff]  }
 0x404   : > { %v3417_v0 = vpop.f32.mrf.mxu0  ;;  %v19827_v4 = vpop.f32.mrf.mxu1  ;;  %5596 = vmatprep.subr.bf16.mxu1 %v16511_v50 }
 0x405   : > { %5561 = vmatprep.mubr.bf16.mxu1 %v3664_v49 }
 0x406   : > { %v3420_v54 = vpop.f32.mrf.mxu0  ;;  %3611 = vmatmul.mubr.bf16.gmra.mxu0 %v16506_v14  ;;  %v5344_v7 = vpop.f32.mrf.mxu1  ;;  %5562 = vmatmul.mubr.bf16.gmra.mxu1 %v3660_v29  ;;  %v16530_v14 = vld [vmem:[%s23922_s2 + $0x5f0] ss:$8 sps:$4 sm:$0xff]   ;;  %v16533_v29 = vld [vmem:[%s23922_s2 + $0x5e0] ss:$8 sps:$4 sm:$0xff]  }
 0x407   : > { %v19833_v33 = vadd.f32 %v5344_v7, %v19652_v10  ;;  %5597 = vmatpush1.bf16.msra.mxu1 %v16509_v60  ;;  %3618 = vmatprep.mubr.bf16.mxu0 %v16517_v59  ;;  %v16515_v10 = vld [vmem:[%s23925_s5 + $0x3f0] ss:$8 sps:$4 sm:$0xff]   ;;  %v16535_v60 = vld [vmem:[%s23922_s2 + $0x5e4] ss:$8 sps:$4 sm:$0xff]  }
 0x408   : > { %v3422_v27 = vpop.f32.mrf.mxu0  ;;  %v5346_v42 = vpop.f32.mrf.mxu1  ;;  %5598 = vmatprep.subr.bf16.mxu1 %v16514_v32  ;;  %v16538_v32 = vld [vmem:[%s23922_s2 + $0x5d4] ss:$8 sps:$4 sm:$0xff]   ;;  %v16536_v7 = vld [vmem:[%s23922_s2 + $0x5d0] ss:$8 sps:$4 sm:$0xff]  }
 0x409   : > { %v19842_v8 = vadd.f32 %v5346_v42, %v19668_v41  ;;  %v16541_v27 = vld [vmem:[%s23922_s2 + $0x5c4] ss:$8 sps:$4 sm:$0xff]  }
 0x40a   : > { %v3423_v15 = vpop.f32.mrf.mxu0  ;;  %v5348_v47 = vpop.f32.mrf.mxu1 }
 0x40b   : > { %v3665_v52 = vpack.c.bf16 %v3423_v15, %v3420_v54  ;;  %v19848_v5 = vadd.f32 %v5348_v47, %v19678_v44  ;;  %5599 = vmatpush1.bf16.msra.mxu1 %v16512_v9  ;;  %v16544_v47 = vld [vmem:[%s23922_s2 + $0x5b4] ss:$8 sps:$4 sm:$0xff]  }
 0x40c   : > { %v3425_v41 = vpop.f32.mrf.mxu0  ;;  %v19855_v19 = vpop.f32.mrf.mxu1  ;;  %5600 = vmatprep.subr.bf16.mxu1 %v16520_v25  ;;  %v16539_v25 = vld [vmem:[%s23922_s2 + $0x5c0] ss:$8 sps:$4 sm:$0xff]  }
 0x40d   : > { %5571 = vmatprep.mubr.bf16.mxu1 %v3665_v52  ;;  %v16542_v52 = vld [vmem:[%s23922_s2 + $0x5b0] ss:$8 sps:$4 sm:$0xff]  }
 0x40e   : > { %v3428_v12 = vpop.f32.mrf.mxu0  ;;  %3619 = vmatmul.mubr.bf16.gmra.mxu0 %v16515_v10  ;;  %v5354_v44 = vpop.f32.mrf.mxu1  ;;  %5572 = vmatmul.mubr.bf16.gmra.mxu1 %v3661_v61  ;;  %v16547_v61 = vld [vmem:[%s23922_s2 + $0x5a4] ss:$8 sps:$4 sm:$0xff]  }
 0x40f   : > { %v19861_v34 = vadd.f32 %v5354_v44, %v19704_v21  ;;  %5601 = vmatpush1.bf16.msra.mxu1 %v16518_v18  ;;  %v16550_v44 = vld [vmem:[%s23922_s2 + $0x594] ss:$8 sps:$4 sm:$0xff]  }
 0x410   : > { %v3430_v20 = vpop.f32.mrf.mxu0  ;;  %v5356_v23 = vpop.f32.mrf.mxu1  ;;  %5602 = vmatprep.subr.bf16.mxu1 %v16523_v45  ;;  %v16545_v45 = vld [vmem:[%s23922_s2 + $0x5a0] ss:$8 sps:$4 sm:$0xff]  }
 0x411   : > { %v19870_v58 = vadd.f32 %v5356_v23, %v19720_v51  ;;  %v16529_v51 = vld [vmem:[%s23922_s2 + $0x504] ss:$8 sps:$4 sm:$0xff]   ;;  %v16548_v20 = vld [vmem:[%s23922_s2 + $0x590] ss:$8 sps:$4 sm:$0xff]  }
 0x412   : > { %v3431_v2 = vpop.f32.mrf.mxu0  ;;  %v5358_v28 = vpop.f32.mrf.mxu1 }
 0x413   : > { %v3666_v38 = vpack.c.bf16 %v3431_v2, %v3428_v12  ;;  %v19873_v21 = vadd.f32 %v5358_v28, %v19730_v22  ;;  %5603 = vmatpush1.bf16.msra.mxu1 %v16521_v36  ;;  %v16551_v28 = vld [vmem:[%s23922_s2 + $0x580] ss:$8 sps:$4 sm:$0xff]  }
 0x414   : > { %v3433_v13 = vpop.f32.mrf.mxu0  ;;  %v19880_v6 = vpop.f32.mrf.mxu1  ;;  %5604 = vmatprep.subr.bf16.mxu1 %v16526_v26  ;;  %v16553_v26 = vld [vmem:[%s23922_s2 + $0x584] ss:$8 sps:$4 sm:$0xff]  }
 0x415   : > { %5581 = vmatprep.mubr.bf16.mxu1 %v3666_v38 }
 0x416   : > { %v19885_v1 = vpop.f32.mrf.mxu0  ;;  %v5364_v22 = vpop.f32.mrf.mxu1  ;;  %5582 = vmatmul.mubr.bf16.gmra.mxu1 %v3662_v46 }
 0x417   : > { %v19888_v30 = vadd.f32 %v5364_v22, %v19756_v24  ;;  %5605 = vmatpush1.bf16.msra.mxu1 %v16524_v56  ;;  %v16556_v56 = vld [vmem:[%s23922_s2 + $0x674] ss:$8 sps:$4 sm:$0xff]  }
 0x418   : > { %v3438_v48 = vpop.f32.mrf.mxu0  ;;  %v5366_v40 = vpop.f32.mrf.mxu1  ;;  %5606 = vmatprep.subr.bf16.mxu1 %v16529_v51  ;;  %v16554_v51 = vld [vmem:[%s23922_s2 + $0x670] ss:$8 sps:$4 sm:$0xff]  }
 0x419   : > { %v19897_v50 = vadd.f32 %v5366_v40, %v19772_v55  ;;  %v16629_v55 = vld [vmem:[%s23923_s3 + $0xe0] ss:$16 sps:$4 sm:$0xff]   ;;  %v16559_v40 = vld [vmem:[%s23922_s2 + $0x664] ss:$8 sps:$4 sm:$0xff]  }
 0x41a   : > { %v19899_v39 = vpop.f32.mrf.mxu0  ;;  %v5368_v3 = vpop.f32.mrf.mxu1 }
 0x41b   : > { %v19902_v24 = vadd.f32 %v5368_v3, %v19780_v16  ;;  %5607 = vmatpush1.bf16.msra.mxu1 %v16527_v63  ;;  %v16631_v16 = vld [vmem:[%s23923_s3 + $0xe4] ss:$16 sps:$4 sm:$0xff]   ;;  %v3667_v22 = vpack.c.bf16 %v19899_v39, %v19885_v1  ;;  %v16557_v1 = vld [vmem:[%s23922_s2 + $0x660] ss:$8 sps:$4 sm:$0xff]  }
 0x41c   : > { %v3441_v49 = vpop.f32.mrf.mxu0  ;;  %5608 = vmatprep.subr.bf16.mxu1 %v16532_v31  ;;  %12397 = vmatprep.subr.bf16.mxu0 %v16631_v16  ;;  %v19975_v63 = vpop.f32.mrf.mxu1  ;;  %v16653_v39 = vld [vmem:[%s23923_s3 + $0xc0] ss:$16 sps:$4 sm:$0xff]  }
 0x41d   : > { %12398 = vmatpush1.bf16.msra.mxu0 %v16629_v55  ;;  %v16655_v49 = vld [vmem:[%s23923_s3 + $0xc4] ss:$16 sps:$4 sm:$0xff]  }
 0x41e   : > { %v19910_v59 = vpop.f32.mrf.mxu0  ;;  %12399 = vmatprep.subr.bf16.mxu0 %v16655_v49 }
 0x41f   : > { %5609 = vmatpush2.bf16.msra.mxu1 %v16530_v14 }
 0x420   : > { %v3446_v0 = vpop.f32.mrf.mxu0  ;;  %5610 = vmatprep.subr.bf16.mxu1 %v16535_v60 }
 0x421   : > { %12400 = vmatpush1.bf16.msra.mxu0 %v16653_v39 }
 0x422   : > { %v19924_v54 = vpop.f32.mrf.mxu0 }
 0x423   : > { %5611 = vmatpush2.bf16.msra.mxu1 %v16533_v29 }
 0x424   : > { %v3449_v9 = vpop.f32.mrf.mxu0  ;;  %5612 = vmatprep.subr.bf16.mxu1 %v16538_v32 }
 0x425   : > { %v16560_v9 = vld [vmem:[%s23922_s2 + $0x650] ss:$8 sps:$4 sm:$0xff]  }
 0x426   : > { %v19932_v42 = vpop.f32.mrf.mxu0 }
 0x427   : > { %5613 = vmatpush2.bf16.msra.mxu1 %v16536_v7 }
 0x428   : > { %v3454_v15 = vpop.f32.mrf.mxu0  ;;  %5614 = vmatprep.subr.bf16.mxu1 %v16541_v27  ;;  %v3668_v27 = vpack.c.bf16 %v19924_v54, %v19910_v59  ;;  %v16563_v59 = vld [vmem:[%s23922_s2 + $0x640] ss:$8 sps:$4 sm:$0xff]  }
 0x42a   : > { %v19940_v10 = vpop.f32.mrf.mxu0 }
 0x42b   : > { %5615 = vmatpush2.bf16.msra.mxu1 %v16539_v25 }
 0x42c   : > { %v3457_v18 = vpop.f32.mrf.mxu0  ;;  %5616 = vmatprep.subr.bf16.mxu1 %v16544_v47 }
 0x42e   : > { %v19948_v41 = vpop.f32.mrf.mxu0 }
 0x42f   : > { %5617 = vmatpush2.bf16.msra.mxu1 %v16542_v52 }
 0x430   : > { %v3462_v12 = vpop.f32.mrf.mxu0  ;;  %5618 = vmatprep.subr.bf16.mxu1 %v16547_v61  ;;  %v16568_v61 = vld [vmem:[%s23922_s2 + $0x634] ss:$8 sps:$4 sm:$0xff]  }
 0x432   : > { %v19956_v36 = vpop.f32.mrf.mxu0 }
 0x433   : > { %5619 = vmatpush2.bf16.msra.mxu1 %v16545_v45 }
 0x434   : > { %v3465_v23 = vpop.f32.mrf.mxu0  ;;  %5620 = vmatprep.subr.bf16.mxu1 %v16550_v44 }
 0x435   : > { %v16566_v23 = vld [vmem:[%s23922_s2 + $0x630] ss:$8 sps:$4 sm:$0xff]  }
 0x436   : > { %v3468_v2 = vpop.f32.mrf.mxu0 }
 0x437   : > { %5621 = vmatpush2.bf16.msra.mxu1 %v16548_v20 }
 0x438   : > { %v3470_v38 = vpop.f32.mrf.mxu0  ;;  %5622 = vmatprep.subr.bf16.mxu1 %v16553_v26  ;;  %v3669_v26 = vpack.c.bf16 %v19940_v10, %v19932_v42  ;;  %v16569_v42 = vld [vmem:[%s23922_s2 + $0x620] ss:$8 sps:$4 sm:$0xff]  }
 0x43a   : > { %v3471_v46 = vpop.f32.mrf.mxu0 }
 0x43b   : > { %v3671_v13 = vpack.c.bf16 %v3471_v46, %v3468_v2  ;;  %5623 = vmatpush2.bf16.msra.mxu1 %v16551_v28 }
 0x43c   : > { %v3473_v48 = vpop.f32.mrf.mxu0  ;;  %5665 = vmatprep.subr.bf16.mxu1 %v16556_v56 }
 0x43d   : > { %5624 = vmatprep.mubr.bf16.mxu1 %v3671_v13  ;;  %v16574_v13 = vld [vmem:[%s23922_s2 + $0x614] ss:$8 sps:$4 sm:$0xff]  }
 0x43e   : > { %v3476_v31 = vpop.f32.mrf.mxu0  ;;  %v5407_v3 = vpop.f32.mrf.mxu1  ;;  %5625 = vmatmul.mubr.bf16.vlgmr.msra.gmra.mxu1 %v3667_v22 }
 0x43f   : > { %v19981_v14 = vadd.f32 %v5407_v3, %v19802_v11  ;;  %5666 = vmatpush1.bf16.msra.mxu1 %v16554_v51  ;;  %v16562_v11 = vld [vmem:[%s23922_s2 + $0x654] ss:$8 sps:$4 sm:$0xff]   ;;  %v3670_v3 = vpack.c.bf16 %v19956_v36, %v19948_v41  ;;  %v16575_v41 = vld [vmem:[%s23922_s2 + $0x600] ss:$8 sps:$4 sm:$0xff]  }
 0x440   : > { %v3478_v60 = vpop.f32.mrf.mxu0  ;;  %v5409_v55 = vpop.f32.mrf.mxu1  ;;  %5667 = vmatprep.subr.bf16.mxu1 %v16559_v40 }
 0x441   : > { %v19996_v16 = vadd.f32 %v5409_v55, %v19811_v57  ;;  %v16565_v57 = vld [vmem:[%s23922_s2 + $0x644] ss:$8 sps:$4 sm:$0xff]  }
 0x442   : > { %v3479_v29 = vpop.f32.mrf.mxu0  ;;  %v5411_v0 = vpop.f32.mrf.mxu1 }
 0x443   : > { %v3672_v32 = vpack.c.bf16 %v3479_v29, %v3476_v31  ;;  %v19999_v7 = vadd.f32 %v5411_v0, %v19817_v35  ;;  %5668 = vmatpush1.bf16.msra.mxu1 %v16557_v1  ;;  %v16572_v31 = vld [vmem:[%s23922_s2 + $0x610] ss:$8 sps:$4 sm:$0xff]  }
 0x444   : > { %v3481_v25 = vpop.f32.mrf.mxu0  ;;  %v20006_v15 = vpop.f32.mrf.mxu1  ;;  %5669 = vmatprep.subr.bf16.mxu1 %v16562_v11  ;;  %v16580_v11 = vld [vmem:[%s23922_s2 + $0x6f4] ss:$8 sps:$4 sm:$0xff]  }
 0x445   : > { %5634 = vmatprep.mubr.bf16.mxu1 %v3672_v32  ;;  %v16583_v25 = vld [vmem:[%s23922_s2 + $0x6e4] ss:$8 sps:$4 sm:$0xff]  }
 0x446   : > { %v3484_v47 = vpop.f32.mrf.mxu0  ;;  %v5417_v35 = vpop.f32.mrf.mxu1  ;;  %5635 = vmatmul.mubr.bf16.gmra.mxu1 %v3668_v27 }
 0x447   : > { %v20012_v52 = vadd.f32 %v5417_v35, %v19833_v33  ;;  %5670 = vmatpush1.bf16.msra.mxu1 %v16560_v9  ;;  %v16578_v9 = vld [vmem:[%s23922_s2 + $0x6f0] ss:$8 sps:$4 sm:$0xff]  }
 0x448   : > { %v3486_v54 = vpop.f32.mrf.mxu0  ;;  %v5419_v18 = vpop.f32.mrf.mxu1  ;;  %5671 = vmatprep.subr.bf16.mxu1 %v16565_v57 }
 0x449   : > { %v20021_v45 = vadd.f32 %v5419_v18, %v19842_v8  ;;  %v16571_v8 = vld [vmem:[%s23922_s2 + $0x624] ss:$8 sps:$4 sm:$0xff]   ;;  %v16584_v18 = vld [vmem:[%s23922_s2 + $0x6d0] ss:$8 sps:$4 sm:$0xff]  }
 0x44a   : > { %v3487_v12 = vpop.f32.mrf.mxu0  ;;  %v5421_v44 = vpop.f32.mrf.mxu1 }
 0x44b   : > { %v3673_v20 = vpack.c.bf16 %v3487_v12, %v3484_v47  ;;  %v20024_v33 = vadd.f32 %v5421_v44, %v19848_v5  ;;  %5672 = vmatpush1.bf16.msra.mxu1 %v16563_v59  ;;  %v16581_v47 = vld [vmem:[%s23922_s2 + $0x6e0] ss:$8 sps:$4 sm:$0xff]   ;;  %v16586_v59 = vld [vmem:[%s23922_s2 + $0x6d4] ss:$8 sps:$4 sm:$0xff]   ;;  %v16589_v12 = vld [vmem:[%s23922_s2 + $0x6c4] ss:$8 sps:$4 sm:$0xff]  }
 0x44c   : > { %v3489_v2 = vpop.f32.mrf.mxu0  ;;  %v20031_v28 = vpop.f32.mrf.mxu1  ;;  %5673 = vmatprep.subr.bf16.mxu1 %v16568_v61 }
 0x44d   : > { %5644 = vmatprep.mubr.bf16.mxu1 %v3673_v20  ;;  %v16587_v20 = vld [vmem:[%s23922_s2 + $0x6c0] ss:$8 sps:$4 sm:$0xff]  }
 0x44e   : > { %v3492_v38 = vpop.f32.mrf.mxu0  ;;  %v5427_v5 = vpop.f32.mrf.mxu1  ;;  %5645 = vmatmul.mubr.bf16.gmra.mxu1 %v3669_v26  ;;  %v16592_v26 = vld [vmem:[%s23922_s2 + $0x6b4] ss:$8 sps:$4 sm:$0xff]  }
 0x44f   : > { %v20037_v56 = vadd.f32 %v5427_v5, %v19861_v34  ;;  %5674 = vmatpush1.bf16.msra.mxu1 %v16566_v23  ;;  %v16595_v5 = vld [vmem:[%s23922_s2 + $0x6a4] ss:$8 sps:$4 sm:$0xff]  }
 0x450   : > { %v3494_v10 = vpop.f32.mrf.mxu0  ;;  %v5429_v46 = vpop.f32.mrf.mxu1  ;;  %5675 = vmatprep.subr.bf16.mxu1 %v16571_v8  ;;  %v16590_v8 = vld [vmem:[%s23922_s2 + $0x6b0] ss:$8 sps:$4 sm:$0xff]  }
 0x451   : > { %v20046_v51 = vadd.f32 %v5429_v46, %v19870_v58  ;;  %v16577_v58 = vld [vmem:[%s23922_s2 + $0x604] ss:$8 sps:$4 sm:$0xff]   ;;  %v16593_v10 = vld [vmem:[%s23922_s2 + $0x6a0] ss:$8 sps:$4 sm:$0xff]  }
 0x452   : > { %v3495_v22 = vpop.f32.mrf.mxu0  ;;  %v5431_v48 = vpop.f32.mrf.mxu1 }
 0x453   : > { %v3674_v40 = vpack.c.bf16 %v3495_v22, %v3492_v38  ;;  %v20049_v34 = vadd.f32 %v5431_v48, %v19873_v21  ;;  %5676 = vmatpush1.bf16.msra.mxu1 %v16569_v42  ;;  %v16596_v48 = vld [vmem:[%s23922_s2 + $0x690] ss:$8 sps:$4 sm:$0xff]  }
 0x454   : > { %v3497_v1 = vpop.f32.mrf.mxu0  ;;  %v20056_v39 = vpop.f32.mrf.mxu1  ;;  %5677 = vmatprep.subr.bf16.mxu1 %v16574_v13  ;;  %v16598_v13 = vld [vmem:[%s23922_s2 + $0x694] ss:$8 sps:$4 sm:$0xff]  }
 0x455   : > { %5654 = vmatprep.mubr.bf16.mxu1 %v3674_v40  ;;  %v16599_v1 = vld [vmem:[%s23922_s2 + $0x680] ss:$8 sps:$4 sm:$0xff]  }
 0x456   : > { %v20061_v49 = vpop.f32.mrf.mxu0  ;;  %v5437_v21 = vpop.f32.mrf.mxu1  ;;  %5655 = vmatmul.mubr.bf16.gmra.mxu1 %v3670_v3 }
 0x457   : > { %v20064_v60 = vadd.f32 %v5437_v21, %v19888_v30  ;;  %5678 = vmatpush1.bf16.msra.mxu1 %v16572_v31  ;;  %v16601_v31 = vld [vmem:[%s23922_s2 + $0x684] ss:$8 sps:$4 sm:$0xff]   ;;  %v16604_v21 = vld [vmem:[%s23922_s2 + $0x774] ss:$8 sps:$4 sm:$0xff]  }
 0x458   : > { %v3502_v36 = vpop.f32.mrf.mxu0  ;;  %v5439_v55 = vpop.f32.mrf.mxu1  ;;  %5679 = vmatprep.subr.bf16.mxu1 %v16577_v58 }
 0x459   : > { %v20073_v29 = vadd.f32 %v5439_v55, %v19897_v50  ;;  %v16656_v50 = vld [vmem:[%s23923_s3 + $0xa0] ss:$16 sps:$4 sm:$0xff]  }
 0x45a   : > { %v20075_v0 = vpop.f32.mrf.mxu0  ;;  %v5441_v32 = vpop.f32.mrf.mxu1  ;;  %v16602_v55 = vld [vmem:[%s23922_s2 + $0x770] ss:$8 sps:$4 sm:$0xff]  }
 0x45b   : > { %v20078_v30 = vadd.f32 %v5441_v32, %v19902_v24  ;;  %5680 = vmatpush1.bf16.msra.mxu1 %v16575_v41  ;;  %v16658_v24 = vld [vmem:[%s23923_s3 + $0xa4] ss:$16 sps:$4 sm:$0xff]  }
 0x45c   : > { %v3505_v27 = vpop.f32.mrf.mxu0  ;;  %5681 = vmatprep.subr.bf16.mxu1 %v16580_v11  ;;  %12401 = vmatprep.subr.bf16.mxu0 %v16658_v24  ;;  %v3675_v11 = vpack.c.bf16 %v20075_v0, %v20061_v49  ;;  %v20151_v32 = vpop.f32.mrf.mxu1  ;;  %v16605_v49 = vld [vmem:[%s23922_s2 + $0x760] ss:$8 sps:$4 sm:$0xff]  }
 0x45d   : > { %12402 = vmatpush1.bf16.msra.mxu0 %v16656_v50  ;;  %v16607_v27 = vld [vmem:[%s23922_s2 + $0x764] ss:$8 sps:$4 sm:$0xff]   ;;  %v16659_v0 = vld [vmem:[%s23923_s3 + $0x80] ss:$16 sps:$4 sm:$0xff]  }
 0x45e   : > { %v20092_v57 = vpop.f32.mrf.mxu0 }
 0x45f   : > { %5682 = vmatpush2.bf16.msra.mxu1 %v16578_v9 }
 0x460   : > { %v3510_v35 = vpop.f32.mrf.mxu0  ;;  %5683 = vmatprep.subr.bf16.mxu1 %v16583_v25 }
 0x462   : > { %v20100_v54 = vpop.f32.mrf.mxu0 }
 0x463   : > { %5684 = vmatpush2.bf16.msra.mxu1 %v16581_v47  ;;  %v16661_v47 = vld [vmem:[%s23923_s3 + $0x84] ss:$16 sps:$4 sm:$0xff]  }
 0x464   : > { %v3513_v61 = vpop.f32.mrf.mxu0  ;;  %5685 = vmatprep.subr.bf16.mxu1 %v16586_v59  ;;  %12403 = vmatprep.subr.bf16.mxu0 %v16661_v47  ;;  %v16620_v47 = vld [vmem:[%s23922_s2 + $0x710] ss:$8 sps:$4 sm:$0xff]  }
 0x465   : > { %12404 = vmatpush1.bf16.msra.mxu0 %v16659_v0 }
 0x466   : > { %v20108_v44 = vpop.f32.mrf.mxu0 }
 0x467   : > { %5686 = vmatpush2.bf16.msra.mxu1 %v16584_v18 }
 0x468   : > { %v3518_v23 = vpop.f32.mrf.mxu0  ;;  %5687 = vmatprep.subr.bf16.mxu1 %v16589_v12 }
 0x46a   : > { %v20116_v2 = vpop.f32.mrf.mxu0 }
 0x46b   : > { %5688 = vmatpush2.bf16.msra.mxu1 %v16587_v20 }
 0x46c   : > { %v3521_v38 = vpop.f32.mrf.mxu0  ;;  %5689 = vmatprep.subr.bf16.mxu1 %v16592_v26  ;;  %v16608_v26 = vld [vmem:[%s23922_s2 + $0x750] ss:$8 sps:$4 sm:$0xff]  }
 0x46e   : > { %v20124_v42 = vpop.f32.mrf.mxu0 }
 0x46f   : > { %5690 = vmatpush2.bf16.msra.mxu1 %v16590_v8  ;;  %v3676_v8 = vpack.c.bf16 %v20100_v54, %v20092_v57  ;;  %v16611_v57 = vld [vmem:[%s23922_s2 + $0x740] ss:$8 sps:$4 sm:$0xff]  }
 0x470   : > { %v3526_v46 = vpop.f32.mrf.mxu0  ;;  %5691 = vmatprep.subr.bf16.mxu1 %v16595_v5 }
 0x472   : > { %v20132_v22 = vpop.f32.mrf.mxu0 }
 0x473   : > { %5692 = vmatpush2.bf16.msra.mxu1 %v16593_v10 }
 0x474   : > { %v3529_v40 = vpop.f32.mrf.mxu0  ;;  %5693 = vmatprep.subr.bf16.mxu1 %v16598_v13 }
 0x476   : > { %v3532_v3 = vpop.f32.mrf.mxu0 }
 0x477   : > { %5694 = vmatpush2.bf16.msra.mxu1 %v16596_v48  ;;  %v16616_v48 = vld [vmem:[%s23922_s2 + $0x734] ss:$8 sps:$4 sm:$0xff]  }
 0x478   : > { %v3534_v58 = vpop.f32.mrf.mxu0  ;;  %5695 = vmatprep.subr.bf16.mxu1 %v16601_v31 }
 0x479   : > { %v16614_v58 = vld [vmem:[%s23922_s2 + $0x730] ss:$8 sps:$4 sm:$0xff]  }
 0x47a   : > { %v3535_v41 = vpop.f32.mrf.mxu0 }
 0x47b   : > { %v3679_v36 = vpack.c.bf16 %v3535_v41, %v3532_v3  ;;  %5696 = vmatpush2.bf16.msra.mxu1 %v16599_v1 }
 0x47c   : > { %v3537_v9 = vpop.f32.mrf.mxu0  ;;  %5738 = vmatprep.subr.bf16.mxu1 %v16604_v21  ;;  %v3677_v21 = vpack.c.bf16 %v20116_v2, %v20108_v44  ;;  %v16617_v44 = vld [vmem:[%s23922_s2 + $0x720] ss:$8 sps:$4 sm:$0xff]  }
 0x47d   : > { %5697 = vmatprep.mubr.bf16.mxu1 %v3679_v36 }
 0x47e   : > { %v3540_v25 = vpop.f32.mrf.mxu0  ;;  %v5480_v50 = vpop.f32.mrf.mxu1  ;;  %5698 = vmatmul.mubr.bf16.vlgmr.msra.gmra.mxu1 %v3675_v11 }
 0x47f   : > { %v20157_v24 = vadd.f32 %v5480_v50, %v19981_v14  ;;  %5739 = vmatpush1.bf16.msra.mxu1 %v16602_v55  ;;  %v16610_v14 = vld [vmem:[%s23922_s2 + $0x754] ss:$8 sps:$4 sm:$0xff]  }
 0x480   : > { %v3542_v35 = vpop.f32.mrf.mxu0  ;;  %v5482_v59 = vpop.f32.mrf.mxu1  ;;  %5740 = vmatprep.subr.bf16.mxu1 %v16607_v27  ;;  %v16622_v27 = vld [vmem:[%s23922_s2 + $0x714] ss:$8 sps:$4 sm:$0xff]  }
 0x481   : > { %v20172_v18 = vadd.f32 %v5482_v59, %v19996_v16  ;;  %v16613_v16 = vld [vmem:[%s23922_s2 + $0x744] ss:$8 sps:$4 sm:$0xff]   ;;  %v3678_v35 = vpack.c.bf16 %v20132_v22, %v20124_v42  ;;  %v16623_v42 = vld [vmem:[%s23922_s2 + $0x700] ss:$8 sps:$4 sm:$0xff]  }
 0x482   : > { %v3543_v61 = vpop.f32.mrf.mxu0  ;;  %v5484_v12 = vpop.f32.mrf.mxu1 }
 0x483   : > { %v3680_v20 = vpack.c.bf16 %v3543_v61, %v3540_v25  ;;  %v20175_v23 = vadd.f32 %v5484_v12, %v19999_v7  ;;  %5741 = vmatpush1.bf16.msra.mxu1 %v16605_v49 }
 0x484   : > { %v3545_v38 = vpop.f32.mrf.mxu0  ;;  %v20182_v5 = vpop.f32.mrf.mxu1  ;;  %5742 = vmatprep.subr.bf16.mxu1 %v16610_v14 }
 0x485   : > { %5707 = vmatprep.mubr.bf16.mxu1 %v3680_v20 }
 0x486   : > { %v3548_v10 = vpop.f32.mrf.mxu0  ;;  %v5490_v7 = vpop.f32.mrf.mxu1  ;;  %5708 = vmatmul.mubr.bf16.gmra.mxu1 %v3676_v8 }
 0x487   : > { %v20188_v46 = vadd.f32 %v5490_v7, %v20012_v52  ;;  %5743 = vmatpush1.bf16.msra.mxu1 %v16608_v26  ;;  %v16628_v26 = vld [vmem:[%s23922_s2 + $0x7f4] ss:$8 sps:$4 sm:$0xff]  }
 0x488   : > { %v3550_v54 = vpop.f32.mrf.mxu0  ;;  %v5492_v13 = vpop.f32.mrf.mxu1  ;;  %5744 = vmatprep.subr.bf16.mxu1 %v16613_v16 }
 0x489   : > { %v20197_v40 = vadd.f32 %v5492_v13, %v20021_v45  ;;  %v16619_v45 = vld [vmem:[%s23922_s2 + $0x724] ss:$8 sps:$4 sm:$0xff]   ;;  %v16632_v13 = vld [vmem:[%s23922_s2 + $0x7e0] ss:$8 sps:$4 sm:$0xff]  }
 0x48a   : > { %v3551_v31 = vpop.f32.mrf.mxu0  ;;  %v5494_v3 = vpop.f32.mrf.mxu1 }
 0x48b   : > { %v3681_v1 = vpack.c.bf16 %v3551_v31, %v3548_v10  ;;  %v20200_v52 = vadd.f32 %v5494_v3, %v20024_v33  ;;  %5745 = vmatpush1.bf16.msra.mxu1 %v16611_v57  ;;  %v16626_v10 = vld [vmem:[%s23922_s2 + $0x7f0] ss:$8 sps:$4 sm:$0xff]   ;;  %v16634_v57 = vld [vmem:[%s23922_s2 + $0x7e4] ss:$8 sps:$4 sm:$0xff]   ;;  %v16637_v31 = vld [vmem:[%s23922_s2 + $0x7d4] ss:$8 sps:$4 sm:$0xff]  }
 0x48c   : > { %v3553_v41 = vpop.f32.mrf.mxu0  ;;  %v20207_v36 = vpop.f32.mrf.mxu1  ;;  %5746 = vmatprep.subr.bf16.mxu1 %v16616_v48 }
 0x48d   : > { %5717 = vmatprep.mubr.bf16.mxu1 %v3681_v1  ;;  %v16635_v1 = vld [vmem:[%s23922_s2 + $0x7d0] ss:$8 sps:$4 sm:$0xff]  }
 0x48e   : > { %v3556_v55 = vpop.f32.mrf.mxu0  ;;  %v5500_v33 = vpop.f32.mrf.mxu1  ;;  %5718 = vmatmul.mubr.bf16.gmra.mxu1 %v3677_v21  ;;  %v16640_v21 = vld [vmem:[%s23922_s2 + $0x7c4] ss:$8 sps:$4 sm:$0xff]  }
 0x48f   : > { %v20213_v11 = vadd.f32 %v5500_v33, %v20037_v56  ;;  %5747 = vmatpush1.bf16.msra.mxu1 %v16614_v58  ;;  %v16643_v33 = vld [vmem:[%s23922_s2 + $0x7b4] ss:$8 sps:$4 sm:$0xff]  }
 0x490   : > { %v3558_v2 = vpop.f32.mrf.mxu0  ;;  %v5502_v9 = vpop.f32.mrf.mxu1  ;;  %5748 = vmatprep.subr.bf16.mxu1 %v16619_v45  ;;  %v16638_v45 = vld [vmem:[%s23922_s2 + $0x7c0] ss:$8 sps:$4 sm:$0xff]  }
 0x491   : > { %v20222_v25 = vadd.f32 %v5502_v9, %v20046_v51  ;;  %v16625_v51 = vld [vmem:[%s23922_s2 + $0x704] ss:$8 sps:$4 sm:$0xff]   ;;  %v16641_v2 = vld [vmem:[%s23922_s2 + $0x7b0] ss:$8 sps:$4 sm:$0xff]  }
 0x492   : > { %v3559_v50 = vpop.f32.mrf.mxu0  ;;  %v5504_v49 = vpop.f32.mrf.mxu1 }
 0x493   : > { %v3682_v0 = vpack.c.bf16 %v3559_v50, %v3556_v55  ;;  %v20225_v56 = vadd.f32 %v5504_v49, %v20049_v34  ;;  %5749 = vmatpush1.bf16.msra.mxu1 %v16617_v44  ;;  %v16644_v49 = vld [vmem:[%s23922_s2 + $0x7a0] ss:$8 sps:$4 sm:$0xff]  }
 0x494   : > { %v3561_v59 = vpop.f32.mrf.mxu0  ;;  %v20232_v14 = vpop.f32.mrf.mxu1  ;;  %5750 = vmatprep.subr.bf16.mxu1 %v16622_v27  ;;  %v16646_v27 = vld [vmem:[%s23922_s2 + $0x7a4] ss:$8 sps:$4 sm:$0xff]  }
 0x495   : > { %5727 = vmatprep.mubr.bf16.mxu1 %v3682_v0  ;;  %v16647_v59 = vld [vmem:[%s23922_s2 + $0x790] ss:$8 sps:$4 sm:$0xff]  }
 0x496   : > { %v20237_v61 = vpop.f32.mrf.mxu0  ;;  %v5510_v34 = vpop.f32.mrf.mxu1  ;;  %5728 = vmatmul.mubr.bf16.gmra.mxu1 %v3678_v35 }
 0x497   : > { %v20240_v12 = vadd.f32 %v5510_v34, %v20064_v60  ;;  %5751 = vmatpush1.bf16.msra.mxu1 %v16620_v47  ;;  %v16649_v47 = vld [vmem:[%s23922_s2 + $0x794] ss:$8 sps:$4 sm:$0xff]   ;;  %v16652_v34 = vld [vmem:[%s23922_s2 + $0x784] ss:$8 sps:$4 sm:$0xff]  }
 0x498   : > { %v3566_v22 = vpop.f32.mrf.mxu0  ;;  %v5512_v20 = vpop.f32.mrf.mxu1  ;;  %5752 = vmatprep.subr.bf16.mxu1 %v16625_v51 }
 0x499   : > { %v20249_v8 = vadd.f32 %v5512_v20, %v20073_v29  ;;  %v16662_v29 = vld [vmem:[%s23923_s3 + $0x60] ss:$16 sps:$4 sm:$0xff]  }
 0x49a   : > { %v3567_v38 = vpop.f32.mrf.mxu0  ;;  %v5514_v16 = vpop.f32.mrf.mxu1  ;;  %v16650_v22 = vld [vmem:[%s23922_s2 + $0x780] ss:$8 sps:$4 sm:$0xff]  }
 0x49b   : > { %v20252_v60 = vadd.f32 %v5514_v16, %v20078_v30  ;;  %5753 = vmatpush1.bf16.msra.mxu1 %v16623_v42  ;;  %v16664_v30 = vld [vmem:[%s23923_s3 + $0x64] ss:$16 sps:$4 sm:$0xff]  }
 0x49c   : > { %v3569_v7 = vpop.f32.mrf.mxu0  ;;  %5754 = vmatprep.subr.bf16.mxu1 %v16628_v26  ;;  %12405 = vmatprep.subr.bf16.mxu0 %v16664_v30 }
 0x49d   : > { %12406 = vmatpush1.bf16.msra.mxu0 %v16662_v29  ;;  %v20318_v7 = vpop.f32.mrf.mxu1 }
 0x49e   : > { %v20266_v54 = vpop.f32.mrf.mxu0 }
 0x49f   : > { %5755 = vmatpush2.bf16.msra.mxu1 %v16626_v10  ;;  %v3683_v10 = vpack.c.bf16 %v3567_v38, %v20237_v61 }
 0x4a0   : > { %v3574_v48 = vpop.f32.mrf.mxu0  ;;  %5756 = vmatprep.subr.bf16.mxu1 %v16634_v57 }
 0x4a1   : > { %v16665_v48 = vld [vmem:[%s23923_s3 + $0x40] ss:$16 sps:$4 sm:$0xff]  }
 0x4a2   : > { %v20274_v3 = vpop.f32.mrf.mxu0 }
 0x4a3   : > { %5757 = vmatpush2.bf16.msra.mxu1 %v16632_v13 }
 0x4a4   : > { %v3577_v58 = vpop.f32.mrf.mxu0  ;;  %5758 = vmatprep.subr.bf16.mxu1 %v16637_v31  ;;  %v16667_v31 = vld [vmem:[%s23923_s3 + $0x44] ss:$16 sps:$4 sm:$0xff]  }
 0x4a5   : > { %12407 = vmatprep.subr.bf16.mxu0 %v16667_v31 }
 0x4a6   : > { %v20282_v41 = vpop.f32.mrf.mxu0  ;;  %12408 = vmatpush1.bf16.msra.mxu0 %v16665_v48 }
 0x4a7   : > { %5759 = vmatpush2.bf16.msra.mxu1 %v16635_v1 }
 0x4a8   : > { %v3582_v55 = vpop.f32.mrf.mxu0  ;;  %5760 = vmatprep.subr.bf16.mxu1 %v16640_v21 }
 0x4aa   : > { %v20290_v44 = vpop.f32.mrf.mxu0 }
 0x4ab   : > { %5761 = vmatpush2.bf16.msra.mxu1 %v16638_v45 }
 0x4ac   : > { %v3585_v9 = vpop.f32.mrf.mxu0  ;;  %5762 = vmatprep.subr.bf16.mxu1 %v16643_v33 }
 0x4ae   : > { %v20298_v50 = vpop.f32.mrf.mxu0 }
 0x4af   : > { %5763 = vmatpush2.bf16.msra.mxu1 %v16641_v2 }
 0x4b0   : > { %v3590_v0 = vpop.f32.mrf.mxu0  ;;  %5764 = vmatprep.subr.bf16.mxu1 %v16646_v27 }
 0x4b2   : > { %v20306_v35 = vpop.f32.mrf.mxu0 }
 0x4b3   : > { %5765 = vmatpush2.bf16.msra.mxu1 %v16644_v49 }
 0x4b4   : > { %v3593_v51 = vpop.f32.mrf.mxu0  ;;  %5766 = vmatprep.subr.bf16.mxu1 %v16649_v47 }
 0x4b6   : > { %v3596_v42 = vpop.f32.mrf.mxu0 }
 0x4b7   : > { %5767 = vmatpush2.bf16.msra.mxu1 %v16647_v59 }
 0x4b8   : > { %v3598_v20 = vpop.f32.mrf.mxu0  ;;  %5768 = vmatprep.subr.bf16.mxu1 %v16652_v34 }
 0x4ba   : > { %v3599_v26 = vpop.f32.mrf.mxu0 }
 0x4bb   : > { %v3687_v16 = vpack.c.bf16 %v3599_v26, %v3596_v42  ;;  %5769 = vmatpush2.bf16.msra.mxu1 %v16650_v22 }
 0x4bc   : > { %v3601_v57 = vpop.f32.mrf.mxu0 }
 0x4bd   : > { %5770 = vmatprep.mubr.bf16.mxu1 %v3687_v16 }
 0x4be   : > { %v3604_v29 = vpop.f32.mrf.mxu0  ;;  %v5553_v30 = vpop.f32.mrf.mxu1  ;;  %5771 = vmatmul.mubr.bf16.vlgmr.msra.gmra.mxu1 %v3683_v10 }
 0x4bf   : > { %v5554_v13 = vadd.f32 %v5553_v30, %v20157_v24  ;;  %v3684_v24 = vpack.c.bf16 %v20274_v3, %v20266_v54  ;;  %v3685_v54 = vpack.c.bf16 %v20290_v44, %v20282_v41  ;;  %v3686_v41 = vpack.c.bf16 %v20306_v35, %v20298_v50  ;;  %v16670_v50 = vld [vmem:[%s23923_s3 + $0x24] ss:$16 sps:$4 sm:$0xff]  }
 0x4c0   : > { %v3606_v1 = vpop.f32.mrf.mxu0  ;;  %v5555_v58 = vpop.f32.mrf.mxu1  ;;  %12409 = vmatprep.subr.bf16.mxu0 %v16670_v50 }
 0x4c1   : > { %v5556_v61 = vadd.f32 %v5555_v58, %v20172_v18 }
 0x4c2   : > { %v3607_v38 = vpop.f32.mrf.mxu0  ;;  %v5557_v21 = vpop.f32.mrf.mxu1 }
 0x4c3   : > { %v3688_v45 = vpack.c.bf16 %v3607_v38, %v3604_v29  ;;  %v5558_v55 = vadd.f32 %v5557_v21, %v20175_v23 }
 0x4c4   : > { %v3609_v33 = vpop.f32.mrf.mxu0  ;;  %v20331_v2 = vpop.f32.mrf.mxu1 }
 0x4c5   : > { %5780 = vmatprep.mubr.bf16.mxu1 %v3688_v45  ;;  %v16673_v33 = vld [vmem:[%s23923_s3 + $0x4] ss:$16 sps:$4 sm:$0xff]  }
 0x4c6   : > { %v3612_v9 = vpop.f32.mrf.mxu0  ;;  %v5563_v27 = vpop.f32.mrf.mxu1  ;;  %5781 = vmatmul.mubr.bf16.gmra.mxu1 %v3684_v24 }
 0x4c7   : > { %v5564_v49 = vadd.f32 %v5563_v27, %v20188_v46 }
 0x4c8   : > { %v3614_v18 = vpop.f32.mrf.mxu0  ;;  %v5565_v0 = vpop.f32.mrf.mxu1 }
 0x4c9   : > { %v5566_v47 = vadd.f32 %v5565_v0, %v20197_v40 }
 0x4ca   : > { %v3615_v59 = vpop.f32.mrf.mxu0  ;;  %v5567_v51 = vpop.f32.mrf.mxu1 }
 0x4cb   : > { %v3689_v34 = vpack.c.bf16 %v3615_v59, %v3612_v9  ;;  %v5568_v23 = vadd.f32 %v5567_v51, %v20200_v52 }
 0x4cc   : > { %v3617_v3 = vpop.f32.mrf.mxu0  ;;  %v20338_v42 = vpop.f32.mrf.mxu1 }
 0x4cd   : > { %5790 = vmatprep.mubr.bf16.mxu1 %v3689_v34 }
 0x4ce   : > { %v3620_v22 = vpop.f32.mrf.mxu0  ;;  %v5573_v20 = vpop.f32.mrf.mxu1  ;;  %5791 = vmatmul.mubr.bf16.gmra.mxu1 %v3685_v54 }
 0x4cf   : > { %v5574_v46 = vadd.f32 %v5573_v20, %v20213_v11 }
 0x4d0   : > { %v3622_v26 = vpop.f32.mrf.mxu0  ;;  %v5575_v16 = vpop.f32.mrf.mxu1 }
 0x4d1   : > { %v5576_v40 = vadd.f32 %v5575_v16, %v20222_v25 }
 0x4d2   : > { %v3623_v10 = vpop.f32.mrf.mxu0  ;;  %v5577_v57 = vpop.f32.mrf.mxu1 }
 0x4d3   : > { %v3690_v29 = vpack.c.bf16 %v3623_v10, %v3620_v22  ;;  %v5578_v52 = vadd.f32 %v5577_v57, %v20225_v56  ;;  %v16668_v56 = vld [vmem:[%s23923_s3 + $0x20] ss:$16 sps:$4 sm:$0xff]  }
 0x4d4   : > { %v20345_v44 = vpop.f32.mrf.mxu1  ;;  %v3625_v30 = vpop.f32.mrf.mxu0  ;;  %12410 = vmatpush1.bf16.msra.mxu0 %v16668_v56  ;;  %v16685_v56 = vld [vmem:[%s23923_s3 + $0x1a4] ss:$16 sps:$4 sm:$0xff]  }
 0x4d5   : > { %5800 = vmatprep.mubr.bf16.mxu1 %v3690_v29  ;;  %12411 = vmatprep.subr.bf16.mxu0 %v16673_v33  ;;  %v16679_v29 = vld [vmem:[%s23923_s3 + $0x1c0] ss:$16 sps:$4 sm:$0xff]  }
 0x4d6   : > { %v5583_v48 = vpop.f32.mrf.mxu1  ;;  %5801 = vmatmul.mubr.bf16.gmra.mxu1 %v3686_v41 }
 0x4d7   : > { %v5584_v11 = vadd.f32 %v5583_v48, %v20240_v12  ;;  %6060 = vmatprep.mubr.bf16.mxu1 %v23928_v17 }
 0x4d8   : > { %v5585_v31 = vpop.f32.mrf.mxu1 }
 0x4d9   : > { %v5586_v25 = vadd.f32 %v5585_v31, %v20249_v8 }
 0x4da   : > { %v5587_v1 = vpop.f32.mrf.mxu1 }
 0x4db   : > { %v20351_v58 = vadd.f32 %v5587_v1, %v20252_v60  ;;  %v16671_v60 = vld [vmem:[%s23923_s3] ss:$16 sps:$4 sm:$0xff]  }
 0x4dc   : > { %v20359_v12 = vpop.f32.mrf.mxu1  ;;  %12412 = vmatpush1.bf16.msra.mxu0 %v16671_v60  ;;  %v16683_v1 = vld [vmem:[%s23923_s3 + $0x1a0] ss:$16 sps:$4 sm:$0xff]  }
 0x4fe   : > { %v5626_v35 = vpop.f32.mrf.mxu1 }
 0x4ff   : > { %v5627_v38 = vadd.f32 %v5626_v35, %v5554_v13  ;;  %v16687_v35 = vld [vmem:[%s23923_s3 + $0x180] ss:$16 sps:$4 sm:$0xff]  }
 0x500   : > { %v5628_v21 = vpop.f32.mrf.mxu1 }
 0x501   : > { %v5629_v8 = vadd.f32 %v5628_v21, %v5556_v61 }
 0x502   : > { %v5630_v45 = vpop.f32.mrf.mxu1 }
 0x503   : > { %v5631_v24 = vadd.f32 %v5630_v45, %v5558_v55  ;;  %v16691_v45 = vld [vmem:[%s23923_s3 + $0x160] ss:$16 sps:$4 sm:$0xff]  }
 0x504   : > { %v20367_v9 = vpop.f32.mrf.mxu1 }
 0x506   : > { %v5636_v27 = vpop.f32.mrf.mxu1 }
 0x507   : > { %v20369_v18 = vadd.f32 %v5636_v27, %v5564_v49 }
 0x508   : > { %v5638_v13 = vpop.f32.mrf.mxu1 }
 0x509   : > { %v20371_v0 = vadd.f32 %v5638_v13, %v5566_v47 }
 0x50a   : > { %v5640_v61 = vpop.f32.mrf.mxu1 }
 0x50b   : > { %v20373_v55 = vadd.f32 %v5640_v61, %v5568_v23  ;;  %v16674_v23 = vld [vmem:[%s23923_s3 + $0x1e0] ss:$16 sps:$4 sm:$0xff]  }
 0x50c   : > { %v20375_v59 = vpop.f32.mrf.mxu1  ;;  %v16696_v61 = vld [vmem:[%s23923_s3 + $0x140] ss:$16 sps:$4 sm:$0xff]  }
 0x50e   : > { %v5646_v51 = vpop.f32.mrf.mxu1 }
 0x50f   : > { %v20377_v34 = vadd.f32 %v5646_v51, %v5574_v46  ;;  %v16676_v46 = vld [vmem:[%s23923_s3 + $0x1e4] ss:$16 sps:$4 sm:$0xff]  }
 0x510   : > { %v5648_v54 = vpop.f32.mrf.mxu1  ;;  %12413 = vmatprep.subr.bf16.mxu0 %v16676_v46  ;;  %v16698_v51 = vld [vmem:[%s23923_s3 + $0x144] ss:$16 sps:$4 sm:$0xff]  }
 0x511   : > { %v20379_v3 = vadd.f32 %v5648_v54, %v5576_v40  ;;  %12414 = vmatpush2.bf16.msra.mxu0 %v16674_v23 }
 0x512   : > { %v5650_v22 = vpop.f32.mrf.mxu1 }
 0x513   : > { %v20381_v20 = vadd.f32 %v5650_v22, %v5578_v52  ;;  %v16681_v52 = vld [vmem:[%s23923_s3 + $0x1c4] ss:$16 sps:$4 sm:$0xff]  }
 0x514   : > { %v20383_v26 = vpop.f32.mrf.mxu1  ;;  %12415 = vmatprep.subr.bf16.mxu0 %v16681_v52 }
 0x515   : > { %12416 = vmatpush2.bf16.msra.mxu0 %v16679_v29 }
 0x516   : > { %v5656_v49 = vpop.f32.mrf.mxu1  ;;  %12417 = vmatprep.subr.bf16.mxu0 %v16685_v56 }
 0x517   : > { %v20385_v16 = vadd.f32 %v5656_v49, %v5584_v11 }
 0x518   : > { %v5658_v47 = vpop.f32.mrf.mxu1 }
 0x519   : > { %v20387_v10 = vadd.f32 %v5658_v47, %v5586_v25  ;;  %12418 = vmatpush2.bf16.msra.mxu0 %v16683_v1 }
 0x51a   : > { %v20395_v40 = vpop.f32.mrf.mxu1 }
 0x51c   : > { %v20397_v57 = vpop.f32.mrf.mxu1 }
 0x53e   : > { %v5699_v41 = vpop.f32.mrf.mxu1 }
 0x53f   : > { %v5700_v30 = vadd.f32 %v5699_v41, %v5627_v38  ;;  %v16689_v38 = vld [vmem:[%s23923_s3 + $0x184] ss:$16 sps:$4 sm:$0xff]  }
 0x540   : > { %v5701_v48 = vpop.f32.mrf.mxu1  ;;  %12419 = vmatprep.subr.bf16.mxu0 %v16689_v38  ;;  %v16720_v38 = vld [vmem:[%s23923_s3 + $0x124] ss:$16 sps:$4 sm:$0xff]  }
 0x541   : > { %v20405_v11 = vadd.f32 %v5701_v48, %v5629_v8  ;;  %12420 = vmatpush2.bf16.msra.mxu0 %v16687_v35  ;;  %v16718_v35 = vld [vmem:[%s23923_s3 + $0x120] ss:$16 sps:$4 sm:$0xff]  }
 0x542   : > { %v5703_v31 = vpop.f32.mrf.mxu1 }
 0x543   : > { %23930 = vst [vmem:[#allocation2_spill] sm:$0xff] %v20405_v11  ;;  %v5704_v25 = vadd.f32 %v5703_v31, %v5631_v24  ;;  %v16693_v24 = vld [vmem:[%s23923_s3 + $0x164] ss:$16 sps:$4 sm:$0xff]  }
 0x544   : > { %v20413_v50 = vpop.f32.mrf.mxu1  ;;  %12421 = vmatprep.subr.bf16.mxu0 %v16693_v24 }
 0x545   : > { %12422 = vmatpush2.bf16.msra.mxu0 %v16691_v45 }
 0x546   : > { %v5709_v21 = vpop.f32.mrf.mxu1  ;;  %12423 = vmatprep.subr.bf16.mxu0 %v16698_v51 }
 0x547   : > { %v5710_v45 = vadd.f32 %v5709_v21, %v20369_v18  ;;  %v5361_v21 = vadd.f32 %v19880_v6, %v19746_v53  ;;  %v5351_v53 = vadd.f32 %v19855_v19, %v19694_v62  ;;  %v5371_v6 = vadd.f32 %v19975_v63, %v19796_v43 }
 0x548   : > { %v20421_v8 = vpop.f32.mrf.mxu1 }
 0x549   : > { %12424 = vmatpush2.bf16.msra.mxu0 %v16696_v61 }
 0x54a   : > { %v5713_v60 = vpop.f32.mrf.mxu1  ;;  %12425 = vmatprep.subr.bf16.mxu0 %v16720_v38 }
 0x54b   : > { %v5714_v17 = vadd.f32 %v5713_v60, %v20373_v55 }
 0x54c   : > { %v20429_v33 = vpop.f32.mrf.mxu1 }
 0x54d   : > { %12426 = vmatpush2.bf16.msra.mxu0 %v16718_v35  ;;  %v5434_v35 = vadd.f32 %v20056_v39, %v5361_v21 }
 0x54e   : > { %v5719_v27 = vpop.f32.mrf.mxu1 }
 0x550   : > { %v20431_v13 = vpop.f32.mrf.mxu1 }
 0x552   : > { %v5723_v54 = vpop.f32.mrf.mxu1 }
 0x554   : > { %v20439_v22 = vpop.f32.mrf.mxu1 }
 0x556   : > { %v5729_v49 = vpop.f32.mrf.mxu1 }
 0x558   : > { %v20441_v47 = vpop.f32.mrf.mxu1 }
 0x55a   : > { %v20443_v23 = vpop.f32.mrf.mxu1 }
 0x55c   : > { %v20445_v46 = vpop.f32.mrf.mxu1 }
 0x57e   : > { %v5772_v29 = vpop.f32.mrf.mxu1 }
 0x57f   : > { %v5773_v52 = vadd.f32 %v5772_v29, %v5700_v30 }
 0x580   : > { %v20447_v41 = vpop.f32.mrf.mxu1 }
 0x581   : > { %23931 = vst [vmem:[#allocation3_spill] sm:$0xff] %v20447_v41  ;;  %v5827_v31 = vmul.f32 0.2, %v5773_v52  ;;  %vm5811_vm0 = vcmp.gt.f32.partialorder %v5773_v52, 0.0 }
 0x582   : > { %v5776_v48 = vpop.f32.mrf.mxu1 }
 0x583   : > { %v5777_v1 = vadd.f32 %v5776_v48, %v5704_v25  ;;  %v20458_v61 = vsel %vm5811_vm0, %v5773_v52, %v5827_v31  ;;  %v5720_v31 = vadd.f32 %v5719_v27, %v20377_v34  ;;  %v5507_v34 = vadd.f32 %v20232_v14, %v5434_v35 }
 0x584   : > { %v20449_v56 = vpop.f32.mrf.mxu1  ;;  %vm5979_vm0 = vcmask 523264  }
 0x585   : > { %vm5813_vm1 = vcmp.gt.f32.partialorder %v5777_v1, 0.0  ;;  %v5829_v30 = vmul.f32 0.2, %v5777_v1 }
 0x586   : > { %v5782_v24 = vpop.f32.mrf.mxu1 }
 0x587   : > { %v20460_v25 = vsel %vm5813_vm1, %v5777_v1, %v5829_v30  ;;  %v5783_v51 = vadd.f32 %v5782_v24, %v5710_v45  ;;  %v5341_v45 = vadd.f32 %v19827_v4, %v19644_v37  ;;  %v5724_v37 = vadd.f32 %v5723_v54, %v20381_v20 }
 0x588   : > { %v5859_v29 = vpack.c.bf16 %v20460_v25, %v20458_v61  ;;  %v20464_v48 = vpop.f32.mrf.mxu1  ;;  %v5424_v4 = vadd.f32 %v20031_v28, %v5351_v53  ;;  %v5730_v28 = vadd.f32 %v5729_v49, %v20385_v16  ;;  %v5661_v54 = vadd.f32 %v20395_v40, %v20351_v58  ;;  %v16704_v61 = vld [vmem:[%s23923_s3 + $0x4c0] ss:$16 sps:$4 sm:$0xff]   ;;  %v16709_v25 = vld [vmem:[%s23923_s3 + $0x4a4] ss:$16 sps:$4 sm:$0xff]  }
 0x589   : > { %v5831_v11 = vmul.f32 0.2, %v5783_v51  ;;  %vm5815_vm2 = vcmp.gt.f32.partialorder %v5783_v51, 0.0  ;;  %v5414_v27 = vadd.f32 %v20006_v15, %v5341_v45  ;;  %v5722_v49 = vadd.f32 %v20431_v13, %v20379_v3 }
 0x58a   : > { %v5786_v41 = vpop.f32.mrf.mxu1  ;;  %v5497_v14 = vadd.f32 %v20207_v36, %v5424_v4  ;;  %v5734_v40 = vadd.f32 %v20443_v23, %v5661_v54  ;;  %v5712_v13 = vadd.f32 %v20421_v8, %v20371_v0  ;;  %v16700_v54 = vld [vmem:[%s23923_s3 + $0x4e0] ss:$16 sps:$4 sm:$0xff]  }
 0x58b   : > { %v5787_v18 = vadd.f32 %v5786_v41, %v5714_v17  ;;  %v20473_v30 = vsel %vm5815_vm2, %v5783_v51, %v5831_v11  ;;  %v5444_v11 = vadd.f32 %v20151_v32, %v5371_v6  ;;  %v5580_v41 = vadd.f32 %v20345_v44, %v5507_v34 }
 0x58c   : > { %v5788_v52 = vpop.f32.mrf.mxu1  ;;  %v5487_v19 = vadd.f32 %v20182_v5, %v5414_v27  ;;  %v5570_v44 = vadd.f32 %v20338_v42, %v5497_v14 }
 0x58d   : > { %vm5817_vm3 = vcmp.gt.f32.partialorder %v5787_v18, 0.0  ;;  %v5833_v1 = vmul.f32 0.2, %v5787_v18  ;;  %v5517_v24 = vadd.f32 %v20318_v7, %v5444_v11  ;;  %v5653_v51 = vadd.f32 %v20383_v26, %v5580_v41  ;;  %v23932_v41 = vld [vmem:[#allocation2_spill] sm:$0xff] }
 0x58e   : > { %v5792_v38 = vpop.f32.mrf.mxu1  ;;  %v5560_v20 = vadd.f32 %v20331_v2, %v5487_v19  ;;  %v5732_v26 = vadd.f32 %v20441_v47, %v20387_v10  ;;  %v5643_v16 = vadd.f32 %v20375_v59, %v5570_v44  ;;  %v16702_v44 = vld [vmem:[%s23923_s3 + $0x4e4] ss:$16 sps:$4 sm:$0xff]  }
 0x58f   : > { %v20475_v55 = vsel %vm5817_vm3, %v5787_v18, %v5833_v1  ;;  %v5793_v17 = vadd.f32 %v5792_v38, %v5720_v31  ;;  %v5590_v5 = vadd.f32 %v20359_v12, %v5517_v24  ;;  %v5726_v36 = vadd.f32 %v20439_v22, %v5653_v51 }
 0x590   : > { %v5861_v39 = vpack.c.bf16 %v20475_v55, %v20473_v30  ;;  %v5794_v60 = vpop.f32.mrf.mxu1  ;;  %v5633_v1 = vadd.f32 %v20367_v9, %v5560_v20  ;;  %v5716_v10 = vadd.f32 %v20429_v33, %v5643_v16  ;;  %v5785_v33 = vadd.f32 %v20464_v48, %v5712_v13  ;;  %v16706_v30 = vld [vmem:[%s23923_s3 + $0x4c4] ss:$16 sps:$4 sm:$0xff]   ;;  %v16721_v16 = vld [vmem:[%s23923_s3 + $0x440] ss:$16 sps:$4 sm:$0xff]  }
 0x591   : > { %v5835_v43 = vmul.f32 0.2, %v5793_v17  ;;  %vm5819_vm4 = vcmp.gt.f32.partialorder %v5793_v17, 0.0  ;;  %v5663_v58 = vadd.f32 %v20397_v57, %v5590_v5  ;;  %v5795_v47 = vadd.f32 %v5794_v60, %v5722_v49  ;;  %v16677_v5 = vld [vmem:[%s23926_s6] sm:$0xff]  }
 0x592   : > { %v5796_v62 = vpop.f32.mrf.mxu1  ;;  %v5706_v38 = vadd.f32 %v20413_v50, %v5633_v1  ;;  %v5832_v19 = vmul.f32 0.2, %v5785_v33  ;;  %vm5816_vm13 = vcmp.gt.f32.partialorder %v5785_v33, 0.0  ;;  %v23934_v55 = vmov 0   ;;  %v16726_v49 = vld [vmem:[%s23923_s3 + $0x424] ss:$16 sps:$4 sm:$0xff]  }
 0x593   : > { %v5797_v63 = vadd.f32 %v5796_v62, %v5724_v37  ;;  %v5851_v18 = vsel %vm5819_vm4, %v5793_v17, %v5835_v43  ;;  %v5736_v59 = vadd.f32 %v20445_v46, %v5663_v58  ;;  %v5789_v17 = vadd.f32 %v5788_v52, %v5716_v10  ;;  %v23933_v62 = vld [vmem:[#allocation3_spill] sm:$0xff]  ;;  %v16728_v1 = vld [vmem:[%s23923_s3 + $0x400] ss:$16 sps:$4 sm:$0xff]   ;;  %v16733_v58 = vld [vmem:[%s23923_s3 + $0x5e4] ss:$16 sps:$4 sm:$0xff]  }
 0x594   : > { %v5798_v15 = vpop.f32.mrf.mxu1  ;;  %v5836_v34 = vmul.f32 0.2, %v5795_v47  ;;  %v5779_v27 = vadd.f32 %v20449_v56, %v5706_v38  ;;  %vm5820_vm11 = vcmp.gt.f32.partialorder %v5795_v47, 0.0  ;;  %v5775_v48 = vadd.f32 %v23933_v62, %v23932_v41  ;;  %v16737_v10 = vld [vmem:[%s23923_s3 + $0x5c4] ss:$16 sps:$4 sm:$0xff]   ;;  %v16741_v41 = vld [vmem:[%s23926_s6 + $0x68] sm:$0xff]  }
 0x595   : > { %vm5821_vm5 = vcmp.gt.f32.partialorder %v5797_v63, 0.0  ;;  %v5837_v32 = vmul.f32 0.2, %v5797_v63  ;;  %v5799_v31 = vadd.f32 %v5798_v15, %v5726_v36  ;;  %v5834_v8 = vmul.f32 0.2, %v5789_v17  ;;  %v16695_v38 = vld [vmem:[%s23926_s6 + $0x30] sm:$0xff]  }
 0x596   : > { %v5802_v7 = vpop.f32.mrf.mxu1  ;;  %vm5818_vm12 = vcmp.gt.f32.partialorder %v5789_v17, 0.0  ;;  %v5852_v43 = vsel %vm5820_vm11, %v5795_v47, %v5836_v34  ;;  %v5830_v14 = vmul.f32 0.2, %v5779_v27  ;;  %vm5814_vm14 = vcmp.gt.f32.partialorder %v5779_v27, 0.0  ;;  %v16713_v36 = vld [vmem:[%s23923_s3 + $0x484] ss:$16 sps:$4 sm:$0xff]  }
 0x597   : > { %v5853_v21 = vsel %vm5821_vm5, %v5797_v63, %v5837_v32  ;;  %v5803_v2 = vadd.f32 %v5802_v7, %v5730_v28  ;;  %v5838_v9 = vmul.f32 0.2, %v5799_v31  ;;  %vm5822_vm8 = vcmp.gt.f32.partialorder %v5799_v31, 0.0  ;;  %v16711_v7 = vld [vmem:[%s23923_s3 + $0x480] ss:$16 sps:$4 sm:$0xff]  }
 0x598   : > { %v5863_v42 = vpack.c.bf16 %v5853_v21, %v5851_v18  ;;  %v5804_v12 = vpop.f32.mrf.mxu1  ;;  %v5850_v24 = vsel %vm5818_vm12, %v5789_v17, %v5834_v8  ;;  %v5828_v56 = vmul.f32 0.2, %v5775_v48  ;;  %v5848_v51 = vsel %vm5816_vm13, %v5785_v33, %v5832_v19  ;;  %v16682_v18 = vld [vmem:[%s23926_s6 + $0x10] sm:$0xff]   ;;  %v16710_v17 = vld [vmem:[%s23926_s6 + $0x48] sm:$0xff]   ;;  %v16727_v8 = vld [vmem:[%s23926_s6 + $0x58] sm:$0xff]  }
 0x599   : > { %v5805_v22 = vadd.f32 %v5804_v12, %v5732_v26  ;;  %v5839_v45 = vmul.f32 0.2, %v5803_v2  ;;  %vm5823_vm6 = vcmp.gt.f32.partialorder %v5803_v2, 0.0  ;;  %v5854_v4 = vsel %vm5822_vm8, %v5799_v31, %v5838_v9  ;;  %v16716_v26 = vld [vmem:[%s23923_s3 + $0x464] ss:$16 sps:$4 sm:$0xff]  }
 0x59a   : > { %v5806_v35 = vpop.f32.mrf.mxu1  ;;  %v5864_v63 = vpack.c.bf16 %v5854_v4, %v5852_v43  ;;  %vm5812_vm15 = vcmp.gt.f32.partialorder %v5775_v48, 0.0  ;;  %v5862_v15 = vpack.c.bf16 %v5850_v24, %v5848_v51  ;;  %v5846_v20 = vsel %vm5814_vm14, %v5779_v27, %v5830_v14  ;;  %v16714_v21 = vld [vmem:[%s23923_s3 + $0x460] ss:$16 sps:$4 sm:$0xff]   ;;  %v16730_v12 = vld [vmem:[%s23923_s3 + $0x404] ss:$16 sps:$4 sm:$0xff]  }
 0x59b   : > { %v5807_v3 = vadd.f32 %v5806_v35, %v5734_v40  ;;  %v5840_v53 = vmul.f32 0.2, %v5805_v22  ;;  %vm5824_vm9 = vcmp.gt.f32.partialorder %v5805_v22, 0.0  ;;  %v5855_v50 = vsel %vm5823_vm6, %v5803_v2, %v5839_v45  ;;  %v16723_v2 = vld [vmem:[%s23923_s3 + $0x444] ss:$16 sps:$4 sm:$0xff]   ;;  %v16694_v35 = vld [vmem:[%s23926_s6 + $0x28] sm:$0xff]  }
 0x59c   : > { %v5808_v57 = vpop.f32.mrf.mxu1  ;;  %v5844_v28 = vsel %vm5812_vm15, %v5775_v48, %v5828_v56  ;;  %v16724_v31 = vld [vmem:[%s23923_s3 + $0x420] ss:$16 sps:$4 sm:$0xff]   ;;  %v16740_v13 = vld [vmem:[%s23923_s3 + $0x5a4] ss:$16 sps:$4 sm:$0xff]   ;;  %v16767_v48 = vld [vmem:[%s23926_s6 + $0x78] sm:$0xff]  }
 0x59d   : > { %vm5825_vm7 = vcmp.gt.f32.partialorder %v5807_v3, 0.0  ;;  %v5841_v23 = vmul.f32 0.2, %v5807_v3  ;;  %v5809_v6 = vadd.f32 %v5808_v57, %v5736_v59  ;;  %v5856_v52 = vsel %vm5824_vm9, %v5805_v22, %v5840_v53  ;;  %v16690_v40 = vld [vmem:[%s23926_s6 + $0x20] sm:$0xff]   ;;  %v16699_v59 = vld [vmem:[%s23926_s6 + $0x38] sm:$0xff]   ;;  %v16754_v62 = vld [vmem:[%s23926_s6 + $0x70] sm:$0xff]  }
 0x59e   : > { %v5860_v32 = vpack.c.bf16 %v5846_v20, %v5844_v28  ;;  %v16731_v22 = vld [vmem:[%s23923_s3 + $0x5e0] ss:$16 sps:$4 sm:$0xff]   ;;  %v16744_v9 = vld [vmem:[%s23923_s3 + $0x104] ss:$16 sps:$4 sm:$0xff]  }
 0x59f   : > { %v5857_v46 = vsel %vm5825_vm7, %v5807_v3, %v5841_v23  ;;  %vm5826_vm10 = vcmp.gt.f32.partialorder %v5809_v6, 0.0  ;;  %v5842_v60 = vmul.f32 0.2, %v5809_v6  ;;  %v16735_v47 = vld [vmem:[%s23923_s3 + $0x5c0] ss:$16 sps:$4 sm:$0xff]   ;;  %12427 = vmatprep.subr.bf16.mxu0 %v16744_v9 }
 0x5a0   : > { %v5865_v0 = vpack.c.bf16 %v5857_v46, %v5855_v50  ;;  %v16703_v45 = vld [vmem:[%s23926_s6 + $0x40] sm:$0xff]   ;;  %v16717_v50 = vld [vmem:[%s23926_s6 + $0x50] sm:$0xff]  }
 0x5a1   : > { %v5858_v37 = vsel %vm5826_vm10, %v5809_v6, %v5842_v60  ;;  %v16738_v3 = vld [vmem:[%s23923_s3 + $0x5a0] ss:$16 sps:$4 sm:$0xff]   ;;  %v16747_v57 = vld [vmem:[%s23923_s3 + $0x584] ss:$16 sps:$4 sm:$0xff]  }
 0x5a2   : > { %v5866_v11 = vpack.c.bf16 %v5858_v37, %v5856_v52  ;;  %v16742_v53 = vld [vmem:[%s23923_s3 + $0x100] ss:$16 sps:$4 sm:$0xff]   ;;  %v16750_v6 = vld [vmem:[%s23923_s3 + $0x2e4] ss:$16 sps:$4 sm:$0xff]  }
 0x5a3   : > { %v16745_v23 = vld [vmem:[%s23923_s3 + $0x580] ss:$16 sps:$4 sm:$0xff]   ;;  %12428 = vmatpush2.bf16.msra.mxu0 %v16742_v53  ;;  %v16753_v33 = vld [vmem:[%s23923_s3 + $0x564] ss:$16 sps:$4 sm:$0xff]  }
 0x5a4   : > { %6036 = vmatprep.subr.bf16.mxu1 %v5866_v11  ;;  %v16751_v34 = vld [vmem:[%s23923_s3 + $0x560] ss:$16 sps:$4 sm:$0xff]   ;;  %12440 = vmatprep.subr.bf16.mxu0 %v16750_v6  ;;  %v16760_v46 = vld [vmem:[%s23923_s3 + $0x544] ss:$16 sps:$4 sm:$0xff]  }
 0x5a5   : > { %6037 = vmatpush1.bf16.msra.mxu1 %v5865_v0  ;;  %v16758_v60 = vld [vmem:[%s23923_s3 + $0x540] ss:$16 sps:$4 sm:$0xff]   ;;  %v16766_v0 = vld [vmem:[%s23923_s3 + $0x524] ss:$16 sps:$4 sm:$0xff]  }
 0x5a6   : > { %6038 = vmatprep.subr.bf16.mxu1 %v5864_v63  ;;  %v16764_v27 = vld [vmem:[%s23923_s3 + $0x520] ss:$16 sps:$4 sm:$0xff]   ;;  %v16773_v52 = vld [vmem:[%s23923_s3 + $0x504] ss:$16 sps:$4 sm:$0xff]  }
 0x5a7   : > { %v16771_v37 = vld [vmem:[%s23923_s3 + $0x500] ss:$16 sps:$4 sm:$0xff]   ;;  %v16779_v4 = vld [vmem:[%s23923_s3 + $0x8e4] ss:$16 sps:$4 sm:$0xff]  }
 0x5a8   : > { %v16734_v11 = vld [vmem:[%s23926_s6 + $0x60] sm:$0xff]  }
 0x5a9   : > { %6039 = vmatpush1.bf16.msra.mxu1 %v5863_v42  ;;  %v16686_v42 = vld [vmem:[%s23926_s6 + $0x18] sm:$0xff]   ;;  %v16748_v56 = vld [vmem:[%s23923_s3 + $0x2e0] ss:$16 sps:$4 sm:$0xff]   ;;  %v16757_v20 = vld [vmem:[%s23923_s3 + $0x2c4] ss:$16 sps:$4 sm:$0xff]  }
 0x5aa   : > { %6040 = vmatprep.subr.bf16.mxu1 %v5862_v15  ;;  %v16792_v9 = vld [vmem:[%s23923_s3 + $0x200] ss:$16 sps:$4 sm:$0xff]   ;;  %v16800_v53 = vld [vmem:[%s23923_s3 + $0x3e4] ss:$16 sps:$4 sm:$0xff]  }
 0x5ad   : > { %6041 = vmatpush1.bf16.msra.mxu1 %v5861_v39  ;;  %v16707_v39 = vld [vmem:[%s23923_s3 + $0x4a0] ss:$16 sps:$4 sm:$0xff]  }
 0x5ae   : > { %6042 = vmatprep.subr.bf16.mxu1 %v5860_v32  ;;  %v16755_v32 = vld [vmem:[%s23923_s3 + $0x2c0] ss:$16 sps:$4 sm:$0xff]  }
 0x5b1   : > { %6043 = vmatpush1.bf16.msra.mxu1 %v5859_v29  ;;  %v16678_v29 = vld [vmem:[%s23926_s6 + $0x8] sm:$0xff]  }
 0x5b2   : > { %12483 = vmatprep.subr.bf16.mxu1 %v16702_v44 }
 0x5b4   : > { %14510 = vmatmul.mubr.msk.bf16.vlgmr.msra.gmra.mxu1 %vm5979_vm0, %v16677_v5  ;;  %v16763_v5 = vld [vmem:[%s23923_s3 + $0x2a4] ss:$16 sps:$4 sm:$0xff]  }
 0x5b5   : > { %6070 = vmatprep.mubr.bf16.mxu1 %v23934_v55  ;;  %12484 = vmatpush1.bf16.msra.mxu1 %v16700_v54 }
 0x5b6   : > { %12485 = vmatprep.subr.bf16.mxu1 %v16706_v30 }
 0x5b9   : > { %12486 = vmatpush1.bf16.msra.mxu1 %v16704_v61 }
 0x5ba   : > { %12487 = vmatprep.subr.bf16.mxu1 %v16709_v25  ;;  %v16770_v25 = vld [vmem:[%s23923_s3 + $0x284] ss:$16 sps:$4 sm:$0xff]  }
 0x5bc   : > { %14511 = vmatmul.mubr.msk.bf16.gmra.mxu1 %vm5979_vm0, %v16678_v29 }
 0x5bd   : > { %6080 = vmatprep.mubr.bf16.mxu1 %v23934_v55  ;;  %12488 = vmatpush1.bf16.msra.mxu1 %v16707_v39  ;;  %v16768_v39 = vld [vmem:[%s23923_s3 + $0x280] ss:$16 sps:$4 sm:$0xff]  }
 0x5be   : > { %12489 = vmatprep.subr.bf16.mxu1 %v16713_v36 }
 0x5c1   : > { %12490 = vmatpush1.bf16.msra.mxu1 %v16711_v7  ;;  %v16776_v7 = vld [vmem:[%s23923_s3 + $0x264] ss:$16 sps:$4 sm:$0xff]  }
 0x5c2   : > { %12491 = vmatprep.subr.bf16.mxu1 %v16716_v26 }
 0x5c4   : > { %14512 = vmatmul.mubr.msk.bf16.gmra.mxu1 %vm5979_vm0, %v16682_v18 }
 0x5c5   : > { %6090 = vmatprep.mubr.bf16.mxu1 %v23934_v55  ;;  %12492 = vmatpush1.bf16.msra.mxu1 %v16714_v21 }
 0x5c6   : > { %12493 = vmatprep.subr.bf16.mxu1 %v16723_v2  ;;  %v16774_v2 = vld [vmem:[%s23923_s3 + $0x260] ss:$16 sps:$4 sm:$0xff]  }
 0x5c9   : > { %12494 = vmatpush1.bf16.msra.mxu1 %v16721_v16  ;;  %v16777_v16 = vld [vmem:[%s23923_s3 + $0x8e0] ss:$16 sps:$4 sm:$0xff]  }
 0x5ca   : > { %12495 = vmatprep.subr.bf16.mxu1 %v16726_v49  ;;  %v16782_v49 = vld [vmem:[%s23923_s3 + $0x244] ss:$16 sps:$4 sm:$0xff]  }
 0x5cc   : > { %14513 = vmatmul.mubr.msk.bf16.gmra.mxu1 %vm5979_vm0, %v16686_v42  ;;  %v16785_v42 = vld [vmem:[%s23923_s3 + $0x8c4] ss:$16 sps:$4 sm:$0xff]  }
 0x5cd   : > { %6100 = vmatprep.mubr.bf16.mxu1 %v23934_v55  ;;  %12496 = vmatpush1.bf16.msra.mxu1 %v16724_v31 }
 0x5ce   : > { %12497 = vmatprep.subr.bf16.mxu1 %v16730_v12 }
 0x5d1   : > { %12498 = vmatpush1.bf16.msra.mxu1 %v16728_v1  ;;  %v16780_v1 = vld [vmem:[%s23923_s3 + $0x240] ss:$16 sps:$4 sm:$0xff]  }
 0x5d2   : > { %12499 = vmatprep.subr.bf16.mxu1 %v16733_v58  ;;  %v16783_v58 = vld [vmem:[%s23923_s3 + $0x8c0] ss:$16 sps:$4 sm:$0xff]  }
 0x5d4   : > { %14514 = vmatmul.mubr.msk.bf16.gmra.mxu1 %vm5979_vm0, %v16690_v40  ;;  %v16788_v40 = vld [vmem:[%s23923_s3 + $0x224] ss:$16 sps:$4 sm:$0xff]  }
 0x5d5   : > { %6110 = vmatprep.mubr.bf16.mxu1 %v23934_v55  ;;  %12500 = vmatpush2.bf16.msra.mxu1 %v16731_v22  ;;  %v16791_v22 = vld [vmem:[%s23923_s3 + $0x8a4] ss:$16 sps:$4 sm:$0xff]  }
 0x5d6   : > { %12501 = vmatprep.subr.bf16.mxu1 %v16737_v10 }
 0x5d9   : > { %12502 = vmatpush2.bf16.msra.mxu1 %v16735_v47 }
 0x5da   : > { %12503 = vmatprep.subr.bf16.mxu1 %v16740_v13 }
 0x5dc   : > { %14515 = vmatmul.mubr.msk.bf16.gmra.mxu1 %vm5979_vm0, %v16694_v35 }
 0x5dd   : > { %6120 = vmatprep.mubr.bf16.mxu1 %v23934_v55  ;;  %12504 = vmatpush2.bf16.msra.mxu1 %v16738_v3  ;;  %v16797_v3 = vld [vmem:[%s23923_s3 + $0x884] ss:$16 sps:$4 sm:$0xff]  }
 0x5de   : > { %12505 = vmatprep.subr.bf16.mxu1 %v16747_v57  ;;  %v16795_v57 = vld [vmem:[%s23923_s3 + $0x880] ss:$16 sps:$4 sm:$0xff]  }
 0x5e1   : > { %12506 = vmatpush2.bf16.msra.mxu1 %v16745_v23  ;;  %v16803_v23 = vld [vmem:[%s23923_s3 + $0x864] ss:$16 sps:$4 sm:$0xff]  }
 0x5e2   : > { %12507 = vmatprep.subr.bf16.mxu1 %v16753_v33 }
 0x5e4   : > { %14516 = vmatmul.mubr.msk.bf16.gmra.mxu1 %vm5979_vm0, %v16695_v38  ;;  %v16786_v38 = vld [vmem:[%s23923_s3 + $0x220] ss:$16 sps:$4 sm:$0xff]  }
 0x5e5   : > { %6130 = vmatprep.mubr.bf16.mxu1 %v23934_v55  ;;  %12508 = vmatpush2.bf16.msra.mxu1 %v16751_v34  ;;  %v16798_v34 = vld [vmem:[%s23923_s3 + $0x3e0] ss:$16 sps:$4 sm:$0xff]  }
 0x5e6   : > { %12509 = vmatprep.subr.bf16.mxu1 %v16760_v46 }
 0x5e9   : > { %12510 = vmatpush2.bf16.msra.mxu1 %v16758_v60  ;;  %v16806_v60 = vld [vmem:[%s23923_s3 + $0x3c4] ss:$16 sps:$4 sm:$0xff]  }
 0x5ea   : > { %12511 = vmatprep.subr.bf16.mxu1 %v16766_v0 }
 0x5ec   : > { %14517 = vmatmul.mubr.msk.bf16.gmra.mxu1 %vm5979_vm0, %v16699_v59  ;;  %v16789_v59 = vld [vmem:[%s23923_s3 + $0x8a0] ss:$16 sps:$4 sm:$0xff]  }
 0x5ed   : > { %6140 = vmatprep.mubr.bf16.mxu1 %v23934_v55  ;;  %12512 = vmatpush2.bf16.msra.mxu1 %v16764_v27  ;;  %v16809_v27 = vld [vmem:[%s23923_s3 + $0x844] ss:$16 sps:$4 sm:$0xff]  }
 0x5ee   : > { %12513 = vmatprep.subr.bf16.mxu1 %v16773_v52  ;;  %v16804_v52 = vld [vmem:[%s23923_s3 + $0x3c0] ss:$16 sps:$4 sm:$0xff]  }
 0x5f1   : > { %12514 = vmatpush2.bf16.msra.mxu1 %v16771_v37  ;;  %v16807_v37 = vld [vmem:[%s23923_s3 + $0x840] ss:$16 sps:$4 sm:$0xff]  }
 0x5f2   : > { %12569 = vmatprep.subr.bf16.mxu1 %v16779_v4  ;;  %v16812_v4 = vld [vmem:[%s23923_s3 + $0x3a4] ss:$16 sps:$4 sm:$0xff]  }
 0x5f4   : > { %14518 = vmatmul.mubr.msk.bf16.gmra.mxu1 %vm5979_vm0, %v16703_v45  ;;  %v16794_v45 = vld [vmem:[%s23923_s3 + $0x204] ss:$16 sps:$4 sm:$0xff]  }
 0x5f5   : > { %6150 = vmatprep.mubr.bf16.mxu1 %v23934_v55 }
 0x5fc   : > { %14519 = vmatmul.mubr.msk.bf16.gmra.mxu1 %vm5979_vm0, %v16710_v17 }
 0x5fd   : > { %6160 = vmatprep.mubr.bf16.mxu1 %v23934_v55 }
 0x604   : > { %14520 = vmatmul.mubr.msk.bf16.gmra.mxu1 %vm5979_vm0, %v16717_v50  ;;  %v16801_v50 = vld [vmem:[%s23923_s3 + $0x860] ss:$16 sps:$4 sm:$0xff]  }
 0x605   : > { %6170 = vmatprep.mubr.bf16.mxu1 %v23934_v55 }
 0x60c   : > { %14521 = vmatmul.mubr.msk.bf16.gmra.mxu1 %vm5979_vm0, %v16727_v8 }
 0x60d   : > { %6180 = vmatprep.mubr.bf16.mxu1 %v23934_v55 }
 0x614   : > { %14522 = vmatmul.mubr.msk.bf16.gmra.mxu1 %vm5979_vm0, %v16734_v11  ;;  %v16815_v11 = vld [vmem:[%s23923_s3 + $0x824] ss:$16 sps:$4 sm:$0xff]  }
 0x615   : > { %6190 = vmatprep.mubr.bf16.mxu1 %v23934_v55 }
 0x61c   : > { %14523 = vmatmul.mubr.msk.bf16.gmra.mxu1 %vm5979_vm0, %v16741_v41 }
 0x61d   : > { %6200 = vmatprep.mubr.bf16.mxu1 %v23934_v55 }
 0x624   : > { %14524 = vmatmul.mubr.msk.bf16.gmra.mxu1 %vm5979_vm0, %v16754_v62 }
 0x625   : > { %6210 = vmatprep.mubr.bf16.mxu1 %v23934_v55  ;;  %v16761_v55 = vld [vmem:[%s23923_s3 + $0x2a0] ss:$16 sps:$4 sm:$0xff]  }
 0x62c   : > { %14525 = vmatmul.mubr.msk.bf16.gmra.mxu1 %vm5979_vm0, %v16767_v48  ;;  %v16810_v48 = vld [vmem:[%s23923_s3 + $0x3a0] ss:$16 sps:$4 sm:$0xff]  }
 0x674   : > { %v6062_v19 = vpop.f32.mrf.mxu1 }
 0x676   : > { %v6064_v43 = vpop.f32.mrf.mxu1 }
 0x678   : > { %v6066_v63 = vpop.f32.mrf.mxu1 }
 0x679   : > { %v20715_v51 = vpack.c.bf16 %v6066_v63, %v6062_v19  ;;  %v16813_v19 = vld [vmem:[%s23923_s3 + $0x820] ss:$16 sps:$4 sm:$0xff]   ;;  %v16821_v63 = vld [vmem:[%s23923_s3 + $0x804] ss:$16 sps:$4 sm:$0xff]  }
 0x67a   : > { %v6068_v14 = vpop.f32.mrf.mxu1 }
 0x67b   : > { %v20710_v24 = vpack.c.bf16 %v6068_v14, %v6064_v43  ;;  %v16818_v43 = vld [vmem:[%s23923_s3 + $0x384] ss:$16 sps:$4 sm:$0xff]  }
 0x67c   : > { %v20717_v15 = vpop.f32.mrf.mxu1 }
 0x67d   : > { %12429 = vmatprep.mubr.bf16.mxu0 %v20710_v24 }
 0x67e   : > { %v6074_v28 = vpop.f32.mrf.mxu1  ;;  %12430 = vmatmul.mubr.bf16.vlgmr.msra.gmra.mxu0 %v20715_v51 }
 0x67f   : > { %12441 = vmatpush1.bf16.msra.mxu0 %v16748_v56  ;;  %v16816_v56 = vld [vmem:[%s23923_s3 + $0x380] ss:$16 sps:$4 sm:$0xff]  }
 0x680   : > { %v20727_v44 = vpop.f32.mrf.mxu1  ;;  %12442 = vmatprep.subr.bf16.mxu0 %v16757_v20  ;;  %v16819_v20 = vld [vmem:[%s23923_s3 + $0x800] ss:$16 sps:$4 sm:$0xff]  }
 0x682   : > { %v6078_v54 = vpop.f32.mrf.mxu1 }
 0x683   : > { %v20732_v30 = vpack.c.bf16 %v6078_v54, %v6074_v28  ;;  %12443 = vmatpush1.bf16.msra.mxu0 %v16755_v32  ;;  %v16824_v28 = vld [vmem:[%s23923_s3 + $0x364] ss:$16 sps:$4 sm:$0xff]   ;;  %v16822_v54 = vld [vmem:[%s23923_s3 + $0x360] ss:$16 sps:$4 sm:$0xff]  }
 0x684   : > { %v6082_v61 = vpop.f32.mrf.mxu1  ;;  %12444 = vmatprep.subr.bf16.mxu0 %v16763_v5  ;;  %v16827_v32 = vld [vmem:[%s23923_s3 + $0x9e4] ss:$16 sps:$4 sm:$0xff]  }
 0x685   : > { %12472 = vmatprep.mubr.bf16.mxu0 %v20732_v30 }
 0x686   : > { %v6084_v29 = vpop.f32.mrf.mxu1 }
 0x687   : > { %12445 = vmatpush1.bf16.msra.mxu0 %v16761_v55  ;;  %v16825_v55 = vld [vmem:[%s23923_s3 + $0x9e0] ss:$16 sps:$4 sm:$0xff]  }
 0x688   : > { %v6086_v36 = vpop.f32.mrf.mxu1  ;;  %12446 = vmatprep.subr.bf16.mxu0 %v16770_v25  ;;  %v16833_v25 = vld [vmem:[%s23923_s3 + $0x9c4] ss:$16 sps:$4 sm:$0xff]  }
 0x689   : > { %v20747_v26 = vpack.c.bf16 %v6086_v36, %v6082_v61  ;;  %v16830_v61 = vld [vmem:[%s23923_s3 + $0x344] ss:$16 sps:$4 sm:$0xff]   ;;  %v16831_v36 = vld [vmem:[%s23923_s3 + $0x9c0] ss:$16 sps:$4 sm:$0xff]  }
 0x68a   : > { %v6088_v18 = vpop.f32.mrf.mxu1 }
 0x68b   : > { %v20749_v21 = vpack.c.bf16 %v6088_v18, %v6084_v29  ;;  %12447 = vmatpush1.bf16.msra.mxu0 %v16768_v39  ;;  %v16828_v39 = vld [vmem:[%s23923_s3 + $0x340] ss:$16 sps:$4 sm:$0xff]   ;;  %v16839_v18 = vld [vmem:[%s23923_s3 + $0x9a4] ss:$16 sps:$4 sm:$0xff]  }
 0x68c   : > { %12448 = vmatprep.subr.bf16.mxu0 %v16776_v7  ;;  %v6092_v31 = vpop.f32.mrf.mxu1  ;;  %v16836_v7 = vld [vmem:[%s23923_s3 + $0x324] ss:$16 sps:$4 sm:$0xff]  }
 0x68d   : > { %12515 = vmatprep.mubr.bf16.mxu1 %v20749_v21 }
 0x68e   : > { %12516 = vmatmul.mubr.bf16.vlgmr.msra.gmra.mxu1 %v20747_v26  ;;  %v20765_v12 = vpop.f32.mrf.mxu1 }
 0x68f   : > { %12449 = vmatpush1.bf16.msra.mxu0 %v16774_v2  ;;  %12570 = vmatpush1.bf16.msra.mxu1 %v16777_v16  ;;  %v16834_v16 = vld [vmem:[%s23923_s3 + $0x320] ss:$16 sps:$4 sm:$0xff]  }
 0x690   : > { %12450 = vmatprep.subr.bf16.mxu0 %v16782_v49  ;;  %12571 = vmatprep.subr.bf16.mxu1 %v16785_v42  ;;  %v6096_v10 = vpop.f32.mrf.mxu1  ;;  %v16837_v49 = vld [vmem:[%s23923_s3 + $0x9a0] ss:$16 sps:$4 sm:$0xff]   ;;  %v16842_v42 = vld [vmem:[%s23923_s3 + $0x304] ss:$16 sps:$4 sm:$0xff]  }
 0x691   : > { %v20779_v47 = vpack.c.bf16 %v6096_v10, %v6092_v31  ;;  %v16845_v31 = vld [vmem:[%s23923_s3 + $0x984] ss:$16 sps:$4 sm:$0xff]  }
 0x692   : > { %v20781_v35 = vpop.f32.mrf.mxu1  ;;  %v16848_v10 = vld [vmem:[%s23923_s3 + $0x6e4] ss:$16 sps:$4 sm:$0xff]  }
 0x693   : > { %12451 = vmatpush1.bf16.msra.mxu0 %v16780_v1  ;;  %12572 = vmatpush1.bf16.msra.mxu1 %v16783_v58  ;;  %v16840_v58 = vld [vmem:[%s23923_s3 + $0x300] ss:$16 sps:$4 sm:$0xff]  }
 0x694   : > { %12452 = vmatprep.subr.bf16.mxu0 %v16788_v40  ;;  %12573 = vmatprep.subr.bf16.mxu1 %v16791_v22  ;;  %v20795_v13 = vpop.f32.mrf.mxu1  ;;  %v16843_v40 = vld [vmem:[%s23923_s3 + $0x980] ss:$16 sps:$4 sm:$0xff]  }
 0x696   : > { %v6104_v17 = vpop.f32.mrf.mxu1 }
 0x697   : > { %12453 = vmatpush1.bf16.msra.mxu0 %v16786_v38  ;;  %12574 = vmatpush1.bf16.msra.mxu1 %v16789_v59  ;;  %v16851_v38 = vld [vmem:[%s23923_s3 + $0x964] ss:$16 sps:$4 sm:$0xff]  }
 0x698   : > { %12454 = vmatprep.subr.bf16.mxu0 %v16794_v45  ;;  %12575 = vmatprep.subr.bf16.mxu1 %v16797_v3  ;;  %v20809_v6 = vpop.f32.mrf.mxu1  ;;  %v16846_v45 = vld [vmem:[%s23923_s3 + $0x6e0] ss:$16 sps:$4 sm:$0xff]  }
 0x699   : > { %v16849_v3 = vld [vmem:[%s23923_s3 + $0x960] ss:$16 sps:$4 sm:$0xff]  }
 0x69a   : > { %v6108_v33 = vpop.f32.mrf.mxu1 }
 0x69b   : > { %12455 = vmatpush1.bf16.msra.mxu0 %v16792_v9  ;;  %12576 = vmatpush1.bf16.msra.mxu1 %v16795_v57  ;;  %v20817_v46 = vpack.c.bf16 %v6108_v33, %v6104_v17  ;;  %v20934_v9 = vpack.c.bf16 %v20727_v44, %v20717_v15  ;;  %v16854_v57 = vld [vmem:[%s23923_s3 + $0x6c4] ss:$16 sps:$4 sm:$0xff]   ;;  %v20946_v33 = vpack.c.bf16 %v20781_v35, %v20765_v12  ;;  %v16852_v15 = vld [vmem:[%s23923_s3 + $0x6c0] ss:$16 sps:$4 sm:$0xff]  }
 0x69c   : > { %12456 = vmatprep.subr.bf16.mxu0 %v16800_v53  ;;  %12577 = vmatprep.subr.bf16.mxu1 %v16803_v23  ;;  %v6112_v0 = vpop.f32.mrf.mxu1  ;;  %v16857_v53 = vld [vmem:[%s23923_s3 + $0x944] ss:$16 sps:$4 sm:$0xff]   ;;  %v16855_v44 = vld [vmem:[%s23923_s3 + $0x940] ss:$16 sps:$4 sm:$0xff]  }
 0x69d   : > { %12601 = vmatprep.mubr.bf16.mxu1 %v20817_v46  ;;  %v16860_v12 = vld [vmem:[%s23923_s3 + $0x6a4] ss:$16 sps:$4 sm:$0xff]  }
 0x69e   : > { %v20826_v8 = vpop.f32.mrf.mxu1  ;;  %v16863_v35 = vld [vmem:[%s23923_s3 + $0x924] ss:$16 sps:$4 sm:$0xff]  }
 0x69f   : > { %12457 = vmatpush2.bf16.msra.mxu0 %v16798_v34  ;;  %12578 = vmatpush1.bf16.msra.mxu1 %v16801_v50 }
 0x6a0   : > { %12458 = vmatprep.subr.bf16.mxu0 %v16806_v60  ;;  %12579 = vmatprep.subr.bf16.mxu1 %v16809_v27  ;;  %v6116_v41 = vpop.f32.mrf.mxu1  ;;  %v16858_v27 = vld [vmem:[%s23923_s3 + $0x6a0] ss:$16 sps:$4 sm:$0xff]  }
 0x6a1   : > { %v20840_v62 = vpack.c.bf16 %v6116_v41, %v6112_v0  ;;  %v16861_v0 = vld [vmem:[%s23923_s3 + $0x920] ss:$16 sps:$4 sm:$0xff]  }
 0x6a2   : > { %v20854_v14 = vpop.f32.mrf.mxu1  ;;  %v16864_v41 = vld [vmem:[%s23923_s3 + $0x680] ss:$16 sps:$4 sm:$0xff]  }
 0x6a3   : > { %12459 = vmatpush2.bf16.msra.mxu0 %v16804_v52  ;;  %12580 = vmatpush1.bf16.msra.mxu1 %v16807_v37  ;;  %v16866_v37 = vld [vmem:[%s23923_s3 + $0x684] ss:$16 sps:$4 sm:$0xff]  }
 0x6a4   : > { %12460 = vmatprep.subr.bf16.mxu0 %v16812_v4  ;;  %12581 = vmatprep.subr.bf16.mxu1 %v16815_v11  ;;  %v20868_v5 = vpop.f32.mrf.mxu1  ;;  %v16869_v4 = vld [vmem:[%s23923_s3 + $0x904] ss:$16 sps:$4 sm:$0xff]  }
 0x6a6   : > { %v20882_v29 = vpop.f32.mrf.mxu1 }
 0x6a7   : > { %12461 = vmatpush2.bf16.msra.mxu0 %v16810_v48  ;;  %12582 = vmatpush1.bf16.msra.mxu1 %v16813_v19  ;;  %v16867_v48 = vld [vmem:[%s23923_s3 + $0x900] ss:$16 sps:$4 sm:$0xff]  }
 0x6a8   : > { %12462 = vmatprep.subr.bf16.mxu0 %v16818_v43  ;;  %12583 = vmatprep.subr.bf16.mxu1 %v16821_v63  ;;  %v20896_v2 = vpop.f32.mrf.mxu1  ;;  %v16872_v43 = vld [vmem:[%s23923_s3 + $0x664] ss:$16 sps:$4 sm:$0xff]  }
 0x6a9   : > { %v16875_v63 = vld [vmem:[%s23923_s3 + $0xce4] ss:$16 sps:$4 sm:$0xff]  }
 0x6aa   : > { %v20910_v1 = vpop.f32.mrf.mxu1 }
 0x6ab   : > { %12463 = vmatpush2.bf16.msra.mxu0 %v16816_v56  ;;  %12584 = vmatpush1.bf16.msra.mxu1 %v16819_v20  ;;  %v21000_v20 = vpack.c.bf16 %v20809_v6, %v20795_v13  ;;  %v16881_v13 = vld [vmem:[%s23923_s3 + $0xcc4] ss:$16 sps:$4 sm:$0xff]  }
 0x6ac   : > { %12464 = vmatprep.subr.bf16.mxu0 %v16824_v28  ;;  %12585 = vmatprep.subr.bf16.mxu1 %v16827_v32  ;;  %v6132_v22 = vpop.f32.mrf.mxu1  ;;  %v16870_v28 = vld [vmem:[%s23923_s3 + $0x660] ss:$16 sps:$4 sm:$0xff]  }
 0x6ad   : > { %v16873_v32 = vld [vmem:[%s23923_s3 + $0xce0] ss:$16 sps:$4 sm:$0xff]  }
 0x6ae   : > { %v20924_v59 = vpop.f32.mrf.mxu1 }
 0x6af   : > { %12465 = vmatpush2.bf16.msra.mxu0 %v16822_v54  ;;  %12586 = vmatpush2.bf16.msra.mxu1 %v16825_v55  ;;  %v16878_v55 = vld [vmem:[%s23923_s3 + $0x644] ss:$16 sps:$4 sm:$0xff]  }
 0x6b0   : > { %12466 = vmatprep.subr.bf16.mxu0 %v16830_v61  ;;  %12587 = vmatprep.subr.bf16.mxu1 %v16833_v25  ;;  %v6136_v17 = vpop.f32.mrf.mxu1  ;;  %v21018_v61 = vpack.c.bf16 %v20910_v1, %v20882_v29  ;;  %v16884_v29 = vld [vmem:[%s23923_s3 + $0x624] ss:$16 sps:$4 sm:$0xff]  }
 0x6b1   : > { %v20942_v23 = vpack.c.bf16 %v6136_v17, %v6132_v22  ;;  %v16890_v1 = vld [vmem:[%s23923_s3 + $0x604] ss:$16 sps:$4 sm:$0xff]   ;;  %v16888_v22 = vld [vmem:[%s23923_s3 + $0x600] ss:$16 sps:$4 sm:$0xff]  }
 0x6b2   : > { %v20948_v34 = vpop.f32.mrf.mxu1 }
 0x6b3   : > { %12467 = vmatpush2.bf16.msra.mxu0 %v16828_v39  ;;  %12588 = vmatpush2.bf16.msra.mxu1 %v16831_v36  ;;  %v16876_v39 = vld [vmem:[%s23923_s3 + $0x640] ss:$16 sps:$4 sm:$0xff]  }
 0x6b4   : > { %12468 = vmatprep.subr.bf16.mxu0 %v16836_v7  ;;  %12589 = vmatprep.subr.bf16.mxu1 %v16839_v18  ;;  %v20957_v50 = vpop.f32.mrf.mxu1  ;;  %v16879_v36 = vld [vmem:[%s23923_s3 + $0xcc0] ss:$16 sps:$4 sm:$0xff]   ;;  %v16887_v18 = vld [vmem:[%s23923_s3 + $0xca4] ss:$16 sps:$4 sm:$0xff]  }
 0x6b6   : > { %v20966_v60 = vpop.f32.mrf.mxu1 }
 0x6b7   : > { %12469 = vmatpush2.bf16.msra.mxu0 %v16834_v16  ;;  %12590 = vmatpush2.bf16.msra.mxu1 %v16837_v49  ;;  %v16882_v49 = vld [vmem:[%s23923_s3 + $0x620] ss:$16 sps:$4 sm:$0xff]  }
 0x6b8   : > { %12470 = vmatprep.subr.bf16.mxu0 %v16842_v42  ;;  %12591 = vmatprep.subr.bf16.mxu1 %v16845_v31  ;;  %v20974_v52 = vpop.f32.mrf.mxu1  ;;  %v16885_v42 = vld [vmem:[%s23923_s3 + $0xca0] ss:$16 sps:$4 sm:$0xff]  }
 0x6ba   : > { %v20982_v11 = vpop.f32.mrf.mxu1 }
 0x6bb   : > { %12471 = vmatpush2.bf16.msra.mxu0 %v16840_v58  ;;  %12592 = vmatpush2.bf16.msra.mxu1 %v16843_v40  ;;  %v16893_v58 = vld [vmem:[%s23923_s3 + $0xc84] ss:$16 sps:$4 sm:$0xff]  }
 0x6bc   : > { %12526 = vmatprep.subr.bf16.mxu0 %v16848_v10  ;;  %12593 = vmatprep.subr.bf16.mxu1 %v16851_v38  ;;  %v6152_v19 = vpop.f32.mrf.mxu1  ;;  %v16891_v10 = vld [vmem:[%s23923_s3 + $0xc80] ss:$16 sps:$4 sm:$0xff]  }
 0x6be   : > { %12473 = vmatmul.mubr.bf16.vlgmr.msra.gmra.mxu0 %v20934_v9  ;;  %v20996_v56 = vpop.f32.mrf.mxu1 }
 0x6bf   : > { %12527 = vmatpush1.bf16.msra.mxu0 %v16846_v45  ;;  %12594 = vmatpush2.bf16.msra.mxu1 %v16849_v3  ;;  %v16896_v45 = vld [vmem:[%s23923_s3 + $0x7e4] ss:$16 sps:$4 sm:$0xff]  }
 0x6c0   : > { %12528 = vmatprep.subr.bf16.mxu0 %v16854_v57  ;;  %12595 = vmatprep.subr.bf16.mxu1 %v16857_v53  ;;  %v6156_v54 = vpop.f32.mrf.mxu1  ;;  %v16899_v3 = vld [vmem:[%s23923_s3 + $0xc64] ss:$16 sps:$4 sm:$0xff]   ;;  %v16894_v57 = vld [vmem:[%s23923_s3 + $0x7e0] ss:$16 sps:$4 sm:$0xff]  }
 0x6c1   : > { %12558 = vmatprep.mubr.bf16.mxu0 %v20946_v33  ;;  %v21014_v6 = vpack.c.bf16 %v6156_v54, %v6152_v19  ;;  %v16897_v53 = vld [vmem:[%s23923_s3 + $0xc60] ss:$16 sps:$4 sm:$0xff]   ;;  %v16917_v54 = vld [vmem:[%s23923_s3 + $0xc04] ss:$16 sps:$4 sm:$0xff]  }
 0x6c2   : > { %v21020_v25 = vpop.f32.mrf.mxu1 }
 0x6c3   : > { %12529 = vmatpush1.bf16.msra.mxu0 %v16852_v15  ;;  %12596 = vmatpush2.bf16.msra.mxu1 %v16855_v44  ;;  %v16902_v44 = vld [vmem:[%s23923_s3 + $0x7c4] ss:$16 sps:$4 sm:$0xff]  }
 0x6c4   : > { %12530 = vmatprep.subr.bf16.mxu0 %v16860_v12  ;;  %12597 = vmatprep.subr.bf16.mxu1 %v16863_v35  ;;  %v21029_v7 = vpop.f32.mrf.mxu1  ;;  %v16905_v12 = vld [vmem:[%s23923_s3 + $0xc44] ss:$16 sps:$4 sm:$0xff]  }
 0x6c6   : > { %v21038_v16 = vpop.f32.mrf.mxu1 }
 0x6c7   : > { %12531 = vmatpush1.bf16.msra.mxu0 %v16858_v27  ;;  %12598 = vmatpush2.bf16.msra.mxu1 %v16861_v0  ;;  %v16900_v0 = vld [vmem:[%s23923_s3 + $0x7c0] ss:$16 sps:$4 sm:$0xff]  }
 0x6c8   : > { %12532 = vmatprep.subr.bf16.mxu0 %v16866_v37  ;;  %12599 = vmatprep.subr.bf16.mxu1 %v16869_v4  ;;  %v21046_v31 = vpop.f32.mrf.mxu1  ;;  %v16903_v37 = vld [vmem:[%s23923_s3 + $0xc40] ss:$16 sps:$4 sm:$0xff]  }
 0x6ca   : > { %v21054_v40 = vpop.f32.mrf.mxu1 }
 0x6cb   : > { %12533 = vmatpush1.bf16.msra.mxu0 %v16864_v41  ;;  %12600 = vmatpush2.bf16.msra.mxu1 %v16867_v48  ;;  %v16908_v41 = vld [vmem:[%s23923_s3 + $0x7a4] ss:$16 sps:$4 sm:$0xff]  }
 0x6cc   : > { %12534 = vmatprep.subr.bf16.mxu0 %v16872_v43  ;;  %12655 = vmatprep.subr.bf16.mxu1 %v16875_v63  ;;  %v6172_v38 = vpop.f32.mrf.mxu1  ;;  %v16911_v48 = vld [vmem:[%s23923_s3 + $0xc24] ss:$16 sps:$4 sm:$0xff]   ;;  %v16906_v43 = vld [vmem:[%s23923_s3 + $0x7a0] ss:$16 sps:$4 sm:$0xff]  }
 0x6cd   : > { %v16909_v63 = vld [vmem:[%s23923_s3 + $0xc20] ss:$16 sps:$4 sm:$0xff]  }
 0x6ce   : > { %12602 = vmatmul.mubr.bf16.vlgmr.msra.gmra.mxu1 %v21000_v20  ;;  %v21068_v17 = vpop.f32.mrf.mxu1 }
 0x6cf   : > { %12535 = vmatpush1.bf16.msra.mxu0 %v16870_v28  ;;  %12656 = vmatpush1.bf16.msra.mxu1 %v16873_v32  ;;  %v16914_v32 = vld [vmem:[%s23923_s3 + $0x784] ss:$16 sps:$4 sm:$0xff]  }
 0x6d0   : > { %12536 = vmatprep.subr.bf16.mxu0 %v16878_v55  ;;  %12657 = vmatprep.subr.bf16.mxu1 %v16881_v13  ;;  %v6176_v15 = vpop.f32.mrf.mxu1 }
 0x6d1   : > { %12687 = vmatprep.mubr.bf16.mxu1 %v21018_v61  ;;  %v21082_v35 = vpack.c.bf16 %v6176_v15, %v6172_v38  ;;  %v16929_v38 = vld [vmem:[%s23923_s3 + $0xdc4] ss:$16 sps:$4 sm:$0xff]  }
 0x6d2   : > { %v21084_v27 = vpop.f32.mrf.mxu1 }
 0x6d3   : > { %12537 = vmatpush1.bf16.msra.mxu0 %v16876_v39  ;;  %12658 = vmatpush1.bf16.msra.mxu1 %v16879_v36  ;;  %v16912_v39 = vld [vmem:[%s23923_s3 + $0x780] ss:$16 sps:$4 sm:$0xff]  }
 0x6d4   : > { %12538 = vmatprep.subr.bf16.mxu0 %v16884_v29  ;;  %12659 = vmatprep.subr.bf16.mxu1 %v16887_v18  ;;  %v6182_v4 = vpop.f32.mrf.mxu1  ;;  %v16915_v36 = vld [vmem:[%s23923_s3 + $0xc00] ss:$16 sps:$4 sm:$0xff]   ;;  %v16920_v18 = vld [vmem:[%s23923_s3 + $0x764] ss:$16 sps:$4 sm:$0xff]  }
 0x6d6   : > { %v21098_v19 = vpop.f32.mrf.mxu1 }
 0x6d7   : > { %12539 = vmatpush1.bf16.msra.mxu0 %v16882_v49  ;;  %12660 = vmatpush1.bf16.msra.mxu1 %v16885_v42  ;;  %v16923_v49 = vld [vmem:[%s23923_s3 + $0xde4] ss:$16 sps:$4 sm:$0xff]  }
 0x6d8   : > { %12540 = vmatprep.subr.bf16.mxu0 %v16890_v1  ;;  %12661 = vmatprep.subr.bf16.mxu1 %v16893_v58  ;;  %v6186_v28 = vpop.f32.mrf.mxu1  ;;  %v16918_v1 = vld [vmem:[%s23923_s3 + $0x760] ss:$16 sps:$4 sm:$0xff]  }
 0x6d9   : > { %v21112_v55 = vpack.c.bf16 %v6186_v28, %v6182_v4  ;;  %v16921_v58 = vld [vmem:[%s23923_s3 + $0xde0] ss:$16 sps:$4 sm:$0xff]  }
 0x6da   : > { %v21114_v13 = vpop.f32.mrf.mxu1  ;;  %v16933_v4 = vld [vmem:[%s23923_s3 + $0xda0] ss:$16 sps:$4 sm:$0xff]  }
 0x6db   : > { %12541 = vmatpush1.bf16.msra.mxu0 %v16888_v22  ;;  %12662 = vmatpush1.bf16.msra.mxu1 %v16891_v10  ;;  %v16926_v10 = vld [vmem:[%s23923_s3 + $0x744] ss:$16 sps:$4 sm:$0xff]  }
 0x6dc   : > { %12542 = vmatprep.subr.bf16.mxu0 %v16896_v45  ;;  %12663 = vmatprep.subr.bf16.mxu1 %v16899_v3  ;;  %v6192_v29 = vpop.f32.mrf.mxu1 }
 0x6de   : > { %v21128_v42 = vpop.f32.mrf.mxu1 }
 0x6df   : > { %12543 = vmatpush2.bf16.msra.mxu0 %v16894_v57  ;;  %12664 = vmatpush1.bf16.msra.mxu1 %v16897_v53  ;;  %v16924_v57 = vld [vmem:[%s23923_s3 + $0x740] ss:$16 sps:$4 sm:$0xff]  }
 0x6e0   : > { %12544 = vmatprep.subr.bf16.mxu0 %v16902_v44  ;;  %12665 = vmatprep.subr.bf16.mxu1 %v16905_v12  ;;  %v6196_v22 = vpop.f32.mrf.mxu1  ;;  %v16927_v53 = vld [vmem:[%s23923_s3 + $0xdc0] ss:$16 sps:$4 sm:$0xff]   ;;  %v16932_v44 = vld [vmem:[%s23923_s3 + $0x724] ss:$16 sps:$4 sm:$0xff]  }
 0x6e1   : > { %v21142_v45 = vpack.c.bf16 %v6196_v22, %v6192_v29  ;;  %v16935_v12 = vld [vmem:[%s23923_s3 + $0xda4] ss:$16 sps:$4 sm:$0xff]  }
 0x6e2   : > { %v21144_v3 = vpop.f32.mrf.mxu1  ;;  %v16947_v29 = vld [vmem:[%s23923_s3 + $0xd64] ss:$16 sps:$4 sm:$0xff]  }
 0x6e3   : > { %12545 = vmatpush2.bf16.msra.mxu0 %v16900_v0  ;;  %12666 = vmatpush1.bf16.msra.mxu1 %v16903_v37  ;;  %v16930_v37 = vld [vmem:[%s23923_s3 + $0x720] ss:$16 sps:$4 sm:$0xff]   ;;  %v16950_v22 = vld [vmem:[%s23923_s3 + $0xac4] ss:$16 sps:$4 sm:$0xff]  }
 0x6e4   : > { %12546 = vmatprep.subr.bf16.mxu0 %v16908_v41  ;;  %12667 = vmatprep.subr.bf16.mxu1 %v16911_v48  ;;  %v6202_v15 = vpop.f32.mrf.mxu1  ;;  %v16938_v48 = vld [vmem:[%s23923_s3 + $0x704] ss:$16 sps:$4 sm:$0xff]  }
 0x6e6   : > { %v21158_v0 = vpop.f32.mrf.mxu1 }
 0x6e7   : > { %12547 = vmatpush2.bf16.msra.mxu0 %v16906_v43  ;;  %12668 = vmatpush1.bf16.msra.mxu1 %v16909_v63  ;;  %v16941_v43 = vld [vmem:[%s23923_s3 + $0xd84] ss:$16 sps:$4 sm:$0xff]  }
 0x6e8   : > { %12548 = vmatprep.subr.bf16.mxu0 %v16914_v32  ;;  %12669 = vmatprep.subr.bf16.mxu1 %v16917_v54  ;;  %v6206_v41 = vpop.f32.mrf.mxu1  ;;  %v16936_v32 = vld [vmem:[%s23923_s3 + $0x700] ss:$16 sps:$4 sm:$0xff]  }
 0x6e9   : > { %v21172_v63 = vpack.c.bf16 %v6206_v41, %v6202_v15  ;;  %v16939_v54 = vld [vmem:[%s23923_s3 + $0xd80] ss:$16 sps:$4 sm:$0xff]  }
 0x6ea   : > { %v21174_v28 = vpop.f32.mrf.mxu1  ;;  %v16951_v15 = vld [vmem:[%s23923_s3 + $0xd40] ss:$16 sps:$4 sm:$0xff]  }
 0x6eb   : > { %12549 = vmatpush2.bf16.msra.mxu0 %v16912_v39  ;;  %12670 = vmatpush1.bf16.msra.mxu1 %v16915_v36  ;;  %v16944_v36 = vld [vmem:[%s23923_s3 + $0xae4] ss:$16 sps:$4 sm:$0xff]   ;;  %v16960_v41 = vld [vmem:[%s23923_s3 + $0xa80] ss:$16 sps:$4 sm:$0xff]  }
 0x6ec   : > { %12550 = vmatprep.subr.bf16.mxu0 %v16920_v18  ;;  %12671 = vmatprep.subr.bf16.mxu1 %v16923_v49  ;;  %v6212_v39 = vpop.f32.mrf.mxu1  ;;  %v16942_v49 = vld [vmem:[%s23923_s3 + $0xae0] ss:$16 sps:$4 sm:$0xff]  }
 0x6ee   : > { %v21188_v18 = vpop.f32.mrf.mxu1 }
 0x6ef   : > { %12551 = vmatpush2.bf16.msra.mxu0 %v16918_v1  ;;  %12672 = vmatpush2.bf16.msra.mxu1 %v16921_v58  ;;  %v16945_v1 = vld [vmem:[%s23923_s3 + $0xd60] ss:$16 sps:$4 sm:$0xff]  }
 0x6f0   : > { %12552 = vmatprep.subr.bf16.mxu0 %v16926_v10  ;;  %12673 = vmatprep.subr.bf16.mxu1 %v16929_v38  ;;  %v6216_v58 = vpop.f32.mrf.mxu1  ;;  %v16953_v10 = vld [vmem:[%s23923_s3 + $0xd44] ss:$16 sps:$4 sm:$0xff]  }
 0x6f1   : > { %v21202_v38 = vpack.c.bf16 %v6216_v58, %v6212_v39  ;;  %v16966_v39 = vld [vmem:[%s23923_s3 + $0xa60] ss:$16 sps:$4 sm:$0xff]   ;;  %v16980_v58 = vld [vmem:[%s23923_s3 + $0xa24] ss:$16 sps:$4 sm:$0xff]  }
 0x6f3   : > { %12553 = vmatpush2.bf16.msra.mxu0 %v16924_v57  ;;  %12674 = vmatpush2.bf16.msra.mxu1 %v16927_v53  ;;  %v21206_v57 = vpack.c.bf16 %v20854_v14, %v20826_v8  ;;  %v16948_v53 = vld [vmem:[%s23923_s3 + $0xac0] ss:$16 sps:$4 sm:$0xff]   ;;  %v16959_v8 = vld [vmem:[%s23923_s3 + $0xd24] ss:$16 sps:$4 sm:$0xff]  }
 0x6f4   : > { %12554 = vmatprep.subr.bf16.mxu0 %v16932_v44  ;;  %12675 = vmatprep.subr.bf16.mxu1 %v16935_v12  ;;  %v16956_v44 = vld [vmem:[%s23923_s3 + $0xaa4] ss:$16 sps:$4 sm:$0xff]   ;;  %v16954_v14 = vld [vmem:[%s23923_s3 + $0xaa0] ss:$16 sps:$4 sm:$0xff]  }
 0x6f5   : > { %v16957_v12 = vld [vmem:[%s23923_s3 + $0xd20] ss:$16 sps:$4 sm:$0xff]  }
 0x6f7   : > { %12555 = vmatpush2.bf16.msra.mxu0 %v16930_v37  ;;  %12676 = vmatpush2.bf16.msra.mxu1 %v16933_v4  ;;  %v16962_v37 = vld [vmem:[%s23923_s3 + $0xa84] ss:$16 sps:$4 sm:$0xff]  }
 0x6f8   : > { %12556 = vmatprep.subr.bf16.mxu0 %v16938_v48  ;;  %12677 = vmatprep.subr.bf16.mxu1 %v16941_v43  ;;  %v16965_v4 = vld [vmem:[%s23923_s3 + $0xd04] ss:$16 sps:$4 sm:$0xff]   ;;  %v16963_v48 = vld [vmem:[%s23923_s3 + $0xd00] ss:$16 sps:$4 sm:$0xff]  }
 0x6f9   : > { %v16968_v43 = vld [vmem:[%s23923_s3 + $0xa64] ss:$16 sps:$4 sm:$0xff]  }
 0x6fb   : > { %12557 = vmatpush2.bf16.msra.mxu0 %v16936_v32  ;;  %12678 = vmatpush2.bf16.msra.mxu1 %v16939_v54  ;;  %v16971_v32 = vld [vmem:[%s23923_s3 + $0x10e4] ss:$16 sps:$4 sm:$0xff]   ;;  %v21248_v54 = vpack.c.bf16 %v20896_v2, %v20868_v5  ;;  %v21264_v2 = vpack.c.bf16 %v20982_v11, %v20966_v60  ;;  %v16978_v11 = vld [vmem:[%s23923_s3 + $0xa20] ss:$16 sps:$4 sm:$0xff]  }
 0x6fc   : > { %12612 = vmatprep.subr.bf16.mxu0 %v16944_v36  ;;  %12679 = vmatprep.subr.bf16.mxu1 %v16947_v29  ;;  %v16969_v36 = vld [vmem:[%s23923_s3 + $0x10e0] ss:$16 sps:$4 sm:$0xff]   ;;  %v16974_v29 = vld [vmem:[%s23923_s3 + $0xa44] ss:$16 sps:$4 sm:$0xff]  }
 0x6fd   : > { %v16977_v5 = vld [vmem:[%s23923_s3 + $0x10c4] ss:$16 sps:$4 sm:$0xff]  }
 0x6fe   : > { %12559 = vmatmul.mubr.bf16.vlgmr.msra.gmra.mxu0 %v20779_v47  ;;  %v16983_v60 = vld [vmem:[%s23923_s3 + $0x10a4] ss:$16 sps:$4 sm:$0xff]  }
 0x6ff   : > { %12613 = vmatpush1.bf16.msra.mxu0 %v16942_v49  ;;  %12680 = vmatpush2.bf16.msra.mxu1 %v16945_v1  ;;  %v16972_v49 = vld [vmem:[%s23923_s3 + $0xa40] ss:$16 sps:$4 sm:$0xff]  }
 0x700   : > { %12614 = vmatprep.subr.bf16.mxu0 %v16950_v22  ;;  %12681 = vmatprep.subr.bf16.mxu1 %v16953_v10  ;;  %v16975_v1 = vld [vmem:[%s23923_s3 + $0x10c0] ss:$16 sps:$4 sm:$0xff]   ;;  %v16986_v10 = vld [vmem:[%s23923_s3 + $0xa04] ss:$16 sps:$4 sm:$0xff]  }
 0x701   : > { %12644 = vmatprep.mubr.bf16.mxu0 %v21206_v57  ;;  %v16981_v22 = vld [vmem:[%s23923_s3 + $0x10a0] ss:$16 sps:$4 sm:$0xff]  }
 0x703   : > { %12615 = vmatpush1.bf16.msra.mxu0 %v16948_v53  ;;  %12682 = vmatpush2.bf16.msra.mxu1 %v16951_v15  ;;  %v16989_v53 = vld [vmem:[%s23923_s3 + $0x1084] ss:$16 sps:$4 sm:$0xff]   ;;  %v16984_v15 = vld [vmem:[%s23923_s3 + $0xa00] ss:$16 sps:$4 sm:$0xff]  }
 0x704   : > { %12616 = vmatprep.subr.bf16.mxu0 %v16956_v44  ;;  %12683 = vmatprep.subr.bf16.mxu1 %v16959_v8  ;;  %v16987_v44 = vld [vmem:[%s23923_s3 + $0x1080] ss:$16 sps:$4 sm:$0xff]   ;;  %v16992_v8 = vld [vmem:[%s23923_s3 + $0xbe4] ss:$16 sps:$4 sm:$0xff]  }
 0x707   : > { %12617 = vmatpush1.bf16.msra.mxu0 %v16954_v14  ;;  %12684 = vmatpush2.bf16.msra.mxu1 %v16957_v12  ;;  %v16995_v14 = vld [vmem:[%s23923_s3 + $0x1064] ss:$16 sps:$4 sm:$0xff]   ;;  %v16990_v12 = vld [vmem:[%s23923_s3 + $0xbe0] ss:$16 sps:$4 sm:$0xff]  }
 0x708   : > { %12618 = vmatprep.subr.bf16.mxu0 %v16962_v37  ;;  %12685 = vmatprep.subr.bf16.mxu1 %v16965_v4  ;;  %v16993_v37 = vld [vmem:[%s23923_s3 + $0x1060] ss:$16 sps:$4 sm:$0xff]   ;;  %v16998_v4 = vld [vmem:[%s23923_s3 + $0xbc4] ss:$16 sps:$4 sm:$0xff]  }
 0x70b   : > { %12619 = vmatpush1.bf16.msra.mxu0 %v16960_v41  ;;  %12686 = vmatpush2.bf16.msra.mxu1 %v16963_v48  ;;  %v17001_v41 = vld [vmem:[%s23923_s3 + $0x1044] ss:$16 sps:$4 sm:$0xff]   ;;  %v16996_v48 = vld [vmem:[%s23923_s3 + $0xbc0] ss:$16 sps:$4 sm:$0xff]  }
 0x70c   : > { %12620 = vmatprep.subr.bf16.mxu0 %v16968_v43  ;;  %12741 = vmatprep.subr.bf16.mxu1 %v16971_v32  ;;  %v16999_v43 = vld [vmem:[%s23923_s3 + $0x1040] ss:$16 sps:$4 sm:$0xff]   ;;  %v17004_v32 = vld [vmem:[%s23923_s3 + $0xba4] ss:$16 sps:$4 sm:$0xff]  }
 0x70e   : > { %12688 = vmatmul.mubr.bf16.vlgmr.msra.gmra.mxu1 %v21248_v54 }
 0x70f   : > { %12621 = vmatpush1.bf16.msra.mxu0 %v16966_v39  ;;  %12742 = vmatpush1.bf16.msra.mxu1 %v16969_v36  ;;  %v17007_v39 = vld [vmem:[%s23923_s3 + $0x1024] ss:$16 sps:$4 sm:$0xff]   ;;  %v17002_v36 = vld [vmem:[%s23923_s3 + $0xba0] ss:$16 sps:$4 sm:$0xff]  }
 0x710   : > { %12622 = vmatprep.subr.bf16.mxu0 %v16974_v29  ;;  %12743 = vmatprep.subr.bf16.mxu1 %v16977_v5  ;;  %v17005_v29 = vld [vmem:[%s23923_s3 + $0x1020] ss:$16 sps:$4 sm:$0xff]   ;;  %v17010_v5 = vld [vmem:[%s23923_s3 + $0xb84] ss:$16 sps:$4 sm:$0xff]  }
 0x711   : > { %12773 = vmatprep.mubr.bf16.mxu1 %v21264_v2 }
 0x713   : > { %12623 = vmatpush1.bf16.msra.mxu0 %v16972_v49  ;;  %12744 = vmatpush1.bf16.msra.mxu1 %v16975_v1  ;;  %v17013_v49 = vld [vmem:[%s23923_s3 + $0x1004] ss:$16 sps:$4 sm:$0xff]   ;;  %v17008_v1 = vld [vmem:[%s23923_s3 + $0xb80] ss:$16 sps:$4 sm:$0xff]  }
 0x714   : > { %12624 = vmatprep.subr.bf16.mxu0 %v16980_v58  ;;  %12745 = vmatprep.subr.bf16.mxu1 %v16983_v60  ;;  %v17011_v58 = vld [vmem:[%s23923_s3 + $0x1000] ss:$16 sps:$4 sm:$0xff]   ;;  %v17016_v60 = vld [vmem:[%s23923_s3 + $0xb64] ss:$16 sps:$4 sm:$0xff]  }
 0x717   : > { %12625 = vmatpush1.bf16.msra.mxu0 %v16978_v11  ;;  %12746 = vmatpush1.bf16.msra.mxu1 %v16981_v22  ;;  %v17019_v11 = vld [vmem:[%s23923_s3 + $0x11e4] ss:$16 sps:$4 sm:$0xff]   ;;  %v17014_v22 = vld [vmem:[%s23923_s3 + $0xb60] ss:$16 sps:$4 sm:$0xff]  }
 0x718   : > { %12626 = vmatprep.subr.bf16.mxu0 %v16986_v10  ;;  %12747 = vmatprep.subr.bf16.mxu1 %v16989_v53  ;;  %v17017_v10 = vld [vmem:[%s23923_s3 + $0x11e0] ss:$16 sps:$4 sm:$0xff]   ;;  %v17022_v53 = vld [vmem:[%s23923_s3 + $0xb44] ss:$16 sps:$4 sm:$0xff]  }
 0x71b   : > { %12627 = vmatpush1.bf16.msra.mxu0 %v16984_v15  ;;  %12748 = vmatpush1.bf16.msra.mxu1 %v16987_v44  ;;  %v17025_v15 = vld [vmem:[%s23923_s3 + $0x11c4] ss:$16 sps:$4 sm:$0xff]   ;;  %v17020_v44 = vld [vmem:[%s23923_s3 + $0xb40] ss:$16 sps:$4 sm:$0xff]  }
 0x71c   : > { %12628 = vmatprep.subr.bf16.mxu0 %v16992_v8  ;;  %12749 = vmatprep.subr.bf16.mxu1 %v16995_v14  ;;  %v17023_v8 = vld [vmem:[%s23923_s3 + $0x11c0] ss:$16 sps:$4 sm:$0xff]   ;;  %v17028_v14 = vld [vmem:[%s23923_s3 + $0xb24] ss:$16 sps:$4 sm:$0xff]  }
 0x71f   : > { %12629 = vmatpush2.bf16.msra.mxu0 %v16990_v12  ;;  %12750 = vmatpush1.bf16.msra.mxu1 %v16993_v37  ;;  %v17031_v12 = vld [vmem:[%s23923_s3 + $0x11a4] ss:$16 sps:$4 sm:$0xff]   ;;  %v17026_v37 = vld [vmem:[%s23923_s3 + $0xb20] ss:$16 sps:$4 sm:$0xff]  }
 0x720   : > { %12630 = vmatprep.subr.bf16.mxu0 %v16998_v4  ;;  %12751 = vmatprep.subr.bf16.mxu1 %v17001_v41  ;;  %v17029_v4 = vld [vmem:[%s23923_s3 + $0x11a0] ss:$16 sps:$4 sm:$0xff]   ;;  %v17034_v41 = vld [vmem:[%s23923_s3 + $0xb04] ss:$16 sps:$4 sm:$0xff]  }
 0x723   : > { %12631 = vmatpush2.bf16.msra.mxu0 %v16996_v48  ;;  %12752 = vmatpush1.bf16.msra.mxu1 %v16999_v43  ;;  %v17037_v48 = vld [vmem:[%s23923_s3 + $0x1184] ss:$16 sps:$4 sm:$0xff]   ;;  %v17032_v43 = vld [vmem:[%s23923_s3 + $0xb00] ss:$16 sps:$4 sm:$0xff]  }
 0x724   : > { %12632 = vmatprep.subr.bf16.mxu0 %v17004_v32  ;;  %12753 = vmatprep.subr.bf16.mxu1 %v17007_v39  ;;  %v17035_v32 = vld [vmem:[%s23923_s3 + $0x1180] ss:$16 sps:$4 sm:$0xff]   ;;  %v17040_v39 = vld [vmem:[%s23923_s3 + $0xee4] ss:$16 sps:$4 sm:$0xff]  }
 0x727   : > { %12633 = vmatpush2.bf16.msra.mxu0 %v17002_v36  ;;  %12754 = vmatpush1.bf16.msra.mxu1 %v17005_v29  ;;  %v17043_v36 = vld [vmem:[%s23923_s3 + $0x1164] ss:$16 sps:$4 sm:$0xff]   ;;  %v17038_v29 = vld [vmem:[%s23923_s3 + $0xee0] ss:$16 sps:$4 sm:$0xff]  }
 0x728   : > { %12634 = vmatprep.subr.bf16.mxu0 %v17010_v5  ;;  %12755 = vmatprep.subr.bf16.mxu1 %v17013_v49  ;;  %v17041_v5 = vld [vmem:[%s23923_s3 + $0x1160] ss:$16 sps:$4 sm:$0xff]   ;;  %v17046_v49 = vld [vmem:[%s23923_s3 + $0xec4] ss:$16 sps:$4 sm:$0xff]  }
 0x72b   : > { %12635 = vmatpush2.bf16.msra.mxu0 %v17008_v1  ;;  %12756 = vmatpush1.bf16.msra.mxu1 %v17011_v58  ;;  %v17049_v1 = vld [vmem:[%s23923_s3 + $0x1144] ss:$16 sps:$4 sm:$0xff]   ;;  %v21414_v58 = vpack.c.bf16 %v20948_v34, %v20924_v59  ;;  %v17050_v34 = vld [vmem:[%s23923_s3 + $0xea0] ss:$16 sps:$4 sm:$0xff]  }
 0x72c   : > { %12636 = vmatprep.subr.bf16.mxu0 %v17016_v60  ;;  %12757 = vmatprep.subr.bf16.mxu1 %v17019_v11  ;;  %v17044_v60 = vld [vmem:[%s23923_s3 + $0xec0] ss:$16 sps:$4 sm:$0xff]   ;;  %v17055_v59 = vld [vmem:[%s23923_s3 + $0x1124] ss:$16 sps:$4 sm:$0xff]  }
 0x72d   : > { %v17047_v11 = vld [vmem:[%s23923_s3 + $0x1140] ss:$16 sps:$4 sm:$0xff]  }
 0x72f   : > { %12637 = vmatpush2.bf16.msra.mxu0 %v17014_v22  ;;  %12758 = vmatpush2.bf16.msra.mxu1 %v17017_v10  ;;  %v17052_v22 = vld [vmem:[%s23923_s3 + $0xea4] ss:$16 sps:$4 sm:$0xff]   ;;  %v17053_v10 = vld [vmem:[%s23923_s3 + $0x1120] ss:$16 sps:$4 sm:$0xff]  }
 0x730   : > { %12638 = vmatprep.subr.bf16.mxu0 %v17022_v53  ;;  %12759 = vmatprep.subr.bf16.mxu1 %v17025_v15  ;;  %v17058_v53 = vld [vmem:[%s23923_s3 + $0xe84] ss:$16 sps:$4 sm:$0xff]  }
 0x731   : > { %v17061_v15 = vld [vmem:[%s23923_s3 + $0x1104] ss:$16 sps:$4 sm:$0xff]  }
 0x733   : > { %12639 = vmatpush2.bf16.msra.mxu0 %v17020_v44  ;;  %12760 = vmatpush2.bf16.msra.mxu1 %v17023_v8  ;;  %v17056_v44 = vld [vmem:[%s23923_s3 + $0xe80] ss:$16 sps:$4 sm:$0xff]  }
 0x734   : > { %12640 = vmatprep.subr.bf16.mxu0 %v17028_v14  ;;  %12761 = vmatprep.subr.bf16.mxu1 %v17031_v12  ;;  %v17059_v8 = vld [vmem:[%s23923_s3 + $0x1100] ss:$16 sps:$4 sm:$0xff]   ;;  %v17064_v14 = vld [vmem:[%s23923_s3 + $0xe64] ss:$16 sps:$4 sm:$0xff]  }
 0x735   : > { %v17067_v12 = vld [vmem:[%s23923_s3 + $0x14e4] ss:$16 sps:$4 sm:$0xff]  }
 0x737   : > { %12641 = vmatpush2.bf16.msra.mxu0 %v17026_v37  ;;  %12762 = vmatpush2.bf16.msra.mxu1 %v17029_v4  ;;  %v21456_v37 = vpack.c.bf16 %v20974_v52, %v20957_v50  ;;  %v17062_v4 = vld [vmem:[%s23923_s3 + $0xe60] ss:$16 sps:$4 sm:$0xff]   ;;  %v17073_v50 = vld [vmem:[%s23923_s3 + $0x14c4] ss:$16 sps:$4 sm:$0xff]   ;;  %v21472_v52 = vpack.c.bf16 %v21054_v40, %v21038_v16 }
 0x738   : > { %12642 = vmatprep.subr.bf16.mxu0 %v17034_v41  ;;  %12763 = vmatprep.subr.bf16.mxu1 %v17037_v48  ;;  %v17065_v41 = vld [vmem:[%s23923_s3 + $0x14e0] ss:$16 sps:$4 sm:$0xff]   ;;  %v17070_v48 = vld [vmem:[%s23923_s3 + $0xe44] ss:$16 sps:$4 sm:$0xff]  }
 0x739   : > { %v17079_v16 = vld [vmem:[%s23923_s3 + $0x14a4] ss:$16 sps:$4 sm:$0xff]   ;;  %v17074_v40 = vld [vmem:[%s23923_s3 + $0xe20] ss:$16 sps:$4 sm:$0xff]  }
 0x73b   : > { %12643 = vmatpush2.bf16.msra.mxu0 %v17032_v43  ;;  %12764 = vmatpush2.bf16.msra.mxu1 %v17035_v32  ;;  %v17068_v43 = vld [vmem:[%s23923_s3 + $0xe40] ss:$16 sps:$4 sm:$0xff]  }
 0x73c   : > { %12698 = vmatprep.subr.bf16.mxu0 %v17040_v39  ;;  %12765 = vmatprep.subr.bf16.mxu1 %v17043_v36  ;;  %v17071_v32 = vld [vmem:[%s23923_s3 + $0x14c0] ss:$16 sps:$4 sm:$0xff]   ;;  %v17076_v39 = vld [vmem:[%s23923_s3 + $0xe24] ss:$16 sps:$4 sm:$0xff]  }
 0x73d   : > { %v17077_v36 = vld [vmem:[%s23923_s3 + $0x14a0] ss:$16 sps:$4 sm:$0xff]  }
 0x73e   : > { %12645 = vmatmul.mubr.bf16.vlgmr.msra.gmra.mxu0 %v20840_v62 }
 0x73f   : > { %12699 = vmatpush1.bf16.msra.mxu0 %v17038_v29  ;;  %12766 = vmatpush2.bf16.msra.mxu1 %v17041_v5  ;;  %v17082_v29 = vld [vmem:[%s23923_s3 + $0xe04] ss:$16 sps:$4 sm:$0xff]  }
 0x740   : > { %12700 = vmatprep.subr.bf16.mxu0 %v17046_v49  ;;  %12767 = vmatprep.subr.bf16.mxu1 %v17049_v1  ;;  %v17085_v5 = vld [vmem:[%s23923_s3 + $0x1484] ss:$16 sps:$4 sm:$0xff]   ;;  %v17080_v49 = vld [vmem:[%s23923_s3 + $0xe00] ss:$16 sps:$4 sm:$0xff]  }
 0x741   : > { %12730 = vmatprep.mubr.bf16.mxu0 %v21414_v58  ;;  %v17083_v1 = vld [vmem:[%s23923_s3 + $0x1480] ss:$16 sps:$4 sm:$0xff]  }
 0x743   : > { %12701 = vmatpush1.bf16.msra.mxu0 %v17044_v60  ;;  %12768 = vmatpush2.bf16.msra.mxu1 %v17047_v11  ;;  %v17088_v60 = vld [vmem:[%s23923_s3 + $0xfe4] ss:$16 sps:$4 sm:$0xff]  }
 0x744   : > { %12702 = vmatprep.subr.bf16.mxu0 %v17052_v22  ;;  %12769 = vmatprep.subr.bf16.mxu1 %v17055_v59  ;;  %v17091_v11 = vld [vmem:[%s23923_s3 + $0x1464] ss:$16 sps:$4 sm:$0xff]   ;;  %v17086_v22 = vld [vmem:[%s23923_s3 + $0xfe0] ss:$16 sps:$4 sm:$0xff]  }
 0x745   : > { %v17089_v59 = vld [vmem:[%s23923_s3 + $0x1460] ss:$16 sps:$4 sm:$0xff]  }
 0x747   : > { %12703 = vmatpush1.bf16.msra.mxu0 %v17050_v34  ;;  %12770 = vmatpush2.bf16.msra.mxu1 %v17053_v10  ;;  %v17094_v34 = vld [vmem:[%s23923_s3 + $0xfc4] ss:$16 sps:$4 sm:$0xff]  }
 0x748   : > { %12704 = vmatprep.subr.bf16.mxu0 %v17058_v53  ;;  %12771 = vmatprep.subr.bf16.mxu1 %v17061_v15  ;;  %v17097_v10 = vld [vmem:[%s23923_s3 + $0x1444] ss:$16 sps:$4 sm:$0xff]   ;;  %v17092_v53 = vld [vmem:[%s23923_s3 + $0xfc0] ss:$16 sps:$4 sm:$0xff]  }
 0x749   : > { %v17095_v15 = vld [vmem:[%s23923_s3 + $0x1440] ss:$16 sps:$4 sm:$0xff]  }
 0x74b   : > { %12705 = vmatpush1.bf16.msra.mxu0 %v17056_v44  ;;  %12772 = vmatpush2.bf16.msra.mxu1 %v17059_v8  ;;  %v17100_v44 = vld [vmem:[%s23923_s3 + $0xfa4] ss:$16 sps:$4 sm:$0xff]  }
 0x74c   : > { %12706 = vmatprep.subr.bf16.mxu0 %v17064_v14  ;;  %12827 = vmatprep.subr.bf16.mxu1 %v17067_v12  ;;  %v17103_v8 = vld [vmem:[%s23923_s3 + $0x1424] ss:$16 sps:$4 sm:$0xff]   ;;  %v17098_v14 = vld [vmem:[%s23923_s3 + $0xfa0] ss:$16 sps:$4 sm:$0xff]  }
 0x74d   : > { %v17101_v12 = vld [vmem:[%s23923_s3 + $0x1420] ss:$16 sps:$4 sm:$0xff]  }
 0x74e   : > { %12774 = vmatmul.mubr.bf16.vlgmr.msra.gmra.mxu1 %v21456_v37 }
 0x74f   : > { %12707 = vmatpush1.bf16.msra.mxu0 %v17062_v4  ;;  %12828 = vmatpush1.bf16.msra.mxu1 %v17065_v41  ;;  %v17106_v4 = vld [vmem:[%s23923_s3 + $0xf84] ss:$16 sps:$4 sm:$0xff]  }
 0x750   : > { %12708 = vmatprep.subr.bf16.mxu0 %v17070_v48  ;;  %12829 = vmatprep.subr.bf16.mxu1 %v17073_v50  ;;  %v17109_v41 = vld [vmem:[%s23923_s3 + $0x1404] ss:$16 sps:$4 sm:$0xff]   ;;  %v17104_v48 = vld [vmem:[%s23923_s3 + $0xf80] ss:$16 sps:$4 sm:$0xff]  }
 0x751   : > { %12859 = vmatprep.mubr.bf16.mxu1 %v21472_v52  ;;  %v17107_v50 = vld [vmem:[%s23923_s3 + $0x1400] ss:$16 sps:$4 sm:$0xff]  }
 0x753   : > { %12709 = vmatpush1.bf16.msra.mxu0 %v17068_v43  ;;  %12830 = vmatpush1.bf16.msra.mxu1 %v17071_v32  ;;  %v17112_v43 = vld [vmem:[%s23923_s3 + $0xf64] ss:$16 sps:$4 sm:$0xff]  }
 0x754   : > { %12710 = vmatprep.subr.bf16.mxu0 %v17076_v39  ;;  %12831 = vmatprep.subr.bf16.mxu1 %v17079_v16  ;;  %v17115_v32 = vld [vmem:[%s23923_s3 + $0x15e4] ss:$16 sps:$4 sm:$0xff]   ;;  %v17110_v39 = vld [vmem:[%s23923_s3 + $0xf60] ss:$16 sps:$4 sm:$0xff]  }
 0x755   : > { %v17113_v16 = vld [vmem:[%s23923_s3 + $0x15e0] ss:$16 sps:$4 sm:$0xff]  }
 0x757   : > { %12711 = vmatpush1.bf16.msra.mxu0 %v17074_v40  ;;  %12832 = vmatpush1.bf16.msra.mxu1 %v17077_v36  ;;  %v17118_v40 = vld [vmem:[%s23923_s3 + $0xf44] ss:$16 sps:$4 sm:$0xff]  }
 0x758   : > { %12712 = vmatprep.subr.bf16.mxu0 %v17082_v29  ;;  %12833 = vmatprep.subr.bf16.mxu1 %v17085_v5  ;;  %v17121_v36 = vld [vmem:[%s23923_s3 + $0x15c4] ss:$16 sps:$4 sm:$0xff]   ;;  %v17116_v29 = vld [vmem:[%s23923_s3 + $0xf40] ss:$16 sps:$4 sm:$0xff]  }
 0x759   : > { %v17119_v5 = vld [vmem:[%s23923_s3 + $0x15c0] ss:$16 sps:$4 sm:$0xff]  }
 0x75b   : > { %12713 = vmatpush1.bf16.msra.mxu0 %v17080_v49  ;;  %12834 = vmatpush1.bf16.msra.mxu1 %v17083_v1  ;;  %v12431_v49 = vpop.f32.mrf.mxu0  ;;  %v17124_v1 = vld [vmem:[%s23923_s3 + $0xf24] ss:$16 sps:$4 sm:$0xff]  }
 0x75c   : > { %12714 = vmatprep.subr.bf16.mxu0 %v17088_v60  ;;  %12835 = vmatprep.subr.bf16.mxu1 %v17091_v11  ;;  %v17127_v60 = vld [vmem:[%s23923_s3 + $0x15a4] ss:$16 sps:$4 sm:$0xff]   ;;  %v17122_v11 = vld [vmem:[%s23923_s3 + $0xf20] ss:$16 sps:$4 sm:$0xff]  }
 0x75f   : > { %12715 = vmatpush2.bf16.msra.mxu0 %v17086_v22  ;;  %12836 = vmatpush1.bf16.msra.mxu1 %v17089_v59  ;;  %v17125_v22 = vld [vmem:[%s23923_s3 + $0x15a0] ss:$16 sps:$4 sm:$0xff]   ;;  %v12433_v59 = vpop.f32.mrf.mxu0 }
 0x760   : > { %12716 = vmatprep.subr.bf16.mxu0 %v17094_v34  ;;  %12837 = vmatprep.subr.bf16.mxu1 %v17097_v10  ;;  %v17130_v34 = vld [vmem:[%s23923_s3 + $0xf04] ss:$16 sps:$4 sm:$0xff]  }
 0x761   : > { %v17133_v10 = vld [vmem:[%s23923_s3 + $0x1584] ss:$16 sps:$4 sm:$0xff]  }
 0x763   : > { %12717 = vmatpush2.bf16.msra.mxu0 %v17092_v53  ;;  %12838 = vmatpush1.bf16.msra.mxu1 %v17095_v15  ;;  %v21596_v53 = vpop.f32.mrf.mxu1  ;;  %v17128_v15 = vld [vmem:[%s23923_s3 + $0xf00] ss:$16 sps:$4 sm:$0xff]  }
 0x764   : > { %12718 = vmatprep.subr.bf16.mxu0 %v17100_v44  ;;  %12839 = vmatprep.subr.bf16.mxu1 %v17103_v8  ;;  %v17131_v44 = vld [vmem:[%s23923_s3 + $0x1580] ss:$16 sps:$4 sm:$0xff]   ;;  %v12435_v8 = vpop.f32.mrf.mxu0 }
 0x767   : > { %12719 = vmatpush2.bf16.msra.mxu0 %v17098_v14  ;;  %12840 = vmatpush1.bf16.msra.mxu1 %v17101_v12  ;;  %v17136_v14 = vld [vmem:[%s23923_s3 + $0x12e4] ss:$16 sps:$4 sm:$0xff]  }
 0x768   : > { %12720 = vmatprep.subr.bf16.mxu0 %v17106_v4  ;;  %12841 = vmatprep.subr.bf16.mxu1 %v17109_v41  ;;  %v17139_v12 = vld [vmem:[%s23923_s3 + $0x1564] ss:$16 sps:$4 sm:$0xff]   ;;  %v12517_v4 = vpop.f32.mrf.mxu1  ;;  %v17134_v41 = vld [vmem:[%s23923_s3 + $0x12e0] ss:$16 sps:$4 sm:$0xff]  }
 0x76b   : > { %12721 = vmatpush2.bf16.msra.mxu0 %v17104_v48  ;;  %12842 = vmatpush1.bf16.msra.mxu1 %v17107_v50  ;;  %v17137_v48 = vld [vmem:[%s23923_s3 + $0x1560] ss:$16 sps:$4 sm:$0xff]   ;;  %v12437_v50 = vpop.f32.mrf.mxu0 }
 0x76c   : > { %12722 = vmatprep.subr.bf16.mxu0 %v17112_v43  ;;  %12843 = vmatprep.subr.bf16.mxu1 %v17115_v32  ;;  %v12519_v43 = vpop.f32.mrf.mxu1  ;;  %v17142_v32 = vld [vmem:[%s23923_s3 + $0x12c4] ss:$16 sps:$4 sm:$0xff]  }
 0x76f   : > { %12723 = vmatpush2.bf16.msra.mxu0 %v17110_v39  ;;  %12844 = vmatpush2.bf16.msra.mxu1 %v17113_v16  ;;  %v17145_v39 = vld [vmem:[%s23923_s3 + $0x1544] ss:$16 sps:$4 sm:$0xff]   ;;  %v21624_v16 = vpack.c.bf16 %v21020_v25, %v20996_v56 }
 0x770   : > { %12724 = vmatprep.subr.bf16.mxu0 %v17118_v40  ;;  %12845 = vmatprep.subr.bf16.mxu1 %v17121_v36  ;;  %v17148_v56 = vld [vmem:[%s23923_s3 + $0x12a4] ss:$16 sps:$4 sm:$0xff]  }
 0x771   : > { %v17151_v25 = vld [vmem:[%s23923_s3 + $0x1524] ss:$16 sps:$4 sm:$0xff]  }
 0x773   : > { %12725 = vmatpush2.bf16.msra.mxu0 %v17116_v29  ;;  %12846 = vmatpush2.bf16.msra.mxu1 %v17119_v5  ;;  %v17140_v29 = vld [vmem:[%s23923_s3 + $0x12c0] ss:$16 sps:$4 sm:$0xff]  }
 0x774   : > { %12726 = vmatprep.subr.bf16.mxu0 %v17124_v1  ;;  %12847 = vmatprep.subr.bf16.mxu1 %v17127_v60  ;;  %v17143_v5 = vld [vmem:[%s23923_s3 + $0x1540] ss:$16 sps:$4 sm:$0xff]   ;;  %v12521_v60 = vpop.f32.mrf.mxu1 }
 0x777   : > { %12727 = vmatpush2.bf16.msra.mxu0 %v17122_v11  ;;  %12848 = vmatpush2.bf16.msra.mxu1 %v17125_v22 }
 0x778   : > { %12728 = vmatprep.subr.bf16.mxu0 %v17130_v34  ;;  %12849 = vmatprep.subr.bf16.mxu1 %v17133_v10 }
 0x77b   : > { %12729 = vmatpush2.bf16.msra.mxu0 %v17128_v15  ;;  %12850 = vmatpush2.bf16.msra.mxu1 %v17131_v44  ;;  %v17146_v15 = vld [vmem:[%s23923_s3 + $0x12a0] ss:$16 sps:$4 sm:$0xff]  }
 0x77c   : > { %12784 = vmatprep.subr.bf16.mxu0 %v17136_v14  ;;  %12851 = vmatprep.subr.bf16.mxu1 %v17139_v12  ;;  %v17149_v44 = vld [vmem:[%s23923_s3 + $0x1520] ss:$16 sps:$4 sm:$0xff]   ;;  %v17157_v12 = vld [vmem:[%s23923_s3 + $0x1504] ss:$16 sps:$4 sm:$0xff]  }
 0x77e   : > { %v12474_v40 = vpop.f32.mrf.mxu0  ;;  %12731 = vmatmul.mubr.bf16.vlgmr.msra.gmra.mxu0 %v20942_v23 }
 0x77f   : > { %v12475_v36 = vadd.f32 %v12474_v40, %v12431_v49  ;;  %12785 = vmatpush1.bf16.msra.mxu0 %v17134_v41  ;;  %12852 = vmatpush2.bf16.msra.mxu1 %v17137_v48  ;;  %v21674_v40 = vpack.c.bf16 %v21046_v31, %v21029_v7  ;;  %v17169_v7 = vld [vmem:[%s23923_s3 + $0x18c4] ss:$16 sps:$4 sm:$0xff]   ;;  %v21690_v31 = vpack.c.bf16 %v21114_v13, %v21098_v19  ;;  %v17170_v13 = vld [vmem:[%s23923_s3 + $0x1220] ss:$16 sps:$4 sm:$0xff]  }
 0x780   : > { %v12476_v1 = vpop.f32.mrf.mxu0  ;;  %12786 = vmatprep.subr.bf16.mxu0 %v17142_v32  ;;  %12853 = vmatprep.subr.bf16.mxu1 %v17145_v39  ;;  %v17155_v32 = vld [vmem:[%s23923_s3 + $0x1500] ss:$16 sps:$4 sm:$0xff]   ;;  %v17163_v39 = vld [vmem:[%s23923_s3 + $0x18e4] ss:$16 sps:$4 sm:$0xff]  }
 0x781   : > { %v12477_v49 = vadd.f32 %v12476_v1, %v12433_v59  ;;  %v21639_v11 = vadd.f32 %v12517_v4, %v12475_v36  ;;  %12816 = vmatprep.mubr.bf16.mxu0 %v21624_v16  ;;  %v12523_v59 = vpop.f32.mrf.mxu1  ;;  %v17158_v36 = vld [vmem:[%s23923_s3 + $0x1260] ss:$16 sps:$4 sm:$0xff]   ;;  %v17175_v19 = vld [vmem:[%s23923_s3 + $0x18a4] ss:$16 sps:$4 sm:$0xff]  }
 0x782   : > { %v12478_v22 = vpop.f32.mrf.mxu0  ;;  %v17164_v1 = vld [vmem:[%s23923_s3 + $0x1240] ss:$16 sps:$4 sm:$0xff]  }
 0x783   : > { %v12479_v34 = vadd.f32 %v12478_v22, %v12435_v8  ;;  %v21642_v10 = vadd.f32 %v12519_v43, %v12477_v49  ;;  %12787 = vmatpush1.bf16.msra.mxu0 %v17140_v29  ;;  %12854 = vmatpush2.bf16.msra.mxu1 %v17143_v5  ;;  %v17154_v8 = vld [vmem:[%s23923_s3 + $0x1284] ss:$16 sps:$4 sm:$0xff]   ;;  %v17152_v43 = vld [vmem:[%s23923_s3 + $0x1280] ss:$16 sps:$4 sm:$0xff]  }
 0x784   : > { %v12480_v14 = vpop.f32.mrf.mxu0  ;;  %12788 = vmatprep.subr.bf16.mxu0 %v17148_v56  ;;  %12855 = vmatprep.subr.bf16.mxu1 %v17151_v25  ;;  %v17161_v29 = vld [vmem:[%s23923_s3 + $0x18e0] ss:$16 sps:$4 sm:$0xff]   ;;  %v17166_v5 = vld [vmem:[%s23923_s3 + $0x1244] ss:$16 sps:$4 sm:$0xff]  }
 0x785   : > { %v12481_v4 = vadd.f32 %v12480_v14, %v12437_v50  ;;  %v21656_v41 = vadd.f32 %v12521_v60, %v12479_v34  ;;  %v17160_v50 = vld [vmem:[%s23923_s3 + $0x1264] ss:$16 sps:$4 sm:$0xff]   ;;  %v17167_v60 = vld [vmem:[%s23923_s3 + $0x18c0] ss:$16 sps:$4 sm:$0xff]  }
 0x786   : > { %v17172_v56 = vld [vmem:[%s23923_s3 + $0x1224] ss:$16 sps:$4 sm:$0xff]   ;;  %v17173_v25 = vld [vmem:[%s23923_s3 + $0x18a0] ss:$16 sps:$4 sm:$0xff]  }
 0x787   : > { %v21658_v48 = vadd.f32 %v12523_v59, %v12481_v4  ;;  %12789 = vmatpush1.bf16.msra.mxu0 %v17146_v15  ;;  %12856 = vmatpush2.bf16.msra.mxu1 %v17149_v44  ;;  %v17178_v49 = vld [vmem:[%s23923_s3 + $0x1204] ss:$16 sps:$4 sm:$0xff]   ;;  %v17176_v34 = vld [vmem:[%s23923_s3 + $0x1200] ss:$16 sps:$4 sm:$0xff]  }
 0x788   : > { %12790 = vmatprep.subr.bf16.mxu0 %v17154_v8  ;;  %12857 = vmatprep.subr.bf16.mxu1 %v17157_v12  ;;  %v17181_v22 = vld [vmem:[%s23923_s3 + $0x1884] ss:$16 sps:$4 sm:$0xff]   ;;  %v17179_v15 = vld [vmem:[%s23923_s3 + $0x1880] ss:$16 sps:$4 sm:$0xff]  }
 0x789   : > { %v17184_v44 = vld [vmem:[%s23923_s3 + $0x13e4] ss:$16 sps:$4 sm:$0xff]   ;;  %v17182_v59 = vld [vmem:[%s23923_s3 + $0x13e0] ss:$16 sps:$4 sm:$0xff]  }
 0x78a   : > { %v17187_v14 = vld [vmem:[%s23923_s3 + $0x1864] ss:$16 sps:$4 sm:$0xff]   ;;  %v17185_v8 = vld [vmem:[%s23923_s3 + $0x1860] ss:$16 sps:$4 sm:$0xff]  }
 0x78b   : > { %12791 = vmatpush1.bf16.msra.mxu0 %v17152_v43  ;;  %12858 = vmatpush2.bf16.msra.mxu1 %v17155_v32  ;;  %v17190_v12 = vld [vmem:[%s23923_s3 + $0x13c4] ss:$16 sps:$4 sm:$0xff]   ;;  %v17188_v43 = vld [vmem:[%s23923_s3 + $0x13c0] ss:$16 sps:$4 sm:$0xff]  }
 0x78c   : > { %12792 = vmatprep.subr.bf16.mxu0 %v17160_v50  ;;  %12913 = vmatprep.subr.bf16.mxu1 %v17163_v39  ;;  %v17193_v4 = vld [vmem:[%s23923_s3 + $0x1844] ss:$16 sps:$4 sm:$0xff]   ;;  %v17191_v32 = vld [vmem:[%s23923_s3 + $0x1840] ss:$16 sps:$4 sm:$0xff]  }
 0x78d   : > { %v17196_v50 = vld [vmem:[%s23923_s3 + $0x13a4] ss:$16 sps:$4 sm:$0xff]  }
 0x78e   : > { %12860 = vmatmul.mubr.bf16.vlgmr.msra.gmra.mxu1 %v21674_v40  ;;  %v17199_v39 = vld [vmem:[%s23923_s3 + $0x1824] ss:$16 sps:$4 sm:$0xff]  }
 0x78f   : > { %12793 = vmatpush1.bf16.msra.mxu0 %v17158_v36  ;;  %12914 = vmatpush1.bf16.msra.mxu1 %v17161_v29  ;;  %v17194_v36 = vld [vmem:[%s23923_s3 + $0x13a0] ss:$16 sps:$4 sm:$0xff]  }
 0x790   : > { %12794 = vmatprep.subr.bf16.mxu0 %v17166_v5  ;;  %12915 = vmatprep.subr.bf16.mxu1 %v17169_v7  ;;  %v17197_v29 = vld [vmem:[%s23923_s3 + $0x1820] ss:$16 sps:$4 sm:$0xff]   ;;  %v17202_v5 = vld [vmem:[%s23923_s3 + $0x1384] ss:$16 sps:$4 sm:$0xff]  }
 0x791   : > { %12945 = vmatprep.mubr.bf16.mxu1 %v21690_v31  ;;  %v17205_v7 = vld [vmem:[%s23923_s3 + $0x1804] ss:$16 sps:$4 sm:$0xff]  }
 0x793   : > { %12795 = vmatpush1.bf16.msra.mxu0 %v17164_v1  ;;  %12916 = vmatpush1.bf16.msra.mxu1 %v17167_v60  ;;  %v17200_v1 = vld [vmem:[%s23923_s3 + $0x1380] ss:$16 sps:$4 sm:$0xff]  }
 0x794   : > { %12796 = vmatprep.subr.bf16.mxu0 %v17172_v56  ;;  %12917 = vmatprep.subr.bf16.mxu1 %v17175_v19  ;;  %v17203_v60 = vld [vmem:[%s23923_s3 + $0x1800] ss:$16 sps:$4 sm:$0xff]   ;;  %v17208_v56 = vld [vmem:[%s23923_s3 + $0x1364] ss:$16 sps:$4 sm:$0xff]  }
 0x795   : > { %v17211_v19 = vld [vmem:[%s23923_s3 + $0x19e4] ss:$16 sps:$4 sm:$0xff]  }
 0x797   : > { %12797 = vmatpush1.bf16.msra.mxu0 %v17170_v13  ;;  %12918 = vmatpush1.bf16.msra.mxu1 %v17173_v25  ;;  %v17206_v13 = vld [vmem:[%s23923_s3 + $0x1360] ss:$16 sps:$4 sm:$0xff]  }
 0x798   : > { %12798 = vmatprep.subr.bf16.mxu0 %v17178_v49  ;;  %12919 = vmatprep.subr.bf16.mxu1 %v17181_v22  ;;  %v17209_v25 = vld [vmem:[%s23923_s3 + $0x19e0] ss:$16 sps:$4 sm:$0xff]   ;;  %v17214_v49 = vld [vmem:[%s23923_s3 + $0x1344] ss:$16 sps:$4 sm:$0xff]  }
 0x799   : > { %v17217_v22 = vld [vmem:[%s23923_s3 + $0x19c4] ss:$16 sps:$4 sm:$0xff]  }
 0x79b   : > { %12799 = vmatpush1.bf16.msra.mxu0 %v17176_v34  ;;  %12920 = vmatpush1.bf16.msra.mxu1 %v17179_v15  ;;  %v17212_v34 = vld [vmem:[%s23923_s3 + $0x1340] ss:$16 sps:$4 sm:$0xff]  }
 0x79c   : > { %12800 = vmatprep.subr.bf16.mxu0 %v17184_v44  ;;  %12921 = vmatprep.subr.bf16.mxu1 %v17187_v14  ;;  %v17215_v15 = vld [vmem:[%s23923_s3 + $0x19c0] ss:$16 sps:$4 sm:$0xff]   ;;  %v17220_v44 = vld [vmem:[%s23923_s3 + $0x1324] ss:$16 sps:$4 sm:$0xff]  }
 0x79d   : > { %v17223_v14 = vld [vmem:[%s23923_s3 + $0x19a4] ss:$16 sps:$4 sm:$0xff]  }
 0x79f   : > { %12801 = vmatpush2.bf16.msra.mxu0 %v17182_v59  ;;  %12922 = vmatpush1.bf16.msra.mxu1 %v17185_v8  ;;  %v17218_v59 = vld [vmem:[%s23923_s3 + $0x1320] ss:$16 sps:$4 sm:$0xff]  }
 0x7a0   : > { %12802 = vmatprep.subr.bf16.mxu0 %v17190_v12  ;;  %12923 = vmatprep.subr.bf16.mxu1 %v17193_v4  ;;  %v17221_v8 = vld [vmem:[%s23923_s3 + $0x19a0] ss:$16 sps:$4 sm:$0xff]   ;;  %v17226_v12 = vld [vmem:[%s23923_s3 + $0x1304] ss:$16 sps:$4 sm:$0xff]  }
 0x7a1   : > { %v17229_v4 = vld [vmem:[%s23923_s3 + $0x1984] ss:$16 sps:$4 sm:$0xff]  }
 0x7a3   : > { %12803 = vmatpush2.bf16.msra.mxu0 %v17188_v43  ;;  %12924 = vmatpush1.bf16.msra.mxu1 %v17191_v32  ;;  %v17224_v43 = vld [vmem:[%s23923_s3 + $0x1300] ss:$16 sps:$4 sm:$0xff]  }
 0x7a4   : > { %12804 = vmatprep.subr.bf16.mxu0 %v17196_v50  ;;  %12925 = vmatprep.subr.bf16.mxu1 %v17199_v39  ;;  %v17227_v32 = vld [vmem:[%s23923_s3 + $0x1980] ss:$16 sps:$4 sm:$0xff]   ;;  %v17232_v50 = vld [vmem:[%s23923_s3 + $0x16e4] ss:$16 sps:$4 sm:$0xff]  }
 0x7a5   : > { %v17235_v39 = vld [vmem:[%s23923_s3 + $0x1964] ss:$16 sps:$4 sm:$0xff]  }
 0x7a7   : > { %12805 = vmatpush2.bf16.msra.mxu0 %v17194_v36  ;;  %12926 = vmatpush1.bf16.msra.mxu1 %v17197_v29  ;;  %v12603_v36 = vpop.f32.mrf.mxu1  ;;  %v17230_v29 = vld [vmem:[%s23923_s3 + $0x16e0] ss:$16 sps:$4 sm:$0xff]  }
 0x7a8   : > { %12806 = vmatprep.subr.bf16.mxu0 %v17202_v5  ;;  %12927 = vmatprep.subr.bf16.mxu1 %v17205_v7  ;;  %v17233_v5 = vld [vmem:[%s23923_s3 + $0x1960] ss:$16 sps:$4 sm:$0xff]  }
 0x7a9   : > { %v12605_v7 = vpop.f32.mrf.mxu1 }
 0x7ab   : > { %12807 = vmatpush2.bf16.msra.mxu0 %v17200_v1  ;;  %12928 = vmatpush1.bf16.msra.mxu1 %v17203_v60  ;;  %v17238_v1 = vld [vmem:[%s23923_s3 + $0x16c4] ss:$16 sps:$4 sm:$0xff]   ;;  %v21837_v60 = vpack.c.bf16 %v21084_v27, %v21068_v17  ;;  %v17239_v17 = vld [vmem:[%s23923_s3 + $0x1940] ss:$16 sps:$4 sm:$0xff]   ;;  %v12607_v27 = vpop.f32.mrf.mxu1 }
 0x7ac   : > { %12808 = vmatprep.subr.bf16.mxu0 %v17208_v56  ;;  %12929 = vmatprep.subr.bf16.mxu1 %v17211_v19  ;;  %v17241_v56 = vld [vmem:[%s23923_s3 + $0x1944] ss:$16 sps:$4 sm:$0xff]  }
 0x7af   : > { %12809 = vmatpush2.bf16.msra.mxu0 %v17206_v13  ;;  %12930 = vmatpush2.bf16.msra.mxu1 %v17209_v25  ;;  %v17236_v25 = vld [vmem:[%s23923_s3 + $0x16c0] ss:$16 sps:$4 sm:$0xff]  }
 0x7b0   : > { %12810 = vmatprep.subr.bf16.mxu0 %v17214_v49  ;;  %12931 = vmatprep.subr.bf16.mxu1 %v17217_v22  ;;  %v17244_v22 = vld [vmem:[%s23923_s3 + $0x16a4] ss:$16 sps:$4 sm:$0xff]  }
 0x7b3   : > { %12811 = vmatpush2.bf16.msra.mxu0 %v17212_v34  ;;  %12932 = vmatpush2.bf16.msra.mxu1 %v17215_v15  ;;  %v17247_v15 = vld [vmem:[%s23923_s3 + $0x1924] ss:$16 sps:$4 sm:$0xff]  }
 0x7b4   : > { %12812 = vmatprep.subr.bf16.mxu0 %v17220_v44  ;;  %12933 = vmatprep.subr.bf16.mxu1 %v17223_v14 }
 0x7b7   : > { %12813 = vmatpush2.bf16.msra.mxu0 %v17218_v59  ;;  %12934 = vmatpush2.bf16.msra.mxu1 %v17221_v8  ;;  %v17242_v8 = vld [vmem:[%s23923_s3 + $0x16a0] ss:$16 sps:$4 sm:$0xff]  }
 0x7b8   : > { %12814 = vmatprep.subr.bf16.mxu0 %v17226_v12  ;;  %12935 = vmatprep.subr.bf16.mxu1 %v17229_v4  ;;  %v17245_v4 = vld [vmem:[%s23923_s3 + $0x1920] ss:$16 sps:$4 sm:$0xff]  }
 0x7bb   : > { %12815 = vmatpush2.bf16.msra.mxu0 %v17224_v43  ;;  %12936 = vmatpush2.bf16.msra.mxu1 %v17227_v32  ;;  %v17250_v43 = vld [vmem:[%s23923_s3 + $0x1684] ss:$16 sps:$4 sm:$0xff]  }
 0x7bc   : > { %12870 = vmatprep.subr.bf16.mxu0 %v17232_v50  ;;  %12937 = vmatprep.subr.bf16.mxu1 %v17235_v39  ;;  %v17253_v50 = vld [vmem:[%s23923_s3 + $0x1904] ss:$16 sps:$4 sm:$0xff]  }
 0x7be   : > { %v12560_v19 = vpop.f32.mrf.mxu0  ;;  %12817 = vmatmul.mubr.bf16.vlgmr.msra.gmra.mxu0 %v21014_v6 }
 0x7bf   : > { %v12561_v13 = vadd.f32 %v12560_v19, %v21639_v11  ;;  %12871 = vmatpush1.bf16.msra.mxu0 %v17230_v29  ;;  %12902 = vmatprep.mubr.bf16.mxu0 %v21837_v60  ;;  %v17256_v29 = vld [vmem:[%s23923_s3 + $0x1664] ss:$16 sps:$4 sm:$0xff]  }
 0x7c0   : > { %12938 = vmatpush2.bf16.msra.mxu1 %v17233_v5  ;;  %v12562_v49 = vpop.f32.mrf.mxu0  ;;  %12872 = vmatprep.subr.bf16.mxu0 %v17238_v1  ;;  %v17259_v5 = vld [vmem:[%s23923_s3 + $0x1ce4] ss:$16 sps:$4 sm:$0xff]   ;;  %v17257_v1 = vld [vmem:[%s23923_s3 + $0x1ce0] ss:$16 sps:$4 sm:$0xff]  }
 0x7c1   : > { %v12563_v11 = vadd.f32 %v12562_v49, %v21642_v10  ;;  %v21855_v34 = vadd.f32 %v12603_v36, %v12561_v13  ;;  %12939 = vmatprep.subr.bf16.mxu1 %v17241_v56  ;;  %v12609_v10 = vpop.f32.mrf.mxu1  ;;  %v17248_v36 = vld [vmem:[%s23923_s3 + $0x1680] ss:$16 sps:$4 sm:$0xff]   ;;  %v17262_v56 = vld [vmem:[%s23923_s3 + $0x1644] ss:$16 sps:$4 sm:$0xff]   ;;  %v21906_v13 = vpack.c.bf16 %v21174_v28, %v21158_v0 }
 0x7c2   : > { %v12564_v44 = vpop.f32.mrf.mxu0  ;;  %v17265_v19 = vld [vmem:[%s23923_s3 + $0x1cc4] ss:$16 sps:$4 sm:$0xff]   ;;  %v17263_v49 = vld [vmem:[%s23923_s3 + $0x1cc0] ss:$16 sps:$4 sm:$0xff]  }
 0x7c3   : > { %v12565_v14 = vadd.f32 %v12564_v44, %v21656_v41  ;;  %v21861_v59 = vadd.f32 %v12605_v7, %v12563_v11  ;;  %12873 = vmatpush1.bf16.msra.mxu0 %v17236_v25  ;;  %v17254_v7 = vld [vmem:[%s23923_s3 + $0x1660] ss:$16 sps:$4 sm:$0xff]   ;;  %v17271_v0 = vld [vmem:[%s23923_s3 + $0x1ca4] ss:$16 sps:$4 sm:$0xff]  }
 0x7c4   : > { %12940 = vmatpush2.bf16.msra.mxu1 %v17239_v17  ;;  %v12566_v12 = vpop.f32.mrf.mxu0  ;;  %12874 = vmatprep.subr.bf16.mxu0 %v17244_v22  ;;  %v17260_v25 = vld [vmem:[%s23923_s3 + $0x1640] ss:$16 sps:$4 sm:$0xff]   ;;  %v17268_v17 = vld [vmem:[%s23923_s3 + $0x1624] ss:$16 sps:$4 sm:$0xff]  }
 0x7c5   : > { %v12567_v41 = vadd.f32 %v12566_v12, %v21658_v48  ;;  %v21873_v32 = vadd.f32 %v12607_v27, %v12565_v14  ;;  %12941 = vmatprep.subr.bf16.mxu1 %v17247_v15  ;;  %v17251_v48 = vld [vmem:[%s23923_s3 + $0x1900] ss:$16 sps:$4 sm:$0xff]   ;;  %v17274_v22 = vld [vmem:[%s23923_s3 + $0x1604] ss:$16 sps:$4 sm:$0xff]  }
 0x7c6   : > { %v17266_v28 = vld [vmem:[%s23923_s3 + $0x1620] ss:$16 sps:$4 sm:$0xff]   ;;  %v17277_v11 = vld [vmem:[%s23923_s3 + $0x1c84] ss:$16 sps:$4 sm:$0xff]  }
 0x7c7   : > { %v21878_v39 = vadd.f32 %v12609_v10, %v12567_v41  ;;  %12875 = vmatpush1.bf16.msra.mxu0 %v17242_v8  ;;  %v17269_v27 = vld [vmem:[%s23923_s3 + $0x1ca0] ss:$16 sps:$4 sm:$0xff]   ;;  %v17280_v14 = vld [vmem:[%s23923_s3 + $0x17e4] ss:$16 sps:$4 sm:$0xff]  }
 0x7c8   : > { %12942 = vmatpush2.bf16.msra.mxu1 %v17245_v4  ;;  %12876 = vmatprep.subr.bf16.mxu0 %v17250_v43  ;;  %v17272_v15 = vld [vmem:[%s23923_s3 + $0x1600] ss:$16 sps:$4 sm:$0xff]   ;;  %v17283_v8 = vld [vmem:[%s23923_s3 + $0x1c64] ss:$16 sps:$4 sm:$0xff]  }
 0x7c9   : > { %12943 = vmatprep.subr.bf16.mxu1 %v17253_v50  ;;  %v17275_v44 = vld [vmem:[%s23923_s3 + $0x1c80] ss:$16 sps:$4 sm:$0xff]   ;;  %v17286_v4 = vld [vmem:[%s23923_s3 + $0x17c4] ss:$16 sps:$4 sm:$0xff]  }
 0x7ca   : > { %v17278_v12 = vld [vmem:[%s23923_s3 + $0x17e0] ss:$16 sps:$4 sm:$0xff]   ;;  %v17289_v43 = vld [vmem:[%s23923_s3 + $0x1c44] ss:$16 sps:$4 sm:$0xff]  }
 0x7cb   : > { %12877 = vmatpush1.bf16.msra.mxu0 %v17248_v36  ;;  %v17281_v10 = vld [vmem:[%s23923_s3 + $0x1c60] ss:$16 sps:$4 sm:$0xff]   ;;  %v17292_v36 = vld [vmem:[%s23923_s3 + $0x17a4] ss:$16 sps:$4 sm:$0xff]  }
 0x7cc   : > { %12944 = vmatpush2.bf16.msra.mxu1 %v17251_v48  ;;  %12878 = vmatprep.subr.bf16.mxu0 %v17256_v29  ;;  %v17284_v41 = vld [vmem:[%s23923_s3 + $0x17c0] ss:$16 sps:$4 sm:$0xff]   ;;  %v17295_v48 = vld [vmem:[%s23923_s3 + $0x1c24] ss:$16 sps:$4 sm:$0xff]  }
 0x7cd   : > { %12999 = vmatprep.subr.bf16.mxu1 %v17259_v5  ;;  %v17287_v50 = vld [vmem:[%s23923_s3 + $0x1c40] ss:$16 sps:$4 sm:$0xff]  }
 0x7ce   : > { %v17290_v29 = vld [vmem:[%s23923_s3 + $0x17a0] ss:$16 sps:$4 sm:$0xff]  }
 0x7cf   : > { %12946 = vmatmul.mubr.bf16.vlgmr.msra.gmra.mxu1 %v21112_v55  ;;  %12879 = vmatpush1.bf16.msra.mxu0 %v17254_v7  ;;  %v17293_v5 = vld [vmem:[%s23923_s3 + $0x1c20] ss:$16 sps:$4 sm:$0xff]   ;;  %v17298_v7 = vld [vmem:[%s23923_s3 + $0x1784] ss:$16 sps:$4 sm:$0xff]  }
 0x7d0   : > { %13000 = vmatpush1.bf16.msra.mxu1 %v17257_v1  ;;  %13031 = vmatprep.mubr.bf16.mxu1 %v21906_v13  ;;  %v17301_v1 = vld [vmem:[%s23923_s3 + $0x1c04] ss:$16 sps:$4 sm:$0xff]  }
 0x7d1   : > { %12880 = vmatprep.subr.bf16.mxu0 %v17262_v56  ;;  %13001 = vmatprep.subr.bf16.mxu1 %v17265_v19  ;;  %v17296_v56 = vld [vmem:[%s23923_s3 + $0x1780] ss:$16 sps:$4 sm:$0xff]  }
 0x7d2   : > { %v17299_v19 = vld [vmem:[%s23923_s3 + $0x1c00] ss:$16 sps:$4 sm:$0xff]  }
 0x7d3   : > { %12881 = vmatpush1.bf16.msra.mxu0 %v17260_v25  ;;  %v17304_v25 = vld [vmem:[%s23923_s3 + $0x1764] ss:$16 sps:$4 sm:$0xff]  }
 0x7d4   : > { %13002 = vmatpush1.bf16.msra.mxu1 %v17263_v49  ;;  %12882 = vmatprep.subr.bf16.mxu0 %v17268_v17  ;;  %v17307_v49 = vld [vmem:[%s23923_s3 + $0x1de4] ss:$16 sps:$4 sm:$0xff]   ;;  %v17302_v17 = vld [vmem:[%s23923_s3 + $0x1760] ss:$16 sps:$4 sm:$0xff]  }
 0x7d5   : > { %13003 = vmatprep.subr.bf16.mxu1 %v17271_v0  ;;  %v17305_v0 = vld [vmem:[%s23923_s3 + $0x1de0] ss:$16 sps:$4 sm:$0xff]  }
 0x7d7   : > { %12883 = vmatpush1.bf16.msra.mxu0 %v17266_v28  ;;  %v17310_v28 = vld [vmem:[%s23923_s3 + $0x1744] ss:$16 sps:$4 sm:$0xff]  }
 0x7d8   : > { %13004 = vmatpush1.bf16.msra.mxu1 %v17269_v27  ;;  %12884 = vmatprep.subr.bf16.mxu0 %v17274_v22  ;;  %v17313_v27 = vld [vmem:[%s23923_s3 + $0x1dc4] ss:$16 sps:$4 sm:$0xff]   ;;  %v17308_v22 = vld [vmem:[%s23923_s3 + $0x1740] ss:$16 sps:$4 sm:$0xff]  }
 0x7d9   : > { %13005 = vmatprep.subr.bf16.mxu1 %v17277_v11  ;;  %v17311_v11 = vld [vmem:[%s23923_s3 + $0x1dc0] ss:$16 sps:$4 sm:$0xff]  }
 0x7db   : > { %12885 = vmatpush1.bf16.msra.mxu0 %v17272_v15  ;;  %v17316_v15 = vld [vmem:[%s23923_s3 + $0x1724] ss:$16 sps:$4 sm:$0xff]  }
 0x7dc   : > { %13006 = vmatpush1.bf16.msra.mxu1 %v17275_v44  ;;  %12886 = vmatprep.subr.bf16.mxu0 %v17280_v14  ;;  %v17319_v44 = vld [vmem:[%s23923_s3 + $0x1da4] ss:$16 sps:$4 sm:$0xff]   ;;  %v17314_v14 = vld [vmem:[%s23923_s3 + $0x1720] ss:$16 sps:$4 sm:$0xff]  }
 0x7dd   : > { %13007 = vmatprep.subr.bf16.mxu1 %v17283_v8  ;;  %v17317_v8 = vld [vmem:[%s23923_s3 + $0x1da0] ss:$16 sps:$4 sm:$0xff]  }
 0x7df   : > { %12887 = vmatpush2.bf16.msra.mxu0 %v17278_v12  ;;  %v17322_v12 = vld [vmem:[%s23923_s3 + $0x1704] ss:$16 sps:$4 sm:$0xff]  }
 0x7e0   : > { %13008 = vmatpush1.bf16.msra.mxu1 %v17281_v10  ;;  %12888 = vmatprep.subr.bf16.mxu0 %v17286_v4  ;;  %v17325_v10 = vld [vmem:[%s23923_s3 + $0x1d84] ss:$16 sps:$4 sm:$0xff]   ;;  %v17320_v4 = vld [vmem:[%s23923_s3 + $0x1700] ss:$16 sps:$4 sm:$0xff]  }
 0x7e1   : > { %13009 = vmatprep.subr.bf16.mxu1 %v17289_v43  ;;  %v17323_v43 = vld [vmem:[%s23923_s3 + $0x1d80] ss:$16 sps:$4 sm:$0xff]  }
 0x7e3   : > { %12889 = vmatpush2.bf16.msra.mxu0 %v17284_v41  ;;  %v17328_v41 = vld [vmem:[%s23923_s3 + $0x1ae4] ss:$16 sps:$4 sm:$0xff]  }
 0x7e4   : > { %13010 = vmatpush1.bf16.msra.mxu1 %v17287_v50  ;;  %12890 = vmatprep.subr.bf16.mxu0 %v17292_v36  ;;  %v12689_v50 = vpop.f32.mrf.mxu1  ;;  %v17331_v36 = vld [vmem:[%s23923_s3 + $0x1d64] ss:$16 sps:$4 sm:$0xff]  }
 0x7e5   : > { %13011 = vmatprep.subr.bf16.mxu1 %v17295_v48  ;;  %v17326_v48 = vld [vmem:[%s23923_s3 + $0x1ae0] ss:$16 sps:$4 sm:$0xff]  }
 0x7e7   : > { %12891 = vmatpush2.bf16.msra.mxu0 %v17290_v29  ;;  %v17329_v29 = vld [vmem:[%s23923_s3 + $0x1d60] ss:$16 sps:$4 sm:$0xff]  }
 0x7e8   : > { %13012 = vmatpush1.bf16.msra.mxu1 %v17293_v5  ;;  %12892 = vmatprep.subr.bf16.mxu0 %v17298_v7  ;;  %v12691_v5 = vpop.f32.mrf.mxu1  ;;  %v17334_v7 = vld [vmem:[%s23923_s3 + $0x1ac4] ss:$16 sps:$4 sm:$0xff]  }
 0x7e9   : > { %13013 = vmatprep.subr.bf16.mxu1 %v17301_v1  ;;  %v22053_v1 = vpack.c.bf16 %v21144_v3, %v21128_v42  ;;  %v17335_v3 = vld [vmem:[%s23923_s3 + $0x1d40] ss:$16 sps:$4 sm:$0xff]  }
 0x7eb   : > { %12893 = vmatpush2.bf16.msra.mxu0 %v17296_v56  ;;  %v17337_v56 = vld [vmem:[%s23923_s3 + $0x1d44] ss:$16 sps:$4 sm:$0xff]  }
 0x7ec   : > { %13014 = vmatpush1.bf16.msra.mxu1 %v17299_v19  ;;  %12894 = vmatprep.subr.bf16.mxu0 %v17304_v25 }
 0x7ed   : > { %13015 = vmatprep.subr.bf16.mxu1 %v17307_v49  ;;  %v17332_v49 = vld [vmem:[%s23923_s3 + $0x1ac0] ss:$16 sps:$4 sm:$0xff]  }
 0x7ef   : > { %12895 = vmatpush2.bf16.msra.mxu0 %v17302_v17  ;;  %v12693_v17 = vpop.f32.mrf.mxu1 }
 0x7f0   : > { %13016 = vmatpush2.bf16.msra.mxu1 %v17305_v0  ;;  %12896 = vmatprep.subr.bf16.mxu0 %v17310_v28  ;;  %v17340_v0 = vld [vmem:[%s23923_s3 + $0x1aa4] ss:$16 sps:$4 sm:$0xff]  }
 0x7f1   : > { %13017 = vmatprep.subr.bf16.mxu1 %v17313_v27  ;;  %v17343_v27 = vld [vmem:[%s23923_s3 + $0x1d24] ss:$16 sps:$4 sm:$0xff]  }
 0x7f3   : > { %12897 = vmatpush2.bf16.msra.mxu0 %v17308_v22 }
 0x7f4   : > { %13018 = vmatpush2.bf16.msra.mxu1 %v17311_v11  ;;  %12898 = vmatprep.subr.bf16.mxu0 %v17316_v15 }
 0x7f5   : > { %13019 = vmatprep.subr.bf16.mxu1 %v17319_v44  ;;  %v17338_v44 = vld [vmem:[%s23923_s3 + $0x1aa0] ss:$16 sps:$4 sm:$0xff]  }
 0x7f7   : > { %12899 = vmatpush2.bf16.msra.mxu0 %v17314_v14 }
 0x7f8   : > { %13020 = vmatpush2.bf16.msra.mxu1 %v17317_v8  ;;  %12900 = vmatprep.subr.bf16.mxu0 %v17322_v12  ;;  %v17341_v8 = vld [vmem:[%s23923_s3 + $0x1d20] ss:$16 sps:$4 sm:$0xff]   ;;  %v17346_v12 = vld [vmem:[%s23923_s3 + $0x1a84] ss:$16 sps:$4 sm:$0xff]  }
 0x7f9   : > { %13021 = vmatprep.subr.bf16.mxu1 %v17325_v10 }
 0x7fb   : > { %12901 = vmatpush2.bf16.msra.mxu0 %v17320_v4  ;;  %v17349_v4 = vld [vmem:[%s23923_s3 + $0x1d04] ss:$16 sps:$4 sm:$0xff]  }
 0x7fc   : > { %13022 = vmatpush2.bf16.msra.mxu1 %v17323_v43  ;;  %12956 = vmatprep.subr.bf16.mxu0 %v17328_v41  ;;  %v17344_v41 = vld [vmem:[%s23923_s3 + $0x1a80] ss:$16 sps:$4 sm:$0xff]  }
 0x7fd   : > { %13023 = vmatprep.subr.bf16.mxu1 %v17331_v36  ;;  %v17355_v36 = vld [vmem:[%s23923_s3 + $0xec] ss:$16 sps:$4 sm:$0xff]  }
 0x7fe   : > { %v12646_v19 = vpop.f32.mrf.mxu0  ;;  %12903 = vmatmul.mubr.bf16.vlgmr.msra.gmra.mxu0 %v21082_v35 }
 0x7ff   : > { %v12647_v25 = vadd.f32 %v12646_v19, %v21855_v34  ;;  %12957 = vmatpush1.bf16.msra.mxu0 %v17326_v48  ;;  %12988 = vmatprep.mubr.bf16.mxu0 %v22053_v1  ;;  %v17350_v48 = vld [vmem:[%s23923_s3 + $0x1a60] ss:$16 sps:$4 sm:$0xff]   ;;  %v17359_v19 = vld [vmem:[%s23923_s3 + $0xc8] ss:$16 sps:$4 sm:$0xff]  }
 0x800   : > { %13024 = vmatpush2.bf16.msra.mxu1 %v17329_v29  ;;  %v12648_v42 = vpop.f32.mrf.mxu0  ;;  %12958 = vmatprep.subr.bf16.mxu0 %v17334_v7  ;;  %v17353_v29 = vld [vmem:[%s23923_s3 + $0xe8] ss:$16 sps:$4 sm:$0xff]   ;;  %v17361_v7 = vld [vmem:[%s23923_s3 + $0xcc] ss:$16 sps:$4 sm:$0xff]  }
 0x801   : > { %v12649_v34 = vadd.f32 %v12648_v42, %v21861_v59  ;;  %v22071_v28 = vadd.f32 %v12689_v50, %v12647_v25  ;;  %13025 = vmatprep.subr.bf16.mxu1 %v17337_v56  ;;  %v12695_v59 = vpop.f32.mrf.mxu1  ;;  %v17352_v50 = vld [vmem:[%s23923_s3 + $0x1a64] ss:$16 sps:$4 sm:$0xff]   ;;  %v17356_v56 = vld [vmem:[%s23923_s3 + $0x1a40] ss:$16 sps:$4 sm:$0xff]  }
 0x802   : > { %v12650_v22 = vpop.f32.mrf.mxu0  ;;  %v17364_v25 = vld [vmem:[%s23923_s3 + $0x1a24] ss:$16 sps:$4 sm:$0xff]   ;;  %v17362_v42 = vld [vmem:[%s23923_s3 + $0x1a20] ss:$16 sps:$4 sm:$0xff]  }
 0x803   : > { %v12651_v11 = vadd.f32 %v12650_v22, %v21873_v32  ;;  %v22077_v15 = vadd.f32 %v12691_v5, %v12649_v34  ;;  %12959 = vmatpush1.bf16.msra.mxu0 %v17332_v49  ;;  %v17358_v5 = vld [vmem:[%s23923_s3 + $0x1a44] ss:$16 sps:$4 sm:$0xff]   ;;  %v17367_v49 = vld [vmem:[%s23923_s3 + $0xac] ss:$16 sps:$4 sm:$0xff]   ;;  %v17371_v34 = vld [vmem:[%s23923_s3 + $0x88] ss:$16 sps:$4 sm:$0xff]  }
 0x804   : > { %13026 = vmatpush2.bf16.msra.mxu1 %v17335_v3  ;;  %v12652_v14 = vpop.f32.mrf.mxu0  ;;  %12960 = vmatprep.subr.bf16.mxu0 %v17340_v0  ;;  %v17370_v3 = vld [vmem:[%s23923_s3 + $0x1a04] ss:$16 sps:$4 sm:$0xff]   ;;  %v17368_v0 = vld [vmem:[%s23923_s3 + $0x1a00] ss:$16 sps:$4 sm:$0xff]   ;;  %v17379_v22 = vld [vmem:[%s23923_s3 + $0x6c] ss:$16 sps:$4 sm:$0xff]  }
 0x805   : > { %v12653_v32 = vadd.f32 %v12652_v14, %v21878_v39  ;;  %v22089_v10 = vadd.f32 %v12693_v17, %v12651_v11  ;;  %13027 = vmatprep.subr.bf16.mxu1 %v17343_v27  ;;  %v17347_v39 = vld [vmem:[%s23923_s3 + $0x1d00] ss:$16 sps:$4 sm:$0xff]   ;;  %v17373_v17 = vld [vmem:[%s23923_s3 + $0x8c] ss:$16 sps:$4 sm:$0xff]   ;;  %v17376_v27 = vld [vmem:[%s23923_s3 + $0x1be4] ss:$16 sps:$4 sm:$0xff]  }
 0x806   : > { %v17374_v11 = vld [vmem:[%s23923_s3 + $0x1be0] ss:$16 sps:$4 sm:$0xff]   ;;  %v17382_v14 = vld [vmem:[%s23923_s3 + $0x1bc4] ss:$16 sps:$4 sm:$0xff]  }
 0x807   : > { %v22094_v43 = vadd.f32 %v12695_v59, %v12653_v32  ;;  %12961 = vmatpush1.bf16.msra.mxu0 %v17338_v44  ;;  %v17377_v44 = vld [vmem:[%s23923_s3 + $0x68] ss:$16 sps:$4 sm:$0xff]   ;;  %v17385_v59 = vld [vmem:[%s23923_s3 + $0x4c] ss:$16 sps:$4 sm:$0xff]   ;;  %v17388_v32 = vld [vmem:[%s23923_s3 + $0x1ba4] ss:$16 sps:$4 sm:$0xff]  }
 0x808   : > { %13028 = vmatpush2.bf16.msra.mxu1 %v17341_v8  ;;  %12962 = vmatprep.subr.bf16.mxu0 %v17346_v12  ;;  %v17380_v8 = vld [vmem:[%s23923_s3 + $0x1bc0] ss:$16 sps:$4 sm:$0xff]   ;;  %v17383_v12 = vld [vmem:[%s23923_s3 + $0x48] ss:$16 sps:$4 sm:$0xff]  }
 0x809   : > { %13029 = vmatprep.subr.bf16.mxu1 %v17349_v4  ;;  %v17391_v4 = vld [vmem:[%s23923_s3 + $0x2c] ss:$16 sps:$4 sm:$0xff]  }
 0x80b   : > { %12963 = vmatpush1.bf16.msra.mxu0 %v17344_v41  ;;  %v17386_v41 = vld [vmem:[%s23923_s3 + $0x1ba0] ss:$16 sps:$4 sm:$0xff]  }
 0x80c   : > { %13030 = vmatpush2.bf16.msra.mxu1 %v17347_v39  ;;  %12964 = vmatprep.subr.bf16.mxu0 %v17352_v50  ;;  %v17389_v39 = vld [vmem:[%s23923_s3 + $0x28] ss:$16 sps:$4 sm:$0xff]   ;;  %v17394_v50 = vld [vmem:[%s23923_s3 + $0x1b84] ss:$16 sps:$4 sm:$0xff]  }
 0x80d   : > { %13085 = vmatprep.subr.bf16.mxu1 %v17355_v36  ;;  %v17397_v36 = vld [vmem:[%s23923_s3 + $0xc] ss:$16 sps:$4 sm:$0xff]  }
 0x80f   : > { %13032 = vmatmul.mubr.bf16.vlgmr.msra.gmra.mxu1 %v21172_v63  ;;  %12965 = vmatpush1.bf16.msra.mxu0 %v17350_v48  ;;  %v17392_v48 = vld [vmem:[%s23923_s3 + $0x1b80] ss:$16 sps:$4 sm:$0xff]  }
 0x810   : > { %13086 = vmatpush1.bf16.msra.mxu1 %v17353_v29  ;;  %13117 = vmatprep.mubr.bf16.mxu1 %v20710_v24  ;;  %v17365_v24 = vld [vmem:[%s23923_s3 + $0xa8] ss:$16 sps:$4 sm:$0xff]  }
 0x811   : > { %12966 = vmatprep.subr.bf16.mxu0 %v17358_v5  ;;  %13087 = vmatprep.subr.bf16.mxu1 %v17361_v7  ;;  %v17395_v29 = vld [vmem:[%s23923_s3 + $0x8] ss:$16 sps:$4 sm:$0xff]   ;;  %v17400_v5 = vld [vmem:[%s23923_s3 + $0x1b64] ss:$16 sps:$4 sm:$0xff]   ;;  %v17403_v7 = vld [vmem:[%s23923_s3 + $0x1ec] ss:$16 sps:$4 sm:$0xff]  }
 0x813   : > { %12967 = vmatpush1.bf16.msra.mxu0 %v17356_v56  ;;  %v17398_v56 = vld [vmem:[%s23923_s3 + $0x1b60] ss:$16 sps:$4 sm:$0xff]  }
 0x814   : > { %13088 = vmatpush1.bf16.msra.mxu1 %v17359_v19  ;;  %12968 = vmatprep.subr.bf16.mxu0 %v17364_v25  ;;  %v17401_v19 = vld [vmem:[%s23923_s3 + $0x1e8] ss:$16 sps:$4 sm:$0xff]   ;;  %v17406_v25 = vld [vmem:[%s23923_s3 + $0x1b44] ss:$16 sps:$4 sm:$0xff]  }
 0x815   : > { %13089 = vmatprep.subr.bf16.mxu1 %v17367_v49  ;;  %v17409_v49 = vld [vmem:[%s23923_s3 + $0x1cc] ss:$16 sps:$4 sm:$0xff]  }
 0x817   : > { %12969 = vmatpush1.bf16.msra.mxu0 %v17362_v42  ;;  %v17404_v42 = vld [vmem:[%s23923_s3 + $0x1b40] ss:$16 sps:$4 sm:$0xff]  }
 0x818   : > { %13090 = vmatpush1.bf16.msra.mxu1 %v17365_v24  ;;  %12970 = vmatprep.subr.bf16.mxu0 %v17370_v3  ;;  %v17407_v24 = vld [vmem:[%s23923_s3 + $0x1c8] ss:$16 sps:$4 sm:$0xff]   ;;  %v17412_v3 = vld [vmem:[%s23923_s3 + $0x1b24] ss:$16 sps:$4 sm:$0xff]  }
 0x819   : > { %13091 = vmatprep.subr.bf16.mxu1 %v17373_v17  ;;  %v17415_v17 = vld [vmem:[%s23923_s3 + $0x1ac] ss:$16 sps:$4 sm:$0xff]  }
 0x81b   : > { %12971 = vmatpush1.bf16.msra.mxu0 %v17368_v0  ;;  %v17410_v0 = vld [vmem:[%s23923_s3 + $0x1b20] ss:$16 sps:$4 sm:$0xff]  }
 0x81c   : > { %13092 = vmatpush1.bf16.msra.mxu1 %v17371_v34  ;;  %12972 = vmatprep.subr.bf16.mxu0 %v17376_v27  ;;  %v17413_v34 = vld [vmem:[%s23923_s3 + $0x1a8] ss:$16 sps:$4 sm:$0xff]   ;;  %v17418_v27 = vld [vmem:[%s23923_s3 + $0x1b04] ss:$16 sps:$4 sm:$0xff]  }
 0x81d   : > { %13093 = vmatprep.subr.bf16.mxu1 %v17379_v22  ;;  %v17421_v22 = vld [vmem:[%s23923_s3 + $0x18c] ss:$16 sps:$4 sm:$0xff]  }
 0x81f   : > { %12973 = vmatpush2.bf16.msra.mxu0 %v17374_v11  ;;  %v17416_v11 = vld [vmem:[%s23923_s3 + $0x1b00] ss:$16 sps:$4 sm:$0xff]  }
 0x820   : > { %13094 = vmatpush1.bf16.msra.mxu1 %v17377_v44  ;;  %12974 = vmatprep.subr.bf16.mxu0 %v17382_v14  ;;  %v17419_v44 = vld [vmem:[%s23923_s3 + $0x188] ss:$16 sps:$4 sm:$0xff]   ;;  %v17424_v14 = vld [vmem:[%s23923_s3 + $0x1ee4] ss:$16 sps:$4 sm:$0xff]  }
 0x821   : > { %13095 = vmatprep.subr.bf16.mxu1 %v17385_v59  ;;  %v17427_v59 = vld [vmem:[%s23923_s3 + $0x16c] ss:$16 sps:$4 sm:$0xff]  }
 0x823   : > { %12975 = vmatpush2.bf16.msra.mxu0 %v17380_v8  ;;  %v12775_v8 = vpop.f32.mrf.mxu1 }
 0x824   : > { %13096 = vmatpush1.bf16.msra.mxu1 %v17383_v12  ;;  %12976 = vmatprep.subr.bf16.mxu0 %v17388_v32  ;;  %v17422_v12 = vld [vmem:[%s23923_s3 + $0x1ee0] ss:$16 sps:$4 sm:$0xff]   ;;  %v17425_v32 = vld [vmem:[%s23923_s3 + $0x168] ss:$16 sps:$4 sm:$0xff]  }
 0x825   : > { %13097 = vmatprep.subr.bf16.mxu1 %v17391_v4  ;;  %v17430_v4 = vld [vmem:[%s23923_s3 + $0x1ec4] ss:$16 sps:$4 sm:$0xff]  }
 0x827   : > { %12977 = vmatpush2.bf16.msra.mxu0 %v17386_v41  ;;  %v22265_v41 = vpack.c.bf16 %v21596_v53, %v21188_v18  ;;  %v17431_v53 = vld [vmem:[%s23923_s3 + $0x148] ss:$16 sps:$4 sm:$0xff]  }
 0x828   : > { %13098 = vmatpush1.bf16.msra.mxu1 %v17389_v39  ;;  %12978 = vmatprep.subr.bf16.mxu0 %v17394_v50  ;;  %v17433_v39 = vld [vmem:[%s23923_s3 + $0x14c] ss:$16 sps:$4 sm:$0xff]  }
 0x829   : > { %13099 = vmatprep.subr.bf16.mxu1 %v17397_v36  ;;  %v12777_v36 = vpop.f32.mrf.mxu1 }
 0x82b   : > { %12979 = vmatpush2.bf16.msra.mxu0 %v17392_v48 }
 0x82c   : > { %13100 = vmatpush1.bf16.msra.mxu1 %v17395_v29  ;;  %12980 = vmatprep.subr.bf16.mxu0 %v17400_v5  ;;  %v17428_v29 = vld [vmem:[%s23923_s3 + $0x1ec0] ss:$16 sps:$4 sm:$0xff]   ;;  %v17436_v5 = vld [vmem:[%s23923_s3 + $0x1ea4] ss:$16 sps:$4 sm:$0xff]  }
 0x82d   : > { %13101 = vmatprep.subr.bf16.mxu1 %v17403_v7 }
 0x82f   : > { %12981 = vmatpush2.bf16.msra.mxu0 %v17398_v56  ;;  %v17439_v56 = vld [vmem:[%s23923_s3 + $0x12c] ss:$16 sps:$4 sm:$0xff]  }
 0x830   : > { %13102 = vmatpush2.bf16.msra.mxu1 %v17401_v19  ;;  %12982 = vmatprep.subr.bf16.mxu0 %v17406_v25  ;;  %v12779_v25 = vpop.f32.mrf.mxu1 }
 0x831   : > { %13103 = vmatprep.subr.bf16.mxu1 %v17409_v49 }
 0x833   : > { %12983 = vmatpush2.bf16.msra.mxu0 %v17404_v42 }
 0x834   : > { %13104 = vmatpush2.bf16.msra.mxu1 %v17407_v24  ;;  %12984 = vmatprep.subr.bf16.mxu0 %v17412_v3  ;;  %v17434_v24 = vld [vmem:[%s23923_s3 + $0x1ea0] ss:$16 sps:$4 sm:$0xff]   ;;  %v17437_v3 = vld [vmem:[%s23923_s3 + $0x128] ss:$16 sps:$4 sm:$0xff]  }
 0x835   : > { %13105 = vmatprep.subr.bf16.mxu1 %v17415_v17  ;;  %v17442_v17 = vld [vmem:[%s23923_s3 + $0x1e84] ss:$16 sps:$4 sm:$0xff]  }
 0x837   : > { %12985 = vmatpush2.bf16.msra.mxu0 %v17410_v0 }
 0x838   : > { %13106 = vmatpush2.bf16.msra.mxu1 %v17413_v34  ;;  %12986 = vmatprep.subr.bf16.mxu0 %v17418_v27  ;;  %v17445_v34 = vld [vmem:[%s23923_s3 + $0x10c] ss:$16 sps:$4 sm:$0xff]   ;;  %v12781_v27 = vpop.f32.mrf.mxu1 }
 0x839   : > { %13107 = vmatprep.subr.bf16.mxu1 %v17421_v22 }
 0x83b   : > { %12987 = vmatpush2.bf16.msra.mxu0 %v17416_v11  ;;  %v17440_v11 = vld [vmem:[%s23923_s3 + $0x1e80] ss:$16 sps:$4 sm:$0xff]  }
 0x83c   : > { %13108 = vmatpush2.bf16.msra.mxu1 %v17419_v44  ;;  %13042 = vmatprep.subr.bf16.mxu0 %v17424_v14  ;;  %v17448_v44 = vld [vmem:[%s23923_s3 + $0x1e64] ss:$16 sps:$4 sm:$0xff]   ;;  %v17451_v14 = vld [vmem:[%s23923_s3 + $0x4ec] ss:$16 sps:$4 sm:$0xff]  }
 0x83d   : > { %13109 = vmatprep.subr.bf16.mxu1 %v17427_v59  ;;  %v17446_v59 = vld [vmem:[%s23923_s3 + $0x1e60] ss:$16 sps:$4 sm:$0xff]  }
 0x83e   : > { %v12732_v50 = vpop.f32.mrf.mxu0  ;;  %12989 = vmatmul.mubr.bf16.vlgmr.msra.gmra.mxu0 %v21142_v45 }
 0x83f   : > { %v12733_v48 = vadd.f32 %v12732_v50, %v22071_v28  ;;  %13043 = vmatpush1.bf16.msra.mxu0 %v17422_v12  ;;  %13074 = vmatprep.mubr.bf16.mxu0 %v22265_v41  ;;  %v17454_v12 = vld [vmem:[%s23923_s3 + $0x1e44] ss:$16 sps:$4 sm:$0xff]  }
 0x840   : > { %13110 = vmatpush2.bf16.msra.mxu1 %v17425_v32  ;;  %v12734_v18 = vpop.f32.mrf.mxu0  ;;  %13044 = vmatprep.subr.bf16.mxu0 %v17430_v4  ;;  %v17457_v32 = vld [vmem:[%s23923_s3 + $0x4cc] ss:$16 sps:$4 sm:$0xff]   ;;  %v17452_v4 = vld [vmem:[%s23923_s3 + $0x1e40] ss:$16 sps:$4 sm:$0xff]   ;;  %v17460_v50 = vld [vmem:[%s23923_s3 + $0x1e24] ss:$16 sps:$4 sm:$0xff]  }
 0x841   : > { %v12735_v28 = vadd.f32 %v12734_v18, %v22077_v15  ;;  %v22283_v7 = vadd.f32 %v12775_v8, %v12733_v48  ;;  %13111 = vmatprep.subr.bf16.mxu1 %v17433_v39  ;;  %v17449_v8 = vld [vmem:[%s23923_s3 + $0x4e8] ss:$16 sps:$4 sm:$0xff]   ;;  %v17466_v48 = vld [vmem:[%s23923_s3 + $0x1e04] ss:$16 sps:$4 sm:$0xff]   ;;  %v17464_v18 = vld [vmem:[%s23923_s3 + $0x1e00] ss:$16 sps:$4 sm:$0xff]  }
 0x842   : > { %v12736_v19 = vpop.f32.mrf.mxu0  ;;  %v17455_v39 = vld [vmem:[%s23923_s3 + $0x4c8] ss:$16 sps:$4 sm:$0xff]  }
 0x843   : > { %v12737_v49 = vadd.f32 %v12736_v19, %v22089_v10  ;;  %v22289_v42 = vadd.f32 %v12777_v36, %v12735_v28  ;;  %13045 = vmatpush1.bf16.msra.mxu0 %v17428_v29  ;;  %v17458_v36 = vld [vmem:[%s23923_s3 + $0x1e20] ss:$16 sps:$4 sm:$0xff]   ;;  %v17469_v29 = vld [vmem:[%s23923_s3 + $0x48c] ss:$16 sps:$4 sm:$0xff]   ;;  %v17473_v19 = vld [vmem:[%s23923_s3 + $0x468] ss:$16 sps:$4 sm:$0xff]  }
 0x844   : > { %13112 = vmatpush2.bf16.msra.mxu1 %v17431_v53  ;;  %v12738_v15 = vpop.f32.mrf.mxu0  ;;  %13046 = vmatprep.subr.bf16.mxu0 %v17436_v5  ;;  %v17467_v53 = vld [vmem:[%s23923_s3 + $0x488] ss:$16 sps:$4 sm:$0xff]   ;;  %v17472_v5 = vld [vmem:[%s23923_s3 + $0x1fe4] ss:$16 sps:$4 sm:$0xff]   ;;  %v17475_v28 = vld [vmem:[%s23923_s3 + $0x46c] ss:$16 sps:$4 sm:$0xff]  }
 0x845   : > { %v12739_v10 = vadd.f32 %v12738_v15, %v22094_v43  ;;  %v22301_v0 = vadd.f32 %v12779_v25, %v12737_v49  ;;  %13113 = vmatprep.subr.bf16.mxu1 %v17439_v56  ;;  %v17443_v43 = vld [vmem:[%s23923_s3 + $0x108] ss:$16 sps:$4 sm:$0xff]   ;;  %v17470_v56 = vld [vmem:[%s23923_s3 + $0x1fe0] ss:$16 sps:$4 sm:$0xff]   ;;  %v17478_v25 = vld [vmem:[%s23923_s3 + $0x1fc4] ss:$16 sps:$4 sm:$0xff]  }
 0x846   : > { %v17481_v49 = vld [vmem:[%s23923_s3 + $0x44c] ss:$16 sps:$4 sm:$0xff]   ;;  %v17479_v15 = vld [vmem:[%s23923_s3 + $0x448] ss:$16 sps:$4 sm:$0xff]  }
 0x847   : > { %v22306_v22 = vadd.f32 %v12781_v27, %v12739_v10  ;;  %13047 = vmatpush1.bf16.msra.mxu0 %v17434_v24  ;;  %v17476_v24 = vld [vmem:[%s23923_s3 + $0x1fc0] ss:$16 sps:$4 sm:$0xff]   ;;  %v17490_v27 = vld [vmem:[%s23923_s3 + $0x1f84] ss:$16 sps:$4 sm:$0xff]  }
 0x848   : > { %13114 = vmatpush2.bf16.msra.mxu1 %v17437_v3  ;;  %13048 = vmatprep.subr.bf16.mxu0 %v17442_v17  ;;  %v17484_v3 = vld [vmem:[%s23923_s3 + $0x1fa4] ss:$16 sps:$4 sm:$0xff]   ;;  %v17487_v17 = vld [vmem:[%s23923_s3 + $0x42c] ss:$16 sps:$4 sm:$0xff]   ;;  %v17482_v10 = vld [vmem:[%s23923_s3 + $0x1fa0] ss:$16 sps:$4 sm:$0xff]  }
 0x849   : > { %13115 = vmatprep.subr.bf16.mxu1 %v17445_v34  ;;  %v17485_v34 = vld [vmem:[%s23923_s3 + $0x428] ss:$16 sps:$4 sm:$0xff]  }
 0x84b   : > { %13049 = vmatpush1.bf16.msra.mxu0 %v17440_v11  ;;  %v17493_v11 = vld [vmem:[%s23923_s3 + $0x40c] ss:$16 sps:$4 sm:$0xff]  }
 0x84c   : > { %13116 = vmatpush2.bf16.msra.mxu1 %v17443_v43  ;;  %13050 = vmatprep.subr.bf16.mxu0 %v17448_v44  ;;  %v17488_v43 = vld [vmem:[%s23923_s3 + $0x1f80] ss:$16 sps:$4 sm:$0xff]   ;;  %v17491_v44 = vld [vmem:[%s23923_s3 + $0x408] ss:$16 sps:$4 sm:$0xff]  }
 0x84d   : > { %13171 = vmatprep.subr.bf16.mxu1 %v17451_v14  ;;  %v17496_v14 = vld [vmem:[%s23923_s3 + $0x1f64] ss:$16 sps:$4 sm:$0xff]  }
 0x84f   : > { %13118 = vmatmul.mubr.bf16.vlgmr.msra.gmra.mxu1 %v20715_v51  ;;  %13051 = vmatpush1.bf16.msra.mxu0 %v17446_v59  ;;  %v17463_v51 = vld [vmem:[%s23923_s3 + $0x4ac] ss:$16 sps:$4 sm:$0xff]  }
 0x850   : > { %13172 = vmatpush1.bf16.msra.mxu1 %v17449_v8  ;;  %13203 = vmatprep.mubr.bf16.mxu1 %v20749_v21  ;;  %v17461_v21 = vld [vmem:[%s23923_s3 + $0x4a8] ss:$16 sps:$4 sm:$0xff]   ;;  %v17499_v59 = vld [vmem:[%s23923_s3 + $0x5ec] ss:$16 sps:$4 sm:$0xff]   ;;  %v17494_v8 = vld [vmem:[%s23923_s3 + $0x1f60] ss:$16 sps:$4 sm:$0xff]  }
 0x851   : > { %13052 = vmatprep.subr.bf16.mxu0 %v17454_v12  ;;  %13173 = vmatprep.subr.bf16.mxu1 %v17457_v32  ;;  %v17497_v12 = vld [vmem:[%s23923_s3 + $0x5e8] ss:$16 sps:$4 sm:$0xff]   ;;  %v17502_v32 = vld [vmem:[%s23923_s3 + $0x1f44] ss:$16 sps:$4 sm:$0xff]  }
 0x853   : > { %13053 = vmatpush1.bf16.msra.mxu0 %v17452_v4  ;;  %v17505_v4 = vld [vmem:[%s23923_s3 + $0x5cc] ss:$16 sps:$4 sm:$0xff]  }
 0x854   : > { %13174 = vmatpush1.bf16.msra.mxu1 %v17455_v39  ;;  %13054 = vmatprep.subr.bf16.mxu0 %v17460_v50  ;;  %v17500_v39 = vld [vmem:[%s23923_s3 + $0x1f40] ss:$16 sps:$4 sm:$0xff]   ;;  %v17503_v50 = vld [vmem:[%s23923_s3 + $0x5c8] ss:$16 sps:$4 sm:$0xff]  }
 0x855   : > { %13175 = vmatprep.subr.bf16.mxu1 %v17463_v51  ;;  %v17508_v51 = vld [vmem:[%s23923_s3 + $0x1f24] ss:$16 sps:$4 sm:$0xff]  }
 0x857   : > { %13055 = vmatpush1.bf16.msra.mxu0 %v17458_v36  ;;  %v17511_v36 = vld [vmem:[%s23923_s3 + $0x5ac] ss:$16 sps:$4 sm:$0xff]  }
 0x858   : > { %13176 = vmatpush1.bf16.msra.mxu1 %v17461_v21  ;;  %13056 = vmatprep.subr.bf16.mxu0 %v17466_v48  ;;  %v17506_v21 = vld [vmem:[%s23923_s3 + $0x1f20] ss:$16 sps:$4 sm:$0xff]   ;;  %v17509_v48 = vld [vmem:[%s23923_s3 + $0x5a8] ss:$16 sps:$4 sm:$0xff]  }
 0x859   : > { %13177 = vmatprep.subr.bf16.mxu1 %v17469_v29  ;;  %v17514_v29 = vld [vmem:[%s23923_s3 + $0x1f04] ss:$16 sps:$4 sm:$0xff]  }
 0x85b   : > { %13057 = vmatpush1.bf16.msra.mxu0 %v17464_v18  ;;  %v17517_v18 = vld [vmem:[%s23923_s3 + $0x58c] ss:$16 sps:$4 sm:$0xff]  }
 0x85c   : > { %13178 = vmatpush1.bf16.msra.mxu1 %v17467_v53  ;;  %13058 = vmatprep.subr.bf16.mxu0 %v17472_v5  ;;  %v17512_v53 = vld [vmem:[%s23923_s3 + $0x1f00] ss:$16 sps:$4 sm:$0xff]   ;;  %v17515_v5 = vld [vmem:[%s23923_s3 + $0x588] ss:$16 sps:$4 sm:$0xff]  }
 0x85d   : > { %13179 = vmatprep.subr.bf16.mxu1 %v17475_v28  ;;  %v17520_v28 = vld [vmem:[%s23923_s3 + $0x2ec] ss:$16 sps:$4 sm:$0xff]  }
 0x85f   : > { %13059 = vmatpush2.bf16.msra.mxu0 %v17470_v56  ;;  %v17523_v56 = vld [vmem:[%s23923_s3 + $0x56c] ss:$16 sps:$4 sm:$0xff]  }
 0x860   : > { %13180 = vmatpush1.bf16.msra.mxu1 %v17473_v19  ;;  %13060 = vmatprep.subr.bf16.mxu0 %v17478_v25  ;;  %v12861_v19 = vpop.f32.mrf.mxu1  ;;  %v17518_v25 = vld [vmem:[%s23923_s3 + $0x2e8] ss:$16 sps:$4 sm:$0xff]  }
 0x861   : > { %13181 = vmatprep.subr.bf16.mxu1 %v17481_v49  ;;  %v17521_v49 = vld [vmem:[%s23923_s3 + $0x568] ss:$16 sps:$4 sm:$0xff]  }
 0x863   : > { %13061 = vmatpush2.bf16.msra.mxu0 %v17476_v24  ;;  %v17526_v24 = vld [vmem:[%s23923_s3 + $0x2cc] ss:$16 sps:$4 sm:$0xff]  }
 0x864   : > { %13182 = vmatpush1.bf16.msra.mxu1 %v17479_v15  ;;  %13062 = vmatprep.subr.bf16.mxu0 %v17484_v3  ;;  %v17529_v15 = vld [vmem:[%s23923_s3 + $0x54c] ss:$16 sps:$4 sm:$0xff]   ;;  %v12863_v3 = vpop.f32.mrf.mxu1 }
 0x865   : > { %13183 = vmatprep.subr.bf16.mxu1 %v17487_v17 }
 0x867   : > { %13063 = vmatpush2.bf16.msra.mxu0 %v17482_v10 }
 0x868   : > { %13184 = vmatpush1.bf16.msra.mxu1 %v17485_v34  ;;  %13064 = vmatprep.subr.bf16.mxu0 %v17490_v27  ;;  %v17524_v34 = vld [vmem:[%s23923_s3 + $0x2c8] ss:$16 sps:$4 sm:$0xff]  }
 0x869   : > { %13185 = vmatprep.subr.bf16.mxu1 %v17493_v11  ;;  %v17527_v11 = vld [vmem:[%s23923_s3 + $0x548] ss:$16 sps:$4 sm:$0xff]  }
 0x86b   : > { %13065 = vmatpush2.bf16.msra.mxu0 %v17488_v43  ;;  %v17532_v43 = vld [vmem:[%s23923_s3 + $0x2ac] ss:$16 sps:$4 sm:$0xff]  }
 0x86c   : > { %13186 = vmatpush1.bf16.msra.mxu1 %v17491_v44  ;;  %13066 = vmatprep.subr.bf16.mxu0 %v17496_v14  ;;  %v12865_v14 = vpop.f32.mrf.mxu1 }
 0x86d   : > { %13187 = vmatprep.subr.bf16.mxu1 %v17499_v59 }
 0x86f   : > { %13067 = vmatpush2.bf16.msra.mxu0 %v17494_v8 }
 0x870   : > { %13188 = vmatpush2.bf16.msra.mxu1 %v17497_v12  ;;  %13068 = vmatprep.subr.bf16.mxu0 %v17502_v32  ;;  %v17530_v12 = vld [vmem:[%s23923_s3 + $0x2a8] ss:$16 sps:$4 sm:$0xff]  }
 0x871   : > { %13189 = vmatprep.subr.bf16.mxu1 %v17505_v4  ;;  %v17533_v4 = vld [vmem:[%s23923_s3 + $0x528] ss:$16 sps:$4 sm:$0xff]  }
 0x873   : > { %13069 = vmatpush2.bf16.msra.mxu0 %v17500_v39  ;;  %v17538_v39 = vld [vmem:[%s23923_s3 + $0x28c] ss:$16 sps:$4 sm:$0xff]  }
 0x874   : > { %13190 = vmatpush2.bf16.msra.mxu1 %v17503_v50  ;;  %13070 = vmatprep.subr.bf16.mxu0 %v17508_v51  ;;  %v17541_v50 = vld [vmem:[%s23923_s3 + $0x50c] ss:$16 sps:$4 sm:$0xff]  }
 0x875   : > { %13191 = vmatprep.subr.bf16.mxu1 %v17511_v36  ;;  %v12867_v36 = vpop.f32.mrf.mxu1 }
 0x877   : > { %13071 = vmatpush2.bf16.msra.mxu0 %v17506_v21  ;;  %v17536_v21 = vld [vmem:[%s23923_s3 + $0x288] ss:$16 sps:$4 sm:$0xff]  }
 0x878   : > { %13192 = vmatpush2.bf16.msra.mxu1 %v17509_v48  ;;  %13072 = vmatprep.subr.bf16.mxu0 %v17514_v29  ;;  %v17544_v29 = vld [vmem:[%s23923_s3 + $0x26c] ss:$16 sps:$4 sm:$0xff]  }
 0x879   : > { %13193 = vmatprep.subr.bf16.mxu1 %v17517_v18  ;;  %v17547_v18 = vld [vmem:[%s23923_s3 + $0x8ec] ss:$16 sps:$4 sm:$0xff]  }
 0x87b   : > { %13073 = vmatpush2.bf16.msra.mxu0 %v17512_v53  ;;  %v17542_v53 = vld [vmem:[%s23923_s3 + $0x268] ss:$16 sps:$4 sm:$0xff]  }
 0x87c   : > { %13194 = vmatpush2.bf16.msra.mxu1 %v17515_v5  ;;  %13128 = vmatprep.subr.bf16.mxu0 %v17520_v28  ;;  %v17545_v5 = vld [vmem:[%s23923_s3 + $0x8e8] ss:$16 sps:$4 sm:$0xff]   ;;  %v17550_v28 = vld [vmem:[%s23923_s3 + $0x24c] ss:$16 sps:$4 sm:$0xff]  }
 0x87d   : > { %13195 = vmatprep.subr.bf16.mxu1 %v17523_v56  ;;  %v17553_v56 = vld [vmem:[%s23923_s3 + $0x8cc] ss:$16 sps:$4 sm:$0xff]  }
 0x87e   : > { %v12818_v17 = vpop.f32.mrf.mxu0  ;;  %13075 = vmatmul.mubr.bf16.vlgmr.msra.gmra.mxu0 %v21202_v38 }
 0x87f   : > { %v12819_v10 = vadd.f32 %v12818_v17, %v22283_v7  ;;  %13129 = vmatpush1.bf16.msra.mxu0 %v17518_v25  ;;  %13160 = vmatprep.mubr.bf16.mxu0 %v20732_v30  ;;  %v17535_v30 = vld [vmem:[%s23923_s3 + $0x52c] ss:$16 sps:$4 sm:$0xff]   ;;  %v17551_v25 = vld [vmem:[%s23923_s3 + $0x8c8] ss:$16 sps:$4 sm:$0xff]  }
 0x880   : > { %13196 = vmatpush2.bf16.msra.mxu1 %v17521_v49  ;;  %v12820_v27 = vpop.f32.mrf.mxu0  ;;  %13130 = vmatprep.subr.bf16.mxu0 %v17526_v24  ;;  %v17556_v49 = vld [vmem:[%s23923_s3 + $0x22c] ss:$16 sps:$4 sm:$0xff]   ;;  %v17554_v24 = vld [vmem:[%s23923_s3 + $0x228] ss:$16 sps:$4 sm:$0xff]  }
 0x881   : > { %v12821_v7 = vadd.f32 %v12820_v27, %v22289_v42  ;;  %13197 = vmatprep.subr.bf16.mxu1 %v17529_v15  ;;  %v22494_v44 = vadd.f32 %v12861_v19, %v12819_v10  ;;  %v17548_v19 = vld [vmem:[%s23923_s3 + $0x248] ss:$16 sps:$4 sm:$0xff]   ;;  %v17562_v15 = vld [vmem:[%s23923_s3 + $0x20c] ss:$16 sps:$4 sm:$0xff]  }
 0x882   : > { %v12822_v59 = vpop.f32.mrf.mxu0  ;;  %v17560_v17 = vld [vmem:[%s23923_s3 + $0x208] ss:$16 sps:$4 sm:$0xff]   ;;  %v17571_v27 = vld [vmem:[%s23923_s3 + $0x86c] ss:$16 sps:$4 sm:$0xff]  }
 0x883   : > { %v12823_v8 = vadd.f32 %v12822_v59, %v22301_v0  ;;  %13131 = vmatpush1.bf16.msra.mxu0 %v17524_v34  ;;  %v22500_v32 = vadd.f32 %v12863_v3, %v12821_v7  ;;  %v17565_v3 = vld [vmem:[%s23923_s3 + $0x88c] ss:$16 sps:$4 sm:$0xff]   ;;  %v17563_v10 = vld [vmem:[%s23923_s3 + $0x888] ss:$16 sps:$4 sm:$0xff]  }
 0x884   : > { %13198 = vmatpush2.bf16.msra.mxu1 %v17527_v11  ;;  %v12824_v42 = vpop.f32.mrf.mxu0  ;;  %13132 = vmatprep.subr.bf16.mxu0 %v17532_v43  ;;  %v17568_v34 = vld [vmem:[%s23923_s3 + $0x3ec] ss:$16 sps:$4 sm:$0xff]   ;;  %v17566_v11 = vld [vmem:[%s23923_s3 + $0x3e8] ss:$16 sps:$4 sm:$0xff]  }
 0x885   : > { %v12825_v0 = vadd.f32 %v12824_v42, %v22306_v22  ;;  %13199 = vmatprep.subr.bf16.mxu1 %v17535_v30  ;;  %v22512_v51 = vadd.f32 %v12865_v14, %v12823_v8  ;;  %v17539_v22 = vld [vmem:[%s23923_s3 + $0x508] ss:$16 sps:$4 sm:$0xff]   ;;  %v17574_v7 = vld [vmem:[%s23923_s3 + $0x3cc] ss:$16 sps:$4 sm:$0xff]  }
 0x886   : > { %v17569_v43 = vld [vmem:[%s23923_s3 + $0x868] ss:$16 sps:$4 sm:$0xff]   ;;  %v17577_v30 = vld [vmem:[%s23923_s3 + $0x84c] ss:$16 sps:$4 sm:$0xff]  }
 0x887   : > { %13133 = vmatpush1.bf16.msra.mxu0 %v17530_v12  ;;  %v22517_v48 = vadd.f32 %v12867_v36, %v12825_v0  ;;  %v17572_v14 = vld [vmem:[%s23923_s3 + $0x3c8] ss:$16 sps:$4 sm:$0xff]   ;;  %v17580_v8 = vld [vmem:[%s23923_s3 + $0x3ac] ss:$16 sps:$4 sm:$0xff]  }
 0x888   : > { %13200 = vmatpush2.bf16.msra.mxu1 %v17533_v4  ;;  %13134 = vmatprep.subr.bf16.mxu0 %v17538_v39  ;;  %v17575_v59 = vld [vmem:[%s23923_s3 + $0x848] ss:$16 sps:$4 sm:$0xff]   ;;  %v17583_v12 = vld [vmem:[%s23923_s3 + $0x82c] ss:$16 sps:$4 sm:$0xff]  }
 0x889   : > { %13201 = vmatprep.subr.bf16.mxu1 %v17541_v50  ;;  %v17578_v42 = vld [vmem:[%s23923_s3 + $0x3a8] ss:$16 sps:$4 sm:$0xff]   ;;  %v17586_v39 = vld [vmem:[%s23923_s3 + $0x38c] ss:$16 sps:$4 sm:$0xff]  }
 0x88a   : > { %v17581_v4 = vld [vmem:[%s23923_s3 + $0x828] ss:$16 sps:$4 sm:$0xff]   ;;  %v17589_v0 = vld [vmem:[%s23923_s3 + $0x80c] ss:$16 sps:$4 sm:$0xff]  }
 0x88b   : > { %13135 = vmatpush1.bf16.msra.mxu0 %v17536_v21  ;;  %v17584_v50 = vld [vmem:[%s23923_s3 + $0x388] ss:$16 sps:$4 sm:$0xff]   ;;  %v17592_v21 = vld [vmem:[%s23923_s3 + $0x36c] ss:$16 sps:$4 sm:$0xff]  }
 0x88c   : > { %13202 = vmatpush2.bf16.msra.mxu1 %v17539_v22  ;;  %13136 = vmatprep.subr.bf16.mxu0 %v17544_v29  ;;  %v17587_v36 = vld [vmem:[%s23923_s3 + $0x808] ss:$16 sps:$4 sm:$0xff]   ;;  %v17595_v22 = vld [vmem:[%s23923_s3 + $0x9ec] ss:$16 sps:$4 sm:$0xff]  }
 0x88d   : > { %13257 = vmatprep.subr.bf16.mxu1 %v17547_v18  ;;  %v17590_v29 = vld [vmem:[%s23923_s3 + $0x368] ss:$16 sps:$4 sm:$0xff]  }
 0x88e   : > { %v17593_v18 = vld [vmem:[%s23923_s3 + $0x9e8] ss:$16 sps:$4 sm:$0xff]  }
 0x88f   : > { %13204 = vmatmul.mubr.bf16.vlgmr.msra.gmra.mxu1 %v20747_v26  ;;  %13137 = vmatpush1.bf16.msra.mxu0 %v17542_v53  ;;  %v17559_v26 = vld [vmem:[%s23923_s3 + $0x8ac] ss:$16 sps:$4 sm:$0xff]  }
 0x890   : > { %13258 = vmatpush1.bf16.msra.mxu1 %v17545_v5  ;;  %13289 = vmatprep.mubr.bf16.mxu1 %v20817_v46  ;;  %v17557_v46 = vld [vmem:[%s23923_s3 + $0x8a8] ss:$16 sps:$4 sm:$0xff]   ;;  %v17598_v53 = vld [vmem:[%s23923_s3 + $0x34c] ss:$16 sps:$4 sm:$0xff]  }
 0x891   : > { %13138 = vmatprep.subr.bf16.mxu0 %v17550_v28  ;;  %13259 = vmatprep.subr.bf16.mxu1 %v17553_v56  ;;  %v17601_v5 = vld [vmem:[%s23923_s3 + $0x9cc] ss:$16 sps:$4 sm:$0xff]   ;;  %v17596_v28 = vld [vmem:[%s23923_s3 + $0x348] ss:$16 sps:$4 sm:$0xff]  }
 0x892   : > { %v17599_v56 = vld [vmem:[%s23923_s3 + $0x9c8] ss:$16 sps:$4 sm:$0xff]  }
 0x893   : > { %13139 = vmatpush1.bf16.msra.mxu0 %v17548_v19  ;;  %v17604_v19 = vld [vmem:[%s23923_s3 + $0x32c] ss:$16 sps:$4 sm:$0xff]  }
 0x894   : > { %13260 = vmatpush1.bf16.msra.mxu1 %v17551_v25  ;;  %13140 = vmatprep.subr.bf16.mxu0 %v17556_v49  ;;  %v17607_v25 = vld [vmem:[%s23923_s3 + $0x9ac] ss:$16 sps:$4 sm:$0xff]   ;;  %v17602_v49 = vld [vmem:[%s23923_s3 + $0x328] ss:$16 sps:$4 sm:$0xff]  }
 0x895   : > { %13261 = vmatprep.subr.bf16.mxu1 %v17559_v26  ;;  %v17605_v26 = vld [vmem:[%s23923_s3 + $0x9a8] ss:$16 sps:$4 sm:$0xff]  }
 0x897   : > { %13141 = vmatpush1.bf16.msra.mxu0 %v17554_v24  ;;  %v17610_v24 = vld [vmem:[%s23923_s3 + $0x30c] ss:$16 sps:$4 sm:$0xff]  }
 0x898   : > { %13262 = vmatpush1.bf16.msra.mxu1 %v17557_v46  ;;  %13142 = vmatprep.subr.bf16.mxu0 %v17562_v15  ;;  %v17613_v46 = vld [vmem:[%s23923_s3 + $0x98c] ss:$16 sps:$4 sm:$0xff]   ;;  %v17608_v15 = vld [vmem:[%s23923_s3 + $0x308] ss:$16 sps:$4 sm:$0xff]  }
 0x899   : > { %13263 = vmatprep.subr.bf16.mxu1 %v17565_v3  ;;  %v17611_v3 = vld [vmem:[%s23923_s3 + $0x988] ss:$16 sps:$4 sm:$0xff]  }
 0x89b   : > { %13143 = vmatpush1.bf16.msra.mxu0 %v17560_v17  ;;  %v17616_v17 = vld [vmem:[%s23923_s3 + $0x6ec] ss:$16 sps:$4 sm:$0xff]  }
 0x89c   : > { %13264 = vmatpush1.bf16.msra.mxu1 %v17563_v10  ;;  %13144 = vmatprep.subr.bf16.mxu0 %v17568_v34  ;;  %v17619_v10 = vld [vmem:[%s23923_s3 + $0x96c] ss:$16 sps:$4 sm:$0xff]   ;;  %v12947_v34 = vpop.f32.mrf.mxu1 }
 0x89d   : > { %13265 = vmatprep.subr.bf16.mxu1 %v17571_v27  ;;  %v17614_v27 = vld [vmem:[%s23923_s3 + $0x6e8] ss:$16 sps:$4 sm:$0xff]  }
 0x89f   : > { %13145 = vmatpush2.bf16.msra.mxu0 %v17566_v11  ;;  %v17617_v11 = vld [vmem:[%s23923_s3 + $0x968] ss:$16 sps:$4 sm:$0xff]  }
 0x8a0   : > { %13266 = vmatpush1.bf16.msra.mxu1 %v17569_v43  ;;  %13146 = vmatprep.subr.bf16.mxu0 %v17574_v7  ;;  %v17622_v43 = vld [vmem:[%s23923_s3 + $0x6cc] ss:$16 sps:$4 sm:$0xff]  }
 0x8a1   : > { %13267 = vmatprep.subr.bf16.mxu1 %v17577_v30  ;;  %v17625_v7 = vld [vmem:[%s23923_s3 + $0x94c] ss:$16 sps:$4 sm:$0xff]   ;;  %v12949_v30 = vpop.f32.mrf.mxu1 }
 0x8a3   : > { %13147 = vmatpush2.bf16.msra.mxu0 %v17572_v14 }
 0x8a4   : > { %13268 = vmatpush1.bf16.msra.mxu1 %v17575_v59  ;;  %13148 = vmatprep.subr.bf16.mxu0 %v17580_v8  ;;  %v17620_v8 = vld [vmem:[%s23923_s3 + $0x6c8] ss:$16 sps:$4 sm:$0xff]  }
 0x8a5   : > { %13269 = vmatprep.subr.bf16.mxu1 %v17583_v12 }
 0x8a7   : > { %13149 = vmatpush2.bf16.msra.mxu0 %v17578_v42  ;;  %v17623_v42 = vld [vmem:[%s23923_s3 + $0x948] ss:$16 sps:$4 sm:$0xff]  }
 0x8a8   : > { %13270 = vmatpush1.bf16.msra.mxu1 %v17581_v4  ;;  %13150 = vmatprep.subr.bf16.mxu0 %v17586_v39  ;;  %v12951_v39 = vpop.f32.mrf.mxu1 }
 0x8a9   : > { %13271 = vmatprep.subr.bf16.mxu1 %v17589_v0 }
 0x8ab   : > { %13151 = vmatpush2.bf16.msra.mxu0 %v17584_v50 }
 0x8ac   : > { %13272 = vmatpush1.bf16.msra.mxu1 %v17587_v36  ;;  %13152 = vmatprep.subr.bf16.mxu0 %v17592_v21  ;;  %v17626_v36 = vld [vmem:[%s23923_s3 + $0x6a8] ss:$16 sps:$4 sm:$0xff]  }
 0x8ad   : > { %13273 = vmatprep.subr.bf16.mxu1 %v17595_v22  ;;  %v17629_v22 = vld [vmem:[%s23923_s3 + $0x928] ss:$16 sps:$4 sm:$0xff]  }
 0x8af   : > { %13153 = vmatpush2.bf16.msra.mxu0 %v17590_v29  ;;  %v17634_v29 = vld [vmem:[%s23923_s3 + $0x68c] ss:$16 sps:$4 sm:$0xff]  }
 0x8b0   : > { %13274 = vmatpush2.bf16.msra.mxu1 %v17593_v18  ;;  %13154 = vmatprep.subr.bf16.mxu0 %v17598_v53  ;;  %v17637_v18 = vld [vmem:[%s23923_s3 + $0x90c] ss:$16 sps:$4 sm:$0xff]  }
 0x8b1   : > { %13275 = vmatprep.subr.bf16.mxu1 %v17601_v5  ;;  %v12953_v5 = vpop.f32.mrf.mxu1 }
 0x8b3   : > { %13155 = vmatpush2.bf16.msra.mxu0 %v17596_v28  ;;  %v17632_v28 = vld [vmem:[%s23923_s3 + $0x688] ss:$16 sps:$4 sm:$0xff]  }
 0x8b4   : > { %13276 = vmatpush2.bf16.msra.mxu1 %v17599_v56  ;;  %13156 = vmatprep.subr.bf16.mxu0 %v17604_v19  ;;  %v17640_v19 = vld [vmem:[%s23923_s3 + $0x66c] ss:$16 sps:$4 sm:$0xff]  }
 0x8b5   : > { %13277 = vmatprep.subr.bf16.mxu1 %v17607_v25  ;;  %v17643_v25 = vld [vmem:[%s23923_s3 + $0xcec] ss:$16 sps:$4 sm:$0xff]  }
 0x8b7   : > { %13157 = vmatpush2.bf16.msra.mxu0 %v17602_v49  ;;  %v17638_v49 = vld [vmem:[%s23923_s3 + $0x668] ss:$16 sps:$4 sm:$0xff]  }
 0x8b8   : > { %13278 = vmatpush2.bf16.msra.mxu1 %v17605_v26  ;;  %13158 = vmatprep.subr.bf16.mxu0 %v17610_v24  ;;  %v17641_v26 = vld [vmem:[%s23923_s3 + $0xce8] ss:$16 sps:$4 sm:$0xff]   ;;  %v17646_v24 = vld [vmem:[%s23923_s3 + $0x64c] ss:$16 sps:$4 sm:$0xff]  }
 0x8b9   : > { %13279 = vmatprep.subr.bf16.mxu1 %v17613_v46  ;;  %v17649_v46 = vld [vmem:[%s23923_s3 + $0xccc] ss:$16 sps:$4 sm:$0xff]  }
 0x8bb   : > { %13159 = vmatpush2.bf16.msra.mxu0 %v17608_v15  ;;  %v17644_v15 = vld [vmem:[%s23923_s3 + $0x648] ss:$16 sps:$4 sm:$0xff]  }
 0x8bc   : > { %13280 = vmatpush2.bf16.msra.mxu1 %v17611_v3  ;;  %13214 = vmatprep.subr.bf16.mxu0 %v17616_v17  ;;  %v17647_v3 = vld [vmem:[%s23923_s3 + $0xcc8] ss:$16 sps:$4 sm:$0xff]   ;;  %v17652_v17 = vld [vmem:[%s23923_s3 + $0x62c] ss:$16 sps:$4 sm:$0xff]  }
 0x8bd   : > { %13281 = vmatprep.subr.bf16.mxu1 %v17619_v10  ;;  %v17650_v10 = vld [vmem:[%s23923_s3 + $0x628] ss:$16 sps:$4 sm:$0xff]  }
 0x8be   : > { %v12904_v14 = vpop.f32.mrf.mxu0  ;;  %13161 = vmatmul.mubr.bf16.vlgmr.msra.gmra.mxu0 %v20934_v9  ;;  %v17628_v9 = vld [vmem:[%s23923_s3 + $0x6ac] ss:$16 sps:$4 sm:$0xff]  }
 0x8bf   : > { %v12905_v59 = vadd.f32 %v12904_v14, %v22494_v44  ;;  %13215 = vmatpush1.bf16.msra.mxu0 %v17614_v27  ;;  %13246 = vmatprep.mubr.bf16.mxu0 %v20946_v33  ;;  %v17631_v33 = vld [vmem:[%s23923_s3 + $0x92c] ss:$16 sps:$4 sm:$0xff]   ;;  %v17662_v14 = vld [vmem:[%s23923_s3 + $0x7e8] ss:$16 sps:$4 sm:$0xff]  }
 0x8c0   : > { %13282 = vmatpush2.bf16.msra.mxu1 %v17617_v11  ;;  %v12906_v12 = vpop.f32.mrf.mxu0  ;;  %13216 = vmatprep.subr.bf16.mxu0 %v17622_v43  ;;  %v17661_v27 = vld [vmem:[%s23923_s3 + $0xc8c] ss:$16 sps:$4 sm:$0xff]   ;;  %v17656_v11 = vld [vmem:[%s23923_s3 + $0x608] ss:$16 sps:$4 sm:$0xff]  }
 0x8c1   : > { %v12907_v44 = vadd.f32 %v12906_v12, %v22500_v32  ;;  %13283 = vmatprep.subr.bf16.mxu1 %v17625_v7  ;;  %v22702_v4 = vadd.f32 %v12947_v34, %v12905_v59  ;;  %v17658_v34 = vld [vmem:[%s23923_s3 + $0x60c] ss:$16 sps:$4 sm:$0xff]   ;;  %v17659_v43 = vld [vmem:[%s23923_s3 + $0xc88] ss:$16 sps:$4 sm:$0xff]  }
 0x8c2   : > { %v12908_v0 = vpop.f32.mrf.mxu0  ;;  %v17664_v7 = vld [vmem:[%s23923_s3 + $0x7ec] ss:$16 sps:$4 sm:$0xff]   ;;  %v17665_v59 = vld [vmem:[%s23923_s3 + $0xc68] ss:$16 sps:$4 sm:$0xff]  }
 0x8c3   : > { %v12909_v50 = vadd.f32 %v12908_v0, %v22512_v51  ;;  %13217 = vmatpush1.bf16.msra.mxu0 %v17620_v8  ;;  %v22708_v21 = vadd.f32 %v12949_v30, %v12907_v44  ;;  %v17667_v30 = vld [vmem:[%s23923_s3 + $0xc6c] ss:$16 sps:$4 sm:$0xff]   ;;  %v17677_v0 = vld [vmem:[%s23923_s3 + $0xc28] ss:$16 sps:$4 sm:$0xff]  }
 0x8c4   : > { %13284 = vmatpush2.bf16.msra.mxu1 %v17623_v42  ;;  %v12910_v32 = vpop.f32.mrf.mxu0  ;;  %13218 = vmatprep.subr.bf16.mxu0 %v17628_v9  ;;  %v17670_v8 = vld [vmem:[%s23923_s3 + $0x7cc] ss:$16 sps:$4 sm:$0xff]   ;;  %v17668_v42 = vld [vmem:[%s23923_s3 + $0x7c8] ss:$16 sps:$4 sm:$0xff]  }
 0x8c5   : > { %v12911_v51 = vadd.f32 %v12910_v32, %v22517_v48  ;;  %13285 = vmatprep.subr.bf16.mxu1 %v17631_v33  ;;  %v22720_v53 = vadd.f32 %v12951_v39, %v12909_v50  ;;  %v17635_v48 = vld [vmem:[%s23923_s3 + $0x908] ss:$16 sps:$4 sm:$0xff]   ;;  %v17673_v12 = vld [vmem:[%s23923_s3 + $0xc4c] ss:$16 sps:$4 sm:$0xff]  }
 0x8c6   : > { %v17671_v9 = vld [vmem:[%s23923_s3 + $0xc48] ss:$16 sps:$4 sm:$0xff]   ;;  %v17676_v44 = vld [vmem:[%s23923_s3 + $0x7ac] ss:$16 sps:$4 sm:$0xff]  }
 0x8c7   : > { %13219 = vmatpush1.bf16.msra.mxu0 %v17626_v36  ;;  %v22725_v56 = vadd.f32 %v12953_v5, %v12911_v51  ;;  %v17679_v33 = vld [vmem:[%s23923_s3 + $0xc2c] ss:$16 sps:$4 sm:$0xff]   ;;  %v17674_v39 = vld [vmem:[%s23923_s3 + $0x7a8] ss:$16 sps:$4 sm:$0xff]  }
 0x8c8   : > { %13286 = vmatpush2.bf16.msra.mxu1 %v17629_v22  ;;  %13220 = vmatprep.subr.bf16.mxu0 %v17634_v29  ;;  %v17682_v50 = vld [vmem:[%s23923_s3 + $0x78c] ss:$16 sps:$4 sm:$0xff]   ;;  %v17680_v32 = vld [vmem:[%s23923_s3 + $0x788] ss:$16 sps:$4 sm:$0xff]  }
 0x8c9   : > { %13287 = vmatprep.subr.bf16.mxu1 %v17637_v18  ;;  %v17685_v36 = vld [vmem:[%s23923_s3 + $0xc0c] ss:$16 sps:$4 sm:$0xff]   ;;  %v17683_v22 = vld [vmem:[%s23923_s3 + $0xc08] ss:$16 sps:$4 sm:$0xff]  }
 0x8ca   : > { %v17688_v29 = vld [vmem:[%s23923_s3 + $0x76c] ss:$16 sps:$4 sm:$0xff]   ;;  %v17686_v18 = vld [vmem:[%s23923_s3 + $0x768] ss:$16 sps:$4 sm:$0xff]  }
 0x8cb   : > { %13221 = vmatpush1.bf16.msra.mxu0 %v17632_v28  ;;  %v17691_v51 = vld [vmem:[%s23923_s3 + $0xdec] ss:$16 sps:$4 sm:$0xff]   ;;  %v17689_v5 = vld [vmem:[%s23923_s3 + $0xde8] ss:$16 sps:$4 sm:$0xff]  }
 0x8cc   : > { %13288 = vmatpush2.bf16.msra.mxu1 %v17635_v48  ;;  %13222 = vmatprep.subr.bf16.mxu0 %v17640_v19  ;;  %v17694_v28 = vld [vmem:[%s23923_s3 + $0x74c] ss:$16 sps:$4 sm:$0xff]   ;;  %v17692_v19 = vld [vmem:[%s23923_s3 + $0x748] ss:$16 sps:$4 sm:$0xff]  }
 0x8cd   : > { %13343 = vmatprep.subr.bf16.mxu1 %v17643_v25  ;;  %v17697_v48 = vld [vmem:[%s23923_s3 + $0xdcc] ss:$16 sps:$4 sm:$0xff]   ;;  %v17695_v25 = vld [vmem:[%s23923_s3 + $0xdc8] ss:$16 sps:$4 sm:$0xff]  }
 0x8cf   : > { %13290 = vmatmul.mubr.bf16.vlgmr.msra.gmra.mxu1 %v21000_v20  ;;  %13223 = vmatpush1.bf16.msra.mxu0 %v17638_v49  ;;  %v17655_v20 = vld [vmem:[%s23923_s3 + $0xcac] ss:$16 sps:$4 sm:$0xff]  }
 0x8d0   : > { %13344 = vmatpush1.bf16.msra.mxu1 %v17641_v26  ;;  %13375 = vmatprep.mubr.bf16.mxu1 %v21018_v61  ;;  %v17653_v61 = vld [vmem:[%s23923_s3 + $0xca8] ss:$16 sps:$4 sm:$0xff]   ;;  %v17700_v49 = vld [vmem:[%s23923_s3 + $0x72c] ss:$16 sps:$4 sm:$0xff]  }
 0x8d1   : > { %13224 = vmatprep.subr.bf16.mxu0 %v17646_v24  ;;  %13345 = vmatprep.subr.bf16.mxu1 %v17649_v46  ;;  %v17703_v26 = vld [vmem:[%s23923_s3 + $0xdac] ss:$16 sps:$4 sm:$0xff]   ;;  %v17698_v24 = vld [vmem:[%s23923_s3 + $0x728] ss:$16 sps:$4 sm:$0xff]  }
 0x8d2   : > { %v17701_v46 = vld [vmem:[%s23923_s3 + $0xda8] ss:$16 sps:$4 sm:$0xff]  }
 0x8d3   : > { %13225 = vmatpush1.bf16.msra.mxu0 %v17644_v15  ;;  %v17706_v15 = vld [vmem:[%s23923_s3 + $0x70c] ss:$16 sps:$4 sm:$0xff]  }
 0x8d4   : > { %13346 = vmatpush1.bf16.msra.mxu1 %v17647_v3  ;;  %13226 = vmatprep.subr.bf16.mxu0 %v17652_v17  ;;  %v17709_v3 = vld [vmem:[%s23923_s3 + $0xd8c] ss:$16 sps:$4 sm:$0xff]   ;;  %v17704_v17 = vld [vmem:[%s23923_s3 + $0x708] ss:$16 sps:$4 sm:$0xff]  }
 0x8d5   : > { %13347 = vmatprep.subr.bf16.mxu1 %v17655_v20  ;;  %v17707_v20 = vld [vmem:[%s23923_s3 + $0xd88] ss:$16 sps:$4 sm:$0xff]  }
 0x8d7   : > { %13227 = vmatpush1.bf16.msra.mxu0 %v17650_v10  ;;  %v17712_v10 = vld [vmem:[%s23923_s3 + $0xaec] ss:$16 sps:$4 sm:$0xff]  }
 0x8d8   : > { %13348 = vmatpush1.bf16.msra.mxu1 %v17653_v61  ;;  %13228 = vmatprep.subr.bf16.mxu0 %v17658_v34  ;;  %v17715_v61 = vld [vmem:[%s23923_s3 + $0xd6c] ss:$16 sps:$4 sm:$0xff]   ;;  %v17710_v34 = vld [vmem:[%s23923_s3 + $0xae8] ss:$16 sps:$4 sm:$0xff]  }
 0x8d9   : > { %13349 = vmatprep.subr.bf16.mxu1 %v17661_v27  ;;  %v17713_v27 = vld [vmem:[%s23923_s3 + $0xd68] ss:$16 sps:$4 sm:$0xff]  }
 0x8db   : > { %13229 = vmatpush1.bf16.msra.mxu0 %v17656_v11  ;;  %v17718_v11 = vld [vmem:[%s23923_s3 + $0xacc] ss:$16 sps:$4 sm:$0xff]  }
 0x8dc   : > { %13350 = vmatpush1.bf16.msra.mxu1 %v17659_v43  ;;  %13230 = vmatprep.subr.bf16.mxu0 %v17664_v7  ;;  %v17721_v43 = vld [vmem:[%s23923_s3 + $0xd4c] ss:$16 sps:$4 sm:$0xff]   ;;  %v13033_v7 = vpop.f32.mrf.mxu1 }
 0x8dd   : > { %13351 = vmatprep.subr.bf16.mxu1 %v17667_v30 }
 0x8df   : > { %13231 = vmatpush2.bf16.msra.mxu0 %v17662_v14 }
 0x8e0   : > { %13352 = vmatpush1.bf16.msra.mxu1 %v17665_v59  ;;  %13232 = vmatprep.subr.bf16.mxu0 %v17670_v8  ;;  %v17716_v59 = vld [vmem:[%s23923_s3 + $0xac8] ss:$16 sps:$4 sm:$0xff]  }
 0x8e1   : > { %13353 = vmatprep.subr.bf16.mxu1 %v17673_v12  ;;  %v17719_v12 = vld [vmem:[%s23923_s3 + $0xd48] ss:$16 sps:$4 sm:$0xff]  }
 0x8e3   : > { %13233 = vmatpush2.bf16.msra.mxu0 %v17668_v42 }
 0x8e4   : > { %13354 = vmatpush1.bf16.msra.mxu1 %v17671_v9  ;;  %13234 = vmatprep.subr.bf16.mxu0 %v17676_v44  ;;  %v13035_v9 = vpop.f32.mrf.mxu1 }
 0x8e5   : > { %13355 = vmatprep.subr.bf16.mxu1 %v17679_v33 }
 0x8e7   : > { %13235 = vmatpush2.bf16.msra.mxu0 %v17674_v39  ;;  %v17722_v39 = vld [vmem:[%s23923_s3 + $0xaa8] ss:$16 sps:$4 sm:$0xff]  }
 0x8e8   : > { %13356 = vmatpush1.bf16.msra.mxu1 %v17677_v0  ;;  %13236 = vmatprep.subr.bf16.mxu0 %v17682_v50  ;;  %v17725_v50 = vld [vmem:[%s23923_s3 + $0xd28] ss:$16 sps:$4 sm:$0xff]  }
 0x8e9   : > { %13357 = vmatprep.subr.bf16.mxu1 %v17685_v36  ;;  %v17730_v36 = vld [vmem:[%s23923_s3 + $0xa8c] ss:$16 sps:$4 sm:$0xff]  }
 0x8eb   : > { %13237 = vmatpush2.bf16.msra.mxu0 %v17680_v32  ;;  %v17733_v32 = vld [vmem:[%s23923_s3 + $0xd0c] ss:$16 sps:$4 sm:$0xff]  }
 0x8ec   : > { %13358 = vmatpush1.bf16.msra.mxu1 %v17683_v22  ;;  %13238 = vmatprep.subr.bf16.mxu0 %v17688_v29  ;;  %v17728_v22 = vld [vmem:[%s23923_s3 + $0xa88] ss:$16 sps:$4 sm:$0xff]  }
 0x8ed   : > { %13359 = vmatprep.subr.bf16.mxu1 %v17691_v51  ;;  %v17731_v29 = vld [vmem:[%s23923_s3 + $0xd08] ss:$16 sps:$4 sm:$0xff]   ;;  %v17739_v51 = vld [vmem:[%s23923_s3 + $0x10ec] ss:$16 sps:$4 sm:$0xff]  }
 0x8ef   : > { %13239 = vmatpush2.bf16.msra.mxu0 %v17686_v18  ;;  %v17734_v18 = vld [vmem:[%s23923_s3 + $0xa68] ss:$16 sps:$4 sm:$0xff]  }
 0x8f0   : > { %13360 = vmatpush2.bf16.msra.mxu1 %v17689_v5  ;;  %13240 = vmatprep.subr.bf16.mxu0 %v17694_v28  ;;  %v17737_v5 = vld [vmem:[%s23923_s3 + $0x10e8] ss:$16 sps:$4 sm:$0xff]   ;;  %v17742_v28 = vld [vmem:[%s23923_s3 + $0xa4c] ss:$16 sps:$4 sm:$0xff]  }
 0x8f1   : > { %13361 = vmatprep.subr.bf16.mxu1 %v17697_v48  ;;  %v17745_v48 = vld [vmem:[%s23923_s3 + $0x10cc] ss:$16 sps:$4 sm:$0xff]  }
 0x8f3   : > { %13241 = vmatpush2.bf16.msra.mxu0 %v17692_v19  ;;  %v17740_v19 = vld [vmem:[%s23923_s3 + $0xa48] ss:$16 sps:$4 sm:$0xff]  }
 0x8f4   : > { %13362 = vmatpush2.bf16.msra.mxu1 %v17695_v25  ;;  %13242 = vmatprep.subr.bf16.mxu0 %v17700_v49  ;;  %v17743_v25 = vld [vmem:[%s23923_s3 + $0x10c8] ss:$16 sps:$4 sm:$0xff]   ;;  %v17748_v49 = vld [vmem:[%s23923_s3 + $0xa2c] ss:$16 sps:$4 sm:$0xff]  }
 0x8f5   : > { %13363 = vmatprep.subr.bf16.mxu1 %v17703_v26  ;;  %v17746_v26 = vld [vmem:[%s23923_s3 + $0xa28] ss:$16 sps:$4 sm:$0xff]  }
 0x8f7   : > { %13243 = vmatpush2.bf16.msra.mxu0 %v17698_v24  ;;  %v17754_v24 = vld [vmem:[%s23923_s3 + $0xa0c] ss:$16 sps:$4 sm:$0xff]  }
 0x8f8   : > { %13364 = vmatpush2.bf16.msra.mxu1 %v17701_v46  ;;  %13244 = vmatprep.subr.bf16.mxu0 %v17706_v15  ;;  %v17757_v46 = vld [vmem:[%s23923_s3 + $0x108c] ss:$16 sps:$4 sm:$0xff]   ;;  %v17752_v15 = vld [vmem:[%s23923_s3 + $0xa08] ss:$16 sps:$4 sm:$0xff]  }
 0x8f9   : > { %13365 = vmatprep.subr.bf16.mxu1 %v17709_v3  ;;  %v17755_v3 = vld [vmem:[%s23923_s3 + $0x1088] ss:$16 sps:$4 sm:$0xff]  }
 0x8fb   : > { %13245 = vmatpush2.bf16.msra.mxu0 %v17704_v17  ;;  %v17760_v17 = vld [vmem:[%s23923_s3 + $0xbec] ss:$16 sps:$4 sm:$0xff]  }
 0x8fc   : > { %13366 = vmatpush2.bf16.msra.mxu1 %v17707_v20  ;;  %13300 = vmatprep.subr.bf16.mxu0 %v17712_v10  ;;  %v17763_v20 = vld [vmem:[%s23923_s3 + $0x106c] ss:$16 sps:$4 sm:$0xff]   ;;  %v17758_v10 = vld [vmem:[%s23923_s3 + $0xbe8] ss:$16 sps:$4 sm:$0xff]  }
 0x8fd   : > { %13367 = vmatprep.subr.bf16.mxu1 %v17715_v61  ;;  %v17761_v61 = vld [vmem:[%s23923_s3 + $0x1068] ss:$16 sps:$4 sm:$0xff]  }
 0x8fe   : > { %v12990_v30 = vpop.f32.mrf.mxu0  ;;  %13247 = vmatmul.mubr.bf16.vlgmr.msra.gmra.mxu0 %v20779_v47  ;;  %v17724_v47 = vld [vmem:[%s23923_s3 + $0xaac] ss:$16 sps:$4 sm:$0xff]  }
 0x8ff   : > { %v12991_v14 = vadd.f32 %v12990_v30, %v22702_v4  ;;  %13301 = vmatpush1.bf16.msra.mxu0 %v17710_v34  ;;  %13332 = vmatprep.mubr.bf16.mxu0 %v21206_v57  ;;  %v17727_v57 = vld [vmem:[%s23923_s3 + $0xd2c] ss:$16 sps:$4 sm:$0xff]  }
 0x900   : > { %13368 = vmatpush2.bf16.msra.mxu1 %v17713_v27  ;;  %v12992_v8 = vpop.f32.mrf.mxu0  ;;  %13302 = vmatprep.subr.bf16.mxu0 %v17718_v11  ;;  %v17766_v34 = vld [vmem:[%s23923_s3 + $0xbcc] ss:$16 sps:$4 sm:$0xff]   ;;  %v17764_v11 = vld [vmem:[%s23923_s3 + $0xbc8] ss:$16 sps:$4 sm:$0xff]  }
 0x901   : > { %v12993_v4 = vadd.f32 %v12992_v8, %v22708_v21  ;;  %13369 = vmatprep.subr.bf16.mxu1 %v17721_v43  ;;  %v22910_v42 = vadd.f32 %v13033_v7, %v12991_v14  ;;  %v17769_v27 = vld [vmem:[%s23923_s3 + $0x104c] ss:$16 sps:$4 sm:$0xff]   ;;  %v17767_v43 = vld [vmem:[%s23923_s3 + $0x1048] ss:$16 sps:$4 sm:$0xff]  }
 0x902   : > { %v12994_v44 = vpop.f32.mrf.mxu0  ;;  %v17772_v7 = vld [vmem:[%s23923_s3 + $0xbac] ss:$16 sps:$4 sm:$0xff]   ;;  %v17770_v14 = vld [vmem:[%s23923_s3 + $0xba8] ss:$16 sps:$4 sm:$0xff]  }
 0x903   : > { %v22913_v33 = vadd.f32 %v12994_v44, %v22720_v53  ;;  %13303 = vmatpush1.bf16.msra.mxu0 %v17716_v59  ;;  %v22918_v0 = vadd.f32 %v13035_v9, %v12993_v4  ;;  %v17775_v30 = vld [vmem:[%s23923_s3 + $0x102c] ss:$16 sps:$4 sm:$0xff]   ;;  %v17773_v59 = vld [vmem:[%s23923_s3 + $0x1028] ss:$16 sps:$4 sm:$0xff]  }
 0x904   : > { %13370 = vmatpush2.bf16.msra.mxu1 %v17719_v12  ;;  %v12996_v21 = vpop.f32.mrf.mxu0  ;;  %13304 = vmatprep.subr.bf16.mxu0 %v17724_v47  ;;  %v17778_v8 = vld [vmem:[%s23923_s3 + $0xb8c] ss:$16 sps:$4 sm:$0xff]   ;;  %v17776_v47 = vld [vmem:[%s23923_s3 + $0xb88] ss:$16 sps:$4 sm:$0xff]  }
 0x905   : > { %v22927_v53 = vadd.f32 %v12996_v21, %v22725_v56  ;;  %13371 = vmatprep.subr.bf16.mxu1 %v17727_v57  ;;  %v17736_v56 = vld [vmem:[%s23923_s3 + $0xa6c] ss:$16 sps:$4 sm:$0xff]   ;;  %v17779_v4 = vld [vmem:[%s23923_s3 + $0x1008] ss:$16 sps:$4 sm:$0xff]  }
 0x906   : > { %v17781_v12 = vld [vmem:[%s23923_s3 + $0x100c] ss:$16 sps:$4 sm:$0xff]   ;;  %v17782_v44 = vld [vmem:[%s23923_s3 + $0xb68] ss:$16 sps:$4 sm:$0xff]  }
 0x907   : > { %13305 = vmatpush1.bf16.msra.mxu0 %v17722_v39  ;;  %v17784_v57 = vld [vmem:[%s23923_s3 + $0xb6c] ss:$16 sps:$4 sm:$0xff]   ;;  %v17785_v39 = vld [vmem:[%s23923_s3 + $0x11e8] ss:$16 sps:$4 sm:$0xff]  }
 0x908   : > { %13372 = vmatpush2.bf16.msra.mxu1 %v17725_v50  ;;  %13306 = vmatprep.subr.bf16.mxu0 %v17730_v36  ;;  %v17787_v9 = vld [vmem:[%s23923_s3 + $0x11ec] ss:$16 sps:$4 sm:$0xff]   ;;  %v17788_v36 = vld [vmem:[%s23923_s3 + $0xb48] ss:$16 sps:$4 sm:$0xff]  }
 0x909   : > { %13373 = vmatprep.subr.bf16.mxu1 %v17733_v32  ;;  %v17790_v21 = vld [vmem:[%s23923_s3 + $0xb4c] ss:$16 sps:$4 sm:$0xff]   ;;  %v17791_v32 = vld [vmem:[%s23923_s3 + $0x11c8] ss:$16 sps:$4 sm:$0xff]  }
 0x90a   : > { %v17793_v50 = vld [vmem:[%s23923_s3 + $0x11cc] ss:$16 sps:$4 sm:$0xff]  }
 0x90b   : > { %13307 = vmatpush1.bf16.msra.mxu0 %v17728_v22  ;;  %v17796_v22 = vld [vmem:[%s23923_s3 + $0xb2c] ss:$16 sps:$4 sm:$0xff]  }
 0x90c   : > { %13374 = vmatpush2.bf16.msra.mxu1 %v17731_v29  ;;  %13308 = vmatprep.subr.bf16.mxu0 %v17736_v56  ;;  %v17799_v29 = vld [vmem:[%s23923_s3 + $0x11ac] ss:$16 sps:$4 sm:$0xff]   ;;  %v17794_v56 = vld [vmem:[%s23923_s3 + $0xb28] ss:$16 sps:$4 sm:$0xff]  }
 0x90d   : > { %13429 = vmatprep.subr.bf16.mxu1 %v17739_v51  ;;  %v17797_v51 = vld [vmem:[%s23923_s3 + $0x11a8] ss:$16 sps:$4 sm:$0xff]  }
 0x90f   : > { %13376 = vmatmul.mubr.bf16.vlgmr.msra.gmra.mxu1 %v21248_v54  ;;  %13309 = vmatpush1.bf16.msra.mxu0 %v17734_v18  ;;  %v17751_v54 = vld [vmem:[%s23923_s3 + $0x10ac] ss:$16 sps:$4 sm:$0xff]  }
 0x910   : > { %13430 = vmatpush1.bf16.msra.mxu1 %v17737_v5  ;;  %13461 = vmatprep.mubr.bf16.mxu1 %v21264_v2  ;;  %v17749_v2 = vld [vmem:[%s23923_s3 + $0x10a8] ss:$16 sps:$4 sm:$0xff]   ;;  %v17802_v18 = vld [vmem:[%s23923_s3 + $0xb0c] ss:$16 sps:$4 sm:$0xff]  }
 0x911   : > { %13310 = vmatprep.subr.bf16.mxu0 %v17742_v28  ;;  %13431 = vmatprep.subr.bf16.mxu1 %v17745_v48  ;;  %v17805_v5 = vld [vmem:[%s23923_s3 + $0x118c] ss:$16 sps:$4 sm:$0xff]   ;;  %v17800_v28 = vld [vmem:[%s23923_s3 + $0xb08] ss:$16 sps:$4 sm:$0xff]  }
 0x912   : > { %v17803_v48 = vld [vmem:[%s23923_s3 + $0x1188] ss:$16 sps:$4 sm:$0xff]  }
 0x913   : > { %13311 = vmatpush1.bf16.msra.mxu0 %v17740_v19  ;;  %v17808_v19 = vld [vmem:[%s23923_s3 + $0xeec] ss:$16 sps:$4 sm:$0xff]  }
 0x914   : > { %13432 = vmatpush1.bf16.msra.mxu1 %v17743_v25  ;;  %13312 = vmatprep.subr.bf16.mxu0 %v17748_v49  ;;  %v17811_v25 = vld [vmem:[%s23923_s3 + $0x116c] ss:$16 sps:$4 sm:$0xff]   ;;  %v17806_v49 = vld [vmem:[%s23923_s3 + $0xee8] ss:$16 sps:$4 sm:$0xff]  }
 0x915   : > { %13433 = vmatprep.subr.bf16.mxu1 %v17751_v54  ;;  %v17809_v54 = vld [vmem:[%s23923_s3 + $0x1168] ss:$16 sps:$4 sm:$0xff]  }
 0x917   : > { %13313 = vmatpush1.bf16.msra.mxu0 %v17746_v26  ;;  %v17814_v26 = vld [vmem:[%s23923_s3 + $0xecc] ss:$16 sps:$4 sm:$0xff]  }
 0x918   : > { %13434 = vmatpush1.bf16.msra.mxu1 %v17749_v2  ;;  %13314 = vmatprep.subr.bf16.mxu0 %v17754_v24  ;;  %v17817_v2 = vld [vmem:[%s23923_s3 + $0x114c] ss:$16 sps:$4 sm:$0xff]   ;;  %v13037_v24 = vpop.f32.mrf.mxu1 }
 0x919   : > { %13435 = vmatprep.subr.bf16.mxu1 %v17757_v46 }
 0x91b   : > { %13315 = vmatpush1.bf16.msra.mxu0 %v17752_v15 }
 0x91c   : > { %13436 = vmatpush1.bf16.msra.mxu1 %v17755_v3  ;;  %13316 = vmatprep.subr.bf16.mxu0 %v17760_v17  ;;  %v17812_v3 = vld [vmem:[%s23923_s3 + $0xec8] ss:$16 sps:$4 sm:$0xff]  }
 0x91d   : > { %13437 = vmatprep.subr.bf16.mxu1 %v17763_v20  ;;  %v17815_v20 = vld [vmem:[%s23923_s3 + $0x1148] ss:$16 sps:$4 sm:$0xff]  }
 0x91f   : > { %13317 = vmatpush2.bf16.msra.mxu0 %v17758_v10 }
 0x920   : > { %13438 = vmatpush1.bf16.msra.mxu1 %v17761_v61  ;;  %13318 = vmatprep.subr.bf16.mxu0 %v17766_v34  ;;  %v13038_v61 = vadd.f32 %v13037_v24, %v22913_v33  ;;  %v13799_v34 = vld [vmem:[%s23924_s4 + $0x10] sm:$0xff]  ;;  %v17818_v33 = vld [vmem:[%s23923_s3 + $0xea8] ss:$16 sps:$4 sm:$0xff]   ;;  %v17841_v24 = vld [vmem:[%s23923_s3 + $0x14cc] ss:$16 sps:$4 sm:$0xff]  }
 0x921   : > { %13439 = vmatprep.subr.bf16.mxu1 %v17769_v27  ;;  %v17823_v27 = vld [vmem:[%s23923_s3 + $0x112c] ss:$16 sps:$4 sm:$0xff]  }
 0x923   : > { %13319 = vmatpush2.bf16.msra.mxu0 %v17764_v11  ;;  %v13039_v11 = vpop.f32.mrf.mxu1 }
 0x924   : > { %13440 = vmatpush1.bf16.msra.mxu1 %v17767_v43  ;;  %13320 = vmatprep.subr.bf16.mxu0 %v17772_v7 }
 0x925   : > { %13441 = vmatprep.subr.bf16.mxu1 %v17775_v30 }
 0x927   : > { %13321 = vmatpush2.bf16.msra.mxu0 %v17770_v14  ;;  %v13040_v14 = vadd.f32 %v13039_v11, %v22927_v53 }
 0x928   : > { %13442 = vmatpush1.bf16.msra.mxu1 %v17773_v59  ;;  %13322 = vmatprep.subr.bf16.mxu0 %v17778_v8  ;;  %v13805_v59 = vunpack.c.l.bf16 %v13799_v34 }
 0x929   : > { %13443 = vmatprep.subr.bf16.mxu1 %v17781_v12  ;;  %v17821_v12 = vld [vmem:[%s23923_s3 + $0x1128] ss:$16 sps:$4 sm:$0xff]  }
 0x92b   : > { %13323 = vmatpush2.bf16.msra.mxu0 %v17776_v47  ;;  %v17826_v47 = vld [vmem:[%s23923_s3 + $0xe8c] ss:$16 sps:$4 sm:$0xff]  }
 0x92c   : > { %13444 = vmatpush1.bf16.msra.mxu1 %v17779_v4  ;;  %13324 = vmatprep.subr.bf16.mxu0 %v17784_v57 }
 0x92d   : > { %13445 = vmatprep.subr.bf16.mxu1 %v17787_v9  ;;  %v17829_v9 = vld [vmem:[%s23923_s3 + $0x110c] ss:$16 sps:$4 sm:$0xff]  }
 0x92f   : > { %13325 = vmatpush2.bf16.msra.mxu0 %v17782_v44 }
 0x930   : > { %13446 = vmatpush2.bf16.msra.mxu1 %v17785_v39  ;;  %13326 = vmatprep.subr.bf16.mxu0 %v17790_v21  ;;  %v13806_v39 = vunpack.c.h.bf16 %v13799_v34  ;;  %v17850_v34 = vld [vmem:[%s23923_s3 + $0xe0c] ss:$16 sps:$4 sm:$0xff]  }
 0x931   : > { %13447 = vmatprep.subr.bf16.mxu1 %v17793_v50 }
 0x933   : > { %13327 = vmatpush2.bf16.msra.mxu0 %v17788_v36 }
 0x934   : > { %13448 = vmatpush2.bf16.msra.mxu1 %v17791_v32  ;;  %13328 = vmatprep.subr.bf16.mxu0 %v17796_v22  ;;  %v17824_v32 = vld [vmem:[%s23923_s3 + $0xe88] ss:$16 sps:$4 sm:$0xff]  }
 0x935   : > { %13449 = vmatprep.subr.bf16.mxu1 %v17799_v29 }
 0x937   : > { %13329 = vmatpush2.bf16.msra.mxu0 %v17794_v56  ;;  %v17827_v56 = vld [vmem:[%s23923_s3 + $0x1108] ss:$16 sps:$4 sm:$0xff]  }
 0x938   : > { %13450 = vmatpush2.bf16.msra.mxu1 %v17797_v51  ;;  %13330 = vmatprep.subr.bf16.mxu0 %v17802_v18  ;;  %v17832_v51 = vld [vmem:[%s23923_s3 + $0xe6c] ss:$16 sps:$4 sm:$0xff]  }
 0x939   : > { %13451 = vmatprep.subr.bf16.mxu1 %v17805_v5  ;;  %v17835_v5 = vld [vmem:[%s23923_s3 + $0x14ec] ss:$16 sps:$4 sm:$0xff]  }
 0x93b   : > { %13331 = vmatpush2.bf16.msra.mxu0 %v17800_v28 }
 0x93c   : > { %13452 = vmatpush2.bf16.msra.mxu1 %v17803_v48  ;;  %13386 = vmatprep.subr.bf16.mxu0 %v17808_v19 }
 0x93d   : > { %13453 = vmatprep.subr.bf16.mxu1 %v17811_v25  ;;  %v17830_v25 = vld [vmem:[%s23923_s3 + $0xe68] ss:$16 sps:$4 sm:$0xff]  }
 0x93e   : > { %v13076_v46 = vpop.f32.mrf.mxu0  ;;  %13333 = vmatmul.mubr.bf16.vlgmr.msra.gmra.mxu0 %v20840_v62  ;;  %v17820_v62 = vld [vmem:[%s23923_s3 + $0xeac] ss:$16 sps:$4 sm:$0xff]  }
 0x93f   : > { %v13077_v15 = vadd.f32 %v13076_v46, %v22910_v42  ;;  %13387 = vmatpush1.bf16.msra.mxu0 %v17806_v49  ;;  %13418 = vmatprep.mubr.bf16.mxu0 %v21414_v58  ;;  %v13797_v58 = vld [vmem:[%s23924_s4] sm:$0xff] }
 0x940   : > { %13454 = vmatpush2.bf16.msra.mxu1 %v17809_v54  ;;  %v13078_v17 = vpop.f32.mrf.mxu0  ;;  %13388 = vmatprep.subr.bf16.mxu0 %v17814_v26  ;;  %v13802_v44 = vunpack.c.h.bf16 %v13797_v58  ;;  %v17833_v26 = vld [vmem:[%s23923_s3 + $0x14e8] ss:$16 sps:$4 sm:$0xff]  }
 0x941   : > { %v13781_v10 = vmul.f32 0.2, %v13077_v15  ;;  %v13079_v42 = vadd.f32 %v13078_v17, %v22918_v0  ;;  %13455 = vmatprep.subr.bf16.mxu1 %v17817_v2  ;;  %vm13773_vm1 = vcmp.gt.f32.partialorder %v13077_v15, 0.0  ;;  %v13801_v0 = vunpack.c.l.bf16 %v13797_v58  ;;  %v17838_v2 = vld [vmem:[%s23923_s3 + $0xe4c] ss:$16 sps:$4 sm:$0xff]  }
 0x942   : > { %v13080_v43 = vpop.f32.mrf.mxu0  ;;  %v17839_v17 = vld [vmem:[%s23923_s3 + $0x14c8] ss:$16 sps:$4 sm:$0xff]  }
 0x943   : > { %v13782_v7 = vmul.f32 0.2, %v13079_v42  ;;  %v13081_v30 = vadd.f32 %v13080_v43, %v13038_v61  ;;  %13389 = vmatpush1.bf16.msra.mxu0 %v17812_v3  ;;  %vm13774_vm2 = vcmp.gt.f32.partialorder %v13079_v42, 0.0  ;;  %v13789_v4 = vsel %vm13773_vm1, %v13077_v15, %v13781_v10  ;;  %v17836_v3 = vld [vmem:[%s23923_s3 + $0xe48] ss:$16 sps:$4 sm:$0xff]  }
 0x944   : > { %13456 = vmatpush2.bf16.msra.mxu1 %v17815_v20  ;;  %v13082_v8 = vpop.f32.mrf.mxu0  ;;  %13390 = vmatprep.subr.bf16.mxu0 %v17820_v62  ;;  %v13809_v22 = vmul.f32 %v13801_v0, %v13789_v4  ;;  %v17844_v20 = vld [vmem:[%s23923_s3 + $0xe2c] ss:$16 sps:$4 sm:$0xff]   ;;  %v17845_v61 = vld [vmem:[%s23923_s3 + $0x14a8] ss:$16 sps:$4 sm:$0xff]  }
 0x945   : > { %vm13777_vm3 = vcmp.gt.f32.partialorder %v13081_v30, 0.0  ;;  %v13785_v53 = vmul.f32 0.2, %v13081_v30  ;;  %v13083_v57 = vadd.f32 %v13082_v8, %v13040_v14  ;;  %13457 = vmatprep.subr.bf16.mxu1 %v17823_v27  ;;  %v13790_v21 = vsel %vm13774_vm2, %v13079_v42, %v13782_v7  ;;  %v17853_v43 = vld [vmem:[%s23923_s3 + $0x148c] ss:$16 sps:$4 sm:$0xff]  }
 0x946   : > { %v13810_v28 = vmul.f32 %v13802_v44, %v13790_v21  ;;  %v17851_v14 = vld [vmem:[%s23923_s3 + $0x1488] ss:$16 sps:$4 sm:$0xff]   ;;  %v17859_v8 = vld [vmem:[%s23923_s3 + $0x146c] ss:$16 sps:$4 sm:$0xff]  }
 0x947   : > { %v13793_v50 = vsel %vm13777_vm3, %v13081_v30, %v13785_v53  ;;  %vm13778_vm4 = vcmp.gt.f32.partialorder %v13083_v57, 0.0  ;;  %v13786_v36 = vmul.f32 0.2, %v13083_v57  ;;  %13391 = vmatpush1.bf16.msra.mxu0 %v17818_v33  ;;  %v17848_v30 = vld [vmem:[%s23923_s3 + $0xe08] ss:$16 sps:$4 sm:$0xff]  }
 0x948   : > { %v13813_v29 = vmul.f32 %v13805_v59, %v13793_v50  ;;  %13458 = vmatpush2.bf16.msra.mxu1 %v17821_v12  ;;  %13392 = vmatprep.subr.bf16.mxu0 %v17826_v47  ;;  %v17856_v33 = vld [vmem:[%s23923_s3 + $0xfec] ss:$16 sps:$4 sm:$0xff]   ;;  %v17854_v47 = vld [vmem:[%s23923_s3 + $0xfe8] ss:$16 sps:$4 sm:$0xff]  }
 0x949   : > { %v13794_v18 = vsel %vm13778_vm4, %v13083_v57, %v13786_v36  ;;  %13459 = vmatprep.subr.bf16.mxu1 %v17829_v9  ;;  %v17857_v4 = vld [vmem:[%s23923_s3 + $0x1468] ss:$16 sps:$4 sm:$0xff]   ;;  %v17862_v53 = vld [vmem:[%s23923_s3 + $0xfcc] ss:$16 sps:$4 sm:$0xff]  }
 0x94a   : > { %v13817_v48 = vadd.f32 %v13813_v29, %v13809_v22  ;;  %v13814_v19 = vmul.f32 %v13806_v39, %v13794_v18  ;;  %v17865_v57 = vld [vmem:[%s23923_s3 + $0x144c] ss:$16 sps:$4 sm:$0xff]   ;;  %v17860_v9 = vld [vmem:[%s23923_s3 + $0xfc8] ss:$16 sps:$4 sm:$0xff]  }
 0x94b   : > { %13393 = vmatpush1.bf16.msra.mxu0 %v17824_v32  ;;  %v17863_v44 = vld [vmem:[%s23923_s3 + $0x1448] ss:$16 sps:$4 sm:$0xff]   ;;  %v17868_v39 = vld [vmem:[%s23923_s3 + $0xfac] ss:$16 sps:$4 sm:$0xff]  }
 0x94c   : > { %v13818_v49 = vrot.slane %v13817_v48, 4  ;;  %v13824_v54 = vadd.f32 %v13814_v19, %v13810_v28  ;;  %13460 = vmatpush2.bf16.msra.mxu1 %v17827_v56  ;;  %13394 = vmatprep.subr.bf16.mxu0 %v17832_v51  ;;  %v17871_v21 = vld [vmem:[%s23923_s3 + $0x142c] ss:$16 sps:$4 sm:$0xff]   ;;  %v17866_v50 = vld [vmem:[%s23923_s3 + $0xfa8] ss:$16 sps:$4 sm:$0xff]  }
 0x94d   : > { %13515 = vmatprep.subr.bf16.mxu1 %v17835_v5  ;;  %v17869_v36 = vld [vmem:[%s23923_s3 + $0x1428] ss:$16 sps:$4 sm:$0xff]   ;;  %v17874_v32 = vld [vmem:[%s23923_s3 + $0xf8c] ss:$16 sps:$4 sm:$0xff]  }
 0x94e   : > { %v13825_v46 = vrot.slane %v13824_v54, 4  ;;  %v13819_v15 = vadd.f32 %v13818_v49, %v13817_v48  ;;  %v17877_v22 = vld [vmem:[%s23923_s3 + $0x140c] ss:$16 sps:$4 sm:$0xff]   ;;  %v17872_v29 = vld [vmem:[%s23923_s3 + $0xf88] ss:$16 sps:$4 sm:$0xff]  }
 0x94f   : > { %13462 = vmatmul.mubr.bf16.vlgmr.msra.gmra.mxu1 %v21456_v37  ;;  %13395 = vmatpush1.bf16.msra.mxu0 %v17830_v25  ;;  %v17847_v37 = vld [vmem:[%s23923_s3 + $0x14ac] ss:$16 sps:$4 sm:$0xff]   ;;  %v17875_v56 = vld [vmem:[%s23923_s3 + $0x1408] ss:$16 sps:$4 sm:$0xff]  }
 0x950   : > { %13516 = vmatpush1.bf16.msra.mxu1 %v17833_v26  ;;  %13547 = vmatprep.mubr.bf16.mxu1 %v21472_v52  ;;  %v13820_v62 = vrot.slane %v13819_v15, 2  ;;  %v13826_v10 = vadd.f32 %v13825_v46, %v13824_v54  ;;  %v17842_v52 = vld [vmem:[%s23923_s3 + $0xe28] ss:$16 sps:$4 sm:$0xff]   ;;  %v17880_v51 = vld [vmem:[%s23923_s3 + $0xf6c] ss:$16 sps:$4 sm:$0xff]  }
 0x951   : > { %13396 = vmatprep.subr.bf16.mxu0 %v17838_v2  ;;  %13517 = vmatprep.subr.bf16.mxu1 %v17841_v24  ;;  %v17883_v18 = vld [vmem:[%s23923_s3 + $0x15ec] ss:$16 sps:$4 sm:$0xff]   ;;  %v17878_v5 = vld [vmem:[%s23923_s3 + $0xf68] ss:$16 sps:$4 sm:$0xff]  }
 0x952   : > { %v13821_v58 = vadd.f32 %v13820_v62, %v13819_v15  ;;  %v13827_v42 = vrot.slane %v13826_v10, 2  ;;  %v17881_v28 = vld [vmem:[%s23923_s3 + $0x15e8] ss:$16 sps:$4 sm:$0xff]   ;;  %v17886_v48 = vld [vmem:[%s23923_s3 + $0xf4c] ss:$16 sps:$4 sm:$0xff]  }
 0x953   : > { %13397 = vmatpush1.bf16.msra.mxu0 %v17836_v3  ;;  %v17889_v19 = vld [vmem:[%s23923_s3 + $0x15cc] ss:$16 sps:$4 sm:$0xff]   ;;  %v17884_v25 = vld [vmem:[%s23923_s3 + $0xf48] ss:$16 sps:$4 sm:$0xff]  }
 0x954   : > { %13518 = vmatpush1.bf16.msra.mxu1 %v17839_v17  ;;  %13398 = vmatprep.subr.bf16.mxu0 %v17844_v20  ;;  %v13822_v27 = vrot.slane %v13821_v58, 1  ;;  %v13828_v11 = vadd.f32 %v13827_v42, %v13826_v10  ;;  %v17887_v49 = vld [vmem:[%s23923_s3 + $0x15c8] ss:$16 sps:$4 sm:$0xff]   ;;  %v17892_v54 = vld [vmem:[%s23923_s3 + $0xf2c] ss:$16 sps:$4 sm:$0xff]  }
 0x955   : > { %13519 = vmatprep.subr.bf16.mxu1 %v17847_v37  ;;  %v17895_v26 = vld [vmem:[%s23923_s3 + $0x15ac] ss:$16 sps:$4 sm:$0xff]   ;;  %v17890_v2 = vld [vmem:[%s23923_s3 + $0xf28] ss:$16 sps:$4 sm:$0xff]  }
 0x956   : > { %v13829_v7 = vrot.slane %v13828_v11, 1  ;;  %v13823_v0 = vadd.f32 %v13822_v27, %v13821_v58  ;;  %v17893_v24 = vld [vmem:[%s23923_s3 + $0x15a8] ss:$16 sps:$4 sm:$0xff]   ;;  %v17898_v46 = vld [vmem:[%s23923_s3 + $0xf0c] ss:$16 sps:$4 sm:$0xff]  }
 0x957   : > { %13399 = vmatpush1.bf16.msra.mxu0 %v17842_v52  ;;  %v17901_v15 = vld [vmem:[%s23923_s3 + $0x158c] ss:$16 sps:$4 sm:$0xff]   ;;  %v17896_v3 = vld [vmem:[%s23923_s3 + $0xf08] ss:$16 sps:$4 sm:$0xff]  }
 0x958   : > { %13520 = vmatpush1.bf16.msra.mxu1 %v17845_v61  ;;  %13400 = vmatprep.subr.bf16.mxu0 %v17850_v34  ;;  %v13830_v59 = vadd.f32 %v13829_v7, %v13828_v11  ;;  %v17899_v17 = vld [vmem:[%s23923_s3 + $0x1588] ss:$16 sps:$4 sm:$0xff]   ;;  %v17904_v20 = vld [vmem:[%s23923_s3 + $0x12ec] ss:$16 sps:$4 sm:$0xff]  }
 0x959   : > { %13521 = vmatprep.subr.bf16.mxu1 %v17853_v43  ;;  %v17907_v62 = vld [vmem:[%s23923_s3 + $0x156c] ss:$16 sps:$4 sm:$0xff]   ;;  %v17902_v10 = vld [vmem:[%s23923_s3 + $0x12e8] ss:$16 sps:$4 sm:$0xff]  }
 0x95a   : > { %v23200_v12 = vadd.f32 %v13830_v59, %v13823_v0  ;;  %v17905_v37 = vld [vmem:[%s23923_s3 + $0x1568] ss:$16 sps:$4 sm:$0xff]   ;;  %v17910_v58 = vld [vmem:[%s23923_s3 + $0x12cc] ss:$16 sps:$4 sm:$0xff]  }
 0x95b   : > { %13401 = vmatpush1.bf16.msra.mxu0 %v17848_v30  ;;  %v17913_v42 = vld [vmem:[%s23923_s3 + $0x154c] ss:$16 sps:$4 sm:$0xff]   ;;  %v17908_v52 = vld [vmem:[%s23923_s3 + $0x12c8] ss:$16 sps:$4 sm:$0xff]  }
 0x95c   : > { %13522 = vmatpush1.bf16.msra.mxu1 %v17851_v14  ;;  %13402 = vmatprep.subr.bf16.mxu0 %v17856_v33  ;;  %v17911_v61 = vld [vmem:[%s23923_s3 + $0x1548] ss:$16 sps:$4 sm:$0xff]   ;;  %v17916_v34 = vld [vmem:[%s23923_s3 + $0x12ac] ss:$16 sps:$4 sm:$0xff]  }
 0x95d   : > { %13523 = vmatprep.subr.bf16.mxu1 %v17859_v8  ;;  %v17917_v27 = vld [vmem:[%s23923_s3 + $0x1528] ss:$16 sps:$4 sm:$0xff]   ;;  %v17922_v11 = vld [vmem:[%s23923_s3 + $0x128c] ss:$16 sps:$4 sm:$0xff]  }
 0x95e   : > { %v17925_v43 = vld [vmem:[%s23923_s3 + $0x150c] ss:$16 sps:$4 sm:$0xff]   ;;  %v17920_v7 = vld [vmem:[%s23923_s3 + $0x1288] ss:$16 sps:$4 sm:$0xff]  }
 0x95f   : > { %13403 = vmatpush2.bf16.msra.mxu0 %v17854_v47  ;;  %v17923_v30 = vld [vmem:[%s23923_s3 + $0x1508] ss:$16 sps:$4 sm:$0xff]   ;;  %v17928_v14 = vld [vmem:[%s23923_s3 + $0x126c] ss:$16 sps:$4 sm:$0xff]  }
 0x960   : > { %13524 = vmatpush1.bf16.msra.mxu1 %v17857_v4  ;;  %13404 = vmatprep.subr.bf16.mxu0 %v17862_v53  ;;  %v17931_v33 = vld [vmem:[%s23923_s3 + $0x18ec] ss:$16 sps:$4 sm:$0xff]   ;;  %v17926_v0 = vld [vmem:[%s23923_s3 + $0x1268] ss:$16 sps:$4 sm:$0xff]  }
 0x961   : > { %13525 = vmatprep.subr.bf16.mxu1 %v17865_v57  ;;  %v17929_v59 = vld [vmem:[%s23923_s3 + $0x18e8] ss:$16 sps:$4 sm:$0xff]   ;;  %v17934_v8 = vld [vmem:[%s23923_s3 + $0x124c] ss:$16 sps:$4 sm:$0xff]  }
 0x962   : > { %v17937_v47 = vld [vmem:[%s23923_s3 + $0x18cc] ss:$16 sps:$4 sm:$0xff]   ;;  %v17932_v4 = vld [vmem:[%s23923_s3 + $0x1248] ss:$16 sps:$4 sm:$0xff]  }
 0x963   : > { %13405 = vmatpush2.bf16.msra.mxu0 %v17860_v9  ;;  %v17935_v53 = vld [vmem:[%s23923_s3 + $0x18c8] ss:$16 sps:$4 sm:$0xff]   ;;  %v17940_v57 = vld [vmem:[%s23923_s3 + $0x122c] ss:$16 sps:$4 sm:$0xff]  }
 0x964   : > { %13526 = vmatpush1.bf16.msra.mxu1 %v17863_v44  ;;  %13406 = vmatprep.subr.bf16.mxu0 %v17868_v39  ;;  %v17938_v9 = vld [vmem:[%s23923_s3 + $0x1228] ss:$16 sps:$4 sm:$0xff]   ;;  %v17946_v44 = vld [vmem:[%s23923_s3 + $0x120c] ss:$16 sps:$4 sm:$0xff]  }
 0x965   : > { %13527 = vmatprep.subr.bf16.mxu1 %v17871_v21  ;;  %v17949_v39 = vld [vmem:[%s23923_s3 + $0x188c] ss:$16 sps:$4 sm:$0xff]   ;;  %v17944_v21 = vld [vmem:[%s23923_s3 + $0x1208] ss:$16 sps:$4 sm:$0xff]  }
 0x967   : > { %13407 = vmatpush2.bf16.msra.mxu0 %v17866_v50  ;;  %v17947_v50 = vld [vmem:[%s23923_s3 + $0x1888] ss:$16 sps:$4 sm:$0xff]  }
 0x968   : > { %13528 = vmatpush1.bf16.msra.mxu1 %v17869_v36  ;;  %13408 = vmatprep.subr.bf16.mxu0 %v17874_v32  ;;  %v17952_v36 = vld [vmem:[%s23923_s3 + $0x13ec] ss:$16 sps:$4 sm:$0xff]  }
 0x969   : > { %13529 = vmatprep.subr.bf16.mxu1 %v17877_v22  ;;  %v17955_v32 = vld [vmem:[%s23923_s3 + $0x186c] ss:$16 sps:$4 sm:$0xff]   ;;  %v17950_v22 = vld [vmem:[%s23923_s3 + $0x13e8] ss:$16 sps:$4 sm:$0xff]  }
 0x96b   : > { %13409 = vmatpush2.bf16.msra.mxu0 %v17872_v29  ;;  %v17953_v29 = vld [vmem:[%s23923_s3 + $0x1868] ss:$16 sps:$4 sm:$0xff]  }
 0x96c   : > { %13530 = vmatpush1.bf16.msra.mxu1 %v17875_v56  ;;  %13410 = vmatprep.subr.bf16.mxu0 %v17880_v51  ;;  %v17958_v56 = vld [vmem:[%s23923_s3 + $0x13cc] ss:$16 sps:$4 sm:$0xff]  }
 0x96d   : > { %13531 = vmatprep.subr.bf16.mxu1 %v17883_v18  ;;  %v17961_v51 = vld [vmem:[%s23923_s3 + $0x184c] ss:$16 sps:$4 sm:$0xff]   ;;  %v17956_v18 = vld [vmem:[%s23923_s3 + $0x13c8] ss:$16 sps:$4 sm:$0xff]  }
 0x96f   : > { %13411 = vmatpush2.bf16.msra.mxu0 %v17878_v5  ;;  %v17959_v5 = vld [vmem:[%s23923_s3 + $0x1848] ss:$16 sps:$4 sm:$0xff]  }
 0x970   : > { %13532 = vmatpush2.bf16.msra.mxu1 %v17881_v28  ;;  %13412 = vmatprep.subr.bf16.mxu0 %v17886_v48  ;;  %v17964_v28 = vld [vmem:[%s23923_s3 + $0x13ac] ss:$16 sps:$4 sm:$0xff]  }
 0x971   : > { %13533 = vmatprep.subr.bf16.mxu1 %v17889_v19  ;;  %v17967_v48 = vld [vmem:[%s23923_s3 + $0x182c] ss:$16 sps:$4 sm:$0xff]   ;;  %v17962_v19 = vld [vmem:[%s23923_s3 + $0x13a8] ss:$16 sps:$4 sm:$0xff]  }
 0x973   : > { %13413 = vmatpush2.bf16.msra.mxu0 %v17884_v25  ;;  %v17965_v25 = vld [vmem:[%s23923_s3 + $0x1828] ss:$16 sps:$4 sm:$0xff]  }
 0x974   : > { %13534 = vmatpush2.bf16.msra.mxu1 %v17887_v49  ;;  %13414 = vmatprep.subr.bf16.mxu0 %v17892_v54  ;;  %v17970_v49 = vld [vmem:[%s23923_s3 + $0x138c] ss:$16 sps:$4 sm:$0xff]  }
 0x975   : > { %13535 = vmatprep.subr.bf16.mxu1 %v17895_v26  ;;  %v17973_v54 = vld [vmem:[%s23923_s3 + $0x180c] ss:$16 sps:$4 sm:$0xff]   ;;  %v17968_v26 = vld [vmem:[%s23923_s3 + $0x1388] ss:$16 sps:$4 sm:$0xff]  }
 0x977   : > { %13415 = vmatpush2.bf16.msra.mxu0 %v17890_v2  ;;  %v17971_v2 = vld [vmem:[%s23923_s3 + $0x1808] ss:$16 sps:$4 sm:$0xff]  }
 0x978   : > { %13536 = vmatpush2.bf16.msra.mxu1 %v17893_v24  ;;  %13416 = vmatprep.subr.bf16.mxu0 %v17898_v46  ;;  %v17976_v24 = vld [vmem:[%s23923_s3 + $0x136c] ss:$16 sps:$4 sm:$0xff]  }
 0x979   : > { %13537 = vmatprep.subr.bf16.mxu1 %v17901_v15  ;;  %v17979_v46 = vld [vmem:[%s23923_s3 + $0x19ec] ss:$16 sps:$4 sm:$0xff]   ;;  %v17974_v15 = vld [vmem:[%s23923_s3 + $0x1368] ss:$16 sps:$4 sm:$0xff]  }
 0x97b   : > { %13417 = vmatpush2.bf16.msra.mxu0 %v17896_v3  ;;  %v17977_v3 = vld [vmem:[%s23923_s3 + $0x19e8] ss:$16 sps:$4 sm:$0xff]  }
 0x97c   : > { %13538 = vmatpush2.bf16.msra.mxu1 %v17899_v17  ;;  %13472 = vmatprep.subr.bf16.mxu0 %v17904_v20  ;;  %v17982_v17 = vld [vmem:[%s23923_s3 + $0x134c] ss:$16 sps:$4 sm:$0xff]  }
 0x97d   : > { %13539 = vmatprep.subr.bf16.mxu1 %v17907_v62  ;;  %v17985_v20 = vld [vmem:[%s23923_s3 + $0x19cc] ss:$16 sps:$4 sm:$0xff]   ;;  %v17980_v62 = vld [vmem:[%s23923_s3 + $0x1348] ss:$16 sps:$4 sm:$0xff]  }
 0x97e   : > { %13419 = vmatmul.mubr.bf16.vlgmr.msra.gmra.mxu0 %v20942_v23  ;;  %v17919_v23 = vld [vmem:[%s23923_s3 + $0x152c] ss:$16 sps:$4 sm:$0xff]  }
 0x97f   : > { %13473 = vmatpush1.bf16.msra.mxu0 %v17902_v10  ;;  %13504 = vmatprep.mubr.bf16.mxu0 %v21624_v16  ;;  %v17914_v16 = vld [vmem:[%s23923_s3 + $0x12a8] ss:$16 sps:$4 sm:$0xff]  }
 0x980   : > { %13540 = vmatpush2.bf16.msra.mxu1 %v17905_v37  ;;  %13474 = vmatprep.subr.bf16.mxu0 %v17910_v58  ;;  %v17983_v10 = vld [vmem:[%s23923_s3 + $0x19c8] ss:$16 sps:$4 sm:$0xff]   ;;  %v17988_v37 = vld [vmem:[%s23923_s3 + $0x132c] ss:$16 sps:$4 sm:$0xff]  }
 0x981   : > { %13541 = vmatprep.subr.bf16.mxu1 %v17913_v42  ;;  %v17991_v58 = vld [vmem:[%s23923_s3 + $0x19ac] ss:$16 sps:$4 sm:$0xff]   ;;  %v17986_v42 = vld [vmem:[%s23923_s3 + $0x1328] ss:$16 sps:$4 sm:$0xff]  }
 0x983   : > { %13475 = vmatpush1.bf16.msra.mxu0 %v17908_v52  ;;  %v17989_v52 = vld [vmem:[%s23923_s3 + $0x19a8] ss:$16 sps:$4 sm:$0xff]  }
 0x984   : > { %13542 = vmatpush2.bf16.msra.mxu1 %v17911_v61  ;;  %13476 = vmatprep.subr.bf16.mxu0 %v17916_v34  ;;  %v17994_v61 = vld [vmem:[%s23923_s3 + $0x130c] ss:$16 sps:$4 sm:$0xff]  }
 0x985   : > { %13543 = vmatprep.subr.bf16.mxu1 %v17919_v23  ;;  %v17997_v34 = vld [vmem:[%s23923_s3 + $0x198c] ss:$16 sps:$4 sm:$0xff]   ;;  %v17992_v23 = vld [vmem:[%s23923_s3 + $0x1308] ss:$16 sps:$4 sm:$0xff]  }
 0x987   : > { %13477 = vmatpush1.bf16.msra.mxu0 %v17914_v16  ;;  %v17995_v16 = vld [vmem:[%s23923_s3 + $0x1988] ss:$16 sps:$4 sm:$0xff]  }
 0x988   : > { %13544 = vmatpush2.bf16.msra.mxu1 %v17917_v27  ;;  %13478 = vmatprep.subr.bf16.mxu0 %v17922_v11  ;;  %v18000_v27 = vld [vmem:[%s23923_s3 + $0x16ec] ss:$16 sps:$4 sm:$0xff]  }
 0x989   : > { %13545 = vmatprep.subr.bf16.mxu1 %v17925_v43  ;;  %v18003_v11 = vld [vmem:[%s23923_s3 + $0x196c] ss:$16 sps:$4 sm:$0xff]   ;;  %v17998_v43 = vld [vmem:[%s23923_s3 + $0x16e8] ss:$16 sps:$4 sm:$0xff]  }
 0x98b   : > { %13479 = vmatpush1.bf16.msra.mxu0 %v17920_v7  ;;  %v18001_v7 = vld [vmem:[%s23923_s3 + $0x1968] ss:$16 sps:$4 sm:$0xff]  }
 0x98c   : > { %13546 = vmatpush2.bf16.msra.mxu1 %v17923_v30  ;;  %13480 = vmatprep.subr.bf16.mxu0 %v17928_v14  ;;  %v18006_v30 = vld [vmem:[%s23923_s3 + $0x16cc] ss:$16 sps:$4 sm:$0xff]  }
 0x98d   : > { %13601 = vmatprep.subr.bf16.mxu1 %v17931_v33  ;;  %v18009_v14 = vld [vmem:[%s23923_s3 + $0x194c] ss:$16 sps:$4 sm:$0xff]   ;;  %v18004_v33 = vld [vmem:[%s23923_s3 + $0x16c8] ss:$16 sps:$4 sm:$0xff]  }
 0x98f   : > { %13548 = vmatmul.mubr.bf16.vlgmr.msra.gmra.mxu1 %v21674_v40  ;;  %13481 = vmatpush1.bf16.msra.mxu0 %v17926_v0  ;;  %v17943_v40 = vld [vmem:[%s23923_s3 + $0x18ac] ss:$16 sps:$4 sm:$0xff]   ;;  %v18007_v0 = vld [vmem:[%s23923_s3 + $0x1948] ss:$16 sps:$4 sm:$0xff]  }
 0x990   : > { %13602 = vmatpush1.bf16.msra.mxu1 %v17929_v59  ;;  %13633 = vmatprep.mubr.bf16.mxu1 %v21690_v31  ;;  %v17941_v31 = vld [vmem:[%s23923_s3 + $0x18a8] ss:$16 sps:$4 sm:$0xff]   ;;  %v18012_v59 = vld [vmem:[%s23923_s3 + $0x16ac] ss:$16 sps:$4 sm:$0xff]  }
 0x991   : > { %13482 = vmatprep.subr.bf16.mxu0 %v17934_v8  ;;  %13603 = vmatprep.subr.bf16.mxu1 %v17937_v47  ;;  %v18013_v8 = vld [vmem:[%s23923_s3 + $0x1928] ss:$16 sps:$4 sm:$0xff]   ;;  %v18018_v47 = vld [vmem:[%s23923_s3 + $0x168c] ss:$16 sps:$4 sm:$0xff]  }
 0x993   : > { %13483 = vmatpush1.bf16.msra.mxu0 %v17932_v4  ;;  %v18021_v4 = vld [vmem:[%s23923_s3 + $0x190c] ss:$16 sps:$4 sm:$0xff]  }
 0x994   : > { %13604 = vmatpush1.bf16.msra.mxu1 %v17935_v53  ;;  %13484 = vmatprep.subr.bf16.mxu0 %v17940_v57  ;;  %v18016_v53 = vld [vmem:[%s23923_s3 + $0x1688] ss:$16 sps:$4 sm:$0xff]  }
 0x995   : > { %13605 = vmatprep.subr.bf16.mxu1 %v17943_v40  ;;  %v18019_v57 = vld [vmem:[%s23923_s3 + $0x1908] ss:$16 sps:$4 sm:$0xff]   ;;  %v18024_v40 = vld [vmem:[%s23923_s3 + $0x166c] ss:$16 sps:$4 sm:$0xff]  }
 0x997   : > { %13485 = vmatpush1.bf16.msra.mxu0 %v17938_v9  ;;  %v18027_v9 = vld [vmem:[%s23923_s3 + $0x1cec] ss:$16 sps:$4 sm:$0xff]  }
 0x998   : > { %13606 = vmatpush1.bf16.msra.mxu1 %v17941_v31  ;;  %13486 = vmatprep.subr.bf16.mxu0 %v17946_v44  ;;  %v18022_v31 = vld [vmem:[%s23923_s3 + $0x1668] ss:$16 sps:$4 sm:$0xff]  }
 0x999   : > { %13607 = vmatprep.subr.bf16.mxu1 %v17949_v39  ;;  %v18025_v44 = vld [vmem:[%s23923_s3 + $0x1ce8] ss:$16 sps:$4 sm:$0xff]   ;;  %v18030_v39 = vld [vmem:[%s23923_s3 + $0x164c] ss:$16 sps:$4 sm:$0xff]  }
 0x99b   : > { %13487 = vmatpush1.bf16.msra.mxu0 %v17944_v21  ;;  %v18033_v21 = vld [vmem:[%s23923_s3 + $0x1ccc] ss:$16 sps:$4 sm:$0xff]  }
 0x99c   : > { %13608 = vmatpush1.bf16.msra.mxu1 %v17947_v50  ;;  %13488 = vmatprep.subr.bf16.mxu0 %v17952_v36  ;;  %v18028_v50 = vld [vmem:[%s23923_s3 + $0x1648] ss:$16 sps:$4 sm:$0xff]  }
 0x99d   : > { %13609 = vmatprep.subr.bf16.mxu1 %v17955_v32  ;;  %v18031_v36 = vld [vmem:[%s23923_s3 + $0x1cc8] ss:$16 sps:$4 sm:$0xff]   ;;  %v18036_v32 = vld [vmem:[%s23923_s3 + $0x162c] ss:$16 sps:$4 sm:$0xff]  }
 0x99f   : > { %13489 = vmatpush2.bf16.msra.mxu0 %v17950_v22  ;;  %v18034_v22 = vld [vmem:[%s23923_s3 + $0x1628] ss:$16 sps:$4 sm:$0xff]  }
 0x9a0   : > { %13610 = vmatpush1.bf16.msra.mxu1 %v17953_v29  ;;  %13490 = vmatprep.subr.bf16.mxu0 %v17958_v56  ;;  %v18042_v29 = vld [vmem:[%s23923_s3 + $0x160c] ss:$16 sps:$4 sm:$0xff]  }
 0x9a1   : > { %13611 = vmatprep.subr.bf16.mxu1 %v17961_v51  ;;  %v18045_v56 = vld [vmem:[%s23923_s3 + $0x1c8c] ss:$16 sps:$4 sm:$0xff]   ;;  %v18040_v51 = vld [vmem:[%s23923_s3 + $0x1608] ss:$16 sps:$4 sm:$0xff]  }
 0x9a3   : > { %13491 = vmatpush2.bf16.msra.mxu0 %v17956_v18  ;;  %v18043_v18 = vld [vmem:[%s23923_s3 + $0x1c88] ss:$16 sps:$4 sm:$0xff]  }
 0x9a4   : > { %13612 = vmatpush1.bf16.msra.mxu1 %v17959_v5  ;;  %13492 = vmatprep.subr.bf16.mxu0 %v17964_v28  ;;  %v18048_v5 = vld [vmem:[%s23923_s3 + $0x17ec] ss:$16 sps:$4 sm:$0xff]  }
 0x9a5   : > { %13613 = vmatprep.subr.bf16.mxu1 %v17967_v48  ;;  %v18051_v28 = vld [vmem:[%s23923_s3 + $0x1c6c] ss:$16 sps:$4 sm:$0xff]   ;;  %v18046_v48 = vld [vmem:[%s23923_s3 + $0x17e8] ss:$16 sps:$4 sm:$0xff]  }
 0x9a7   : > { %13493 = vmatpush2.bf16.msra.mxu0 %v17962_v19  ;;  %v18049_v19 = vld [vmem:[%s23923_s3 + $0x1c68] ss:$16 sps:$4 sm:$0xff]  }
 0x9a8   : > { %13614 = vmatpush1.bf16.msra.mxu1 %v17965_v25  ;;  %13494 = vmatprep.subr.bf16.mxu0 %v17970_v49  ;;  %v18054_v25 = vld [vmem:[%s23923_s3 + $0x17cc] ss:$16 sps:$4 sm:$0xff]  }
 0x9a9   : > { %13615 = vmatprep.subr.bf16.mxu1 %v17973_v54  ;;  %v18057_v49 = vld [vmem:[%s23923_s3 + $0x1c4c] ss:$16 sps:$4 sm:$0xff]   ;;  %v18052_v54 = vld [vmem:[%s23923_s3 + $0x17c8] ss:$16 sps:$4 sm:$0xff]  }
 0x9ab   : > { %13495 = vmatpush2.bf16.msra.mxu0 %v17968_v26  ;;  %v18055_v26 = vld [vmem:[%s23923_s3 + $0x1c48] ss:$16 sps:$4 sm:$0xff]  }
 0x9ac   : > { %13616 = vmatpush1.bf16.msra.mxu1 %v17971_v2  ;;  %13496 = vmatprep.subr.bf16.mxu0 %v17976_v24  ;;  %v18060_v2 = vld [vmem:[%s23923_s3 + $0x17ac] ss:$16 sps:$4 sm:$0xff]  }
 0x9ad   : > { %13617 = vmatprep.subr.bf16.mxu1 %v17979_v46  ;;  %v18063_v24 = vld [vmem:[%s23923_s3 + $0x1c2c] ss:$16 sps:$4 sm:$0xff]   ;;  %v18058_v46 = vld [vmem:[%s23923_s3 + $0x17a8] ss:$16 sps:$4 sm:$0xff]  }
 0x9af   : > { %13497 = vmatpush2.bf16.msra.mxu0 %v17974_v15  ;;  %v18061_v15 = vld [vmem:[%s23923_s3 + $0x1c28] ss:$16 sps:$4 sm:$0xff]  }
 0x9b0   : > { %13618 = vmatpush2.bf16.msra.mxu1 %v17977_v3  ;;  %13498 = vmatprep.subr.bf16.mxu0 %v17982_v17  ;;  %v18066_v3 = vld [vmem:[%s23923_s3 + $0x178c] ss:$16 sps:$4 sm:$0xff]  }
 0x9b1   : > { %13619 = vmatprep.subr.bf16.mxu1 %v17985_v20  ;;  %v18069_v17 = vld [vmem:[%s23923_s3 + $0x1c0c] ss:$16 sps:$4 sm:$0xff]   ;;  %v18064_v20 = vld [vmem:[%s23923_s3 + $0x1788] ss:$16 sps:$4 sm:$0xff]  }
 0x9b3   : > { %13499 = vmatpush2.bf16.msra.mxu0 %v17980_v62  ;;  %v18067_v62 = vld [vmem:[%s23923_s3 + $0x1c08] ss:$16 sps:$4 sm:$0xff]  }
 0x9b4   : > { %13620 = vmatpush2.bf16.msra.mxu1 %v17983_v10  ;;  %13500 = vmatprep.subr.bf16.mxu0 %v17988_v37  ;;  %v18072_v10 = vld [vmem:[%s23923_s3 + $0x176c] ss:$16 sps:$4 sm:$0xff]  }
 0x9b5   : > { %13621 = vmatprep.subr.bf16.mxu1 %v17991_v58  ;;  %v18075_v37 = vld [vmem:[%s23923_s3 + $0x1dec] ss:$16 sps:$4 sm:$0xff]   ;;  %v18070_v58 = vld [vmem:[%s23923_s3 + $0x1768] ss:$16 sps:$4 sm:$0xff]  }
 0x9b7   : > { %13501 = vmatpush2.bf16.msra.mxu0 %v17986_v42  ;;  %v18073_v42 = vld [vmem:[%s23923_s3 + $0x1de8] ss:$16 sps:$4 sm:$0xff]  }
 0x9b8   : > { %13622 = vmatpush2.bf16.msra.mxu1 %v17989_v52  ;;  %13502 = vmatprep.subr.bf16.mxu0 %v17994_v61  ;;  %v18078_v52 = vld [vmem:[%s23923_s3 + $0x174c] ss:$16 sps:$4 sm:$0xff]  }
 0x9b9   : > { %13623 = vmatprep.subr.bf16.mxu1 %v17997_v34  ;;  %v18081_v61 = vld [vmem:[%s23923_s3 + $0x1dcc] ss:$16 sps:$4 sm:$0xff]   ;;  %v18076_v34 = vld [vmem:[%s23923_s3 + $0x1748] ss:$16 sps:$4 sm:$0xff]  }
 0x9bb   : > { %13503 = vmatpush2.bf16.msra.mxu0 %v17992_v23  ;;  %v18079_v23 = vld [vmem:[%s23923_s3 + $0x1dc8] ss:$16 sps:$4 sm:$0xff]  }
 0x9bc   : > { %13624 = vmatpush2.bf16.msra.mxu1 %v17995_v16  ;;  %13558 = vmatprep.subr.bf16.mxu0 %v18000_v27  ;;  %v18084_v16 = vld [vmem:[%s23923_s3 + $0x172c] ss:$16 sps:$4 sm:$0xff]  }
 0x9bd   : > { %13625 = vmatprep.subr.bf16.mxu1 %v18003_v11  ;;  %v18087_v27 = vld [vmem:[%s23923_s3 + $0x1dac] ss:$16 sps:$4 sm:$0xff]   ;;  %v18082_v11 = vld [vmem:[%s23923_s3 + $0x1728] ss:$16 sps:$4 sm:$0xff]  }
 0x9be   : > { %13505 = vmatmul.mubr.bf16.vlgmr.msra.gmra.mxu0 %v21014_v6  ;;  %v18015_v6 = vld [vmem:[%s23923_s3 + $0x192c] ss:$16 sps:$4 sm:$0xff]  }
 0x9bf   : > { %13559 = vmatpush1.bf16.msra.mxu0 %v17998_v43  ;;  %13590 = vmatprep.mubr.bf16.mxu0 %v21837_v60  ;;  %v18010_v60 = vld [vmem:[%s23923_s3 + $0x16a8] ss:$16 sps:$4 sm:$0xff]  }
 0x9c0   : > { %13626 = vmatpush2.bf16.msra.mxu1 %v18001_v7  ;;  %13560 = vmatprep.subr.bf16.mxu0 %v18006_v30  ;;  %v18085_v43 = vld [vmem:[%s23923_s3 + $0x1da8] ss:$16 sps:$4 sm:$0xff]   ;;  %v18090_v7 = vld [vmem:[%s23923_s3 + $0x170c] ss:$16 sps:$4 sm:$0xff]  }
 0x9c1   : > { %13627 = vmatprep.subr.bf16.mxu1 %v18009_v14  ;;  %v18093_v30 = vld [vmem:[%s23923_s3 + $0x1d8c] ss:$16 sps:$4 sm:$0xff]   ;;  %v18088_v14 = vld [vmem:[%s23923_s3 + $0x1708] ss:$16 sps:$4 sm:$0xff]  }
 0x9c3   : > { %13561 = vmatpush1.bf16.msra.mxu0 %v18004_v33  ;;  %v18091_v33 = vld [vmem:[%s23923_s3 + $0x1d88] ss:$16 sps:$4 sm:$0xff]  }
 0x9c4   : > { %13628 = vmatpush2.bf16.msra.mxu1 %v18007_v0  ;;  %13562 = vmatprep.subr.bf16.mxu0 %v18012_v59  ;;  %v18096_v0 = vld [vmem:[%s23923_s3 + $0x1aec] ss:$16 sps:$4 sm:$0xff]  }
 0x9c5   : > { %13629 = vmatprep.subr.bf16.mxu1 %v18015_v6  ;;  %v18099_v59 = vld [vmem:[%s23923_s3 + $0x1d6c] ss:$16 sps:$4 sm:$0xff]   ;;  %v18094_v6 = vld [vmem:[%s23923_s3 + $0x1ae8] ss:$16 sps:$4 sm:$0xff]  }
 0x9c7   : > { %13563 = vmatpush1.bf16.msra.mxu0 %v18010_v60  ;;  %v18097_v60 = vld [vmem:[%s23923_s3 + $0x1d68] ss:$16 sps:$4 sm:$0xff]  }
 0x9c8   : > { %13630 = vmatpush2.bf16.msra.mxu1 %v18013_v8  ;;  %13564 = vmatprep.subr.bf16.mxu0 %v18018_v47  ;;  %v18102_v8 = vld [vmem:[%s23923_s3 + $0x1acc] ss:$16 sps:$4 sm:$0xff]  }
 0x9c9   : > { %13631 = vmatprep.subr.bf16.mxu1 %v18021_v4  ;;  %v18105_v47 = vld [vmem:[%s23923_s3 + $0x1d4c] ss:$16 sps:$4 sm:$0xff]   ;;  %v18100_v4 = vld [vmem:[%s23923_s3 + $0x1ac8] ss:$16 sps:$4 sm:$0xff]  }
 0x9cb   : > { %13565 = vmatpush1.bf16.msra.mxu0 %v18016_v53  ;;  %v18103_v53 = vld [vmem:[%s23923_s3 + $0x1d48] ss:$16 sps:$4 sm:$0xff]  }
 0x9cc   : > { %13632 = vmatpush2.bf16.msra.mxu1 %v18019_v57  ;;  %13566 = vmatprep.subr.bf16.mxu0 %v18024_v40  ;;  %v18108_v57 = vld [vmem:[%s23923_s3 + $0x1aac] ss:$16 sps:$4 sm:$0xff]   ;;  %v18109_v40 = vld [vmem:[%s23923_s3 + $0x1d28] ss:$16 sps:$4 sm:$0xff]  }
 0x9cd   : > { %13687 = vmatprep.subr.bf16.mxu1 %v18027_v9  ;;  %v18114_v9 = vld [vmem:[%s23923_s3 + $0x1a8c] ss:$16 sps:$4 sm:$0xff]  }
 0x9cf   : > { %13634 = vmatmul.mubr.bf16.vlgmr.msra.gmra.mxu1 %v21112_v55  ;;  %13567 = vmatpush1.bf16.msra.mxu0 %v18022_v31  ;;  %v18039_v55 = vld [vmem:[%s23923_s3 + $0x1cac] ss:$16 sps:$4 sm:$0xff]  }
 0x9d0   : > { %13688 = vmatpush1.bf16.msra.mxu1 %v18025_v44  ;;  %13719 = vmatprep.mubr.bf16.mxu1 %v21906_v13  ;;  %v18037_v13 = vld [vmem:[%s23923_s3 + $0x1ca8] ss:$16 sps:$4 sm:$0xff]   ;;  %v18117_v31 = vld [vmem:[%s23923_s3 + $0x1d0c] ss:$16 sps:$4 sm:$0xff]  }
 0x9d1   : > { %13568 = vmatprep.subr.bf16.mxu0 %v18030_v39  ;;  %13689 = vmatprep.subr.bf16.mxu1 %v18033_v21  ;;  %v18112_v44 = vld [vmem:[%s23923_s3 + $0x1a88] ss:$16 sps:$4 sm:$0xff]   ;;  %v18120_v21 = vld [vmem:[%s23923_s3 + $0x1a6c] ss:$16 sps:$4 sm:$0xff]  }
 0x9d2   : > { %v18115_v39 = vld [vmem:[%s23923_s3 + $0x1d08] ss:$16 sps:$4 sm:$0xff]  }
 0x9d3   : > { %13569 = vmatpush1.bf16.msra.mxu0 %v18028_v50  ;;  %v18118_v50 = vld [vmem:[%s23923_s3 + $0x1a68] ss:$16 sps:$4 sm:$0xff]  }
 0x9d4   : > { %13690 = vmatpush1.bf16.msra.mxu1 %v18031_v36  ;;  %13570 = vmatprep.subr.bf16.mxu0 %v18036_v32  ;;  %v18123_v36 = vld [vmem:[%s23923_s3 + $0x1a4c] ss:$16 sps:$4 sm:$0xff]   ;;  %v18121_v32 = vld [vmem:[%s23923_s3 + $0x1a48] ss:$16 sps:$4 sm:$0xff]  }
 0x9d5   : > { %13691 = vmatprep.subr.bf16.mxu1 %v18039_v55  ;;  %v18126_v55 = vld [vmem:[%s23923_s3 + $0x1a2c] ss:$16 sps:$4 sm:$0xff]  }
 0x9d7   : > { %13571 = vmatpush1.bf16.msra.mxu0 %v18034_v22  ;;  %v18124_v22 = vld [vmem:[%s23923_s3 + $0x1a28] ss:$16 sps:$4 sm:$0xff]  }
 0x9d8   : > { %13692 = vmatpush1.bf16.msra.mxu1 %v18037_v13  ;;  %13572 = vmatprep.subr.bf16.mxu0 %v18042_v29  ;;  %v18127_v13 = vld [vmem:[%s23923_s3 + $0x1a08] ss:$16 sps:$4 sm:$0xff]   ;;  %v18132_v29 = vld [vmem:[%s23923_s3 + $0x1bec] ss:$16 sps:$4 sm:$0xff]  }
 0x9d9   : > { %13693 = vmatprep.subr.bf16.mxu1 %v18045_v56  ;;  %v18130_v56 = vld [vmem:[%s23923_s3 + $0x1be8] ss:$16 sps:$4 sm:$0xff]  }
 0x9db   : > { %13573 = vmatpush1.bf16.msra.mxu0 %v18040_v51  ;;  %v18135_v51 = vld [vmem:[%s23923_s3 + $0x1bcc] ss:$16 sps:$4 sm:$0xff]  }
 0x9dc   : > { %13694 = vmatpush1.bf16.msra.mxu1 %v18043_v18  ;;  %13574 = vmatprep.subr.bf16.mxu0 %v18048_v5  ;;  %v18133_v18 = vld [vmem:[%s23923_s3 + $0x1bc8] ss:$16 sps:$4 sm:$0xff]   ;;  %v18138_v5 = vld [vmem:[%s23923_s3 + $0x1bac] ss:$16 sps:$4 sm:$0xff]  }
 0x9dd   : > { %13695 = vmatprep.subr.bf16.mxu1 %v18051_v28  ;;  %v18136_v28 = vld [vmem:[%s23923_s3 + $0x1ba8] ss:$16 sps:$4 sm:$0xff]  }
 0x9df   : > { %13575 = vmatpush2.bf16.msra.mxu0 %v18046_v48  ;;  %v18141_v48 = vld [vmem:[%s23923_s3 + $0x1b8c] ss:$16 sps:$4 sm:$0xff]  }
 0x9e0   : > { %13696 = vmatpush1.bf16.msra.mxu1 %v18049_v19  ;;  %13576 = vmatprep.subr.bf16.mxu0 %v18054_v25  ;;  %v18139_v19 = vld [vmem:[%s23923_s3 + $0x1b88] ss:$16 sps:$4 sm:$0xff]   ;;  %v18144_v25 = vld [vmem:[%s23923_s3 + $0x1b6c] ss:$16 sps:$4 sm:$0xff]  }
 0x9e1   : > { %13697 = vmatprep.subr.bf16.mxu1 %v18057_v49  ;;  %v18142_v49 = vld [vmem:[%s23923_s3 + $0x1b68] ss:$16 sps:$4 sm:$0xff]  }
 0x9e3   : > { %13577 = vmatpush2.bf16.msra.mxu0 %v18052_v54  ;;  %v18147_v54 = vld [vmem:[%s23923_s3 + $0x1b4c] ss:$16 sps:$4 sm:$0xff]  }
 0x9e4   : > { %13698 = vmatpush1.bf16.msra.mxu1 %v18055_v26  ;;  %13578 = vmatprep.subr.bf16.mxu0 %v18060_v2  ;;  %v18145_v26 = vld [vmem:[%s23923_s3 + $0x1b48] ss:$16 sps:$4 sm:$0xff]   ;;  %v18150_v2 = vld [vmem:[%s23923_s3 + $0x1b2c] ss:$16 sps:$4 sm:$0xff]  }
 0x9e5   : > { %13699 = vmatprep.subr.bf16.mxu1 %v18063_v24  ;;  %v18148_v24 = vld [vmem:[%s23923_s3 + $0x1b28] ss:$16 sps:$4 sm:$0xff]  }
 0x9e7   : > { %13579 = vmatpush2.bf16.msra.mxu0 %v18058_v46  ;;  %v18153_v46 = vld [vmem:[%s23923_s3 + $0x1b0c] ss:$16 sps:$4 sm:$0xff]  }
 0x9e8   : > { %13700 = vmatpush1.bf16.msra.mxu1 %v18061_v15  ;;  %13580 = vmatprep.subr.bf16.mxu0 %v18066_v3  ;;  %v18151_v15 = vld [vmem:[%s23923_s3 + $0x1b08] ss:$16 sps:$4 sm:$0xff]   ;;  %v18156_v3 = vld [vmem:[%s23923_s3 + $0x1eec] ss:$16 sps:$4 sm:$0xff]  }
 0x9e9   : > { %13701 = vmatprep.subr.bf16.mxu1 %v18069_v17  ;;  %v18154_v17 = vld [vmem:[%s23923_s3 + $0x1ee8] ss:$16 sps:$4 sm:$0xff]  }
 0x9eb   : > { %13581 = vmatpush2.bf16.msra.mxu0 %v18064_v20  ;;  %v18159_v20 = vld [vmem:[%s23923_s3 + $0x1ecc] ss:$16 sps:$4 sm:$0xff]  }
 0x9ec   : > { %13702 = vmatpush1.bf16.msra.mxu1 %v18067_v62  ;;  %13582 = vmatprep.subr.bf16.mxu0 %v18072_v10  ;;  %v18157_v62 = vld [vmem:[%s23923_s3 + $0x1ec8] ss:$16 sps:$4 sm:$0xff]   ;;  %v18162_v10 = vld [vmem:[%s23923_s3 + $0x1eac] ss:$16 sps:$4 sm:$0xff]  }
 0x9ed   : > { %13703 = vmatprep.subr.bf16.mxu1 %v18075_v37  ;;  %v18160_v37 = vld [vmem:[%s23923_s3 + $0x1ea8] ss:$16 sps:$4 sm:$0xff]  }
 0x9ef   : > { %13583 = vmatpush2.bf16.msra.mxu0 %v18070_v58  ;;  %v18168_v58 = vld [vmem:[%s23923_s3 + $0x1e6c] ss:$16 sps:$4 sm:$0xff]  }
 0x9f0   : > { %13704 = vmatpush2.bf16.msra.mxu1 %v18073_v42  ;;  %13584 = vmatprep.subr.bf16.mxu0 %v18078_v52  ;;  %v18166_v42 = vld [vmem:[%s23923_s3 + $0x1e68] ss:$16 sps:$4 sm:$0xff]   ;;  %v18171_v52 = vld [vmem:[%s23923_s3 + $0x1e4c] ss:$16 sps:$4 sm:$0xff]  }
 0x9f1   : > { %13705 = vmatprep.subr.bf16.mxu1 %v18081_v61  ;;  %v18169_v61 = vld [vmem:[%s23923_s3 + $0x1e48] ss:$16 sps:$4 sm:$0xff]  }
 0x9f3   : > { %13585 = vmatpush2.bf16.msra.mxu0 %v18076_v34  ;;  %v18174_v34 = vld [vmem:[%s23923_s3 + $0x1e2c] ss:$16 sps:$4 sm:$0xff]  }
 0x9f4   : > { %13706 = vmatpush2.bf16.msra.mxu1 %v18079_v23  ;;  %13586 = vmatprep.subr.bf16.mxu0 %v18084_v16  ;;  %v18172_v23 = vld [vmem:[%s23923_s3 + $0x1e28] ss:$16 sps:$4 sm:$0xff]   ;;  %v18177_v16 = vld [vmem:[%s23923_s3 + $0x1e0c] ss:$16 sps:$4 sm:$0xff]  }
 0x9f5   : > { %13707 = vmatprep.subr.bf16.mxu1 %v18087_v27  ;;  %v18175_v27 = vld [vmem:[%s23923_s3 + $0x1e08] ss:$16 sps:$4 sm:$0xff]  }
 0x9f7   : > { %13587 = vmatpush2.bf16.msra.mxu0 %v18082_v11  ;;  %v18180_v11 = vld [vmem:[%s23923_s3 + $0x1fec] ss:$16 sps:$4 sm:$0xff]  }
 0x9f8   : > { %13708 = vmatpush2.bf16.msra.mxu1 %v18085_v43  ;;  %13588 = vmatprep.subr.bf16.mxu0 %v18090_v7  ;;  %v18178_v43 = vld [vmem:[%s23923_s3 + $0x1fe8] ss:$16 sps:$4 sm:$0xff]   ;;  %v18183_v7 = vld [vmem:[%s23923_s3 + $0x1fcc] ss:$16 sps:$4 sm:$0xff]  }
 0x9f9   : > { %13709 = vmatprep.subr.bf16.mxu1 %v18093_v30  ;;  %v18181_v30 = vld [vmem:[%s23923_s3 + $0x1fc8] ss:$16 sps:$4 sm:$0xff]  }
 0x9fb   : > { %13589 = vmatpush2.bf16.msra.mxu0 %v18088_v14  ;;  %v18186_v14 = vld [vmem:[%s23923_s3 + $0x1fac] ss:$16 sps:$4 sm:$0xff]  }
 0x9fc   : > { %13710 = vmatpush2.bf16.msra.mxu1 %v18091_v33  ;;  %13644 = vmatprep.subr.bf16.mxu0 %v18096_v0  ;;  %v18184_v33 = vld [vmem:[%s23923_s3 + $0x1fa8] ss:$16 sps:$4 sm:$0xff]   ;;  %v18189_v0 = vld [vmem:[%s23923_s3 + $0x1f8c] ss:$16 sps:$4 sm:$0xff]  }
 0x9fd   : > { %13711 = vmatprep.subr.bf16.mxu1 %v18099_v59  ;;  %v18187_v59 = vld [vmem:[%s23923_s3 + $0x1f88] ss:$16 sps:$4 sm:$0xff]  }
 0x9fe   : > { %13591 = vmatmul.mubr.bf16.vlgmr.msra.gmra.mxu0 %v21082_v35  ;;  %v18111_v35 = vld [vmem:[%s23923_s3 + $0x1d2c] ss:$16 sps:$4 sm:$0xff]  }
 0x9ff   : > { %13645 = vmatpush1.bf16.msra.mxu0 %v18094_v6  ;;  %13676 = vmatprep.mubr.bf16.mxu0 %v22053_v1  ;;  %v18106_v1 = vld [vmem:[%s23923_s3 + $0x1aa8] ss:$16 sps:$4 sm:$0xff]   ;;  %v18192_v6 = vld [vmem:[%s23923_s3 + $0x1f6c] ss:$16 sps:$4 sm:$0xff]  }
 0xa00   : > { %13712 = vmatpush2.bf16.msra.mxu1 %v18097_v60  ;;  %13646 = vmatprep.subr.bf16.mxu0 %v18102_v8  ;;  %v18190_v60 = vld [vmem:[%s23923_s3 + $0x1f68] ss:$16 sps:$4 sm:$0xff]   ;;  %v18195_v8 = vld [vmem:[%s23923_s3 + $0x1f4c] ss:$16 sps:$4 sm:$0xff]  }
 0xa01   : > { %13713 = vmatprep.subr.bf16.mxu1 %v18105_v47  ;;  %v18193_v47 = vld [vmem:[%s23923_s3 + $0x1f48] ss:$16 sps:$4 sm:$0xff]  }
 0xa03   : > { %13647 = vmatpush1.bf16.msra.mxu0 %v18100_v4  ;;  %v18198_v4 = vld [vmem:[%s23923_s3 + $0x1f2c] ss:$16 sps:$4 sm:$0xff]  }
 0xa04   : > { %13714 = vmatpush2.bf16.msra.mxu1 %v18103_v53  ;;  %13648 = vmatprep.subr.bf16.mxu0 %v18108_v57  ;;  %v18196_v53 = vld [vmem:[%s23923_s3 + $0x1f28] ss:$16 sps:$4 sm:$0xff]   ;;  %v18201_v57 = vld [vmem:[%s23923_s3 + $0x1f0c] ss:$16 sps:$4 sm:$0xff]  }
 0xa05   : > { %13715 = vmatprep.subr.bf16.mxu1 %v18111_v35  ;;  %v18199_v35 = vld [vmem:[%s23923_s3 + $0x1f08] ss:$16 sps:$4 sm:$0xff]  }
 0xa07   : > { %13649 = vmatpush1.bf16.msra.mxu0 %v18106_v1  ;;  %v13119_v1 = vpop.f32.mrf.mxu1 }
 0xa08   : > { %13716 = vmatpush2.bf16.msra.mxu1 %v18109_v40  ;;  %13650 = vmatprep.subr.bf16.mxu0 %v18114_v9 }
 0xa09   : > { %13717 = vmatprep.subr.bf16.mxu1 %v18117_v31  ;;  %v13121_v40 = vpop.f32.mrf.mxu1  ;;  %v13162_v31 = vpop.f32.mrf.mxu0 }
 0xa0b   : > { %13651 = vmatpush1.bf16.msra.mxu0 %v18112_v44  ;;  %v13123_v9 = vpop.f32.mrf.mxu1 }
 0xa0c   : > { %13718 = vmatpush2.bf16.msra.mxu1 %v18115_v39  ;;  %13652 = vmatprep.subr.bf16.mxu0 %v18120_v21  ;;  %v13164_v39 = vpop.f32.mrf.mxu0 }
 0xa0d   : > { %v13125_v44 = vpop.f32.mrf.mxu1 }
 0xa0f   : > { %13720 = vmatmul.mubr.bf16.vlgmr.msra.gmra.mxu1 %v21172_v63  ;;  %13653 = vmatpush1.bf16.msra.mxu0 %v18118_v50  ;;  %v18129_v63 = vld [vmem:[%s23923_s3 + $0x1a0c] ss:$16 sps:$4 sm:$0xff]   ;;  %v13205_v21 = vpop.f32.mrf.mxu1  ;;  %v13166_v50 = vpop.f32.mrf.mxu0 }
 0xa10   : > { %13654 = vmatprep.subr.bf16.mxu0 %v18123_v36 }
 0xa11   : > { %v13207_v36 = vpop.f32.mrf.mxu1 }
 0xa13   : > { %13655 = vmatpush1.bf16.msra.mxu0 %v18121_v32  ;;  %v13168_v32 = vpop.f32.mrf.mxu0 }
 0xa14   : > { %13656 = vmatprep.subr.bf16.mxu0 %v18126_v55  ;;  %v13209_v55 = vpop.f32.mrf.mxu1 }
 0xa17   : > { %13657 = vmatpush1.bf16.msra.mxu0 %v18124_v22  ;;  %v13248_v22 = vpop.f32.mrf.mxu0 }
 0xa18   : > { %13658 = vmatprep.subr.bf16.mxu0 %v18129_v63  ;;  %v13211_v63 = vpop.f32.mrf.mxu1 }
 0xa1b   : > { %13659 = vmatpush1.bf16.msra.mxu0 %v18127_v13  ;;  %v13250_v13 = vpop.f32.mrf.mxu0 }
 0xa1c   : > { %13660 = vmatprep.subr.bf16.mxu0 %v18132_v29  ;;  %v13291_v29 = vpop.f32.mrf.mxu1 }
 0xa1f   : > { %13661 = vmatpush2.bf16.msra.mxu0 %v18130_v56  ;;  %v13252_v56 = vpop.f32.mrf.mxu0 }
 0xa20   : > { %13662 = vmatprep.subr.bf16.mxu0 %v18135_v51  ;;  %v13293_v51 = vpop.f32.mrf.mxu1 }
 0xa23   : > { %13663 = vmatpush2.bf16.msra.mxu0 %v18133_v18  ;;  %v13254_v18 = vpop.f32.mrf.mxu0 }
 0xa24   : > { %13664 = vmatprep.subr.bf16.mxu0 %v18138_v5  ;;  %v13295_v5 = vpop.f32.mrf.mxu1 }
 0xa27   : > { %13665 = vmatpush2.bf16.msra.mxu0 %v18136_v28  ;;  %v13297_v28 = vpop.f32.mrf.mxu1 }
 0xa28   : > { %13666 = vmatprep.subr.bf16.mxu0 %v18141_v48 }
 0xa2b   : > { %13667 = vmatpush2.bf16.msra.mxu0 %v18139_v19  ;;  %v13377_v19 = vpop.f32.mrf.mxu1 }
 0xa2c   : > { %13668 = vmatprep.subr.bf16.mxu0 %v18144_v25 }
 0xa2f   : > { %13669 = vmatpush2.bf16.msra.mxu0 %v18142_v49  ;;  %v13379_v49 = vpop.f32.mrf.mxu1 }
 0xa30   : > { %13670 = vmatprep.subr.bf16.mxu0 %v18147_v54 }
 0xa33   : > { %13671 = vmatpush2.bf16.msra.mxu0 %v18145_v26  ;;  %v13381_v26 = vpop.f32.mrf.mxu1 }
 0xa34   : > { %13672 = vmatprep.subr.bf16.mxu0 %v18150_v2 }
 0xa37   : > { %13673 = vmatpush2.bf16.msra.mxu0 %v18148_v24  ;;  %v13383_v24 = vpop.f32.mrf.mxu1 }
 0xa38   : > { %13674 = vmatprep.subr.bf16.mxu0 %v18153_v46 }
 0xa3b   : > { %13675 = vmatpush2.bf16.msra.mxu0 %v18151_v15  ;;  %v13463_v15 = vpop.f32.mrf.mxu1 }
 0xa3c   : > { %13730 = vmatprep.subr.bf16.mxu0 %v18156_v3 }
 0xa3e   : > { %13677 = vmatmul.mubr.bf16.vlgmr.msra.gmra.mxu0 %v21142_v45  ;;  %v18165_v45 = vld [vmem:[%s23923_s3 + $0x1e8c] ss:$16 sps:$4 sm:$0xff]  }
 0xa3f   : > { %13731 = vmatpush1.bf16.msra.mxu0 %v18154_v17  ;;  %13762 = vmatprep.mubr.bf16.mxu0 %v22265_v41  ;;  %v18163_v41 = vld [vmem:[%s23923_s3 + $0x1e88] ss:$16 sps:$4 sm:$0xff]   ;;  %v13465_v17 = vpop.f32.mrf.mxu1 }
 0xa40   : > { %13732 = vmatprep.subr.bf16.mxu0 %v18159_v20 }
 0xa43   : > { %13733 = vmatpush1.bf16.msra.mxu0 %v18157_v62  ;;  %v13467_v62 = vpop.f32.mrf.mxu1 }
 0xa44   : > { %13734 = vmatprep.subr.bf16.mxu0 %v18162_v10 }
 0xa47   : > { %13735 = vmatpush1.bf16.msra.mxu0 %v18160_v37  ;;  %v13163_v37 = vadd.f32 %v13162_v31, %v13119_v1 }
 0xa48   : > { %13736 = vmatprep.subr.bf16.mxu0 %v18165_v45  ;;  %v13165_v45 = vadd.f32 %v13164_v39, %v13121_v40 }
 0xa4b   : > { %13737 = vmatpush1.bf16.msra.mxu0 %v18163_v41  ;;  %v13469_v41 = vpop.f32.mrf.mxu1 }
 0xa4c   : > { %13738 = vmatprep.subr.bf16.mxu0 %v18168_v58 }
 0xa4f   : > { %13739 = vmatpush1.bf16.msra.mxu0 %v18166_v42  ;;  %v13167_v42 = vadd.f32 %v13166_v50, %v13123_v9 }
 0xa50   : > { %13740 = vmatprep.subr.bf16.mxu0 %v18171_v52  ;;  %v13206_v52 = vadd.f32 %v13205_v21, %v13163_v37 }
 0xa53   : > { %13741 = vmatpush1.bf16.msra.mxu0 %v18169_v61  ;;  %v13549_v61 = vpop.f32.mrf.mxu1 }
 0xa54   : > { %13742 = vmatprep.subr.bf16.mxu0 %v18174_v34  ;;  %v13169_v34 = vadd.f32 %v13168_v32, %v13125_v44 }
 0xa57   : > { %13743 = vmatpush1.bf16.msra.mxu0 %v18172_v23  ;;  %v13249_v23 = vadd.f32 %v13248_v22, %v13206_v52 }
 0xa58   : > { %13744 = vmatprep.subr.bf16.mxu0 %v18177_v16  ;;  %v13208_v16 = vadd.f32 %v13207_v36, %v13165_v45 }
 0xa5b   : > { %13745 = vmatpush1.bf16.msra.mxu0 %v18175_v27 }
 0xa5c   : > { %13746 = vmatprep.subr.bf16.mxu0 %v18180_v11  ;;  %v13251_v11 = vadd.f32 %v13250_v13, %v13208_v16 }
 0xa5f   : > { %13747 = vmatpush2.bf16.msra.mxu0 %v18178_v43  ;;  %v13210_v43 = vadd.f32 %v13209_v55, %v13167_v42 }
 0xa60   : > { %13748 = vmatprep.subr.bf16.mxu0 %v18183_v7  ;;  %v13551_v7 = vpop.f32.mrf.mxu1 }
 0xa63   : > { %13749 = vmatpush2.bf16.msra.mxu0 %v18181_v30  ;;  %v13253_v30 = vadd.f32 %v13252_v56, %v13210_v43 }
 0xa64   : > { %13750 = vmatprep.subr.bf16.mxu0 %v18186_v14  ;;  %v13212_v14 = vadd.f32 %v13211_v63, %v13169_v34 }
 0xa67   : > { %13751 = vmatpush2.bf16.msra.mxu0 %v18184_v33  ;;  %v13292_v33 = vadd.f32 %v13291_v29, %v13249_v23 }
 0xa68   : > { %13752 = vmatprep.subr.bf16.mxu0 %v18189_v0 }
 0xa6b   : > { %13753 = vmatpush2.bf16.msra.mxu0 %v18187_v59  ;;  %v13255_v59 = vadd.f32 %v13254_v18, %v13212_v14 }
 0xa6c   : > { %13754 = vmatprep.subr.bf16.mxu0 %v18192_v6 }
 0xa6f   : > { %13755 = vmatpush2.bf16.msra.mxu0 %v18190_v60  ;;  %v13294_v60 = vadd.f32 %v13293_v51, %v13251_v11 }
 0xa70   : > { %13756 = vmatprep.subr.bf16.mxu0 %v18195_v8  ;;  %v13553_v8 = vpop.f32.mrf.mxu1 }
 0xa72   : > { %v13555_v40 = vpop.f32.mrf.mxu1 }
 0xa73   : > { %13757 = vmatpush2.bf16.msra.mxu0 %v18193_v47 }
 0xa74   : > { %13758 = vmatprep.subr.bf16.mxu0 %v18198_v4 }
 0xa77   : > { %13759 = vmatpush2.bf16.msra.mxu0 %v18196_v53  ;;  %v13296_v53 = vadd.f32 %v13295_v5, %v13253_v30 }
 0xa78   : > { %13760 = vmatprep.subr.bf16.mxu0 %v18201_v57 }
 0xa7b   : > { %13761 = vmatpush2.bf16.msra.mxu0 %v18199_v35  ;;  %v13298_v35 = vadd.f32 %v13297_v28, %v13255_v59  ;;  %v13798_v59 = vld [vmem:[%s23924_s4 + $0x8] sm:$0xff] }
 0xa7e   : > { %13763 = vmatmul.mubr.bf16.vlgmr.msra.gmra.mxu0 %v21202_v38  ;;  %v13334_v38 = vpop.f32.mrf.mxu0 }
 0xa7f   : > { %v13335_v6 = vadd.f32 %v13334_v38, %v13292_v33 }
 0xa80   : > { %v13336_v48 = vpop.f32.mrf.mxu0 }
 0xa81   : > { %v13337_v4 = vadd.f32 %v13336_v48, %v13294_v60  ;;  %v13378_v1 = vadd.f32 %v13377_v19, %v13335_v6 }
 0xa82   : > { %v13338_v25 = vpop.f32.mrf.mxu0 }
 0xa83   : > { %v13339_v57 = vadd.f32 %v13338_v25, %v13296_v53  ;;  %v13380_v39 = vadd.f32 %v13379_v49, %v13337_v4 }
 0xa84   : > { %v13340_v54 = vpop.f32.mrf.mxu0 }
 0xa85   : > { %v13341_v31 = vadd.f32 %v13340_v54, %v13298_v35  ;;  %v13382_v36 = vadd.f32 %v13381_v26, %v13339_v57 }
 0xa86   : > { %v13420_v2 = vpop.f32.mrf.mxu0 }
 0xa87   : > { %v13421_v44 = vadd.f32 %v13420_v2, %v13378_v1  ;;  %v13384_v22 = vadd.f32 %v13383_v24, %v13341_v31  ;;  %v13803_v1 = vunpack.c.l.bf16 %v13798_v59 }
 0xa88   : > { %v13422_v46 = vpop.f32.mrf.mxu0 }
 0xa89   : > { %v13423_v50 = vadd.f32 %v13422_v46, %v13380_v39  ;;  %v13464_v63 = vadd.f32 %v13463_v15, %v13421_v44 }
 0xa8a   : > { %v13424_v3 = vpop.f32.mrf.mxu0 }
 0xa8b   : > { %v13425_v55 = vadd.f32 %v13424_v3, %v13382_v36  ;;  %v13466_v51 = vadd.f32 %v13465_v17, %v13423_v50 }
 0xa8c   : > { %v13426_v20 = vpop.f32.mrf.mxu0 }
 0xa8d   : > { %v13427_v29 = vadd.f32 %v13426_v20, %v13384_v22  ;;  %v13468_v38 = vadd.f32 %v13467_v62, %v13425_v55 }
 0xa8e   : > { %v13506_v10 = vpop.f32.mrf.mxu0 }
 0xa8f   : > { %v13635_v21 = vpop.f32.mrf.mxu1  ;;  %v13507_v56 = vadd.f32 %v13506_v10, %v13464_v63  ;;  %v13470_v25 = vadd.f32 %v13469_v41, %v13427_v29 }
 0xa90   : > { %v13508_v58 = vpop.f32.mrf.mxu0 }
 0xa91   : > { %v13637_v13 = vpop.f32.mrf.mxu1  ;;  %v13509_v5 = vadd.f32 %v13508_v58, %v13466_v51  ;;  %v13550_v54 = vadd.f32 %v13549_v61, %v13507_v56 }
 0xa92   : > { %v13510_v27 = vpop.f32.mrf.mxu0 }
 0xa93   : > { %v13639_v28 = vpop.f32.mrf.mxu1  ;;  %v13511_v19 = vadd.f32 %v13510_v27, %v13468_v38  ;;  %v13552_v46 = vadd.f32 %v13551_v7, %v13509_v5 }
 0xa94   : > { %v13512_v0 = vpop.f32.mrf.mxu0 }
 0xa95   : > { %v13513_v49 = vadd.f32 %v13512_v0, %v13470_v25  ;;  %v13641_v26 = vpop.f32.mrf.mxu1  ;;  %v13554_v24 = vadd.f32 %v13553_v8, %v13511_v19  ;;  %v13800_v8 = vld [vmem:[%s23924_s4 + $0x18] sm:$0xff] }
 0xa96   : > { %v13808_v50 = vunpack.c.h.bf16 %v13800_v8 }
 0xa97   : > { %v13556_v20 = vadd.f32 %v13555_v40, %v13513_v49  ;;  %v13807_v40 = vunpack.c.l.bf16 %v13800_v8 }
 0xabe   : > { %v13592_v47 = vpop.f32.mrf.mxu0 }
 0xabf   : > { %v13593_v2 = vadd.f32 %v13592_v47, %v13550_v54 }
 0xac0   : > { %v13594_v9 = vpop.f32.mrf.mxu0 }
 0xac1   : > { %v13595_v3 = vadd.f32 %v13594_v9, %v13552_v46  ;;  %v13636_v10 = vadd.f32 %v13635_v21, %v13593_v2  ;;  %v13804_v21 = vunpack.c.h.bf16 %v13798_v59 }
 0xac2   : > { %v13596_v32 = vpop.f32.mrf.mxu0 }
 0xac3   : > { %v13597_v45 = vadd.f32 %v13596_v32, %v13554_v24  ;;  %v13638_v62 = vadd.f32 %v13637_v13, %v13595_v3 }
 0xac4   : > { %v13598_v18 = vpop.f32.mrf.mxu0 }
 0xac5   : > { %v13599_v42 = vadd.f32 %v13598_v18, %v13556_v20  ;;  %v13640_v23 = vadd.f32 %v13639_v28, %v13597_v45 }
 0xac7   : > { %v13642_v16 = vadd.f32 %v13641_v26, %v13599_v42 }
 0xacf   : > { %v13721_v15 = vpop.f32.mrf.mxu1 }
 0xad1   : > { %v13723_v52 = vpop.f32.mrf.mxu1 }
 0xad3   : > { %v13725_v11 = vpop.f32.mrf.mxu1 }
 0xad5   : > { %v13727_v47 = vpop.f32.mrf.mxu1 }
 0xafe   : > { %v13678_v48 = vpop.f32.mrf.mxu0 }
 0xaff   : > { %v13679_v58 = vadd.f32 %v13678_v48, %v13636_v10 }
 0xb00   : > { %v13680_v37 = vpop.f32.mrf.mxu0 }
 0xb01   : > { %v13681_v34 = vadd.f32 %v13680_v37, %v13638_v62  ;;  %v13722_v27 = vadd.f32 %v13721_v15, %v13679_v58 }
 0xb02   : > { %v13682_v17 = vpop.f32.mrf.mxu0 }
 0xb03   : > { %v13683_v61 = vadd.f32 %v13682_v17, %v13640_v23  ;;  %v13724_v14 = vadd.f32 %v13723_v52, %v13681_v34 }
 0xb04   : > { %v13684_v41 = vpop.f32.mrf.mxu0 }
 0xb05   : > { %v13685_v7 = vadd.f32 %v13684_v41, %v13642_v16  ;;  %v13726_v60 = vadd.f32 %v13725_v11, %v13683_v61 }
 0xb07   : > { %v13728_v35 = vadd.f32 %v13727_v47, %v13685_v7 }
 0xb3e   : > { %v13764_v43 = vpop.f32.mrf.mxu0 }
 0xb3f   : > { %v13765_v30 = vadd.f32 %v13764_v43, %v13722_v27 }
 0xb40   : > { %v13766_v33 = vpop.f32.mrf.mxu0 }
 0xb41   : > { %v13783_v0 = vmul.f32 0.2, %v13765_v30  ;;  %v13767_v6 = vadd.f32 %v13766_v33, %v13724_v14  ;;  %vm13775_vm5 = vcmp.gt.f32.partialorder %v13765_v30, 0.0 }
 0xb42   : > { %v13768_v4 = vpop.f32.mrf.mxu0 }
 0xb43   : > { %v13784_v53 = vmul.f32 0.2, %v13767_v6  ;;  %v13769_v57 = vadd.f32 %v13768_v4, %v13726_v60  ;;  %vm13776_vm6 = vcmp.gt.f32.partialorder %v13767_v6, 0.0  ;;  %v13791_v31 = vsel %vm13775_vm5, %v13765_v30, %v13783_v0 }
 0xb44   : > { %v13770_v9 = vpop.f32.mrf.mxu0  ;;  %v13811_v22 = vmul.f32 %v13803_v1, %v13791_v31 }
 0xb45   : > { %vm13779_vm7 = vcmp.gt.f32.partialorder %v13769_v57, 0.0  ;;  %v13787_v44 = vmul.f32 0.2, %v13769_v57  ;;  %v13771_v39 = vadd.f32 %v13770_v9, %v13728_v35  ;;  %v13792_v36 = vsel %vm13776_vm6, %v13767_v6, %v13784_v53 }
 0xb46   : > { %v13812_v29 = vmul.f32 %v13804_v21, %v13792_v36 }
 0xb47   : > { %v13795_v32 = vsel %vm13779_vm7, %v13769_v57, %v13787_v44  ;;  %vm13780_vm8 = vcmp.gt.f32.partialorder %v13771_v39, 0.0  ;;  %v13788_v55 = vmul.f32 0.2, %v13771_v39 }
 0xb48   : > { %v13815_v63 = vmul.f32 %v13807_v40, %v13795_v32 }
 0xb49   : > { %v13796_v13 = vsel %vm13780_vm8, %v13771_v39, %v13788_v55 }
 0xb4a   : > { %v13831_v56 = vadd.f32 %v13815_v63, %v13811_v22  ;;  %v13816_v51 = vmul.f32 %v13808_v50, %v13796_v13 }
 0xb4c   : > { %v13832_v18 = vrot.slane %v13831_v56, 4  ;;  %v13838_v5 = vadd.f32 %v13816_v51, %v13812_v29 }
 0xb4e   : > { %v13833_v38 = vadd.f32 %v13832_v18, %v13831_v56  ;;  %v13839_v28 = vrot.slane %v13838_v5, 4 }
 0xb50   : > { %v13834_v48 = vrot.slane %v13833_v38, 2  ;;  %v13840_v19 = vadd.f32 %v13839_v28, %v13838_v5 }
 0xb52   : > { %v13835_v25 = vadd.f32 %v13834_v48, %v13833_v38  ;;  %v13841_v54 = vrot.slane %v13840_v19, 2 }
 0xb54   : > { %v13836_v49 = vrot.slane %v13835_v25, 1  ;;  %v13842_v2 = vadd.f32 %v13841_v54, %v13840_v19 }
 0xb56   : > { %v13837_v46 = vadd.f32 %v13836_v49, %v13835_v25  ;;  %v13843_v26 = vrot.slane %v13842_v2, 1 }
 0xb58   : > { %v13844_v37 = vadd.f32 %v13843_v26, %v13842_v2  ;;  %v13846_v3 = vadd.f32 %v23200_v12, %v13837_v46 }
 0xb5a   : > { %v13847_v24 = vadd.f32 %v13846_v3, %v13844_v37 }
 0xb5c   : > { %13848 = vadd.xlane.f32.xlu0 %v13847_v24 }
 0xbe5   : > { %v13849_v15 = vpop.xlane.xlu0 %13848 }
 0xbe6   : > { %v13850_v45 = vsub.f32 0.0, %v13849_v15 }
 0xbe8   : > { %v13851_v20 = vmul.f32 1.442695, %v13850_v45 }
 0xbea   : > { %18202 = vpow2.f32 %v13851_v20 }
 0xbf7   : > { %v18203_v10 = vpop.eup %18202 }
 0xbf8   : > { %v13853_v17 = vadd.f32 1.0, %v18203_v10 }
 0xbfa   : > { %18204 = vrcp.f32 %v13853_v17 }
 0xc07   : > { %v18205_v42 = vpop.eup %18204 }
 0xc08   : > { %13856 = vst [vmem:[%s276_s14] sm:$0xff] %v18205_v42 }
 0xc09 PF: > { %s17_s24 = sadd.s32 1, %s18212_s24  }
 0xc0a   : > { %p14_p4 = scmp.ge.s32.totalorder %s17_s24, 4  }
 0xc0c   :  { %16 = sbr.rel (!%p14_p4) target bundleno = 1 (0x1), region = 78 }

</bundles_post_ra>
